<compile_context>
chip_gen: v5e
topology: v5e:2x2
jax: 0.10.0
libtpu: 0.0.40
codegen_flags: <defaults>
</compile_context>

<pallas_src>
import functools

import jax
import jax.numpy as jnp
from jax.experimental import pallas as pl
from jax.experimental.pallas import tpu as pltpu

LANE = 128  # pad channel dims to a multiple of the 128-wide lane dim


def _ceil_to(x, m):
    return ((x + m - 1) // m) * m


@functools.lru_cache(maxsize=1)
def _vmem_limit_bytes():
    # Generation-aware scoped-VMEM limit: ~3/4 of physical capacity
    # (96 MiB on v5e/v6e, 48 MiB on v7x), with a conservative fallback.
    try:
        cap = int(pltpu.get_tpu_info().vmem_capacity_bytes)
        return max(32 * 1024 * 1024, (cap * 3) // 4)
    except Exception:
        return 48 * 1024 * 1024


# ----------------------------------------------------------------------------
# Kernel 1: fused BN(scale/shift) -> ReLU -> 3x3 conv (pad=1, stride=1)
#           output in bf16 (conv1 bias is folded into BN2 downstream).
# ----------------------------------------------------------------------------
def _bn_relu_conv3x3_kernel(x_ref, scale_ref, shift_ref, w_ref, o_ref,
                            pad_ref, col_ref):
    H, W, Cin = x_ref.shape
    HW = H * W
    Cout = o_ref.shape[-1]

    # Zero only the 1-pixel border of the padded scratch (interior is fully
    # overwritten below).  Re-done every step so it is correct no matter how
    # the "parallel" batch axis is sharded across TensorCores.
    pad_ref[0:1, :, :] = jnp.zeros((1, W + 2, Cin), jnp.float32)
    pad_ref[H + 1:H + 2, :, :] = jnp.zeros((1, W + 2, Cin), jnp.float32)
    pad_ref[:, 0:1, :] = jnp.zeros((H + 2, 1, Cin), jnp.float32)
    pad_ref[:, W + 1:W + 2, :] = jnp.zeros((H + 2, 1, Cin), jnp.float32)

    scale = scale_ref[...].reshape(1, 1, Cin)
    shift = shift_ref[...].reshape(1, 1, Cin)
    pad_ref[1:H + 1, 1:W + 1, :] = jnp.maximum(x_ref[...] * scale + shift, 0.0)

    # Per-dh accumulation: stage 3 dw-shifted windows side-by-side (K = 3*Cin)
    # and accumulate 3 GEMMs in f32 -> 3x smaller staging buffer than a full
    # (HW, 9*Cin) im2col while keeping the MXU fed.
    acc = jnp.zeros((HW, Cout), jnp.float32)
    for dh in range(3):
        for dw in range(3):
            win = pad_ref[dh:dh + H, dw:dw + W, :]
            col_ref[:, dw * Cin:(dw + 1) * Cin] = (
                win.reshape(HW, Cin).astype(jnp.bfloat16))
        acc = acc + jnp.dot(col_ref[...],
                            w_ref[dh * 3 * Cin:(dh + 1) * 3 * Cin, :],
                            preferred_element_type=jnp.float32)

    o_ref[...] = acc.astype(o_ref.dtype)  # bf16 intermediate -> half HBM traffic


def bn_relu_conv3x3(x_nhwc, scale, shift, w_flat):
    N, H, W, Cin = x_nhwc.shape
    Cout = w_flat.shape[1]
    return pl.pallas_call(
        _bn_relu_conv3x3_kernel,
        out_shape=jax.ShapeDtypeStruct((N, H * W, Cout), jnp.bfloat16),
        grid=(N,),
        in_specs=[
            pl.BlockSpec((None, H, W, Cin), lambda b: (b, 0, 0, 0)),
            pl.BlockSpec((1, Cin), lambda b: (0, 0)),
            pl.BlockSpec((1, Cin), lambda b: (0, 0)),
            pl.BlockSpec((9 * Cin, Cout), lambda b: (0, 0)),
        ],
        out_specs=pl.BlockSpec((None, H * W, Cout), lambda b: (b, 0, 0)),
        scratch_shapes=[
            pltpu.VMEM((H + 2, W + 2, Cin), jnp.float32),
            pltpu.VMEM((H * W, 3 * Cin), jnp.bfloat16),
        ],
        compiler_params=pltpu.CompilerParams(
            dimension_semantics=("parallel",),
            vmem_limit_bytes=_vmem_limit_bytes()),
    )(x_nhwc, scale.reshape(1, -1), shift.reshape(1, -1), w_flat)


# ----------------------------------------------------------------------------
# Kernel 2: fused BN -> ReLU -> strided 3x3 conv -> +bias -> + shortcut
#           shortcut = identity (use_proj=False) or 1x1 conv projection of x.
#           bias = b2 (+ bsc when projecting), pre-combined in the wrapper.
# ----------------------------------------------------------------------------
def _bn_relu_conv3x3_shortcut_kernel(h_ref, scale_ref, shift_ref, w_ref, b_ref,
                                     x_ref, *rest, stride, use_proj):
    if use_proj:
        wsc_ref, o_ref, pad_ref, col_ref = rest
    else:
        o_ref, pad_ref, col_ref = rest
        wsc_ref = None

    H, W, Cin = h_ref.shape
    Cx = x_ref.shape[-1]
    Cout = o_ref.shape[-1]
    Ho = (H - 1) // stride + 1
    Wo = (W - 1) // stride + 1
    HWo = Ho * Wo

    # Border-only zeroing of the padded scratch (interior overwritten below).
    pad_ref[0:1, :, :] = jnp.zeros((1, W + 2, Cin), jnp.float32)
    pad_ref[H + 1:H + 2, :, :] = jnp.zeros((1, W + 2, Cin), jnp.float32)
    pad_ref[:, 0:1, :] = jnp.zeros((H + 2, 1, Cin), jnp.float32)
    pad_ref[:, W + 1:W + 2, :] = jnp.zeros((H + 2, 1, Cin), jnp.float32)

    scale = scale_ref[...].reshape(1, 1, Cin)
    shift = shift_ref[...].reshape(1, 1, Cin)
    h = h_ref[...].astype(jnp.float32)  # bf16 intermediate -> f32 for BN math
    pad_ref[1:H + 1, 1:W + 1, :] = jnp.maximum(h * scale + shift, 0.0)

    # Per-dh accumulation with the conv stride folded in: only the strided
    # output positions are gathered, so stride=2 does 1/4 of the GEMM work.
    acc = jnp.zeros((HWo, Cout), jnp.float32)
    for dh in range(3):
        for dw in range(3):
            if stride == 1:
                win = pad_ref[dh:dh + H, dw:dw + W, :]
            else:
                win = pad_ref[pl.ds(dh, Ho, stride), pl.ds(dw, Wo, stride), :]
            col_ref[:, dw * Cin:(dw + 1) * Cin] = (
                win.reshape(HWo, Cin).astype(jnp.bfloat16))
        acc = acc + jnp.dot(col_ref[...],
                            w_ref[dh * 3 * Cin:(dh + 1) * 3 * Cin, :],
                            preferred_element_type=jnp.float32)

    # Shortcut branch, fused into the epilogue; subsampled in-kernel.
    if stride == 1:
        xs = x_ref[...]
    else:
        xs = x_ref[pl.ds(0, Ho, stride), pl.ds(0, Wo, stride), :]
    xs = xs.reshape(HWo, Cx)
    if use_proj:
        sc = jnp.dot(xs.astype(jnp.bfloat16), wsc_ref[...],
                     preferred_element_type=jnp.float32)
    else:
        sc = xs  # identity shortcut (Cx == Cout, stride == 1)

    o_ref[...] = acc + sc + b_ref[...]  # single combined bias add


def bn_relu_conv3x3_shortcut(h_nhwc, scale, shift, w_flat, bias,
                             x_nhwc, wsc, *, stride, use_proj):
    N, H, W, Cin = h_nhwc.shape
    Cout = w_flat.shape[1]
    Cx = x_nhwc.shape[-1]
    Ho = (H - 1) // stride + 1
    Wo = (W - 1) // stride + 1
    kernel = functools.partial(_bn_relu_conv3x3_shortcut_kernel,
                               stride=stride, use_proj=use_proj)
    in_specs = [
        pl.BlockSpec((None, H, W, Cin), lambda b: (b, 0, 0, 0)),
        pl.BlockSpec((1, Cin), lambda b: (0, 0)),
        pl.BlockSpec((1, Cin), lambda b: (0, 0)),
        pl.BlockSpec((9 * Cin, Cout), lambda b: (0, 0)),
        pl.BlockSpec((1, Cout), lambda b: (0, 0)),
        pl.BlockSpec((None, H, W, Cx), lambda b: (b, 0, 0, 0)),
    ]
    args = [h_nhwc, scale.reshape(1, -1), shift.reshape(1, -1), w_flat,
            bias.reshape(1, -1), x_nhwc]
    if use_proj:  # only pass / DMA the projection weight when it is used
        in_specs.append(pl.BlockSpec((Cx, Cout), lambda b: (0, 0)))
        args.append(wsc)
    return pl.pallas_call(
        kernel,
        out_shape=jax.ShapeDtypeStruct((N, Ho * Wo, Cout), jnp.float32),
        grid=(N,),
        in_specs=in_specs,
        out_specs=pl.BlockSpec((None, Ho * Wo, Cout), lambda b: (b, 0, 0)),
        scratch_shapes=[
            pltpu.VMEM((H + 2, W + 2, Cin), jnp.float32),
            pltpu.VMEM((Ho * Wo, 3 * Cin), jnp.bfloat16),
        ],
        compiler_params=pltpu.CompilerParams(
            dimension_semantics=("parallel",),
            vmem_limit_bytes=_vmem_limit_bytes()),
    )(*args)


# ----------------------------------------------------------------------------
# wide_basic forward (wrapper: NCHW in/out, params in PyTorch shapes)
# ----------------------------------------------------------------------------
def _fold_bn(gamma, beta, mean, var, eps=1e-5):
    scale = gamma / jnp.sqrt(var + eps)
    shift = beta - mean * scale
    return scale, shift


def _pad_vec(v, cp):
    return jnp.pad(v, (0, cp - v.shape[0]))


def _conv3x3_w_to_flat(w_oihw, cin_p, cout_p):
    # (Cout, Cin, 3, 3) -> (3, 3, Cin_p, Cout_p) -> (9*Cin_p, Cout_p) bf16;
    # row index = (dh*3+dw)*Cin_p + ci, matching the im2col column layout and
    # the per-dh contiguous weight slices used in the kernels.
    cout, cin = w_oihw.shape[0], w_oihw.shape[1]
    w = jnp.transpose(w_oihw, (2, 3, 1, 0))
    w = jnp.pad(w, ((0, 0), (0, 0), (0, cin_p - cin), (0, cout_p - cout)))
    return w.reshape(9 * cin_p, cout_p).astype(jnp.bfloat16)


def wide_basic_forward(x_nchw, params, *, in_planes, planes, stride):
    N, _, H, W = x_nchw.shape
    c0p = _ceil_to(in_planes, LANE)
    c1p = _ceil_to(planes, LANE)

    # NCHW -> NHWC, lane-pad channels (padded channels are inert: their BN
    # scale/shift and weights are zero, so they stay exactly zero).
    x = jnp.transpose(x_nchw, (0, 2, 3, 1)).astype(jnp.float32)
    x = jnp.pad(x, ((0, 0), (0, 0), (0, 0), (0, c0p - in_planes)))

    scale1, shift1 = _fold_bn(params["bn1_gamma"], params["bn1_beta"],
                              params["bn1_mean"], params["bn1_var"])
    # conv1 bias is folded into BN2 below -> kernel 1 needs no bias operand.
    h = bn_relu_conv3x3(
        x, _pad_vec(scale1, c0p), _pad_vec(shift1, c0p),
        _conv3x3_w_to_flat(params["w1"], c0p, c1p))
    h = h.reshape(N, H, W, c1p)  # contiguous -> metadata-only reshape in XLA
    # dropout: eval-mode identity (see TODO at top of file)

    scale2, shift2 = _fold_bn(params["bn2_gamma"], params["bn2_beta"],
                              params["bn2_mean"], params["bn2_var"])
    # Exact eval-mode fold: BN2(conv1 + b1) = scale2*conv1 + (shift2 + scale2*b1)
    shift2 = shift2 + scale2 * params["b1"]

    use_proj = (stride != 1) or (in_planes != planes)
    if use_proj:
        wsc = params["wsc"][:, :, 0, 0].T  # (Cin, Cout)
        wsc = jnp.pad(wsc, ((0, c0p - in_planes), (0, c1p - planes)))
        wsc = wsc.astype(jnp.bfloat16)
        bias2 = params["b2"] + params["bsc"]   # single combined epilogue bias
    else:
        assert c0p == c1p
        wsc = None                              # not passed to the kernel
        bias2 = params["b2"]

    out = bn_relu_conv3x3_shortcut(
        h, _pad_vec(scale2, c1p), _pad_vec(shift2, c1p),
        _conv3x3_w_to_flat(params["w2"], c1p, c1p),
        _pad_vec(bias2, c1p),
        x, wsc, stride=stride, use_proj=use_proj)

    Ho = (H - 1) // stride + 1
    Wo = (W - 1) // stride + 1
    out = out.reshape(N, Ho, Wo, c1p)[:, :, :, :planes]
    return jnp.transpose(out, (0, 3, 1, 2))  # NHWC -> NCHW


# ----------------------------------------------------------------------------
# Pure-JAX (lax.conv) reference for correctness checking
# ----------------------------------------------------------------------------
def reference_forward(x, p, *, in_planes, planes, stride, eps=1e-5):
    def bn(x, g, b, m, v):
        inv = g / jnp.sqrt(v + eps)
        return x * inv[None, :, None, None] + (b - m * inv)[None, :, None, None]

    def conv(x, w, b, s, pad):
        y = jax.lax.conv_general_dilated(
            x, w, window_strides=(s, s), padding=[(pad, pad), (pad, pad)],
            dimension_numbers=("NCHW", "OIHW", "NCHW"),
            precision=jax.lax.Precision.HIGHEST)
        return y + b[None, :, None, None]

    h = conv(jax.nn.relu(bn(x, p["bn1_gamma"], p["bn1_beta"],
                            p["bn1_mean"], p["bn1_var"])), p["w1"], p["b1"], 1, 1)
    y = conv(jax.nn.relu(bn(h, p["bn2_gamma"], p["bn2_beta"],
                            p["bn2_mean"], p["bn2_var"])), p["w2"], p["b2"], stride, 1)
    if stride != 1 or in_planes != planes:
        sc = conv(x, p["wsc"], p["bsc"], stride, 0)
    else:
        sc = x
    return y + sc


# ----------------------------------------------------------------------------
# main
# ----------------------------------------------------------------------------
def make_params(key, in_planes, planes):
    ks = jax.random.split(key, 14)

    def nrm(k, shape, s=0.1):
        return jax.random.normal(k, shape, jnp.float32) * s

    return {
        "bn1_gamma": jax.random.uniform(ks[0], (in_planes,), jnp.float32, 0.5, 1.5),
        "bn1_beta": nrm(ks[1], (in_planes,)),
        "bn1_mean": nrm(ks[2], (in_planes,)),
        "bn1_var": jax.random.uniform(ks[3], (in_planes,), jnp.float32, 0.5, 1.5),
        "w1": nrm(ks[4], (planes, in_planes, 3, 3)),
        "b1": nrm(ks[5], (planes,)),
        "bn2_gamma": jax.random.uniform(ks[6], (planes,), jnp.float32, 0.5, 1.5),
        "bn2_beta": nrm(ks[7], (planes,)),
        "bn2_mean": nrm(ks[8], (planes,)),
        "bn2_var": jax.random.uniform(ks[9], (planes,), jnp.float32, 0.5, 1.5),
        "w2": nrm(ks[10], (planes, planes, 3, 3)),
        "b2": nrm(ks[11], (planes,)),
        "wsc": nrm(ks[12], (planes, in_planes, 1, 1)),
        "bsc": nrm(ks[13], (planes,)),
    }


if __name__ == "__main__":
    N, H, W = 2, 16, 16
    key = jax.random.PRNGKey(0)

    configs = [
        # (in_planes, planes, stride)
        (4, 8, 1),   # projection shortcut (channel change), stride 1
        (4, 8, 2),   # projection shortcut, stride 2
        (8, 8, 1),   # identity shortcut
    ]

    ok = True
    for idx, (in_planes, planes, stride) in enumerate(configs):
        kp, kx = jax.random.split(jax.random.fold_in(key, idx))
        params = make_params(kp, in_planes, planes)
        x = jax.random.normal(kx, (N, in_planes, H, W), jnp.float32)

        fwd = jax.jit(functools.partial(wide_basic_forward, in_planes=in_planes,
                                        planes=planes, stride=stride))
        ref_fn = jax.jit(functools.partial(reference_forward, in_planes=in_planes,
                                           planes=planes, stride=stride))
        out = jax.block_until_ready(fwd(x, params))
        ref = jax.block_until_ready(ref_fn(x, params))
        assert out.shape == ref.shape, (out.shape, ref.shape)
        err = float(jnp.max(jnp.abs(out - ref)))
        # bf16 MXU inputs + bf16 intermediate h with f32 accumulation ->
        # small rounding vs the f32 reference.
        ok = ok and (err < 5e-2)

    if ok:
        print("KERNEL_OK")
    else:
        raise SystemExit("mismatch vs reference")
</pallas_src>

<mosaic_0001>
module attributes {stable_mosaic.version = 11 : i64} {
  func.func @_bn_relu_conv3x3_kernel(%arg0: i32, %arg1: memref<1x16x16x128xf32, #tpu.memory_space<vmem>>, %arg2: memref<1x128xf32, #tpu.memory_space<vmem>>, %arg3: memref<1x128xf32, #tpu.memory_space<vmem>>, %arg4: memref<1152x128xbf16, #tpu.memory_space<vmem>>, %arg5: memref<1x256x128xbf16, #tpu.memory_space<vmem>>, %arg6: memref<18x18x128xf32, #tpu.memory_space<vmem>>, %arg7: memref<256x384xbf16, #tpu.memory_space<vmem>>) attributes {dimension_semantics = [#tpu.dimension_semantics<parallel>], iteration_bounds = array<i64: 2>, scalar_prefetch = 0 : i64, scratch_operands = 2 : i64, tpu.core_type = #tpu.core_type<tc>, window_params = [{transform_indices = @transform_0, window_bounds = array<i64: 1, 16, 16, 128>}, {pipeline_mode = #tpu.pipeline_mode<synchronous>, transform_indices = @transform_1, window_bounds = array<i64: 1, 128>}, {pipeline_mode = #tpu.pipeline_mode<synchronous>, transform_indices = @transform_2, window_bounds = array<i64: 1, 128>}, {pipeline_mode = #tpu.pipeline_mode<synchronous>, transform_indices = @transform_3, window_bounds = array<i64: 1152, 128>}, {transform_indices = @transform_4, window_bounds = array<i64: 1, 256, 128>}]} {
    %cst = arith.constant 0.000000e+00 : f32
    %0 = vector.broadcast %cst : f32 to vector<1x18x128xf32>
    %c0 = arith.constant 0 : index
    %c0_0 = arith.constant 0 : index
    %c0_1 = arith.constant 0 : index
    %1 = vector.load %arg6[%c0, %c0_0, %c0_1] : memref<18x18x128xf32, #tpu.memory_space<vmem>>, vector<1x18x128xf32>
    tpu.vector_store %arg6[%c0, %c0_0, %c0_1], %0 {strides = array<i32>} : memref<18x18x128xf32, #tpu.memory_space<vmem>>, vector<1x18x128xf32>,
    %cst_2 = arith.constant 0.000000e+00 : f32
    %2 = vector.broadcast %cst_2 : f32 to vector<1x18x128xf32>
    %c17 = arith.constant 17 : index
    %c0_3 = arith.constant 0 : index
    %c0_4 = arith.constant 0 : index
    %3 = vector.load %arg6[%c17, %c0_3, %c0_4] : memref<18x18x128xf32, #tpu.memory_space<vmem>>, vector<1x18x128xf32>
    tpu.vector_store %arg6[%c17, %c0_3, %c0_4], %2 {strides = array<i32>} : memref<18x18x128xf32, #tpu.memory_space<vmem>>, vector<1x18x128xf32>,
    %cst_5 = arith.constant 0.000000e+00 : f32
    %4 = vector.broadcast %cst_5 : f32 to vector<18x1x128xf32>
    %c0_6 = arith.constant 0 : index
    %c0_7 = arith.constant 0 : index
    %c0_8 = arith.constant 0 : index
    %5 = vector.load %arg6[%c0_6, %c0_7, %c0_8] : memref<18x18x128xf32, #tpu.memory_space<vmem>>, vector<18x1x128xf32>
    tpu.vector_store %arg6[%c0_6, %c0_7, %c0_8], %4 {strides = array<i32>} : memref<18x18x128xf32, #tpu.memory_space<vmem>>, vector<18x1x128xf32>,
    %cst_9 = arith.constant 0.000000e+00 : f32
    %6 = vector.broadcast %cst_9 : f32 to vector<18x1x128xf32>
    %c0_10 = arith.constant 0 : index
    %c17_11 = arith.constant 17 : index
    %c0_12 = arith.constant 0 : index
    %7 = vector.load %arg6[%c0_10, %c17_11, %c0_12] : memref<18x18x128xf32, #tpu.memory_space<vmem>>, vector<18x1x128xf32>
    tpu.vector_store %arg6[%c0_10, %c17_11, %c0_12], %6 {strides = array<i32>} : memref<18x18x128xf32, #tpu.memory_space<vmem>>, vector<18x1x128xf32>,
    %c0_13 = arith.constant 0 : index
    %c0_14 = arith.constant 0 : index
    %8 = vector.load %arg2[%c0_13, %c0_14] : memref<1x128xf32, #tpu.memory_space<vmem>>, vector<1x128xf32>
    %9 = vector.shape_cast %8 : vector<1x128xf32> to vector<1x1x128xf32>
    %c0_15 = arith.constant 0 : index
    %c0_16 = arith.constant 0 : index
    %10 = vector.load %arg3[%c0_15, %c0_16] : memref<1x128xf32, #tpu.memory_space<vmem>>, vector<1x128xf32>
    %11 = vector.shape_cast %10 : vector<1x128xf32> to vector<1x1x128xf32>
    %c0_17 = arith.constant 0 : index
    %c0_18 = arith.constant 0 : index
    %c0_19 = arith.constant 0 : index
    %c0_20 = arith.constant 0 : index
    %12 = vector.load %arg1[%c0_17, %c0_18, %c0_19, %c0_20] : memref<1x16x16x128xf32, #tpu.memory_space<vmem>>, vector<1x16x16x128xf32>
    %13 = vector.shape_cast %12 : vector<1x16x16x128xf32> to vector<16x16x128xf32>
    %14 = vector.broadcast %9 : vector<1x1x128xf32> to vector<16x16x128xf32>
    %15 = arith.mulf %13, %14 : vector<16x16x128xf32>
    %16 = vector.broadcast %11 : vector<1x1x128xf32> to vector<16x16x128xf32>
    %17 = arith.addf %15, %16 : vector<16x16x128xf32>
    %cst_21 = arith.constant 0.000000e+00 : f32
    %18 = vector.broadcast %cst_21 : f32 to vector<16x16x128xf32>
    %19 = arith.maximumf %17, %18 : vector<16x16x128xf32>
    %c1 = arith.constant 1 : index
    %c1_22 = arith.constant 1 : index
    %c0_23 = arith.constant 0 : index
    %20 = vector.load %arg6[%c1, %c1_22, %c0_23] : memref<18x18x128xf32, #tpu.memory_space<vmem>>, vector<16x16x128xf32>
    tpu.vector_store %arg6[%c1, %c1_22, %c0_23], %19 {strides = array<i32>} : memref<18x18x128xf32, #tpu.memory_space<vmem>>, vector<16x16x128xf32>,
    %cst_24 = arith.constant 0.000000e+00 : f32
    %21 = vector.broadcast %cst_24 : f32 to vector<256x128xf32>
    %c0_25 = arith.constant 0 : index
    %c0_26 = arith.constant 0 : index
    %c0_27 = arith.constant 0 : index
    %22 = vector.load %arg6[%c0_25, %c0_26, %c0_27] : memref<18x18x128xf32, #tpu.memory_space<vmem>>, vector<16x16x128xf32>
    %23 = vector.shape_cast %22 : vector<16x16x128xf32> to vector<256x128xf32>
    %24 = arith.truncf %23 : vector<256x128xf32> to vector<256x128xbf16>
    %c0_28 = arith.constant 0 : index
    %c0_29 = arith.constant 0 : index
    %25 = vector.load %arg7[%c0_28, %c0_29] : memref<256x384xbf16, #tpu.memory_space<vmem>>, vector<256x128xbf16>
    tpu.vector_store %arg7[%c0_28, %c0_29], %24 {strides = array<i32>} : memref<256x384xbf16, #tpu.memory_space<vmem>>, vector<256x128xbf16>,
    %c0_30 = arith.constant 0 : index
    %c1_31 = arith.constant 1 : index
    %c0_32 = arith.constant 0 : index
    %26 = vector.load %arg6[%c0_30, %c1_31, %c0_32] : memref<18x18x128xf32, #tpu.memory_space<vmem>>, vector<16x16x128xf32>
    %27 = vector.shape_cast %26 : vector<16x16x128xf32> to vector<256x128xf32>
    %28 = arith.truncf %27 : vector<256x128xf32> to vector<256x128xbf16>
    %c0_33 = arith.constant 0 : index
    %c128 = arith.constant 128 : index
    %29 = vector.load %arg7[%c0_33, %c128] : memref<256x384xbf16, #tpu.memory_space<vmem>>, vector<256x128xbf16>
    tpu.vector_store %arg7[%c0_33, %c128], %28 {strides = array<i32>} : memref<256x384xbf16, #tpu.memory_space<vmem>>, vector<256x128xbf16>,
    %c0_34 = arith.constant 0 : index
    %c2 = arith.constant 2 : index
    %c0_35 = arith.constant 0 : index
    %30 = vector.load %arg6[%c0_34, %c2, %c0_35] : memref<18x18x128xf32, #tpu.memory_space<vmem>>, vector<16x16x128xf32>
    %31 = vector.shape_cast %30 : vector<16x16x128xf32> to vector<256x128xf32>
    %32 = arith.truncf %31 : vector<256x128xf32> to vector<256x128xbf16>
    %c0_36 = arith.constant 0 : index
    %c256 = arith.constant 256 : index
    %33 = vector.load %arg7[%c0_36, %c256] : memref<256x384xbf16, #tpu.memory_space<vmem>>, vector<256x128xbf16>
    tpu.vector_store %arg7[%c0_36, %c256], %32 {strides = array<i32>} : memref<256x384xbf16, #tpu.memory_space<vmem>>, vector<256x128xbf16>,
    %c0_37 = arith.constant 0 : index
    %c0_38 = arith.constant 0 : index
    %34 = vector.load %arg7[%c0_37, %c0_38] : memref<256x384xbf16, #tpu.memory_space<vmem>>, vector<256x384xbf16>
    %c0_39 = arith.constant 0 : index
    %c0_40 = arith.constant 0 : index
    %35 = vector.load %arg4[%c0_39, %c0_40] : memref<1152x128xbf16, #tpu.memory_space<vmem>>, vector<384x128xbf16>
    %cst_41 = arith.constant dense<0.000000e+00> : vector<256x128xf32>
    %36 = tpu.matmul %34, %35, %cst_41 {dimension_numbers = #tpu.dot_dimension_numbers<[1], [0], [0], [1], [0, 0, 1, 1], [], []>} : vector<256x384xbf16>, vector<384x128xbf16>, vector<256x128xf32> -> vector<256x128xf32>
    %37 = arith.addf %21, %36 : vector<256x128xf32>
    %c1_42 = arith.constant 1 : index
    %c0_43 = arith.constant 0 : index
    %c0_44 = arith.constant 0 : index
    %38 = vector.load %arg6[%c1_42, %c0_43, %c0_44] : memref<18x18x128xf32, #tpu.memory_space<vmem>>, vector<16x16x128xf32>
    %39 = vector.shape_cast %38 : vector<16x16x128xf32> to vector<256x128xf32>
    %40 = arith.truncf %39 : vector<256x128xf32> to vector<256x128xbf16>
    %c0_45 = arith.constant 0 : index
    %c0_46 = arith.constant 0 : index
    %41 = vector.load %arg7[%c0_45, %c0_46] : memref<256x384xbf16, #tpu.memory_space<vmem>>, vector<256x128xbf16>
    tpu.vector_store %arg7[%c0_45, %c0_46], %40 {strides = array<i32>} : memref<256x384xbf16, #tpu.memory_space<vmem>>, vector<256x128xbf16>,
    %c1_47 = arith.constant 1 : index
    %c1_48 = arith.constant 1 : index
    %c0_49 = arith.constant 0 : index
    %42 = vector.load %arg6[%c1_47, %c1_48, %c0_49] : memref<18x18x128xf32, #tpu.memory_space<vmem>>, vector<16x16x128xf32>
    %43 = vector.shape_cast %42 : vector<16x16x128xf32> to vector<256x128xf32>
    %44 = arith.truncf %43 : vector<256x128xf32> to vector<256x128xbf16>
    %c0_50 = arith.constant 0 : index
    %c128_51 = arith.constant 128 : index
    %45 = vector.load %arg7[%c0_50, %c128_51] : memref<256x384xbf16, #tpu.memory_space<vmem>>, vector<256x128xbf16>
    tpu.vector_store %arg7[%c0_50, %c128_51], %44 {strides = array<i32>} : memref<256x384xbf16, #tpu.memory_space<vmem>>, vector<256x128xbf16>,
    %c1_52 = arith.constant 1 : index
    %c2_53 = arith.constant 2 : index
    %c0_54 = arith.constant 0 : index
    %46 = vector.load %arg6[%c1_52, %c2_53, %c0_54] : memref<18x18x128xf32, #tpu.memory_space<vmem>>, vector<16x16x128xf32>
    %47 = vector.shape_cast %46 : vector<16x16x128xf32> to vector<256x128xf32>
    %48 = arith.truncf %47 : vector<256x128xf32> to vector<256x128xbf16>
    %c0_55 = arith.constant 0 : index
    %c256_56 = arith.constant 256 : index
    %49 = vector.load %arg7[%c0_55, %c256_56] : memref<256x384xbf16, #tpu.memory_space<vmem>>, vector<256x128xbf16>
    tpu.vector_store %arg7[%c0_55, %c256_56], %48 {strides = array<i32>} : memref<256x384xbf16, #tpu.memory_space<vmem>>, vector<256x128xbf16>,
    %c0_57 = arith.constant 0 : index
    %c0_58 = arith.constant 0 : index
    %50 = vector.load %arg7[%c0_57, %c0_58] : memref<256x384xbf16, #tpu.memory_space<vmem>>, vector<256x384xbf16>
    %c384 = arith.constant 384 : index
    %c0_59 = arith.constant 0 : index
    %51 = vector.load %arg4[%c384, %c0_59] : memref<1152x128xbf16, #tpu.memory_space<vmem>>, vector<384x128xbf16>
    %cst_60 = arith.constant dense<0.000000e+00> : vector<256x128xf32>
    %52 = tpu.matmul %50, %51, %cst_60 {dimension_numbers = #tpu.dot_dimension_numbers<[1], [0], [0], [1], [0, 0, 1, 1], [], []>} : vector<256x384xbf16>, vector<384x128xbf16>, vector<256x128xf32> -> vector<256x128xf32>
    %53 = arith.addf %37, %52 : vector<256x128xf32>
    %c2_61 = arith.constant 2 : index
    %c0_62 = arith.constant 0 : index
    %c0_63 = arith.constant 0 : index
    %54 = vector.load %arg6[%c2_61, %c0_62, %c0_63] : memref<18x18x128xf32, #tpu.memory_space<vmem>>, vector<16x16x128xf32>
    %55 = vector.shape_cast %54 : vector<16x16x128xf32> to vector<256x128xf32>
    %56 = arith.truncf %55 : vector<256x128xf32> to vector<256x128xbf16>
    %c0_64 = arith.constant 0 : index
    %c0_65 = arith.constant 0 : index
    %57 = vector.load %arg7[%c0_64, %c0_65] : memref<256x384xbf16, #tpu.memory_space<vmem>>, vector<256x128xbf16>
    tpu.vector_store %arg7[%c0_64, %c0_65], %56 {strides = array<i32>} : memref<256x384xbf16, #tpu.memory_space<vmem>>, vector<256x128xbf16>,
    %c2_66 = arith.constant 2 : index
    %c1_67 = arith.constant 1 : index
    %c0_68 = arith.constant 0 : index
    %58 = vector.load %arg6[%c2_66, %c1_67, %c0_68] : memref<18x18x128xf32, #tpu.memory_space<vmem>>, vector<16x16x128xf32>
    %59 = vector.shape_cast %58 : vector<16x16x128xf32> to vector<256x128xf32>
    %60 = arith.truncf %59 : vector<256x128xf32> to vector<256x128xbf16>
    %c0_69 = arith.constant 0 : index
    %c128_70 = arith.constant 128 : index
    %61 = vector.load %arg7[%c0_69, %c128_70] : memref<256x384xbf16, #tpu.memory_space<vmem>>, vector<256x128xbf16>
    tpu.vector_store %arg7[%c0_69, %c128_70], %60 {strides = array<i32>} : memref<256x384xbf16, #tpu.memory_space<vmem>>, vector<256x128xbf16>,
    %c2_71 = arith.constant 2 : index
    %c2_72 = arith.constant 2 : index
    %c0_73 = arith.constant 0 : index
    %62 = vector.load %arg6[%c2_71, %c2_72, %c0_73] : memref<18x18x128xf32, #tpu.memory_space<vmem>>, vector<16x16x128xf32>
    %63 = vector.shape_cast %62 : vector<16x16x128xf32> to vector<256x128xf32>
    %64 = arith.truncf %63 : vector<256x128xf32> to vector<256x128xbf16>
    %c0_74 = arith.constant 0 : index
    %c256_75 = arith.constant 256 : index
    %65 = vector.load %arg7[%c0_74, %c256_75] : memref<256x384xbf16, #tpu.memory_space<vmem>>, vector<256x128xbf16>
    tpu.vector_store %arg7[%c0_74, %c256_75], %64 {strides = array<i32>} : memref<256x384xbf16, #tpu.memory_space<vmem>>, vector<256x128xbf16>,
    %c0_76 = arith.constant 0 : index
    %c0_77 = arith.constant 0 : index
    %66 = vector.load %arg7[%c0_76, %c0_77] : memref<256x384xbf16, #tpu.memory_space<vmem>>, vector<256x384xbf16>
    %c768 = arith.constant 768 : index
    %c0_78 = arith.constant 0 : index
    %67 = vector.load %arg4[%c768, %c0_78] : memref<1152x128xbf16, #tpu.memory_space<vmem>>, vector<384x128xbf16>
    %cst_79 = arith.constant dense<0.000000e+00> : vector<256x128xf32>
    %68 = tpu.matmul %66, %67, %cst_79 {dimension_numbers = #tpu.dot_dimension_numbers<[1], [0], [0], [1], [0, 0, 1, 1], [], []>} : vector<256x384xbf16>, vector<384x128xbf16>, vector<256x128xf32> -> vector<256x128xf32>
    %69 = arith.addf %53, %68 : vector<256x128xf32>
    %70 = arith.truncf %69 : vector<256x128xf32> to vector<256x128xbf16>
    %c0_80 = arith.constant 0 : index
    %c0_81 = arith.constant 0 : index
    %c0_82 = arith.constant 0 : index
    %71 = vector.load %arg5[%c0_80, %c0_81, %c0_82] : memref<1x256x128xbf16, #tpu.memory_space<vmem>>, vector<1x256x128xbf16>
    %72 = vector.shape_cast %71 : vector<1x256x128xbf16> to vector<256x128xbf16>
    %73 = vector.shape_cast %70 : vector<256x128xbf16> to vector<1x256x128xbf16>
    tpu.vector_store %arg5[%c0_80, %c0_81, %c0_82], %73 {strides = array<i32>} : memref<1x256x128xbf16, #tpu.memory_space<vmem>>, vector<1x256x128xbf16>,
    return
  }
  func.func @transform_0(%arg0: i32) -> (i32, i32, i32, i32) {
    %c0_i32 = arith.constant 0 : i32
    %c0_i32_0 = arith.constant 0 : i32
    %c0_i32_1 = arith.constant 0 : i32
    %c0_i32_2 = arith.constant 0 : i32
    return %arg0, %c0_i32, %c0_i32_0, %c0_i32_1 : i32, i32, i32, i32
  }
  func.func @transform_1(%arg0: i32) -> (i32, i32) {
    %c0_i32 = arith.constant 0 : i32
    %c0_i32_0 = arith.constant 0 : i32
    %c0_i32_1 = arith.constant 0 : i32
    return %c0_i32, %c0_i32_0 : i32, i32
  }
  func.func @transform_2(%arg0: i32) -> (i32, i32) {
    %c0_i32 = arith.constant 0 : i32
    %c0_i32_0 = arith.constant 0 : i32
    %c0_i32_1 = arith.constant 0 : i32
    return %c0_i32, %c0_i32_0 : i32, i32
  }
  func.func @transform_3(%arg0: i32) -> (i32, i32) {
    %c0_i32 = arith.constant 0 : i32
    %c0_i32_0 = arith.constant 0 : i32
    %c0_i32_1 = arith.constant 0 : i32
    return %c0_i32, %c0_i32_0 : i32, i32
  }
  func.func @transform_4(%arg0: i32) -> (i32, i32, i32) {
    %c0_i32 = arith.constant 0 : i32
    %c0_i32_0 = arith.constant 0 : i32
    %c0_i32_1 = arith.constant 0 : i32
    return %arg0, %c0_i32, %c0_i32_0 : i32, i32, i32
  }
}

module attributes {stable_mosaic.version = 11 : i64} {
  func.func @_bn_relu_conv3x3_shortcut_kernel(%arg0: i32, %arg1: memref<1x16x16x128xbf16, #tpu.memory_space<vmem>>, %arg2: memref<1x128xf32, #tpu.memory_space<vmem>>, %arg3: memref<1x128xf32, #tpu.memory_space<vmem>>, %arg4: memref<1152x128xbf16, #tpu.memory_space<vmem>>, %arg5: memref<1x128xf32, #tpu.memory_space<vmem>>, %arg6: memref<1x16x16x128xf32, #tpu.memory_space<vmem>>, %arg7: memref<128x128xbf16, #tpu.memory_space<vmem>>, %arg8: memref<1x256x128xf32, #tpu.memory_space<vmem>>, %arg9: memref<18x18x128xf32, #tpu.memory_space<vmem>>, %arg10: memref<256x384xbf16, #tpu.memory_space<vmem>>) attributes {dimension_semantics = [#tpu.dimension_semantics<parallel>], iteration_bounds = array<i64: 2>, scalar_prefetch = 0 : i64, scratch_operands = 2 : i64, tpu.core_type = #tpu.core_type<tc>, window_params = [{transform_indices = @transform_0, window_bounds = array<i64: 1, 16, 16, 128>}, {pipeline_mode = #tpu.pipeline_mode<synchronous>, transform_indices = @transform_1, window_bounds = array<i64: 1, 128>}, {pipeline_mode = #tpu.pipeline_mode<synchronous>, transform_indices = @transform_2, window_bounds = array<i64: 1, 128>}, {pipeline_mode = #tpu.pipeline_mode<synchronous>, transform_indices = @transform_3, window_bounds = array<i64: 1152, 128>}, {pipeline_mode = #tpu.pipeline_mode<synchronous>, transform_indices = @transform_4, window_bounds = array<i64: 1, 128>}, {transform_indices = @transform_5, window_bounds = array<i64: 1, 16, 16, 128>}, {pipeline_mode = #tpu.pipeline_mode<synchronous>, transform_indices = @transform_6, window_bounds = array<i64: 128, 128>}, {transform_indices = @transform_7, window_bounds = array<i64: 1, 256, 128>}]} {
    %cst = arith.constant 0.000000e+00 : f32
    %0 = vector.broadcast %cst : f32 to vector<1x18x128xf32>
    %c0 = arith.constant 0 : index
    %c0_0 = arith.constant 0 : index
    %c0_1 = arith.constant 0 : index
    %1 = vector.load %arg9[%c0, %c0_0, %c0_1] : memref<18x18x128xf32, #tpu.memory_space<vmem>>, vector<1x18x128xf32>
    tpu.vector_store %arg9[%c0, %c0_0, %c0_1], %0 {strides = array<i32>} : memref<18x18x128xf32, #tpu.memory_space<vmem>>, vector<1x18x128xf32>,
    %cst_2 = arith.constant 0.000000e+00 : f32
    %2 = vector.broadcast %cst_2 : f32 to vector<1x18x128xf32>
    %c17 = arith.constant 17 : index
    %c0_3 = arith.constant 0 : index
    %c0_4 = arith.constant 0 : index
    %3 = vector.load %arg9[%c17, %c0_3, %c0_4] : memref<18x18x128xf32, #tpu.memory_space<vmem>>, vector<1x18x128xf32>
    tpu.vector_store %arg9[%c17, %c0_3, %c0_4], %2 {strides = array<i32>} : memref<18x18x128xf32, #tpu.memory_space<vmem>>, vector<1x18x128xf32>,
    %cst_5 = arith.constant 0.000000e+00 : f32
    %4 = vector.broadcast %cst_5 : f32 to vector<18x1x128xf32>
    %c0_6 = arith.constant 0 : index
    %c0_7 = arith.constant 0 : index
    %c0_8 = arith.constant 0 : index
    %5 = vector.load %arg9[%c0_6, %c0_7, %c0_8] : memref<18x18x128xf32, #tpu.memory_space<vmem>>, vector<18x1x128xf32>
    tpu.vector_store %arg9[%c0_6, %c0_7, %c0_8], %4 {strides = array<i32>} : memref<18x18x128xf32, #tpu.memory_space<vmem>>, vector<18x1x128xf32>,
    %cst_9 = arith.constant 0.000000e+00 : f32
    %6 = vector.broadcast %cst_9 : f32 to vector<18x1x128xf32>
    %c0_10 = arith.constant 0 : index
    %c17_11 = arith.constant 17 : index
    %c0_12 = arith.constant 0 : index
    %7 = vector.load %arg9[%c0_10, %c17_11, %c0_12] : memref<18x18x128xf32, #tpu.memory_space<vmem>>, vector<18x1x128xf32>
    tpu.vector_store %arg9[%c0_10, %c17_11, %c0_12], %6 {strides = array<i32>} : memref<18x18x128xf32, #tpu.memory_space<vmem>>, vector<18x1x128xf32>,
    %c0_13 = arith.constant 0 : index
    %c0_14 = arith.constant 0 : index
    %8 = vector.load %arg2[%c0_13, %c0_14] : memref<1x128xf32, #tpu.memory_space<vmem>>, vector<1x128xf32>
    %9 = vector.shape_cast %8 : vector<1x128xf32> to vector<1x1x128xf32>
    %c0_15 = arith.constant 0 : index
    %c0_16 = arith.constant 0 : index
    %10 = vector.load %arg3[%c0_15, %c0_16] : memref<1x128xf32, #tpu.memory_space<vmem>>, vector<1x128xf32>
    %11 = vector.shape_cast %10 : vector<1x128xf32> to vector<1x1x128xf32>
    %c0_17 = arith.constant 0 : index
    %c0_18 = arith.constant 0 : index
    %c0_19 = arith.constant 0 : index
    %c0_20 = arith.constant 0 : index
    %12 = vector.load %arg1[%c0_17, %c0_18, %c0_19, %c0_20] : memref<1x16x16x128xbf16, #tpu.memory_space<vmem>>, vector<1x16x16x128xbf16>
    %13 = vector.shape_cast %12 : vector<1x16x16x128xbf16> to vector<16x16x128xbf16>
    %14 = arith.extf %13 : vector<16x16x128xbf16> to vector<16x16x128xf32>
    %15 = vector.broadcast %9 : vector<1x1x128xf32> to vector<16x16x128xf32>
    %16 = arith.mulf %14, %15 : vector<16x16x128xf32>
    %17 = vector.broadcast %11 : vector<1x1x128xf32> to vector<16x16x128xf32>
    %18 = arith.addf %16, %17 : vector<16x16x128xf32>
    %cst_21 = arith.constant 0.000000e+00 : f32
    %19 = vector.broadcast %cst_21 : f32 to vector<16x16x128xf32>
    %20 = arith.maximumf %18, %19 : vector<16x16x128xf32>
    %c1 = arith.constant 1 : index
    %c1_22 = arith.constant 1 : index
    %c0_23 = arith.constant 0 : index
    %21 = vector.load %arg9[%c1, %c1_22, %c0_23] : memref<18x18x128xf32, #tpu.memory_space<vmem>>, vector<16x16x128xf32>
    tpu.vector_store %arg9[%c1, %c1_22, %c0_23], %20 {strides = array<i32>} : memref<18x18x128xf32, #tpu.memory_space<vmem>>, vector<16x16x128xf32>,
    %cst_24 = arith.constant 0.000000e+00 : f32
    %22 = vector.broadcast %cst_24 : f32 to vector<256x128xf32>
    %c0_25 = arith.constant 0 : index
    %c0_26 = arith.constant 0 : index
    %c0_27 = arith.constant 0 : index
    %23 = vector.load %arg9[%c0_25, %c0_26, %c0_27] : memref<18x18x128xf32, #tpu.memory_space<vmem>>, vector<16x16x128xf32>
    %24 = vector.shape_cast %23 : vector<16x16x128xf32> to vector<256x128xf32>
    %25 = arith.truncf %24 : vector<256x128xf32> to vector<256x128xbf16>
    %c0_28 = arith.constant 0 : index
    %c0_29 = arith.constant 0 : index
    %26 = vector.load %arg10[%c0_28, %c0_29] : memref<256x384xbf16, #tpu.memory_space<vmem>>, vector<256x128xbf16>
    tpu.vector_store %arg10[%c0_28, %c0_29], %25 {strides = array<i32>} : memref<256x384xbf16, #tpu.memory_space<vmem>>, vector<256x128xbf16>,
    %c0_30 = arith.constant 0 : index
    %c1_31 = arith.constant 1 : index
    %c0_32 = arith.constant 0 : index
    %27 = vector.load %arg9[%c0_30, %c1_31, %c0_32] : memref<18x18x128xf32, #tpu.memory_space<vmem>>, vector<16x16x128xf32>
    %28 = vector.shape_cast %27 : vector<16x16x128xf32> to vector<256x128xf32>
    %29 = arith.truncf %28 : vector<256x128xf32> to vector<256x128xbf16>
    %c0_33 = arith.constant 0 : index
    %c128 = arith.constant 128 : index
    %30 = vector.load %arg10[%c0_33, %c128] : memref<256x384xbf16, #tpu.memory_space<vmem>>, vector<256x128xbf16>
    tpu.vector_store %arg10[%c0_33, %c128], %29 {strides = array<i32>} : memref<256x384xbf16, #tpu.memory_space<vmem>>, vector<256x128xbf16>,
    %c0_34 = arith.constant 0 : index
    %c2 = arith.constant 2 : index
    %c0_35 = arith.constant 0 : index
    %31 = vector.load %arg9[%c0_34, %c2, %c0_35] : memref<18x18x128xf32, #tpu.memory_space<vmem>>, vector<16x16x128xf32>
    %32 = vector.shape_cast %31 : vector<16x16x128xf32> to vector<256x128xf32>
    %33 = arith.truncf %32 : vector<256x128xf32> to vector<256x128xbf16>
    %c0_36 = arith.constant 0 : index
    %c256 = arith.constant 256 : index
    %34 = vector.load %arg10[%c0_36, %c256] : memref<256x384xbf16, #tpu.memory_space<vmem>>, vector<256x128xbf16>
    tpu.vector_store %arg10[%c0_36, %c256], %33 {strides = array<i32>} : memref<256x384xbf16, #tpu.memory_space<vmem>>, vector<256x128xbf16>,
    %c0_37 = arith.constant 0 : index
    %c0_38 = arith.constant 0 : index
    %35 = vector.load %arg10[%c0_37, %c0_38] : memref<256x384xbf16, #tpu.memory_space<vmem>>, vector<256x384xbf16>
    %c0_39 = arith.constant 0 : index
    %c0_40 = arith.constant 0 : index
    %36 = vector.load %arg4[%c0_39, %c0_40] : memref<1152x128xbf16, #tpu.memory_space<vmem>>, vector<384x128xbf16>
    %cst_41 = arith.constant dense<0.000000e+00> : vector<256x128xf32>
    %37 = tpu.matmul %35, %36, %cst_41 {dimension_numbers = #tpu.dot_dimension_numbers<[1], [0], [0], [1], [0, 0, 1, 1], [], []>} : vector<256x384xbf16>, vector<384x128xbf16>, vector<256x128xf32> -> vector<256x128xf32>
    %38 = arith.addf %22, %37 : vector<256x128xf32>
    %c1_42 = arith.constant 1 : index
    %c0_43 = arith.constant 0 : index
    %c0_44 = arith.constant 0 : index
    %39 = vector.load %arg9[%c1_42, %c0_43, %c0_44] : memref<18x18x128xf32, #tpu.memory_space<vmem>>, vector<16x16x128xf32>
    %40 = vector.shape_cast %39 : vector<16x16x128xf32> to vector<256x128xf32>
    %41 = arith.truncf %40 : vector<256x128xf32> to vector<256x128xbf16>
    %c0_45 = arith.constant 0 : index
    %c0_46 = arith.constant 0 : index
    %42 = vector.load %arg10[%c0_45, %c0_46] : memref<256x384xbf16, #tpu.memory_space<vmem>>, vector<256x128xbf16>
    tpu.vector_store %arg10[%c0_45, %c0_46], %41 {strides = array<i32>} : memref<256x384xbf16, #tpu.memory_space<vmem>>, vector<256x128xbf16>,
    %c1_47 = arith.constant 1 : index
    %c1_48 = arith.constant 1 : index
    %c0_49 = arith.constant 0 : index
    %43 = vector.load %arg9[%c1_47, %c1_48, %c0_49] : memref<18x18x128xf32, #tpu.memory_space<vmem>>, vector<16x16x128xf32>
    %44 = vector.shape_cast %43 : vector<16x16x128xf32> to vector<256x128xf32>
    %45 = arith.truncf %44 : vector<256x128xf32> to vector<256x128xbf16>
    %c0_50 = arith.constant 0 : index
    %c128_51 = arith.constant 128 : index
    %46 = vector.load %arg10[%c0_50, %c128_51] : memref<256x384xbf16, #tpu.memory_space<vmem>>, vector<256x128xbf16>
    tpu.vector_store %arg10[%c0_50, %c128_51], %45 {strides = array<i32>} : memref<256x384xbf16, #tpu.memory_space<vmem>>, vector<256x128xbf16>,
    %c1_52 = arith.constant 1 : index
    %c2_53 = arith.constant 2 : index
    %c0_54 = arith.constant 0 : index
    %47 = vector.load %arg9[%c1_52, %c2_53, %c0_54] : memref<18x18x128xf32, #tpu.memory_space<vmem>>, vector<16x16x128xf32>
    %48 = vector.shape_cast %47 : vector<16x16x128xf32> to vector<256x128xf32>
    %49 = arith.truncf %48 : vector<256x128xf32> to vector<256x128xbf16>
    %c0_55 = arith.constant 0 : index
    %c256_56 = arith.constant 256 : index
    %50 = vector.load %arg10[%c0_55, %c256_56] : memref<256x384xbf16, #tpu.memory_space<vmem>>, vector<256x128xbf16>
    tpu.vector_store %arg10[%c0_55, %c256_56], %49 {strides = array<i32>} : memref<256x384xbf16, #tpu.memory_space<vmem>>, vector<256x128xbf16>,
    %c0_57 = arith.constant 0 : index
    %c0_58 = arith.constant 0 : index
    %51 = vector.load %arg10[%c0_57, %c0_58] : memref<256x384xbf16, #tpu.memory_space<vmem>>, vector<256x384xbf16>
    %c384 = arith.constant 384 : index
    %c0_59 = arith.constant 0 : index
    %52 = vector.load %arg4[%c384, %c0_59] : memref<1152x128xbf16, #tpu.memory_space<vmem>>, vector<384x128xbf16>
    %cst_60 = arith.constant dense<0.000000e+00> : vector<256x128xf32>
    %53 = tpu.matmul %51, %52, %cst_60 {dimension_numbers = #tpu.dot_dimension_numbers<[1], [0], [0], [1], [0, 0, 1, 1], [], []>} : vector<256x384xbf16>, vector<384x128xbf16>, vector<256x128xf32> -> vector<256x128xf32>
    %54 = arith.addf %38, %53 : vector<256x128xf32>
    %c2_61 = arith.constant 2 : index
    %c0_62 = arith.constant 0 : index
    %c0_63 = arith.constant 0 : index
    %55 = vector.load %arg9[%c2_61, %c0_62, %c0_63] : memref<18x18x128xf32, #tpu.memory_space<vmem>>, vector<16x16x128xf32>
    %56 = vector.shape_cast %55 : vector<16x16x128xf32> to vector<256x128xf32>
    %57 = arith.truncf %56 : vector<256x128xf32> to vector<256x128xbf16>
    %c0_64 = arith.constant 0 : index
    %c0_65 = arith.constant 0 : index
    %58 = vector.load %arg10[%c0_64, %c0_65] : memref<256x384xbf16, #tpu.memory_space<vmem>>, vector<256x128xbf16>
    tpu.vector_store %arg10[%c0_64, %c0_65], %57 {strides = array<i32>} : memref<256x384xbf16, #tpu.memory_space<vmem>>, vector<256x128xbf16>,
    %c2_66 = arith.constant 2 : index
    %c1_67 = arith.constant 1 : index
    %c0_68 = arith.constant 0 : index
    %59 = vector.load %arg9[%c2_66, %c1_67, %c0_68] : memref<18x18x128xf32, #tpu.memory_space<vmem>>, vector<16x16x128xf32>
    %60 = vector.shape_cast %59 : vector<16x16x128xf32> to vector<256x128xf32>
    %61 = arith.truncf %60 : vector<256x128xf32> to vector<256x128xbf16>
    %c0_69 = arith.constant 0 : index
    %c128_70 = arith.constant 128 : index
    %62 = vector.load %arg10[%c0_69, %c128_70] : memref<256x384xbf16, #tpu.memory_space<vmem>>, vector<256x128xbf16>
    tpu.vector_store %arg10[%c0_69, %c128_70], %61 {strides = array<i32>} : memref<256x384xbf16, #tpu.memory_space<vmem>>, vector<256x128xbf16>,
    %c2_71 = arith.constant 2 : index
    %c2_72 = arith.constant 2 : index
    %c0_73 = arith.constant 0 : index
    %63 = vector.load %arg9[%c2_71, %c2_72, %c0_73] : memref<18x18x128xf32, #tpu.memory_space<vmem>>, vector<16x16x128xf32>
    %64 = vector.shape_cast %63 : vector<16x16x128xf32> to vector<256x128xf32>
    %65 = arith.truncf %64 : vector<256x128xf32> to vector<256x128xbf16>
    %c0_74 = arith.constant 0 : index
    %c256_75 = arith.constant 256 : index
    %66 = vector.load %arg10[%c0_74, %c256_75] : memref<256x384xbf16, #tpu.memory_space<vmem>>, vector<256x128xbf16>
    tpu.vector_store %arg10[%c0_74, %c256_75], %65 {strides = array<i32>} : memref<256x384xbf16, #tpu.memory_space<vmem>>, vector<256x128xbf16>,
    %c0_76 = arith.constant 0 : index
    %c0_77 = arith.constant 0 : index
    %67 = vector.load %arg10[%c0_76, %c0_77] : memref<256x384xbf16, #tpu.memory_space<vmem>>, vector<256x384xbf16>
    %c768 = arith.constant 768 : index
    %c0_78 = arith.constant 0 : index
    %68 = vector.load %arg4[%c768, %c0_78] : memref<1152x128xbf16, #tpu.memory_space<vmem>>, vector<384x128xbf16>
    %cst_79 = arith.constant dense<0.000000e+00> : vector<256x128xf32>
    %69 = tpu.matmul %67, %68, %cst_79 {dimension_numbers = #tpu.dot_dimension_numbers<[1], [0], [0], [1], [0, 0, 1, 1], [], []>} : vector<256x384xbf16>, vector<384x128xbf16>, vector<256x128xf32> -> vector<256x128xf32>
    %70 = arith.addf %54, %69 : vector<256x128xf32>
    %c0_80 = arith.constant 0 : index
    %c0_81 = arith.constant 0 : index
    %c0_82 = arith.constant 0 : index
    %c0_83 = arith.constant 0 : index
    %71 = vector.load %arg6[%c0_80, %c0_81, %c0_82, %c0_83] : memref<1x16x16x128xf32, #tpu.memory_space<vmem>>, vector<1x16x16x128xf32>
    %72 = vector.shape_cast %71 : vector<1x16x16x128xf32> to vector<16x16x128xf32>
    %73 = vector.shape_cast %72 : vector<16x16x128xf32> to vector<256x128xf32>
    %74 = arith.truncf %73 : vector<256x128xf32> to vector<256x128xbf16>
    %c0_84 = arith.constant 0 : index
    %c0_85 = arith.constant 0 : index
    %75 = vector.load %arg7[%c0_84, %c0_85] : memref<128x128xbf16, #tpu.memory_space<vmem>>, vector<128x128xbf16>
    %cst_86 = arith.constant dense<0.000000e+00> : vector<256x128xf32>
    %76 = tpu.matmul %74, %75, %cst_86 {dimension_numbers = #tpu.dot_dimension_numbers<[1], [0], [0], [1], [0, 0, 1, 1], [], []>} : vector<256x128xbf16>, vector<128x128xbf16>, vector<256x128xf32> -> vector<256x128xf32>
    %77 = arith.addf %70, %76 : vector<256x128xf32>
    %c0_87 = arith.constant 0 : index
    %c0_88 = arith.constant 0 : index
    %78 = vector.load %arg5[%c0_87, %c0_88] : memref<1x128xf32, #tpu.memory_space<vmem>>, vector<1x128xf32>
    %79 = vector.broadcast %78 : vector<1x128xf32> to vector<256x128xf32>
    %80 = arith.addf %77, %79 : vector<256x128xf32>
    %c0_89 = arith.constant 0 : index
    %c0_90 = arith.constant 0 : index
    %c0_91 = arith.constant 0 : index
    %81 = vector.load %arg8[%c0_89, %c0_90, %c0_91] : memref<1x256x128xf32, #tpu.memory_space<vmem>>, vector<1x256x128xf32>
    %82 = vector.shape_cast %81 : vector<1x256x128xf32> to vector<256x128xf32>
    %83 = vector.shape_cast %80 : vector<256x128xf32> to vector<1x256x128xf32>
    tpu.vector_store %arg8[%c0_89, %c0_90, %c0_91], %83 {strides = array<i32>} : memref<1x256x128xf32, #tpu.memory_space<vmem>>, vector<1x256x128xf32>,
    return
  }
  func.func @transform_0(%arg0: i32) -> (i32, i32, i32, i32) {
    %c0_i32 = arith.constant 0 : i32
    %c0_i32_0 = arith.constant 0 : i32
    %c0_i32_1 = arith.constant 0 : i32
    %c0_i32_2 = arith.constant 0 : i32
    return %arg0, %c0_i32, %c0_i32_0, %c0_i32_1 : i32, i32, i32, i32
  }
  func.func @transform_1(%arg0: i32) -> (i32, i32) {
    %c0_i32 = arith.constant 0 : i32
    %c0_i32_0 = arith.constant 0 : i32
    %c0_i32_1 = arith.constant 0 : i32
    return %c0_i32, %c0_i32_0 : i32, i32
  }
  func.func @transform_2(%arg0: i32) -> (i32, i32) {
    %c0_i32 = arith.constant 0 : i32
    %c0_i32_0 = arith.constant 0 : i32
    %c0_i32_1 = arith.constant 0 : i32
    return %c0_i32, %c0_i32_0 : i32, i32
  }
  func.func @transform_3(%arg0: i32) -> (i32, i32) {
    %c0_i32 = arith.constant 0 : i32
    %c0_i32_0 = arith.constant 0 : i32
    %c0_i32_1 = arith.constant 0 : i32
    return %c0_i32, %c0_i32_0 : i32, i32
  }
  func.func @transform_4(%arg0: i32) -> (i32, i32) {
    %c0_i32 = arith.constant 0 : i32
    %c0_i32_0 = arith.constant 0 : i32
    %c0_i32_1 = arith.constant 0 : i32
    return %c0_i32, %c0_i32_0 : i32, i32
  }
  func.func @transform_5(%arg0: i32) -> (i32, i32, i32, i32) {
    %c0_i32 = arith.constant 0 : i32
    %c0_i32_0 = arith.constant 0 : i32
    %c0_i32_1 = arith.constant 0 : i32
    %c0_i32_2 = arith.constant 0 : i32
    return %arg0, %c0_i32, %c0_i32_0, %c0_i32_1 : i32, i32, i32, i32
  }
  func.func @transform_6(%arg0: i32) -> (i32, i32) {
    %c0_i32 = arith.constant 0 : i32
    %c0_i32_0 = arith.constant 0 : i32
    %c0_i32_1 = arith.constant 0 : i32
    return %c0_i32, %c0_i32_0 : i32, i32
  }
  func.func @transform_7(%arg0: i32) -> (i32, i32, i32) {
    %c0_i32 = arith.constant 0 : i32
    %c0_i32_0 = arith.constant 0 : i32
    %c0_i32_1 = arith.constant 0 : i32
    return %arg0, %c0_i32, %c0_i32_0 : i32, i32, i32
  }
}

</mosaic_0001>

<bundles_post_ra>
// kernel: wide_basic_forward.2
= control target key start
LH: loop header
LB: loop body
LE: loop exit
PB: predicated region body
PF: predicated region fallthrough
CT: control target
= control target key end

     0   :  { %s5022_s15 = smov 0   ;;  %s6186_s0 = inlined_call_operand.vmem [shape: f32[2,16,16,128], index: 0, kind: input, shape index: {}]   ;;  %s6187_s1 = inlined_call_operand.vmem [shape: f32[1,128], index: 1, kind: input, shape index: {}]   ;;  %s6188_s2 = inlined_call_operand.vmem [shape: f32[1,128], index: 2, kind: input, shape index: {}]   ;;  %s6189_s3 = inlined_call_operand.vmem [shape: bf16[1152,128], index: 3, kind: input, shape index: {}]   ;;  %s6190_s4 = inlined_call_operand.vmem [shape: bf16[2,256,128], index: 4, kind: output, shape index: {}]  }
   0x1 LB: > { %s3763_s16 = sadd.s32 4294967295, %s4993_s15   ;;  %p3767_p0 = scmp.ge.s32.totalorder %s4993_s15, 1  ;;  %s4993_s15 = sphi %s5022_s15, %s14_s15  }
   0x2   : > { %p162_p1 = scmp.lt.s32.totalorder %s4993_s15, 3 }
   0x4   : > { %p163_p2 = pnand %p3767_p0, %p162_p1 }
   0x6   : > { %166 = sbr.rel (%p163_p2) target bundleno = 858 (0x35a), region = 36 }
   0xb   : > { %v4767_v0 = vld [vmem:[%s6189_s3 + $0xf8] sm:$0xff]  ;;  %p188_p3 = scmp.lt.s32.totalorder %s3763_s16, 1  ;;  %v4995_v1 = vmov 0.0   ;;  %v4766_v2 = vld [vmem:[%s6189_s3 + $0xf0] sm:$0xff]  ;;  %v4765_v3 = vld [vmem:[%s6189_s3 + $0xe8] sm:$0xff]  ;;  %v4996_v8 = vmov 0.0|0.0  }
   0xc   : > { %198 = vst [vmem:[#allocation2] sm:$0xff] %v4995_v1  ;;  %1610 = vmatpush.bf16.msra.mxu0 %v4767_v0  ;;  %4951 = vmatpush.bf16.msra.mxu1 %v4767_v0  ;;  %v5055_v4 = vld [vmem:[%s6187_s1] ss:$0 sm:$0xff]  ;;  %v4763_v26 = vld [vmem:[%s6189_s3 + $0xd8] sm:$0xff]  ;;  %v4762_v27 = vld [vmem:[%s6189_s3 + $0xd0] sm:$0xff] }
   0xd   : > { %s6270_s16 = smov (!%p188_p3, %s3763_s16), 1  ;;  %199 = vst [vmem:[#allocation2 + $0x8] sm:$0xff] %v4995_v1  ;;  %4952 = vmatpush.bf16.msra.mxu2 %v4767_v0  ;;  %4953 = vmatpush.bf16.msra.mxu3 %v4767_v0  ;;  %v5067_v13 = vld [vmem:[%s6188_s2] ss:$0 sm:$0xff]  ;;  %v4761_v32 = vld [vmem:[%s6189_s3 + $0xc8] sm:$0xff] }
   0xe   : > { %205 = vst [vmem:[#allocation2] sm:$0x1] %v4995_v1  ;;  %s4638_s21 = sshll.u32 %s6270_s16, 8  ;;  %v4764_v18 = vld [vmem:[%s6189_s3 + $0xe0] sm:$0xff]  ;;  %s4639_s25 = sshll.u32 %s6270_s16, 7 }
   0xf   : > { %206 = vst [vmem:[#allocation2 + $0x18] sm:$0x1] %v4995_v1  ;;  %s5049_s26 = scalar_lea.vmem %s6186_s0, %s4638_s21  ;;  %v4760_v35 = vld [vmem:[%s6189_s3 + $0xc0] sm:$0xff]  ;;  %s6111_s29 = scalar_lea.vmem %s6190_s4, %s4639_s25 }
  0x10   : > { %207 = vst [vmem:[#allocation2 + $0x30] sm:$0x1] %v4995_v1  ;;  %1611 = vmatpush.bf16.msra.mxu0 %v4766_v2  ;;  %4954 = vmatpush.bf16.msra.mxu1 %v4766_v2  ;;  %v243_v5 = vld [vmem:[%s5049_s26] sm:$0xff]  ;;  %v244_v6 = vld [vmem:[%s5049_s26 + $0x8] sm:$0xff]  ;;  %v245_v7 = vld [vmem:[%s5049_s26 + $0x10] sm:$0xff] }
  0x11   : > { %475 = vst [vmem:[#allocation3 + $0xc] sm:$0xf] %v4996_v8  ;;  %4955 = vmatpush.bf16.msra.mxu2 %v4766_v2  ;;  %4956 = vmatpush.bf16.msra.mxu3 %v4766_v2  ;;  %v246_v9 = vld [vmem:[%s5049_s26 + $0x18] sm:$0xff]  ;;  %v278_v10 = vmul.f32 %v5055_v4, %v243_v5  ;;  %v279_v11 = vmul.f32 %v5055_v4, %v244_v6  ;;  %v249_v43 = vld [vmem:[%s5049_s26 + $0x30] sm:$0xff]  ;;  %v251_v45 = vld [vmem:[%s5049_s26 + $0x40] sm:$0xff] }
  0x12   : > { %v280_v12 = vmul.f32 %v5055_v4, %v245_v7  ;;  %200 = vst [vmem:[#allocation2 + $0x10] sm:$0x3] %v4995_v1  ;;  %v281_v14 = vmul.f32 %v5055_v4, %v246_v9  ;;  %v250_v44 = vld [vmem:[%s5049_s26 + $0x38] sm:$0xff]  ;;  %v252_v46 = vld [vmem:[%s5049_s26 + $0x48] sm:$0xff]  ;;  %v284_v47 = vmul.f32 %v5055_v4, %v249_v43  ;;  %v253_v48 = vld [vmem:[%s5049_s26 + $0x50] sm:$0xff]  ;;  %v286_v51 = vmul.f32 %v5055_v4, %v251_v45 }
  0x13   : > { %202 = vst [vmem:[#allocation2 + $0x198] sm:$0xff] %v4995_v1  ;;  %v313_v15 = vadd.f32 %v5067_v13, %v278_v10  ;;  %v314_v16 = vadd.f32 %v5067_v13, %v279_v11  ;;  %v285_v49 = vmul.f32 %v5055_v4, %v250_v44  ;;  %v254_v50 = vld [vmem:[%s5049_s26 + $0x58] sm:$0xff]  ;;  %v287_v52 = vmul.f32 %v5055_v4, %v252_v46  ;;  %v257_v58 = vld [vmem:[%s5049_s26 + $0x70] sm:$0xff]  ;;  %v259_v5 = vld [vmem:[%s5049_s26 + $0x80] sm:$0xff] }
  0x14   : > { %v315_v17 = vadd.f32 %v5067_v13, %v280_v12  ;;  %203 = vst [vmem:[#allocation2 + $0x1a0] sm:$0xff] %v4995_v1  ;;  %1612 = vmatpush.bf16.msra.mxu0 %v4765_v3  ;;  %4957 = vmatpush.bf16.msra.mxu1 %v4765_v3  ;;  %v316_v19 = vadd.f32 %v5067_v13, %v281_v14  ;;  %v258_v0 = vld [vmem:[%s5049_s26 + $0x78] sm:$0xff]  ;;  %v260_v7 = vld [vmem:[%s5049_s26 + $0x88] sm:$0xff]  ;;  %v261_v9 = vld [vmem:[%s5049_s26 + $0x90] sm:$0xff] }
  0x15   : > { %v410_v20 = vld [vmem:[#allocation2] sm:$0xff]  ;;  %204 = vst [vmem:[#allocation2 + $0x1a8] sm:$0x3] %v4995_v1  ;;  %4958 = vmatpush.bf16.msra.mxu2 %v4765_v3  ;;  %4959 = vmatpush.bf16.msra.mxu3 %v4765_v3  ;;  %v345_v21 = vmax.f32 %v313_v15, 0.0  ;;  %v346_v22 = vmax.f32 %v314_v16, 0.0  ;;  %v288_v53 = vmul.f32 %v5055_v4, %v253_v48  ;;  %v319_v54 = vadd.f32 %v5067_v13, %v284_v47  ;;  %v262_v12 = vld [vmem:[%s5049_s26 + $0x98] sm:$0xff] }
  0x16   : > { %v347_v23 = vmax.f32 %v315_v17, 0.0  ;;  %208 = vst [vmem:[#allocation2 + $0x48] sm:$0x1] %v4995_v1  ;;  %v348_v24 = vmax.f32 %v316_v19, 0.0  ;;  %v442_v25 = vpack.c.bf16 %v410_v20, %v410_v20  ;;  %v289_v55 = vmul.f32 %v5055_v4, %v254_v50  ;;  %v265_v17 = vld [vmem:[%s5049_s26 + $0xb0] sm:$0xff] }
  0x17   : > { %209 = vst [vmem:[#allocation2 + $0x60] sm:$0x1] %v4995_v1  ;;  %v320_v56 = vadd.f32 %v5067_v13, %v285_v49  ;;  %v321_v57 = vadd.f32 %v5067_v13, %v286_v51  ;;  %v322_v59 = vadd.f32 %v5067_v13, %v287_v52  ;;  %v323_v60 = vadd.f32 %v5067_v13, %v288_v53  ;;  %v269_v45 = vld [vmem:[%s5049_s26 + $0xd0] sm:$0xff] }
  0x18   : > { %378 = vst [vmem:[#allocation2 + $0x19] sm:$0xff] %v345_v21  ;;  %1613 = vmatpush.bf16.msra.mxu0 %v4764_v18  ;;  %4960 = vmatpush.bf16.msra.mxu1 %v4764_v18  ;;  %v5092_v29 = vld [vmem:[#allocation3 + $0x8] sm:$0xf0]  ;;  %v351_v61 = vmax.f32 %v319_v54, 0.0  ;;  %v324_v62 = vadd.f32 %v5067_v13, %v289_v55  ;;  %v292_v2 = vmul.f32 %v5055_v4, %v257_v58 }
  0x19   : > { %379 = vst [vmem:[#allocation2 + $0x21] sm:$0xff] %v346_v22  ;;  %4961 = vmatpush.bf16.msra.mxu2 %v4764_v18  ;;  %4962 = vmatpush.bf16.msra.mxu3 %v4764_v18  ;;  %v352_v63 = vmax.f32 %v320_v56, 0.0  ;;  %v353_v3 = vmax.f32 %v321_v57, 0.0  ;;  %v354_v6 = vmax.f32 %v322_v59, 0.0  ;;  %v355_v8 = vmax.f32 %v323_v60, 0.0  ;;  %v270_v55 = vld [vmem:[%s5049_s26 + $0xd8] sm:$0xff] }
  0x1a   : > { %380 = vst [vmem:[#allocation2 + $0x31] sm:$0xff] %v347_v23  ;;  %v293_v10 = vmul.f32 %v5055_v4, %v258_v0  ;;  %v356_v11 = vmax.f32 %v324_v62, 0.0  ;;  %v294_v14 = vmul.f32 %v5055_v4, %v259_v5  ;;  %v327_v15 = vadd.f32 %v5067_v13, %v292_v2  ;;  %v4695_v5 = vld [vmem:[%s6189_s3 + $0x38] sm:$0xff] }
  0x1b   : > { %381 = vst [vmem:[#allocation2 + $0x39] sm:$0xff] %v348_v24  ;;  %v295_v16 = vmul.f32 %v5055_v4, %v260_v7  ;;  %v296_v18 = vmul.f32 %v5055_v4, %v261_v9  ;;  %v297_v19 = vmul.f32 %v5055_v4, %v262_v12  ;;  %v300_v23 = vmul.f32 %v5055_v4, %v265_v17  ;;  %v4775_v9 = vld [vmem:[%s6189_s3 + $0x138] sm:$0xff]  ;;  %v4782_v12 = vld [vmem:[%s6189_s3 + $0x170] sm:$0xff] }
  0x1c   : > { %474 = vst [vmem:[#allocation3] sm:$0xf] %v442_v25  ;;  %1614 = vmatpush.bf16.msra.mxu0 %v4763_v26  ;;  %4963 = vmatpush.bf16.msra.mxu1 %v4763_v26  ;;  %v328_v20 = vadd.f32 %v5067_v13, %v293_v10  ;;  %v329_v21 = vadd.f32 %v5067_v13, %v294_v14  ;;  %v359_v22 = vmax.f32 %v327_v15, 0.0  ;;  %v266_v25 = vld [vmem:[%s5049_s26 + $0xb8] sm:$0xff]  ;;  %v4694_v14 = vld [vmem:[%s6189_s3 + $0x30] sm:$0xff] }
  0x1d   : > { %210 = vst [vmem:[#allocation2 + $0x78] sm:$0x1] %v4995_v1  ;;  %4964 = vmatpush.bf16.msra.mxu2 %v4763_v26  ;;  %4965 = vmatpush.bf16.msra.mxu3 %v4763_v26  ;;  %v330_v24 = vadd.f32 %v5067_v13, %v295_v16  ;;  %v335_v43 = vadd.f32 %v5067_v13, %v300_v23  ;;  %v4703_v15 = vld [vmem:[%s6189_s3 + $0x78] sm:$0xff] }
  0x1e   : > { %211 = vst [vmem:[#allocation2 + $0x90] sm:$0x1] %v4995_v1  ;;  %v304_v51 = vmul.f32 %v5055_v4, %v269_v45  ;;  %v305_v62 = vmul.f32 %v5055_v4, %v270_v55 }
  0x1f   : > { %v810_v28 = vld [vmem:[#allocation2 + $0x18] sm:$0xff]  ;;  %212 = vst [vmem:[#allocation2 + $0xa8] sm:$0x1] %v4995_v1  ;;  %v362_v44 = vmax.f32 %v330_v24, 0.0  ;;  %v367_v53 = vmax.f32 %v335_v43, 0.0  ;;  %v255_v43 = vld [vmem:[%s5049_s26 + $0x60] sm:$0xff] }
  0x20   : > { %v811_v30 = vld [vmem:[#allocation2 + $0x20] sm:$0xff]  ;;  %v5094_v31 = vpack.c.bf16 %v810_v28, %v810_v28  ;;  %213 = vst [vmem:[#allocation2 + $0xc0] sm:$0x1] %v4995_v1  ;;  %1615 = vmatpush.bf16.msra.mxu0 %v4762_v27  ;;  %4966 = vmatpush.bf16.msra.mxu1 %v4762_v27  ;;  %v340_v17 = vadd.f32 %v5067_v13, %v305_v62 }
  0x21   : > { %v5100_v33 = vpack.c.bf16 %v811_v30, %v811_v30  ;;  %214 = vst [vmem:[#allocation2 + $0xd8] sm:$0x1] %v4995_v1  ;;  %4967 = vmatpush.bf16.msra.mxu2 %v4762_v27  ;;  %4968 = vmatpush.bf16.msra.mxu3 %v4762_v27  ;;  %v2545_v37 = vld [vmem:[#allocation2 + $0x30] sm:$0xff]  ;;  %v331_v27 = vadd.f32 %v5067_v13, %v296_v18 }
  0x22   : > { %215 = vst [vmem:[#allocation2 + $0xf0] sm:$0x1] %v4995_v1  ;;  %v2546_v36 = vld [vmem:[#allocation2 + $0x38] sm:$0xff]  ;;  %v5118_v40 = vpack.c.bf16 %v2545_v37, %v2545_v37 }
  0x23   : > { %v5104_v34 = vld [vmem:[#allocation3] sm:$0xf]  ;;  %875 = vst [vmem:[#allocation3 + $0xc] sm:$0xf] %v5100_v33  ;;  %v5115_v38 = vpack.c.bf16 %v2546_v36, %v2546_v36  ;;  %v267_v36 = vld [vmem:[%s5049_s26 + $0xc0] sm:$0xff]  ;;  %v363_v46 = vmax.f32 %v331_v27, 0.0 }
  0x24   : > { %874 = vst [vmem:[#allocation3] sm:$0xf] %v5094_v31  ;;  %1616 = vmatpush.bf16.msra.mxu0 %v4761_v32  ;;  %4969 = vmatpush.bf16.msra.mxu1 %v4761_v32  ;;  %v302_v47 = vmul.f32 %v5055_v4, %v267_v36 }
  0x25   : > { %216 = vst [vmem:[#allocation2 + $0x108] sm:$0x1] %v4995_v1  ;;  %4970 = vmatpush.bf16.msra.mxu2 %v4761_v32  ;;  %4971 = vmatpush.bf16.msra.mxu3 %v4761_v32  ;;  %v332_v32 = vadd.f32 %v5067_v13, %v297_v19  ;;  %v247_v19 = vld [vmem:[%s5049_s26 + $0x20] sm:$0xff] }
  0x26   : > { %217 = vst [vmem:[#allocation2 + $0x120] sm:$0x1] %v4995_v1  ;;  %v337_v57 = vadd.f32 %v5067_v13, %v302_v47 }
  0x27   : > { %218 = vst [vmem:[#allocation2 + $0x138] sm:$0x1] %v4995_v1  ;;  %v364_v49 = vmax.f32 %v332_v32, 0.0 }
  0x28   : > { %219 = vst [vmem:[#allocation2 + $0x150] sm:$0x1] %v4995_v1  ;;  %1617 = vmatpush.bf16.msra.mxu0 %v4760_v35  ;;  %4972 = vmatpush.bf16.msra.mxu1 %v4760_v35 }
  0x29   : > { %220 = vst [vmem:[#allocation2 + $0x168] sm:$0x1] %v4995_v1  ;;  %4973 = vmatpush.bf16.msra.mxu2 %v4760_v35  ;;  %4974 = vmatpush.bf16.msra.mxu3 %v4760_v35  ;;  %v360_v35 = vmax.f32 %v328_v20, 0.0  ;;  %v248_v20 = vld [vmem:[%s5049_s26 + $0x28] sm:$0xff] }
  0x2a   : > { %v4713_v39 = vld [vmem:[#allocation3 + $0x8] sm:$0xf0]  ;;  %221 = vst [vmem:[#allocation2 + $0x180] sm:$0x1] %v4995_v1  ;;  %v283_v23 = vmul.f32 %v5055_v4, %v248_v20 }
  0x2b   : > { %v3774_v41 = vld [vmem:[#allocation3] sm:$0xf]  ;;  %2610 = vst [vmem:[#allocation3 + $0xc] sm:$0xf] %v5115_v38 }
  0x2c   : > { %v3775_v42 = vor.u32 %v4713_v39, %v3774_v41  ;;  %2609 = vst [vmem:[#allocation3] sm:$0xf] %v5118_v40  ;;  %v361_v39 = vmax.f32 %v329_v21, 0.0  ;;  %v268_v41 = vld [vmem:[%s5049_s26 + $0xc8] sm:$0xff]  ;;  %1699 = vmatpush.bf16.msrb.mxu1 %v4775_v9  ;;  %2366 = vmatpush.bf16.msrb.mxu0 %v4703_v15 }
  0x2d   : > { %224 = vst [vmem:[#allocation2 + $0x29] sm:$0x1] %v4995_v1  ;;  %v303_v50 = vmul.f32 %v5055_v4, %v268_v41  ;;  %2277 = vmatpush.bf16.msrb.mxu3 %v4695_v5 }
  0x2e   : > { %1618 = vmatmul.bf16.vlgmr.msra.gmra.mxu0 %v3775_v42  ;;  %225 = vst [vmem:[#allocation2 + $0x41] sm:$0x1] %v4995_v1  ;;  %v301_v42 = vmul.f32 %v5055_v4, %v266_v25 }
  0x2f   : > { %226 = vst [vmem:[#allocation2 + $0x59] sm:$0x1] %v4995_v1  ;;  %v338_v59 = vadd.f32 %v5067_v13, %v303_v50 }
  0x30   : > { %227 = vst [vmem:[#allocation2 + $0x71] sm:$0x1] %v4995_v1  ;;  %v336_v52 = vadd.f32 %v5067_v13, %v301_v42  ;;  %v318_v42 = vadd.f32 %v5067_v13, %v283_v23 }
  0x31   : > { %228 = vst [vmem:[#allocation2 + $0x89] sm:$0x1] %v4995_v1  ;;  %2278 = vmatpush.bf16.msrb.mxu3 %v4694_v14 }
  0x32   : > { %229 = vst [vmem:[#allocation2 + $0xa1] sm:$0x1] %v4995_v1  ;;  %v368_v0 = vmax.f32 %v336_v52, 0.0  ;;  %v350_v52 = vmax.f32 %v318_v42, 0.0 }
  0x33   : > { %230 = vst [vmem:[#allocation2 + $0xb9] sm:$0x1] %v4995_v1 }
  0x34   : > { %231 = vst [vmem:[#allocation2 + $0xd1] sm:$0x1] %v4995_v1 }
  0x35   : > { %232 = vst [vmem:[#allocation2 + $0xe9] sm:$0x1] %v4995_v1 }
  0x36   : > { %233 = vst [vmem:[#allocation2 + $0x101] sm:$0x1] %v4995_v1 }
  0x37   : > { %234 = vst [vmem:[#allocation2 + $0x119] sm:$0x1] %v4995_v1 }
  0x38   : > { %235 = vst [vmem:[#allocation2 + $0x131] sm:$0x1] %v4995_v1 }
  0x39   : > { %236 = vst [vmem:[#allocation2 + $0x149] sm:$0x1] %v4995_v1 }
  0x3a   : > { %237 = vst [vmem:[#allocation2 + $0x161] sm:$0x1] %v4995_v1 }
  0x3b   : > { %238 = vst [vmem:[#allocation2 + $0x179] sm:$0x1] %v4995_v1 }
  0x3c   : > { %239 = vst [vmem:[#allocation2 + $0x191] sm:$0x1] %v4995_v1 }
  0x3d   : > { %384 = vst [vmem:[#allocation2 + $0x61] sm:$0xff] %v351_v61 }
  0x3e   : > { %385 = vst [vmem:[#allocation2 + $0x69] sm:$0xff] %v352_v63  ;;  %v339_v63 = vadd.f32 %v5067_v13, %v304_v51  ;;  %v290_v51 = vmul.f32 %v5055_v4, %v255_v43 }
  0x3f   : > { %386 = vst [vmem:[#allocation2 + $0x79] sm:$0xff] %v353_v3  ;;  %v4783_v3 = vld [vmem:[%s6189_s3 + $0x178] sm:$0xff] }
  0x40   : > { %387 = vst [vmem:[#allocation2 + $0x81] sm:$0xff] %v354_v6  ;;  %1788 = vmatpush.bf16.msrb.mxu2 %v4783_v3  ;;  %v371_v18 = vmax.f32 %v339_v63, 0.0  ;;  %v325_v62 = vadd.f32 %v5067_v13, %v290_v51  ;;  %v263_v3 = vld [vmem:[%s5049_s26 + $0xa0] sm:$0xff]  ;;  %v4781_v51 = vld [vmem:[%s6189_s3 + $0x168] sm:$0xff] }
  0x41   : > { %388 = vst [vmem:[#allocation2 + $0x91] sm:$0xff] %v355_v8  ;;  %v369_v8 = vmax.f32 %v337_v57, 0.0  ;;  %v298_v14 = vmul.f32 %v5055_v4, %v263_v3 }
  0x42   : > { %389 = vst [vmem:[#allocation2 + $0x99] sm:$0xff] %v356_v11  ;;  %v370_v11 = vmax.f32 %v338_v59, 0.0 }
  0x43   : > { %222 = vst [vmem:[#allocation2 + $0x198] sm:$0x1] %v4995_v1 }
  0x44   : > { %v418_v26 = vld [vmem:[#allocation2 + $0x60] sm:$0xff]  ;;  %223 = vst [vmem:[#allocation2 + $0x11] sm:$0x1] %v4995_v1  ;;  %1789 = vmatpush.bf16.msrb.mxu2 %v4782_v12  ;;  %v357_v12 = vmax.f32 %v325_v62, 0.0  ;;  %v4773_v62 = vld [vmem:[%s6189_s3 + $0x128] sm:$0xff] }
  0x45   : > { %v419_v28 = vld [vmem:[#allocation2 + $0x68] sm:$0xff]  ;;  %v5179_v30 = vpack.c.bf16 %v418_v26, %v418_v26  ;;  %240 = vst [vmem:[#allocation2 + $0x1a9] sm:$0x1] %v4995_v1 }
  0x46   : > { %v5184_v37 = vpack.c.bf16 %v419_v28, %v419_v28  ;;  %392 = vst [vmem:[#allocation2 + $0xc1] sm:$0xff] %v359_v22  ;;  %v818_v1 = vld [vmem:[#allocation2 + $0x78] sm:$0xff]  ;;  %v282_v22 = vmul.f32 %v5055_v4, %v247_v19 }
  0x47   : > { %482 = vst [vmem:[#allocation3 + $0x60] sm:$0xf] %v5179_v30  ;;  %v819_v48 = vld [vmem:[#allocation2 + $0x80] sm:$0xff]  ;;  %v5196_v54 = vpack.c.bf16 %v818_v1, %v818_v1 }
  0x48   : > { %483 = vst [vmem:[#allocation3 + $0x6c] sm:$0xf] %v5184_v37  ;;  %v5199_v56 = vpack.c.bf16 %v819_v48, %v819_v48  ;;  %v2553_v6 = vld [vmem:[#allocation2 + $0x90] sm:$0xff]  ;;  %v317_v36 = vadd.f32 %v5067_v13, %v282_v22  ;;  %v271_v22 = vld [vmem:[%s5049_s26 + $0xe0] sm:$0xff]  ;;  %1790 = vmatpush.bf16.msrb.mxu2 %v4781_v51 }
  0x49   : > { %393 = vst [vmem:[#allocation2 + $0xc9] sm:$0xff] %v360_v35  ;;  %v2554_v21 = vld [vmem:[#allocation2 + $0x98] sm:$0xff]  ;;  %v5240_v25 = vpack.c.bf16 %v2553_v6, %v2553_v6  ;;  %v372_v35 = vmax.f32 %v340_v17, 0.0 }
  0x4a   : > { %394 = vst [vmem:[#allocation2 + $0xd9] sm:$0xff] %v361_v39  ;;  %v5244_v32 = vpack.c.bf16 %v2554_v21, %v2554_v21  ;;  %v349_v50 = vmax.f32 %v317_v36, 0.0  ;;  %v306_v36 = vmul.f32 %v5055_v4, %v271_v22 }
  0x4b   : > { %395 = vst [vmem:[#allocation2 + $0xe1] sm:$0xff] %v362_v44 }
  0x4c   : > { %396 = vst [vmem:[#allocation2 + $0xf1] sm:$0xff] %v363_v46  ;;  %v256_v46 = vld [vmem:[%s5049_s26 + $0x68] sm:$0xff] }
  0x4d   : > { %397 = vst [vmem:[#allocation2 + $0xf9] sm:$0xff] %v364_v49  ;;  %v426_v58 = vld [vmem:[#allocation2 + $0xc0] sm:$0xff] }
  0x4e   : > { %v5203_v60 = vld [vmem:[#allocation3 + $0x60] sm:$0xf]  ;;  %v5205_v61 = vpack.c.bf16 %v426_v58, %v426_v58  ;;  %400 = vst [vmem:[#allocation2 + $0x121] sm:$0xff] %v367_v53  ;;  %v291_v53 = vmul.f32 %v5055_v4, %v256_v46 }
  0x4f   : > { %v5209_v2 = vld [vmem:[#allocation3 + $0x68] sm:$0xf0]  ;;  %882 = vst [vmem:[#allocation3 + $0x60] sm:$0xf] %v5196_v54 }
  0x50   : > { %883 = vst [vmem:[#allocation3 + $0x6c] sm:$0xf] %v5199_v56  ;;  %v427_v7 = vld [vmem:[#allocation2 + $0xc8] sm:$0xff] }
  0x51   : > { %v5222_v10 = vpack.c.bf16 %v427_v7, %v427_v7  ;;  %490 = vst [vmem:[#allocation3 + $0xc0] sm:$0xf] %v5205_v61  ;;  %v826_v16 = vld [vmem:[#allocation2 + $0xd8] sm:$0xff]  ;;  %v264_v7 = vld [vmem:[%s5049_s26 + $0xa8] sm:$0xff] }
  0x52   : > { %401 = vst [vmem:[#allocation2 + $0x129] sm:$0xff] %v368_v0  ;;  %v827_v24 = vld [vmem:[#allocation2 + $0xe0] sm:$0xff]  ;;  %v5242_v26 = vpack.c.bf16 %v826_v16, %v826_v16  ;;  %v326_v0 = vadd.f32 %v5067_v13, %v291_v53  ;;  %v299_v17 = vmul.f32 %v5055_v4, %v264_v7  ;;  %v4701_v7 = vld [vmem:[%s6189_s3 + $0x68] sm:$0xff] }
  0x53   : > { %491 = vst [vmem:[#allocation3 + $0xcc] sm:$0xf] %v5222_v10  ;;  %v5248_v41 = vpack.c.bf16 %v827_v24, %v827_v24  ;;  %v2561_v55 = vld [vmem:[#allocation2 + $0xf0] sm:$0xff]  ;;  %v272_v24 = vld [vmem:[%s5049_s26 + $0xe8] sm:$0xff] }
  0x54   : > { %402 = vst [vmem:[#allocation2 + $0x139] sm:$0xff] %v369_v8  ;;  %v2562_v58 = vld [vmem:[#allocation2 + $0xf8] sm:$0xff]  ;;  %v5269_v63 = vpack.c.bf16 %v2561_v55, %v2561_v55  ;;  %v334_v21 = vadd.f32 %v5067_v13, %v299_v17  ;;  %v307_v46 = vmul.f32 %v5055_v4, %v272_v24  ;;  %v4693_v55 = vld [vmem:[%s6189_s3 + $0x28] sm:$0xff] }
  0x55   : > { %403 = vst [vmem:[#allocation2 + $0x141] sm:$0xff] %v370_v11  ;;  %v434_v27 = vld [vmem:[#allocation2 + $0x120] sm:$0xff]  ;;  %v5277_v8 = vpack.c.bf16 %v2562_v58, %v2562_v58  ;;  %2279 = vmatpush.bf16.msrb.mxu3 %v4693_v55 }
  0x56   : > { %v3822_v28 = vld [vmem:[#allocation3 + $0x60] sm:$0xf]  ;;  %404 = vst [vmem:[#allocation2 + $0x151] sm:$0xff] %v371_v18  ;;  %v5255_v1 = vpack.c.bf16 %v434_v27, %v434_v27 }
  0x57   : > { %v4725_v39 = vld [vmem:[#allocation3 + $0x68] sm:$0xf0]  ;;  %2617 = vst [vmem:[#allocation3 + $0x60] sm:$0xf] %v5240_v25 }
  0x58   : > { %v3823_v44 = vor.u32 %v4725_v39, %v3822_v28  ;;  %2618 = vst [vmem:[#allocation3 + $0x6c] sm:$0xf] %v5244_v32  ;;  %v5253_v45 = vld [vmem:[#allocation3 + $0xc0] sm:$0xf] }
  0x59   : > { %890 = vst [vmem:[#allocation3 + $0xc0] sm:$0xf] %v5242_v26  ;;  %v435_v47 = vld [vmem:[#allocation2 + $0x128] sm:$0xff] }
  0x5a   : > { %1638 = vmatmul.bf16.vlgmr.msra.gmra.mxu1 %v3823_v44  ;;  %v5259_v48 = vld [vmem:[#allocation3 + $0xc8] sm:$0xf0]  ;;  %405 = vst [vmem:[#allocation2 + $0x159] sm:$0xff] %v372_v35  ;;  %v5261_v49 = vpack.c.bf16 %v435_v47, %v435_v47  ;;  %v366_v44 = vmax.f32 %v334_v21, 0.0 }
  0x5b   : > { %891 = vst [vmem:[#allocation3 + $0xcc] sm:$0xf] %v5248_v41  ;;  %v834_v57 = vld [vmem:[#allocation2 + $0x138] sm:$0xff] }
  0x5c   : > { %498 = vst [vmem:[#allocation3 + $0x120] sm:$0xf] %v5255_v1  ;;  %v835_v59 = vld [vmem:[#allocation2 + $0x140] sm:$0xff]  ;;  %v5273_v6 = vpack.c.bf16 %v834_v57, %v834_v57  ;;  %v4702_v57 = vld [vmem:[%s6189_s3 + $0x70] sm:$0xff] }
  0x5d   : > { %499 = vst [vmem:[#allocation3 + $0x12c] sm:$0xf] %v5261_v49  ;;  %v5280_v9 = vpack.c.bf16 %v835_v59, %v835_v59  ;;  %v2569_v19 = vld [vmem:[#allocation2 + $0x150] sm:$0xff]  ;;  %v341_v59 = vadd.f32 %v5067_v13, %v306_v36  ;;  %2367 = vmatpush.bf16.msrb.mxu0 %v4702_v57 }
  0x5e   : > { %382 = vst [vmem:[#allocation2 + $0x49] sm:$0xff] %v349_v50  ;;  %v5302_v28 = vpack.c.bf16 %v2569_v19, %v2569_v19  ;;  %v4774_v50 = vld [vmem:[%s6189_s3 + $0x130] sm:$0xff] }
  0x5f   : > { %383 = vst [vmem:[#allocation2 + $0x51] sm:$0xff] %v350_v52  ;;  %1700 = vmatpush.bf16.msrb.mxu1 %v4774_v50 }
  0x60   : > { %v3870_v5 = vld [vmem:[#allocation3 + $0xc0] sm:$0xf]  ;;  %476 = vst [vmem:[#allocation3 + $0x18] sm:$0xf] %v5094_v31  ;;  %v358_v31 = vmax.f32 %v326_v0, 0.0  ;;  %v4780_v0 = vld [vmem:[%s6189_s3 + $0x160] sm:$0xff] }
  0x61   : > { %2625 = vst [vmem:[#allocation3 + $0xc0] sm:$0xf] %v5269_v63  ;;  %v2570_v23 = vld [vmem:[#allocation2 + $0x158] sm:$0xff]  ;;  %1791 = vmatpush.bf16.msrb.mxu2 %v4780_v0  ;;  %2368 = vmatpush.bf16.msrb.mxu0 %v4701_v7 }
  0x62   : > { %v4737_v11 = vld [vmem:[#allocation3 + $0xc8] sm:$0xf0]  ;;  %477 = vst [vmem:[#allocation3 + $0x24] sm:$0xf] %v5100_v33  ;;  %v333_v33 = vadd.f32 %v5067_v13, %v298_v14  ;;  %v5306_v42 = vpack.c.bf16 %v2570_v23, %v2570_v23  ;;  %v4692_v14 = vld [vmem:[%s6189_s3 + $0x20] sm:$0xff] }
  0x63   : > { %v3871_v15 = vor.u32 %v4737_v11, %v3870_v5  ;;  %2626 = vst [vmem:[#allocation3 + $0xcc] sm:$0xf] %v5277_v8  ;;  %v5285_v16 = vld [vmem:[#allocation3 + $0x120] sm:$0xf]  ;;  %v342_v5 = vadd.f32 %v5067_v13, %v307_v46  ;;  %1701 = vmatpush.bf16.msrb.mxu1 %v4773_v62  ;;  %2280 = vmatpush.bf16.msrb.mxu3 %v4692_v14 }
  0x64   : > { %v5288_v18 = vld [vmem:[#allocation3 + $0x128] sm:$0xf0]  ;;  %898 = vst [vmem:[#allocation3 + $0x120] sm:$0xf] %v5273_v6  ;;  %v365_v35 = vmax.f32 %v333_v33, 0.0  ;;  %v373_v33 = vmax.f32 %v341_v59, 0.0 }
  0x65   : > { %1658 = vmatmul.bf16.vlgmr.msra.gmra.mxu2 %v3871_v15  ;;  %899 = vst [vmem:[#allocation3 + $0x12c] sm:$0xf] %v5280_v9  ;;  %v2547_v43 = vld [vmem:[#allocation2 + $0x48] sm:$0xff]  ;;  %v374_v19 = vmax.f32 %v342_v5, 0.0  ;;  %v274_v59 = vld [vmem:[%s5049_s26 + $0xf8] sm:$0xff] }
  0x66   : > { %390 = vst [vmem:[#allocation2 + $0xa9] sm:$0xff] %v357_v12  ;;  %v2548_v53 = vld [vmem:[#allocation2 + $0x50] sm:$0xff]  ;;  %v5324_v58 = vpack.c.bf16 %v2547_v43, %v2547_v43 }
  0x67   : > { %v5293_v20 = vld [vmem:[#allocation3 + $0x18] sm:$0xf]  ;;  %391 = vst [vmem:[#allocation2 + $0xb1] sm:$0xff] %v358_v31  ;;  %v5337_v11 = vpack.c.bf16 %v2548_v53, %v2548_v53 }
  0x68   : > { %876 = vst [vmem:[#allocation3 + $0x18] sm:$0xf] %v5118_v40 }
  0x69   : > { %v5299_v27 = vld [vmem:[#allocation3 + $0x20] sm:$0xf0]  ;;  %484 = vst [vmem:[#allocation3 + $0x78] sm:$0xf] %v5196_v54 }
  0x6a   : > { %877 = vst [vmem:[#allocation3 + $0x24] sm:$0xf] %v5115_v38 }
  0x6b   : > { %v3918_v39 = vld [vmem:[#allocation3 + $0x120] sm:$0xf]  ;;  %485 = vst [vmem:[#allocation3 + $0x84] sm:$0xf] %v5199_v56 }
  0x6c   : > { %v4749_v47 = vld [vmem:[#allocation3 + $0x128] sm:$0xf0]  ;;  %2633 = vst [vmem:[#allocation3 + $0x120] sm:$0xf] %v5302_v28 }
  0x6d   : > { %v3919_v52 = vor.u32 %v4749_v47, %v3918_v39  ;;  %2634 = vst [vmem:[#allocation3 + $0x12c] sm:$0xf] %v5306_v42  ;;  %v2555_v21 = vld [vmem:[#allocation2 + $0xa8] sm:$0xff] }
  0x6e   : > { %398 = vst [vmem:[#allocation2 + $0x109] sm:$0xff] %v365_v35  ;;  %v2556_v22 = vld [vmem:[#allocation2 + $0xb0] sm:$0xff]  ;;  %v5352_v23 = vpack.c.bf16 %v2555_v21, %v2555_v21  ;;  %v4772_v21 = vld [vmem:[%s6189_s3 + $0x120] sm:$0xff] }
  0x6f   : > { %1678 = vmatmul.bf16.vlgmr.msra.gmra.mxu3 %v3919_v52  ;;  %v3786_v3 = vld [vmem:[#allocation3 + $0x18] sm:$0xf]  ;;  %399 = vst [vmem:[#allocation2 + $0x111] sm:$0xff] %v366_v44  ;;  %v5355_v35 = vpack.c.bf16 %v2556_v22, %v2556_v22  ;;  %v273_v52 = vld [vmem:[%s5049_s26 + $0xf0] sm:$0xff]  ;;  %1702 = vmatpush.bf16.msrb.mxu1 %v4772_v21 }
  0x70   : > { %2611 = vst [vmem:[#allocation3 + $0x18] sm:$0xf] %v5324_v58  ;;  %v5340_v12 = vld [vmem:[#allocation3 + $0x78] sm:$0xf]  ;;  %v308_v62 = vmul.f32 %v5055_v4, %v273_v52 }
  0x71   : > { %v4716_v15 = vld [vmem:[#allocation3 + $0x20] sm:$0xf0]  ;;  %884 = vst [vmem:[#allocation3 + $0x78] sm:$0xf] %v5240_v25 }
  0x72   : > { %v3787_v31 = vor.u32 %v4716_v15, %v3786_v3  ;;  %2612 = vst [vmem:[#allocation3 + $0x24] sm:$0xf] %v5337_v11  ;;  %v5347_v17 = vld [vmem:[#allocation3 + $0x80] sm:$0xf0] }
  0x73   : > { %885 = vst [vmem:[#allocation3 + $0x84] sm:$0xf] %v5244_v32 }
  0x74   : > { %1623 = vmatmul.bf16.gmra.mxu0 %v3787_v31  ;;  %492 = vst [vmem:[#allocation3 + $0xd8] sm:$0xf] %v5242_v26 }
  0x75   : > { %493 = vst [vmem:[#allocation3 + $0xe4] sm:$0xf] %v5248_v41  ;;  %v2563_v46 = vld [vmem:[#allocation2 + $0x108] sm:$0xff] }
  0x76   : > { %406 = vst [vmem:[#allocation2 + $0x169] sm:$0xff] %v373_v33  ;;  %v2564_v50 = vld [vmem:[#allocation2 + $0x110] sm:$0xff]  ;;  %v5375_v53 = vpack.c.bf16 %v2563_v46, %v2563_v46  ;;  %v343_v33 = vadd.f32 %v5067_v13, %v308_v62  ;;  %v4700_v46 = vld [vmem:[%s6189_s3 + $0x60] sm:$0xff] }
  0x77   : > { %407 = vst [vmem:[#allocation2 + $0x171] sm:$0xff] %v374_v19  ;;  %v5378_v57 = vpack.c.bf16 %v2564_v50, %v2564_v50  ;;  %v4771_v50 = vld [vmem:[%s6189_s3 + $0x118] sm:$0xff]  ;;  %2369 = vmatpush.bf16.msrb.mxu0 %v4700_v46  ;;  %v4769_v46 = vld [vmem:[%s6189_s3 + $0x108] sm:$0xff] }
  0x78   : > { %v3834_v24 = vld [vmem:[#allocation3 + $0x78] sm:$0xf]  ;;  %500 = vst [vmem:[#allocation3 + $0x138] sm:$0xf] %v5273_v6  ;;  %v375_v52 = vmax.f32 %v343_v33, 0.0  ;;  %1703 = vmatpush.bf16.msrb.mxu1 %v4771_v50  ;;  %v4776_v50 = vld [vmem:[%s6189_s3 + $0x140] sm:$0xff] }
  0x79   : > { %2619 = vst [vmem:[#allocation3 + $0x78] sm:$0xf] %v5352_v23 }
  0x7a   : > { %v4728_v36 = vld [vmem:[#allocation3 + $0x80] sm:$0xf0]  ;;  %501 = vst [vmem:[#allocation3 + $0x144] sm:$0xf] %v5280_v9 }
  0x7b   : > { %v3835_v39 = vor.u32 %v4728_v36, %v3834_v24  ;;  %2620 = vst [vmem:[#allocation3 + $0x84] sm:$0xf] %v5355_v35  ;;  %v5360_v43 = vld [vmem:[#allocation3 + $0xd8] sm:$0xf] }
  0x7c   : > { %v5362_v44 = vld [vmem:[#allocation3 + $0xe0] sm:$0xf0]  ;;  %892 = vst [vmem:[#allocation3 + $0xd8] sm:$0xf] %v5269_v63 }
  0x7d   : > { %1643 = vmatmul.bf16.gmra.mxu1 %v3835_v39  ;;  %893 = vst [vmem:[#allocation3 + $0xe4] sm:$0xf] %v5277_v8  ;;  %v4691_v39 = vld [vmem:[%s6189_s3 + $0x18] sm:$0xff] }
  0x7e   : > { %478 = vst [vmem:[#allocation3 + $0x30] sm:$0xf] %v5118_v40  ;;  %v2571_v40 = vld [vmem:[#allocation2 + $0x168] sm:$0xff]  ;;  %2281 = vmatpush.bf16.msrb.mxu3 %v4691_v39 }
  0x7f   : > { %v5367_v47 = vld [vmem:[#allocation3 + $0x138] sm:$0xf]  ;;  %479 = vst [vmem:[#allocation3 + $0x3c] sm:$0xf] %v5115_v38  ;;  %v5387_v5 = vpack.c.bf16 %v2571_v40, %v2571_v40 }
  0x80   : > { %900 = vst [vmem:[#allocation3 + $0x138] sm:$0xf] %v5302_v28  ;;  %v4777_v39 = vld [vmem:[%s6189_s3 + $0x148] sm:$0xff] }
  0x81   : > { %v5371_v51 = vld [vmem:[#allocation3 + $0x140] sm:$0xf0]  ;;  %486 = vst [vmem:[#allocation3 + $0x90] sm:$0xf] %v5240_v25 }
  0x82   : > { %901 = vst [vmem:[#allocation3 + $0x144] sm:$0xf] %v5306_v42  ;;  %v2572_v25 = vld [vmem:[#allocation2 + $0x170] sm:$0xff] }
  0x83   : > { %v3882_v55 = vld [vmem:[#allocation3 + $0xd8] sm:$0xf]  ;;  %487 = vst [vmem:[#allocation3 + $0x9c] sm:$0xf] %v5244_v32  ;;  %v309_v32 = vmul.f32 %v5055_v4, %v274_v59  ;;  %v5394_v15 = vpack.c.bf16 %v2572_v25, %v2572_v25  ;;  %v4779_v4 = vld [vmem:[%s6189_s3 + $0x158] sm:$0xff]  ;;  %v4690_v59 = vld [vmem:[%s6189_s3 + $0x10] sm:$0xff] }
  0x84   : > { %v4740_v38 = vld [vmem:[#allocation3 + $0xe0] sm:$0xf0]  ;;  %2627 = vst [vmem:[#allocation3 + $0xd8] sm:$0xf] %v5375_v53  ;;  %1792 = vmatpush.bf16.msrb.mxu2 %v4779_v4  ;;  %2282 = vmatpush.bf16.msrb.mxu3 %v4690_v59 }
  0x85   : > { %v3883_v0 = vor.u32 %v4740_v38, %v3882_v55  ;;  %2628 = vst [vmem:[#allocation3 + $0xe4] sm:$0xf] %v5378_v57  ;;  %v5385_v3 = vld [vmem:[#allocation3 + $0x30] sm:$0xf]  ;;  %v344_v36 = vadd.f32 %v5067_v13, %v309_v32  ;;  %v4778_v13 = vld [vmem:[%s6189_s3 + $0x150] sm:$0xff]  ;;  %v4699_v55 = vld [vmem:[%s6189_s3 + $0x58] sm:$0xff] }
  0x86   : > { %v5389_v7 = vld [vmem:[#allocation3 + $0x38] sm:$0xf0]  ;;  %878 = vst [vmem:[#allocation3 + $0x30] sm:$0xf] %v5324_v58  ;;  %2370 = vmatpush.bf16.msrb.mxu0 %v4699_v55 }
  0x87   : > { %1663 = vmatmul.bf16.gmra.mxu2 %v3883_v0  ;;  %v3930_v14 = vld [vmem:[#allocation3 + $0x138] sm:$0xf]  ;;  %879 = vst [vmem:[#allocation3 + $0x3c] sm:$0xf] %v5337_v11  ;;  %v376_v62 = vmax.f32 %v344_v36, 0.0 }
  0x88   : > { %2635 = vst [vmem:[#allocation3 + $0x138] sm:$0xf] %v5387_v5  ;;  %v5397_v31 = vld [vmem:[#allocation3 + $0x90] sm:$0xf]  ;;  %1793 = vmatpush.bf16.msrb.mxu2 %v4778_v13 }
  0x89   : > { %v4752_v19 = vld [vmem:[#allocation3 + $0x140] sm:$0xf0]  ;;  %886 = vst [vmem:[#allocation3 + $0x90] sm:$0xf] %v5352_v23 }
  0x8a   : > { %v3931_v22 = vor.u32 %v4752_v19, %v3930_v14  ;;  %2636 = vst [vmem:[#allocation3 + $0x144] sm:$0xf] %v5394_v15  ;;  %v5408_v24 = vld [vmem:[#allocation3 + $0x98] sm:$0xf0] }
  0x8b   : > { %887 = vst [vmem:[#allocation3 + $0x9c] sm:$0xf] %v5355_v35 }
  0x8c   : > { %1683 = vmatmul.bf16.gmra.mxu3 %v3931_v22  ;;  %494 = vst [vmem:[#allocation3 + $0xf0] sm:$0xf] %v5269_v63  ;;  %v4770_v22 = vld [vmem:[%s6189_s3 + $0x110] sm:$0xff]  ;;  %1794 = vmatpush.bf16.msrb.mxu2 %v4777_v39  ;;  %v906_v39 = vld [vmem:[#allocation2 + $0x19] sm:$0xff] }
  0x8d   : > { %v3798_v40 = vld [vmem:[#allocation3 + $0x30] sm:$0xf]  ;;  %495 = vst [vmem:[#allocation3 + $0xfc] sm:$0xf] %v5277_v8  ;;  %1704 = vmatpush.bf16.msrb.mxu1 %v4770_v22 }
  0x8e   : > { %v4719_v38 = vld [vmem:[#allocation3 + $0x38] sm:$0xf0]  ;;  %2613 = vst [vmem:[#allocation3 + $0x30] sm:$0xf] %v5179_v30 }
  0x8f   : > { %v3799_v0 = vor.u32 %v4719_v38, %v3798_v40  ;;  %2614 = vst [vmem:[#allocation3 + $0x3c] sm:$0xf] %v5184_v37  ;;  %v4768_v38 = vld [vmem:[%s6189_s3 + $0x100] sm:$0xff] }
  0x90   : > { %v3846_v63 = vld [vmem:[#allocation3 + $0x90] sm:$0xf]  ;;  %408 = vst [vmem:[#allocation2 + $0x181] sm:$0xff] %v375_v52  ;;  %1795 = vmatpush.bf16.msrb.mxu2 %v4776_v50 }
  0x91   : > { %1628 = vmatmul.bf16.gmra.mxu0 %v3799_v0  ;;  %2621 = vst [vmem:[#allocation3 + $0x90] sm:$0xf] %v5205_v61  ;;  %1705 = vmatpush.bf16.msrb.mxu1 %v4769_v46  ;;  %v1002_v46 = vld [vmem:[#allocation2 + $0x1a] sm:$0xff] }
  0x92   : > { %v4731_v8 = vld [vmem:[#allocation3 + $0x98] sm:$0xf0]  ;;  %409 = vst [vmem:[#allocation2 + $0x189] sm:$0xff] %v376_v62 }
  0x93   : > { %v3847_v25 = vor.u32 %v4731_v8, %v3846_v63  ;;  %2622 = vst [vmem:[#allocation3 + $0x9c] sm:$0xf] %v5222_v10  ;;  %v5436_v32 = vld [vmem:[#allocation3 + $0xf0] sm:$0xf] }
  0x94   : > { %v5438_v14 = vld [vmem:[#allocation3 + $0xf8] sm:$0xf0]  ;;  %894 = vst [vmem:[#allocation3 + $0xf0] sm:$0xf] %v5375_v53  ;;  %v4696_v63 = vld [vmem:[%s6189_s3 + $0x40] sm:$0xff] }
  0x95   : > { %1648 = vmatmul.bf16.gmra.mxu1 %v3847_v25  ;;  %895 = vst [vmem:[#allocation3 + $0xfc] sm:$0xf] %v5378_v57  ;;  %v506_v8 = vld [vmem:[#allocation2 + $0x1] sm:$0xff] }
  0x96   : > { %502 = vst [vmem:[#allocation3 + $0x150] sm:$0xf] %v5302_v28  ;;  %1706 = vmatpush.bf16.msrb.mxu1 %v4768_v38  ;;  %v1034_v38 = vpack.c.bf16 %v1002_v46, %v1002_v46 }
  0x97   : > { %503 = vst [vmem:[#allocation3 + $0x15c] sm:$0xf] %v5306_v42 }
  0x98   : > { %480 = vst [vmem:[#allocation3 + $0x48] sm:$0xf] %v5324_v58  ;;  %v2573_v58 = vld [vmem:[#allocation2 + $0x180] sm:$0xff] }
  0x99   : > { %481 = vst [vmem:[#allocation3 + $0x54] sm:$0xf] %v5337_v11 }
  0x9a   : > { %488 = vst [vmem:[#allocation3 + $0xa8] sm:$0xf] %v5352_v23  ;;  %v2574_v23 = vld [vmem:[#allocation2 + $0x188] sm:$0xff] }
  0x9b   : > { %v3894_v33 = vld [vmem:[#allocation3 + $0xf0] sm:$0xf]  ;;  %489 = vst [vmem:[#allocation3 + $0xb4] sm:$0xf] %v5355_v35  ;;  %v5492_v52 = vpack.c.bf16 %v2574_v23, %v2574_v23  ;;  %v603_v23 = vld [vmem:[#allocation2 + $0xa] sm:$0xff] }
  0x9c   : > { %v4743_v19 = vld [vmem:[#allocation3 + $0xf8] sm:$0xf0]  ;;  %2629 = vst [vmem:[#allocation3 + $0xf0] sm:$0xf] %v5255_v1 }
  0x9d   : > { %v3895_v21 = vor.u32 %v4743_v19, %v3894_v33  ;;  %2630 = vst [vmem:[#allocation3 + $0xfc] sm:$0xf] %v5261_v49  ;;  %v5450_v4 = vld [vmem:[#allocation3 + $0x150] sm:$0xf]  ;;  %v507_v33 = vld [vmem:[#allocation2 + $0x9] sm:$0xff] }
  0x9e   : > { %v5452_v28 = vld [vmem:[#allocation3 + $0x158] sm:$0xf0]  ;;  %902 = vst [vmem:[#allocation3 + $0x150] sm:$0xf] %v5387_v5 }
  0x9f   : > { %1668 = vmatmul.bf16.gmra.mxu2 %v3895_v21  ;;  %903 = vst [vmem:[#allocation3 + $0x15c] sm:$0xf] %v5394_v15  ;;  %v5456_v42 = vld [vmem:[#allocation3 + $0x48] sm:$0xf]  ;;  %v602_v21 = vld [vmem:[#allocation2 + $0x2] sm:$0xff] }
  0xa0   : > { %v5458_v11 = vld [vmem:[#allocation3 + $0x50] sm:$0xf0]  ;;  %880 = vst [vmem:[#allocation3 + $0x48] sm:$0xf] %v5179_v30  ;;  %v4689_v30 = vld [vmem:[%s6189_s3 + $0x8] sm:$0xff]  ;;  %v634_v22 = vpack.c.bf16 %v602_v21, %v602_v21  ;;  %v2642_v21 = vld [vmem:[#allocation2 + $0x39] sm:$0xff] }
  0xa1   : > { %881 = vst [vmem:[#allocation3 + $0x54] sm:$0xf] %v5184_v37  ;;  %v5462_v35 = vld [vmem:[#allocation3 + $0xa8] sm:$0xf]  ;;  %v4698_v37 = vld [vmem:[%s6189_s3 + $0x50] sm:$0xff]  ;;  %2283 = vmatpush.bf16.msrb.mxu3 %v4689_v30 }
  0xa2   : > { %v5467_v36 = vld [vmem:[#allocation3 + $0xb0] sm:$0xf0]  ;;  %888 = vst [vmem:[#allocation3 + $0xa8] sm:$0xf] %v5205_v61  ;;  %v5483_v61 = vpack.c.bf16 %v2573_v58, %v2573_v58  ;;  %2371 = vmatpush.bf16.msrb.mxu0 %v4698_v37  ;;  %v538_v58 = vpack.c.bf16 %v506_v8, %v506_v8  ;;  %v4847_v30 = vld [vmem:[%s6189_s3 + $0x1f8] sm:$0xff] }
  0xa3   : > { %889 = vst [vmem:[#allocation3 + $0xb4] sm:$0xf] %v5222_v10  ;;  %v4688_v10 = vld [vmem:[%s6189_s3] sm:$0xff] }
  0xa4   : > { %496 = vst [vmem:[#allocation3 + $0x108] sm:$0xf] %v5375_v53  ;;  %v4697_v53 = vld [vmem:[%s6189_s3 + $0x48] sm:$0xff] }
  0xa5   : > { %v3942_v13 = vld [vmem:[#allocation3 + $0x150] sm:$0xf]  ;;  %497 = vst [vmem:[#allocation3 + $0x114] sm:$0xf] %v5378_v57  ;;  %2284 = vmatpush.bf16.msrb.mxu3 %v4688_v10  ;;  %v938_v10 = vpack.c.bf16 %v906_v39, %v906_v39 }
  0xa6   : > { %v4755_v55 = vld [vmem:[#allocation3 + $0x158] sm:$0xf0]  ;;  %2637 = vst [vmem:[#allocation3 + $0x150] sm:$0xf] %v5483_v61  ;;  %2372 = vmatpush.bf16.msrb.mxu0 %v4697_v53 }
  0xa7   : > { %v3943_v40 = vor.u32 %v4755_v55, %v3942_v13  ;;  %2638 = vst [vmem:[#allocation3 + $0x15c] sm:$0xf] %v5492_v52  ;;  %v3810_v59 = vld [vmem:[#allocation3 + $0x48] sm:$0xf]  ;;  %v1003_v13 = vld [vmem:[#allocation2 + $0x22] sm:$0xff] }
  0xa8   : > { %v4722_v62 = vld [vmem:[#allocation3 + $0x50] sm:$0xf0]  ;;  %2615 = vst [vmem:[#allocation3 + $0x48] sm:$0xf] %v5196_v54 }
  0xa9   : > { %1688 = vmatmul.bf16.gmra.mxu3 %v3943_v40  ;;  %v3811_v57 = vor.u32 %v4722_v62, %v3810_v59  ;;  %2616 = vst [vmem:[#allocation3 + $0x54] sm:$0xf] %v5199_v56  ;;  %v3858_v0 = vld [vmem:[#allocation3 + $0xa8] sm:$0xf] }
  0xaa   : > { %v4734_v25 = vld [vmem:[#allocation3 + $0xb0] sm:$0xf0]  ;;  %2623 = vst [vmem:[#allocation3 + $0xa8] sm:$0xf] %v5242_v26  ;;  %2373 = vmatpush.bf16.msrb.mxu0 %v4696_v63  ;;  %v539_v26 = vpack.c.bf16 %v507_v33, %v507_v33  ;;  %3434 = vmatpush.bf16.msra.mxu3 %v4847_v30  ;;  %v2575_v62 = vld [vmem:[#allocation2 + $0x198] sm:$0xff]  ;;  %v4986_v33 = vld [vmem:[#allocation2 + $0x8] sm:$0xff] }
  0xab   : > { %1633 = vmatmul.bf16.gmra.mxu0 %v3811_v57  ;;  %v3859_v19 = vor.u32 %v4734_v25, %v3858_v0  ;;  %2624 = vst [vmem:[#allocation3 + $0xb4] sm:$0xf] %v5248_v41  ;;  %v5510_v54 = vld [vmem:[#allocation3 + $0x108] sm:$0xf]  ;;  %v635_v41 = vpack.c.bf16 %v603_v23, %v603_v23  ;;  %v1035_v57 = vpack.c.bf16 %v1003_v13, %v1003_v13 }
  0xac   : > { %v5512_v56 = vld [vmem:[#allocation3 + $0x110] sm:$0xf0]  ;;  %896 = vst [vmem:[#allocation3 + $0x108] sm:$0xf] %v5255_v1  ;;  %v4839_v1 = vld [vmem:[%s6189_s3 + $0x1b8] sm:$0xff]  ;;  %v2607_v8 = vpack.c.bf16 %v2575_v62, %v2575_v62 }
  0xad   : > { %1653 = vmatmul.bf16.gmra.mxu1 %v3859_v19  ;;  %897 = vst [vmem:[#allocation3 + $0x114] sm:$0xf] %v5261_v49  ;;  %v4711_v49 = vld [vmem:[%s6189_s3 + $0xb8] sm:$0xff]  ;;  %3345 = vmatpush.bf16.msra.mxu2 %v4839_v1  ;;  %v2608_v19 = vpack.c.bf16 %v4986_v33, %v4986_v33  ;;  %v2674_v1 = vpack.c.bf16 %v2642_v21, %v2642_v21 }
  0xae   : > { %504 = vst [vmem:[#allocation3 + $0x168] sm:$0xf] %v5387_v5  ;;  %v907_v5 = vld [vmem:[#allocation2 + $0x21] sm:$0xff]  ;;  %2455 = vmatpush.bf16.msra.mxu1 %v4711_v49  ;;  %v2644_v62 = vld [vmem:[#allocation2 + $0x51] sm:$0xff] }
  0xaf   : > { %505 = vst [vmem:[#allocation3 + $0x174] sm:$0xf] %v5394_v15  ;;  %v4855_v15 = vld [vmem:[%s6189_s3 + $0x238] sm:$0xff]  ;;  %v939_v40 = vpack.c.bf16 %v907_v5, %v907_v5 }
  0xb0   : > { %570 = vst [vmem:[#allocation3 + $0x4] sm:$0xf] %v538_v58  ;;  %3523 = vmatpush.bf16.msra.mxu0 %v4855_v15  ;;  %v2737_v58 = vld [vmem:[#allocation2 + $0x32] sm:$0xff] }
  0xb1   : > { %571 = vst [vmem:[#allocation3 + $0x10] sm:$0xf] %v539_v26  ;;  %v2769_v49 = vpack.c.bf16 %v2737_v58, %v2737_v58 }
  0xb2   : > { %666 = vst [vmem:[#allocation3 + $0x8] sm:$0xf] %v634_v22  ;;  %v2738_v22 = vld [vmem:[#allocation2 + $0x3a] sm:$0xff] }
  0xb3   : > { %v3906_v37 = vld [vmem:[#allocation3 + $0x108] sm:$0xf]  ;;  %667 = vst [vmem:[#allocation3 + $0x14] sm:$0xf] %v635_v41 }
  0xb4   : > { %v4746_v50 = vld [vmem:[#allocation3 + $0x110] sm:$0xf0]  ;;  %2631 = vst [vmem:[#allocation3 + $0x108] sm:$0xf] %v5273_v6 }
  0xb5   : > { %v3907_v53 = vor.u32 %v4746_v50, %v3906_v37  ;;  %2632 = vst [vmem:[#allocation3 + $0x114] sm:$0xf] %v5280_v9  ;;  %v5532_v55 = vld [vmem:[#allocation3 + $0x168] sm:$0xf]  ;;  %v2770_v37 = vpack.c.bf16 %v2738_v22, %v2738_v22 }
  0xb6   : > { %v5534_v59 = vld [vmem:[#allocation3 + $0x170] sm:$0xf0]  ;;  %904 = vst [vmem:[#allocation3 + $0x168] sm:$0xf] %v5483_v61  ;;  %v2641_v61 = vld [vmem:[#allocation2 + $0x31] sm:$0xff] }
  0xb7   : > { %1673 = vmatmul.bf16.gmra.mxu2 %v3907_v53  ;;  %905 = vst [vmem:[#allocation3 + $0x174] sm:$0xf] %v5492_v52  ;;  %v4640_v6 = vld [vmem:[#allocation3 + $0x4] sm:$0xf]  ;;  %v2673_v26 = vpack.c.bf16 %v2641_v61, %v2641_v61  ;;  %v2643_v53 = vld [vmem:[#allocation2 + $0x49] sm:$0xff] }
  0xb8   : > { %v4064_v0 = vld [vmem:[#allocation3 + $0xc] sm:$0xf0]  ;;  %970 = vst [vmem:[#allocation3 + $0x4] sm:$0xf] %v938_v10 }
  0xb9   : > { %971 = vst [vmem:[#allocation3 + $0x10] sm:$0xf] %v939_v40  ;;  %v5538_v63 = vld [vmem:[#allocation3 + $0x8] sm:$0xf]  ;;  %v4067_v9 = vor.u32 %v4640_v6, %v4064_v0  ;;  %v2675_v6 = vpack.c.bf16 %v2643_v53, %v2643_v53 }
  0xba   : > { %v5540_v25 = vld [vmem:[#allocation3 + $0x10] sm:$0xf0]  ;;  %1066 = vst [vmem:[#allocation3 + $0x8] sm:$0xf] %v1034_v38 }
  0xbb   : > { %1067 = vst [vmem:[#allocation3 + $0x14] sm:$0xf] %v1035_v57  ;;  %2374 = vmatmul.bf16.vlgmr.msrb.gmra.mxu0 %v4067_v9  ;;  %v2676_v9 = vpack.c.bf16 %v2644_v62, %v2644_v62 }
  0xbc   : > { %572 = vst [vmem:[#allocation3 + $0x1c] sm:$0xf] %v938_v10 }
  0xbd   : > { %v3954_v52 = vld [vmem:[#allocation3 + $0x168] sm:$0xf]  ;;  %573 = vst [vmem:[#allocation3 + $0x28] sm:$0xf] %v939_v40 }
  0xbe   : > { %v4758_v23 = vld [vmem:[#allocation3 + $0x170] sm:$0xf0]  ;;  %2639 = vst [vmem:[#allocation3 + $0x168] sm:$0xf] %v2607_v8  ;;  %v2739_v8 = vld [vmem:[#allocation2 + $0x4a] sm:$0xff] }
  0xbf   : > { %v3955_v41 = vor.u32 %v4758_v23, %v3954_v52  ;;  %2640 = vst [vmem:[#allocation3 + $0x174] sm:$0xf] %v2608_v19  ;;  %v4712_v39 = vld [vmem:[#allocation3 + $0x4] sm:$0xf]  ;;  %v2771_v21 = vpack.c.bf16 %v2739_v8, %v2739_v8 }
  0xc0   : > { %v3776_v30 = vld [vmem:[#allocation3 + $0xc] sm:$0xf0]  ;;  %2705 = vst [vmem:[#allocation3 + $0x4] sm:$0xf] %v2673_v26  ;;  %v2740_v19 = vld [vmem:[#allocation2 + $0x52] sm:$0xff] }
  0xc1   : > { %1693 = vmatmul.bf16.gmra.mxu3 %v3955_v41  ;;  %v3779_v5 = vor.u32 %v4712_v39, %v3776_v30  ;;  %2706 = vst [vmem:[#allocation3 + $0x10] sm:$0xf] %v2674_v1  ;;  %v3782_v15 = vld [vmem:[#allocation3 + $0x8] sm:$0xf]  ;;  %v2772_v58 = vpack.c.bf16 %v2740_v19, %v2740_v19  ;;  %v4710_v39 = vld [vmem:[%s6189_s3 + $0xb0] sm:$0xff]  ;;  %v2645_v30 = vld [vmem:[#allocation2 + $0x61] sm:$0xff] }
  0xc2   : > { %v4714_v46 = vld [vmem:[#allocation3 + $0x10] sm:$0xf0]  ;;  %2801 = vst [vmem:[#allocation3 + $0x8] sm:$0xf] %v2769_v49  ;;  %2456 = vmatpush.bf16.msra.mxu1 %v4710_v39 }
  0xc3   : > { %1707 = vmatmul.bf16.vlgmr.msrb.gmra.mxu1 %v3779_v5  ;;  %v3783_v50 = vor.u32 %v4714_v46, %v3782_v15  ;;  %2802 = vst [vmem:[#allocation3 + $0x14] sm:$0xf] %v2770_v37  ;;  %v4643_v10 = vld [vmem:[#allocation3 + $0x1c] sm:$0xf]  ;;  %v2741_v15 = vld [vmem:[#allocation2 + $0x62] sm:$0xff]  ;;  %v2677_v46 = vpack.c.bf16 %v2645_v30, %v2645_v30  ;;  %v2743_v30 = vld [vmem:[#allocation2 + $0x7a] sm:$0xff] }
  0xc4   : > { %v4076_v13 = vld [vmem:[#allocation3 + $0x24] sm:$0xf0]  ;;  %972 = vst [vmem:[#allocation3 + $0x1c] sm:$0xf] %v2673_v26 }
  0xc5   : > { %973 = vst [vmem:[#allocation3 + $0x28] sm:$0xf] %v2674_v1  ;;  %v4079_v40 = vor.u32 %v4643_v10, %v4076_v13 }
  0xc6   : > { %668 = vst [vmem:[#allocation3 + $0x20] sm:$0xf] %v1034_v38  ;;  %v4063_v38 = vor.u32 %v5092_v29, %v5104_v34  ;;  %v4838_v29 = vld [vmem:[%s6189_s3 + $0x1b0] sm:$0xff] }
  0xc7   : > { %1796 = vmatmul.bf16.vlgmr.msrb.gmra.mxu2 %v3783_v50  ;;  %669 = vst [vmem:[#allocation3 + $0x2c] sm:$0xf] %v1035_v57  ;;  %v4846_v34 = vld [vmem:[%s6189_s3 + $0x1f0] sm:$0xff] }
  0xc8   : > { %574 = vst [vmem:[#allocation3 + $0x34] sm:$0xf] %v2673_v26  ;;  %3346 = vmatpush.bf16.msra.mxu2 %v4838_v29  ;;  %3435 = vmatpush.bf16.msra.mxu3 %v4846_v34  ;;  %v2742_v50 = vld [vmem:[#allocation2 + $0x6a] sm:$0xff]  ;;  %v2648_v29 = vld [vmem:[#allocation2 + $0x81] sm:$0xff] }
  0xc9   : > { %575 = vst [vmem:[#allocation3 + $0x40] sm:$0xf] %v2674_v1  ;;  %v4854_v1 = vld [vmem:[%s6189_s3 + $0x230] sm:$0xff] }
  0xca   : > { %670 = vst [vmem:[#allocation3 + $0x38] sm:$0xf] %v2769_v49  ;;  %3524 = vmatpush.bf16.msra.mxu0 %v4854_v1  ;;  %v2680_v1 = vpack.c.bf16 %v2648_v29, %v2648_v29 }
  0xcb   : > { %v4715_v0 = vld [vmem:[#allocation3 + $0x1c] sm:$0xf]  ;;  %2379 = vmatmul.bf16.gmra.mxu0 %v4079_v40  ;;  %671 = vst [vmem:[#allocation3 + $0x44] sm:$0xf] %v2770_v37 }
  0xcc   : > { %v3788_v33 = vld [vmem:[#allocation3 + $0x24] sm:$0xf0]  ;;  %2707 = vst [vmem:[#allocation3 + $0x1c] sm:$0xf] %v2675_v6 }
  0xcd   : > { %2708 = vst [vmem:[#allocation3 + $0x28] sm:$0xf] %v2676_v9  ;;  %v5544_v61 = vld [vmem:[#allocation3 + $0x20] sm:$0xf]  ;;  %v3791_v52 = vor.u32 %v4715_v0, %v3788_v33  ;;  %v2773_v0 = vpack.c.bf16 %v2741_v15, %v2741_v15  ;;  %v4099_v33 = vor.u32 %v5458_v11, %v5456_v42 }
  0xce   : > { %v5546_v57 = vld [vmem:[#allocation3 + $0x28] sm:$0xf0]  ;;  %1068 = vst [vmem:[#allocation3 + $0x20] sm:$0xf] %v2769_v49  ;;  %v2646_v49 = vld [vmem:[#allocation2 + $0x69] sm:$0xff] }
  0xcf   : > { %1069 = vst [vmem:[#allocation3 + $0x2c] sm:$0xf] %v2770_v37  ;;  %v4646_v23 = vld [vmem:[#allocation3 + $0x34] sm:$0xf]  ;;  %v2678_v53 = vpack.c.bf16 %v2646_v49, %v2646_v49 }
  0xd0   : > { %v4088_v26 = vld [vmem:[#allocation3 + $0x3c] sm:$0xf0]  ;;  %974 = vst [vmem:[#allocation3 + $0x34] sm:$0xf] %v2675_v6 }
  0xd1   : > { %2285 = vmatmul.bf16.vlgmr.msrb.gmra.mxu3 %v4063_v38  ;;  %975 = vst [vmem:[#allocation3 + $0x40] sm:$0xf] %v2676_v9  ;;  %v5548_v22 = vld [vmem:[#allocation3 + $0x38] sm:$0xf]  ;;  %v4091_v40 = vor.u32 %v4646_v23, %v4088_v26  ;;  %v2647_v26 = vld [vmem:[#allocation2 + $0x79] sm:$0xff] }
  0xd2   : > { %6191 = vst [vmem:[#allocation4_spill] sm:$0xff] %v5548_v22  ;;  %v5556_v41 = vld [vmem:[#allocation3 + $0x40] sm:$0xf0]  ;;  %v2679_v34 = vpack.c.bf16 %v2647_v26, %v2647_v26 }
  0xd3   : > { %6192 = vst [vmem:[#allocation5_spill] sm:$0xff] %v5556_v41  ;;  %1712 = vmatmul.bf16.gmra.mxu1 %v3791_v52  ;;  %v4075_v52 = vor.u32 %v5299_v27, %v5293_v20  ;;  %v2751_v41 = vld [vmem:[#allocation2 + $0xda] sm:$0xff] }
  0xd4   : > { %1070 = vst [vmem:[#allocation3 + $0x38] sm:$0xf] %v2771_v21 }
  0xd5   : > { %1071 = vst [vmem:[#allocation3 + $0x44] sm:$0xf] %v2772_v58  ;;  %v3794_v5 = vld [vmem:[#allocation3 + $0x20] sm:$0xf] }
  0xd6   : > { %576 = vst [vmem:[#allocation3 + $0x4c] sm:$0xf] %v2675_v6  ;;  %v4717_v37 = vld [vmem:[#allocation3 + $0x28] sm:$0xf0]  ;;  %v2774_v6 = vpack.c.bf16 %v2742_v50, %v2742_v50 }
  0xd7   : > { %577 = vst [vmem:[#allocation3 + $0x58] sm:$0xf] %v2676_v9  ;;  %v3795_v10 = vor.u32 %v4717_v37, %v3794_v5  ;;  %v4718_v13 = vld [vmem:[#allocation3 + $0x34] sm:$0xf]  ;;  %v5584_v29 = vpop.f32.mrf.mxu1 }
  0xd8   : > { %2803 = vst [vmem:[#allocation3 + $0x20] sm:$0xf] %v2771_v21  ;;  %v3800_v62 = vld [vmem:[#allocation3 + $0x3c] sm:$0xf0]  ;;  %v2744_v5 = vld [vmem:[#allocation2 + $0x82] sm:$0xff] }
  0xd9   : > { %2804 = vst [vmem:[#allocation3 + $0x2c] sm:$0xf] %v2772_v58  ;;  %1801 = vmatmul.bf16.gmra.mxu2 %v3795_v10  ;;  %v3803_v23 = vor.u32 %v4718_v13, %v3800_v62  ;;  %v2776_v15 = vpack.c.bf16 %v2744_v5, %v2744_v5  ;;  %v2650_v62 = vld [vmem:[#allocation2 + $0x99] sm:$0xff]  ;;  %v4709_v5 = vld [vmem:[%s6189_s3 + $0xa8] sm:$0xff] }
  0xda   : > { %2709 = vst [vmem:[#allocation3 + $0x34] sm:$0xf] %v2677_v46  ;;  %v2682_v26 = vpack.c.bf16 %v2650_v62, %v2650_v62  ;;  %2457 = vmatpush.bf16.msra.mxu1 %v4709_v5 }
  0xdb   : > { %2710 = vst [vmem:[#allocation3 + $0x40] sm:$0xf] %v2678_v53  ;;  %v3806_v8 = vld [vmem:[#allocation3 + $0x38] sm:$0xf]  ;;  %2384 = vmatmul.bf16.gmra.mxu0 %v4091_v40  ;;  %v5578_v40 = vpop.f32.mrf.mxu0 }
  0xdc   : > { %v4720_v9 = vld [vmem:[#allocation3 + $0x40] sm:$0xf0]  ;;  %2805 = vst [vmem:[#allocation3 + $0x38] sm:$0xf] %v2773_v0 }
  0xdd   : > { %2806 = vst [vmem:[#allocation3 + $0x44] sm:$0xf] %v2774_v6  ;;  %v4649_v19 = vld [vmem:[#allocation3 + $0x4c] sm:$0xf]  ;;  %v3807_v20 = vor.u32 %v4720_v9, %v3806_v8 }
  0xde   : > { %v4100_v38 = vld [vmem:[#allocation3 + $0x54] sm:$0xf0]  ;;  %976 = vst [vmem:[#allocation3 + $0x4c] sm:$0xf] %v2677_v46 }
  0xdf   : > { %977 = vst [vmem:[#allocation3 + $0x58] sm:$0xf] %v2678_v53  ;;  %v4103_v37 = vor.u32 %v4649_v19, %v4100_v38  ;;  %v2746_v38 = vld [vmem:[#allocation2 + $0x9a] sm:$0xff] }
  0xe0   : > { %672 = vst [vmem:[#allocation3 + $0x50] sm:$0xf] %v2771_v21 }
  0xe1   : > { %673 = vst [vmem:[#allocation3 + $0x5c] sm:$0xf] %v2772_v58  ;;  %2290 = vmatmul.bf16.gmra.mxu3 %v4075_v52  ;;  %v2775_v58 = vpack.c.bf16 %v2743_v30, %v2743_v30 }
  0xe2   : > { %578 = vst [vmem:[#allocation3 + $0x64] sm:$0xf] %v2677_v46 }
  0xe3   : > { %579 = vst [vmem:[#allocation3 + $0x70] sm:$0xf] %v2678_v53  ;;  %1717 = vmatmul.bf16.gmra.mxu1 %v3803_v23  ;;  %v2649_v53 = vld [vmem:[#allocation2 + $0x91] sm:$0xff] }
  0xe4   : > { %674 = vst [vmem:[#allocation3 + $0x68] sm:$0xf] %v2773_v0  ;;  %v2681_v19 = vpack.c.bf16 %v2649_v53, %v2649_v53 }
  0xe5   : > { %v4721_v39 = vld [vmem:[#allocation3 + $0x4c] sm:$0xf]  ;;  %675 = vst [vmem:[#allocation3 + $0x74] sm:$0xf] %v2774_v6 }
  0xe6   : > { %v3812_v49 = vld [vmem:[#allocation3 + $0x54] sm:$0xf0]  ;;  %2711 = vst [vmem:[#allocation3 + $0x4c] sm:$0xf] %v2679_v34 }
  0xe7   : > { %2712 = vst [vmem:[#allocation3 + $0x58] sm:$0xf] %v2680_v1  ;;  %v5568_v27 = vld [vmem:[#allocation3 + $0x50] sm:$0xf]  ;;  %v3815_v52 = vor.u32 %v4721_v39, %v3812_v49  ;;  %v4845_v39 = vld [vmem:[%s6189_s3 + $0x1e8] sm:$0xff] }
  0xe8   : > { %6193 = vst [vmem:[#allocation6_spill] sm:$0xff] %v5568_v27  ;;  %v5570_v21 = vld [vmem:[#allocation3 + $0x58] sm:$0xf0]  ;;  %3436 = vmatpush.bf16.msra.mxu3 %v4845_v39 }
  0xe9   : > { %6194 = vst [vmem:[#allocation7_spill] sm:$0xff] %v5570_v21  ;;  %v5572_v46 = vld [vmem:[#allocation3 + $0x64] sm:$0xf]  ;;  %1806 = vmatmul.bf16.gmra.mxu2 %v3807_v20  ;;  %v4853_v20 = vld [vmem:[%s6189_s3 + $0x228] sm:$0xff] }
  0xea   : > { %1072 = vst [vmem:[#allocation3 + $0x50] sm:$0xf] %v2773_v0  ;;  %v4112_v50 = vld [vmem:[#allocation3 + $0x6c] sm:$0xf0]  ;;  %v4087_v0 = vor.u32 %v5389_v7, %v5385_v3  ;;  %v2778_v7 = vpack.c.bf16 %v2746_v38, %v2746_v38  ;;  %3525 = vmatpush.bf16.msra.mxu0 %v4853_v20  ;;  %v2651_v38 = vld [vmem:[#allocation2 + $0xa9] sm:$0xff] }
  0xeb   : > { %1073 = vst [vmem:[#allocation3 + $0x5c] sm:$0xf] %v2774_v6  ;;  %v5574_v10 = vld [vmem:[#allocation3 + $0x68] sm:$0xf]  ;;  %2389 = vmatmul.bf16.gmra.mxu0 %v4103_v37  ;;  %v2683_v39 = vpack.c.bf16 %v2651_v38, %v2651_v38  ;;  %v2656_v21 = vld [vmem:[#allocation2 + $0xe1] sm:$0xff] }
  0xec   : > { %978 = vst [vmem:[#allocation3 + $0x64] sm:$0xf] %v2679_v34  ;;  %v5576_v13 = vld [vmem:[#allocation3 + $0x70] sm:$0xf0]  ;;  %v2745_v6 = vld [vmem:[#allocation2 + $0x92] sm:$0xff] }
  0xed   : > { %979 = vst [vmem:[#allocation3 + $0x70] sm:$0xf] %v2680_v1 }
  0xee   : > { %6195 = vst [vmem:[#allocation8_spill] sm:$0xff] %v5574_v10 }
  0xef   : > { %6196 = vst [vmem:[#allocation9_spill] sm:$0xff] %v5576_v13 }
  0xf0   : > { %1074 = vst [vmem:[#allocation3 + $0x68] sm:$0xf] %v2775_v58 }
  0xf1   : > { %1075 = vst [vmem:[#allocation3 + $0x74] sm:$0xf] %v2776_v15  ;;  %v3818_v8 = vld [vmem:[#allocation3 + $0x50] sm:$0xf]  ;;  %2295 = vmatmul.bf16.gmra.mxu3 %v4087_v0  ;;  %v5606_v0 = vpop.f32.mrf.mxu0 }
  0xf2   : > { %580 = vst [vmem:[#allocation3 + $0x7c] sm:$0xf] %v2679_v34  ;;  %v4723_v9 = vld [vmem:[#allocation3 + $0x58] sm:$0xf0]  ;;  %v2777_v34 = vpack.c.bf16 %v2745_v6, %v2745_v6  ;;  %v4115_v6 = vor.u32 %v5572_v46, %v4112_v50 }
  0xf3   : > { %581 = vst [vmem:[#allocation3 + $0x88] sm:$0xf] %v2680_v1  ;;  %v5582_v23 = vld [vmem:[#allocation3 + $0x64] sm:$0xf]  ;;  %v4837_v1 = vld [vmem:[%s6189_s3 + $0x1a8] sm:$0xff]  ;;  %1722 = vmatmul.bf16.gmra.mxu1 %v3815_v52  ;;  %v3819_v62 = vor.u32 %v4723_v9, %v3818_v8 }
  0xf4   : > { %2807 = vst [vmem:[#allocation3 + $0x50] sm:$0xf] %v2775_v58  ;;  %v3824_v30 = vld [vmem:[#allocation3 + $0x6c] sm:$0xf0]  ;;  %3347 = vmatpush.bf16.msra.mxu2 %v4837_v1  ;;  %v2652_v52 = vld [vmem:[#allocation2 + $0xb1] sm:$0xff]  ;;  %v5609_v1 = vpop.f32.mrf.mxu1 }
  0xf5   : > { %2808 = vst [vmem:[#allocation3 + $0x5c] sm:$0xf] %v2776_v15  ;;  %v2684_v8 = vpack.c.bf16 %v2652_v52, %v2652_v52  ;;  %v2747_v46 = vld [vmem:[#allocation2 + $0xaa] sm:$0xff] }
  0xf6   : > { %2713 = vst [vmem:[#allocation3 + $0x64] sm:$0xf] %v2681_v19 }
  0xf7   : > { %2714 = vst [vmem:[#allocation3 + $0x70] sm:$0xf] %v2682_v26  ;;  %v5586_v3 = vld [vmem:[#allocation3 + $0x68] sm:$0xf] }
  0xf8   : > { %v5594_v49 = vld [vmem:[#allocation3 + $0x70] sm:$0xf0]  ;;  %2809 = vst [vmem:[#allocation3 + $0x68] sm:$0xf] %v2777_v34 }
  0xf9   : > { %2810 = vst [vmem:[#allocation3 + $0x74] sm:$0xf] %v2778_v7  ;;  %v5602_v37 = vld [vmem:[#allocation3 + $0x7c] sm:$0xf]  ;;  %1811 = vmatmul.bf16.gmra.mxu2 %v3819_v62  ;;  %v5622_v20 = vpop.f32.mrf.mxu0  ;;  %v2779_v62 = vpack.c.bf16 %v2747_v46, %v2747_v46  ;;  %v3831_v42 = vor.u32 %v5594_v49, %v5586_v3  ;;  %v2749_v49 = vld [vmem:[#allocation2 + $0xc2] sm:$0xff] }
  0xfa   : > { %v5604_v53 = vld [vmem:[#allocation3 + $0x84] sm:$0xf0]  ;;  %980 = vst [vmem:[#allocation3 + $0x7c] sm:$0xf] %v2681_v19  ;;  %v2654_v46 = vld [vmem:[#allocation2 + $0xc9] sm:$0xff]  ;;  %v2781_v13 = vpack.c.bf16 %v2749_v49, %v2749_v49 }
  0xfb   : > { %981 = vst [vmem:[#allocation3 + $0x88] sm:$0xf] %v2682_v26  ;;  %2394 = vmatmul.bf16.gmra.mxu0 %v4115_v6  ;;  %v2686_v3 = vpack.c.bf16 %v2654_v46, %v2654_v46 }
  0xfc   : > { %676 = vst [vmem:[#allocation3 + $0x80] sm:$0xf] %v2775_v58  ;;  %v5615_v58 = vpop.f32.mrf.mxu2 }
  0xfd   : > { %677 = vst [vmem:[#allocation3 + $0x8c] sm:$0xf] %v2776_v15 }
  0xfe   : > { %582 = vst [vmem:[#allocation3 + $0x94] sm:$0xf] %v2681_v19  ;;  %v2748_v19 = vld [vmem:[#allocation2 + $0xb2] sm:$0xff] }
  0xff   : > { %583 = vst [vmem:[#allocation3 + $0xa0] sm:$0xf] %v2682_v26  ;;  %v3827_v26 = vor.u32 %v5582_v23, %v3824_v30  ;;  %v2780_v6 = vpack.c.bf16 %v2748_v19, %v2748_v19  ;;  %v5633_v23 = vpop.f32.mrf.mxu1  ;;  %v5645_v19 = vpop.f32.mrf.mxu3 }
 0x100   : > { %678 = vst [vmem:[#allocation3 + $0x98] sm:$0xf] %v2777_v34 }
 0x101   : > { %v5611_v5 = vld [vmem:[#allocation3 + $0x7c] sm:$0xf]  ;;  %679 = vst [vmem:[#allocation3 + $0xa4] sm:$0xf] %v2778_v7  ;;  %2300 = vmatmul.bf16.gmra.mxu3 %v4099_v33  ;;  %v2653_v33 = vld [vmem:[#allocation2 + $0xc1] sm:$0xff] }
 0x102   : > { %v5613_v9 = vld [vmem:[#allocation3 + $0x84] sm:$0xf0]  ;;  %2715 = vst [vmem:[#allocation3 + $0x7c] sm:$0xf] %v2683_v39 }
 0x103   : > { %2716 = vst [vmem:[#allocation3 + $0x88] sm:$0xf] %v2684_v8  ;;  %v5617_v15 = vld [vmem:[#allocation3 + $0x80] sm:$0xf]  ;;  %1727 = vmatmul.bf16.gmra.mxu1 %v3827_v26  ;;  %v2685_v26 = vpack.c.bf16 %v2653_v33, %v2653_v33 }
 0x104   : > { %6197 = vst [vmem:[#allocation10_spill] sm:$0xff] %v5617_v15  ;;  %v5619_v50 = vld [vmem:[#allocation3 + $0x88] sm:$0xf0] }
 0x105   : > { %6198 = vst [vmem:[#allocation11_spill] sm:$0xff] %v5619_v50  ;;  %v5627_v38 = vld [vmem:[#allocation3 + $0x94] sm:$0xf]  ;;  %v5649_v50 = vpop.f32.mrf.mxu0 }
 0x106   : > { %1076 = vst [vmem:[#allocation3 + $0x80] sm:$0xf] %v2777_v34  ;;  %v5629_v52 = vld [vmem:[#allocation3 + $0x9c] sm:$0xf0] }
 0x107   : > { %1077 = vst [vmem:[#allocation3 + $0x8c] sm:$0xf] %v2778_v7  ;;  %v5631_v34 = vld [vmem:[#allocation3 + $0x98] sm:$0xf] }
 0x108   : > { %584 = vst [vmem:[#allocation3 + $0xac] sm:$0xf] %v2683_v39  ;;  %v5635_v30 = vld [vmem:[#allocation3 + $0xa0] sm:$0xf0] }
 0x109   : > { %585 = vst [vmem:[#allocation3 + $0xb8] sm:$0xf] %v2684_v8  ;;  %1816 = vmatmul.bf16.gmra.mxu2 %v3831_v42  ;;  %v5659_v42 = vpop.f32.mrf.mxu1 }
 0x10a   : > { %982 = vst [vmem:[#allocation3 + $0x94] sm:$0xf] %v2683_v39  ;;  %v5641_v39 = vpop.f32.mrf.mxu2 }
 0x10b   : > { %983 = vst [vmem:[#allocation3 + $0xa0] sm:$0xf] %v2684_v8  ;;  %v4127_v8 = vor.u32 %v5602_v37, %v5604_v53 }
 0x10c   : > { %6199 = vst [vmem:[#allocation12_spill] sm:$0xff] %v5631_v34  ;;  %v2750_v34 = vld [vmem:[#allocation2 + $0xca] sm:$0xff] }
 0x10d   : > { %6200 = vst [vmem:[#allocation13_spill] sm:$0xff] %v5635_v30  ;;  %v5639_v11 = vld [vmem:[#allocation3 + $0x80] sm:$0xf]  ;;  %2399 = vmatmul.bf16.gmra.mxu0 %v4127_v8  ;;  %v2782_v53 = vpack.c.bf16 %v2750_v34, %v2750_v34  ;;  %v4836_v34 = vld [vmem:[%s6189_s3 + $0x1a0] sm:$0xff]  ;;  %v5674_v8 = vpop.f32.mrf.mxu3 }
 0x10e   : > { %1078 = vst [vmem:[#allocation3 + $0x98] sm:$0xf] %v2779_v62  ;;  %v4729_v7 = vld [vmem:[#allocation3 + $0x88] sm:$0xf0]  ;;  %3348 = vmatpush.bf16.msra.mxu2 %v4836_v34 }
 0x10f   : > { %1079 = vst [vmem:[#allocation3 + $0xa4] sm:$0xf] %v2780_v6  ;;  %v4661_v49 = vld [vmem:[#allocation3 + $0xac] sm:$0xf]  ;;  %v3843_v10 = vor.u32 %v4729_v7, %v5639_v11  ;;  %v2783_v11 = vpack.c.bf16 %v2751_v41, %v2751_v41 }
 0x110   : > { %2811 = vst [vmem:[#allocation3 + $0x80] sm:$0xf] %v2779_v62 }
 0x111   : > { %2812 = vst [vmem:[#allocation3 + $0x8c] sm:$0xf] %v2780_v6  ;;  %v5647_v30 = vld [vmem:[#allocation3 + $0x94] sm:$0xf] }
 0x112   : > { %6201 = vst [vmem:[#allocation14_spill] sm:$0xff] %v5645_v19  ;;  %v5651_v15 = vld [vmem:[#allocation3 + $0x9c] sm:$0xf0]  ;;  %v5663_v46 = vpop.f32.mrf.mxu2  ;;  %v2655_v19 = vld [vmem:[#allocation2 + $0xd9] sm:$0xff] }
 0x113   : > { %680 = vst [vmem:[#allocation3 + $0xb0] sm:$0xf] %v2779_v62  ;;  %v4111_v62 = vor.u32 %v5209_v2, %v5203_v60  ;;  %v4844_v60 = vld [vmem:[%s6189_s3 + $0x1e0] sm:$0xff]  ;;  %v2687_v34 = vpack.c.bf16 %v2655_v19, %v2655_v19 }
 0x114   : > { %681 = vst [vmem:[#allocation3 + $0xbc] sm:$0xf] %v2780_v6  ;;  %v3839_v6 = vor.u32 %v5611_v5, %v5613_v9  ;;  %v4708_v2 = vld [vmem:[%s6189_s3 + $0xa0] sm:$0xff]  ;;  %v5679_v9 = vpop.f32.mrf.mxu0  ;;  %3437 = vmatpush.bf16.msra.mxu3 %v4844_v60  ;;  %v5688_v60 = vpop.f32.mrf.mxu1 }
 0x115   : > { %2717 = vst [vmem:[#allocation3 + $0x94] sm:$0xf] %v2685_v26  ;;  %v5653_v37 = vld [vmem:[#allocation3 + $0x98] sm:$0xf]  ;;  %2305 = vmatmul.bf16.gmra.mxu3 %v4111_v62  ;;  %v4852_v5 = vld [vmem:[%s6189_s3 + $0x220] sm:$0xff]  ;;  %2458 = vmatpush.bf16.msra.mxu1 %v4708_v2  ;;  %v2688_v2 = vpack.c.bf16 %v2656_v21, %v2656_v21 }
 0x116   : > { %2718 = vst [vmem:[#allocation3 + $0xa0] sm:$0xf] %v2686_v3  ;;  %v5655_v33 = vld [vmem:[#allocation3 + $0xa0] sm:$0xf0]  ;;  %1732 = vmatmul.bf16.gmra.mxu1 %v3839_v6  ;;  %v4148_v62 = vld [vmem:[#allocation3 + $0xb4] sm:$0xf0]  ;;  %3526 = vmatpush.bf16.msra.mxu0 %v4852_v5  ;;  %v4139_v6 = vor.u32 %v5627_v38, %v5629_v52  ;;  %v3851_v52 = vor.u32 %v5647_v30, %v5651_v15 }
 0x117   : > { %2813 = vst [vmem:[#allocation3 + $0x98] sm:$0xf] %v2781_v13  ;;  %v4151_v15 = vor.u32 %v4661_v49, %v4148_v62  ;;  %v2754_v49 = vld [vmem:[#allocation2 + $0xfa] sm:$0xff] }
 0x118   : > { %2814 = vst [vmem:[#allocation3 + $0xa4] sm:$0xf] %v2782_v53 }
 0x119   : > { %586 = vst [vmem:[#allocation3 + $0xc4] sm:$0xf] %v2685_v26  ;;  %1821 = vmatmul.bf16.gmra.mxu2 %v3843_v10 }
 0x11a   : > { %587 = vst [vmem:[#allocation3 + $0xd0] sm:$0xf] %v2686_v3  ;;  %v5682_v27 = vld [vmem:[#allocation3 + $0xb0] sm:$0xf]  ;;  %v5690_v7 = vpop.f32.mrf.mxu2 }
 0x11b   : > { %682 = vst [vmem:[#allocation3 + $0xc8] sm:$0xf] %v2781_v13 }
 0x11c   : > { %6202 = vst [vmem:[#allocation15_spill] sm:$0xff] %v5663_v46  ;;  %v5696_v21 = vpop.f32.mrf.mxu0 }
 0x11d   : > { %683 = vst [vmem:[#allocation3 + $0xd4] sm:$0xf] %v2782_v53  ;;  %2404 = vmatmul.bf16.gmra.mxu0 %v4139_v6 }
 0x11e   : > { %6203 = vst [vmem:[#allocation16_spill] sm:$0xff] %v5674_v8  ;;  %v5684_v8 = vld [vmem:[#allocation3 + $0xb8] sm:$0xf0] }
 0x11f   : > { %984 = vst [vmem:[#allocation3 + $0xac] sm:$0xf] %v2685_v26  ;;  %v2752_v26 = vld [vmem:[#allocation2 + $0xe2] sm:$0xff] }
 0x120   : > { %6204 = vst [vmem:[#allocation17_spill] sm:$0xff] %v5682_v27  ;;  %v2784_v41 = vpack.c.bf16 %v2752_v26, %v2752_v26  ;;  %v4664_v26 = vld [vmem:[#allocation3 + $0xc4] sm:$0xf] }
 0x121   : > { %985 = vst [vmem:[#allocation3 + $0xb8] sm:$0xf] %v2686_v3  ;;  %v5692_v3 = vpop.f32.mrf.mxu3 }
 0x122   : > { %6205 = vst [vmem:[#allocation18_spill] sm:$0xff] %v5684_v8  ;;  %v4160_v8 = vld [vmem:[#allocation3 + $0xcc] sm:$0xf0]  ;;  %v5712_v27 = vld [vmem:[#allocation3 + $0xc8] sm:$0xf] }
 0x123   : > { %1080 = vst [vmem:[#allocation3 + $0xb0] sm:$0xf] %v2781_v13  ;;  %v4123_v13 = vor.u32 %v5347_v17, %v5340_v12  ;;  %v3855_v12 = vor.u32 %v5655_v33, %v5653_v37  ;;  %v5708_v17 = vpop.f32.mrf.mxu2  ;;  %v2657_v33 = vld [vmem:[#allocation2 + $0xf1] sm:$0xff] }
 0x124   : > { %1081 = vst [vmem:[#allocation3 + $0xbc] sm:$0xf] %v2782_v53  ;;  %v5704_v53 = vpop.f32.mrf.mxu1  ;;  %v5714_v30 = vld [vmem:[#allocation3 + $0xd0] sm:$0xf0] }
 0x125   : > { %588 = vst [vmem:[#allocation3 + $0xdc] sm:$0xf] %v2687_v34  ;;  %2310 = vmatmul.bf16.gmra.mxu3 %v4123_v13 }
 0x126   : > { %589 = vst [vmem:[#allocation3 + $0xe8] sm:$0xf] %v2688_v2  ;;  %v4733_v5 = vld [vmem:[#allocation3 + $0xac] sm:$0xf]  ;;  %1737 = vmatmul.bf16.gmra.mxu1 %v3851_v52 }
 0x127   : > { %6206 = vst [vmem:[#allocation19_spill] sm:$0xff] %v5690_v7  ;;  %v2658_v52 = vld [vmem:[#allocation2 + $0xf9] sm:$0xff]  ;;  %v2786_v7 = vpack.c.bf16 %v2754_v49, %v2754_v49 }
 0x128   : > { %6207 = vst [vmem:[#allocation20_spill] sm:$0xff] %v5692_v3  ;;  %v3860_v38 = vld [vmem:[#allocation3 + $0xb4] sm:$0xf0]  ;;  %v5716_v13 = vpop.f32.mrf.mxu0  ;;  %v4135_v3 = vor.u32 %v5408_v24, %v5397_v31  ;;  %v4835_v24 = vld [vmem:[%s6189_s3 + $0x198] sm:$0xff] }
 0x129   : > { %684 = vst [vmem:[#allocation3 + $0xe0] sm:$0xf] %v2783_v11  ;;  %v5710_v6 = vpop.f32.mrf.mxu3  ;;  %1826 = vmatmul.bf16.gmra.mxu2 %v3855_v12 }
 0x12a   : > { %2719 = vst [vmem:[#allocation3 + $0xac] sm:$0xf] %v2687_v34  ;;  %v5698_v10 = vld [vmem:[#allocation3 + $0xb0] sm:$0xf]  ;;  %3349 = vmatpush.bf16.msra.mxu2 %v4835_v24  ;;  %v4163_v24 = vor.u32 %v4664_v26, %v4160_v8  ;;  %v4147_v8 = vor.u32 %v5467_v36, %v5462_v35  ;;  %v2659_v26 = vld [vmem:[#allocation2 + $0x109] sm:$0xff] }
 0x12b   : > { %2720 = vst [vmem:[#allocation3 + $0xb8] sm:$0xf] %v2688_v2  ;;  %v5702_v19 = vld [vmem:[#allocation3 + $0xb8] sm:$0xf0] }
 0x12c   : > { %2815 = vst [vmem:[#allocation3 + $0xb0] sm:$0xf] %v2783_v11  ;;  %v5718_v37 = vpop.f32.mrf.mxu1 }
 0x12d   : > { %2816 = vst [vmem:[#allocation3 + $0xbc] sm:$0xf] %v2784_v41  ;;  %2409 = vmatmul.bf16.gmra.mxu0 %v4151_v15  ;;  %v4172_v49 = vld [vmem:[#allocation3 + $0xe4] sm:$0xf0] }
 0x12e   : > { %685 = vst [vmem:[#allocation3 + $0xec] sm:$0xf] %v2784_v41 }
 0x12f   : > { %6208 = vst [vmem:[#allocation21_spill] sm:$0xff] %v5708_v17 }
 0x130   : > { %6209 = vst [vmem:[#allocation22_spill] sm:$0xff] %v5710_v6  ;;  %v2753_v6 = vld [vmem:[#allocation2 + $0xf2] sm:$0xff]  ;;  %v5728_v15 = vpop.f32.mrf.mxu0 }
 0x131   : > { %6210 = vst [vmem:[#allocation23_spill] sm:$0xff] %v5712_v27  ;;  %v2689_v27 = vpack.c.bf16 %v2657_v33, %v2657_v33 }
 0x132   : > { %986 = vst [vmem:[#allocation3 + $0xc4] sm:$0xf] %v2687_v34  ;;  %v2690_v34 = vpack.c.bf16 %v2658_v52, %v2658_v52  ;;  %v4667_v52 = vld [vmem:[#allocation3 + $0xdc] sm:$0xf] }
 0x133   : > { %6211 = vst [vmem:[#allocation24_spill] sm:$0xff] %v5714_v30  ;;  %v5724_v30 = vpop.f32.mrf.mxu2 }
 0x134   : > { %987 = vst [vmem:[#allocation3 + $0xd0] sm:$0xf] %v2688_v2  ;;  %v3863_v2 = vor.u32 %v4733_v5, %v3860_v38  ;;  %v4843_v5 = vld [vmem:[%s6189_s3 + $0x1d8] sm:$0xff]  ;;  %v5748_v33 = vpop.f32.mrf.mxu1 }
 0x135   : > { %1082 = vst [vmem:[#allocation3 + $0xc8] sm:$0xf] %v2783_v11  ;;  %v2785_v11 = vpack.c.bf16 %v2753_v6, %v2753_v6  ;;  %2315 = vmatmul.bf16.gmra.mxu3 %v4135_v3  ;;  %v3867_v3 = vor.u32 %v5702_v19, %v5698_v10  ;;  %v4707_v38 = vld [vmem:[%s6189_s3 + $0x98] sm:$0xff] }
 0x136   : > { %1083 = vst [vmem:[#allocation3 + $0xd4] sm:$0xf] %v2784_v41  ;;  %v5726_v41 = vpop.f32.mrf.mxu3  ;;  %1742 = vmatmul.bf16.gmra.mxu1 %v3863_v2  ;;  %3438 = vmatpush.bf16.msra.mxu3 %v4843_v5  ;;  %v4851_v6 = vld [vmem:[%s6189_s3 + $0x218] sm:$0xff]  ;;  %v5750_v2 = vld [vmem:[#allocation3 + $0xe0] sm:$0xf] }
 0x137   : > { %6212 = vst [vmem:[#allocation25_spill] sm:$0xff] %v5724_v30  ;;  %2459 = vmatpush.bf16.msra.mxu1 %v4707_v38  ;;  %3527 = vmatpush.bf16.msra.mxu0 %v4851_v6  ;;  %v5752_v10 = vld [vmem:[#allocation3 + $0xe8] sm:$0xf0]  ;;  %v2660_v38 = vld [vmem:[#allocation2 + $0x111] sm:$0xff]  ;;  %v2691_v6 = vpack.c.bf16 %v2659_v26, %v2659_v26 }
 0x138   : > { %6213 = vst [vmem:[#allocation26_spill] sm:$0xff] %v5726_v41  ;;  %v5754_v19 = vpop.f32.mrf.mxu0 }
 0x139   : > { %v5722_v62 = vld [vmem:[#allocation3 + $0xc4] sm:$0xf]  ;;  %590 = vst [vmem:[#allocation3 + $0xf4] sm:$0xf] %v2689_v27  ;;  %1831 = vmatmul.bf16.gmra.mxu2 %v3867_v3 }
 0x13a   : > { %2721 = vst [vmem:[#allocation3 + $0xc4] sm:$0xf] %v2689_v27 }
 0x13b   : > { %v3872_v12 = vld [vmem:[#allocation3 + $0xcc] sm:$0xf0]  ;;  %591 = vst [vmem:[#allocation3 + $0x100] sm:$0xf] %v2690_v34  ;;  %v5758_v41 = vpop.f32.mrf.mxu2 }
 0x13c   : > { %2722 = vst [vmem:[#allocation3 + $0xd0] sm:$0xf] %v2690_v34  ;;  %v5730_v17 = vld [vmem:[#allocation3 + $0xc8] sm:$0xf] }
 0x13d   : > { %v5732_v31 = vld [vmem:[#allocation3 + $0xd0] sm:$0xf0]  ;;  %2817 = vst [vmem:[#allocation3 + $0xc8] sm:$0xf] %v2785_v11  ;;  %2414 = vmatmul.bf16.gmra.mxu0 %v4163_v24 }
 0x13e   : > { %2818 = vst [vmem:[#allocation3 + $0xd4] sm:$0xf] %v2786_v7  ;;  %v5756_v5 = vpop.f32.mrf.mxu3 }
 0x13f   : > { %686 = vst [vmem:[#allocation3 + $0xf8] sm:$0xf] %v2785_v11 }
 0x140   : > { %6214 = vst [vmem:[#allocation27_spill] sm:$0xff] %v5750_v2  ;;  %v3875_v2 = vor.u32 %v5722_v62, %v3872_v12  ;;  %v1708_v3 = vpop.f32.mrf.mxu1  ;;  %v3879_v12 = vor.u32 %v5732_v31, %v5730_v17 }
 0x141   : > { %988 = vst [vmem:[#allocation3 + $0xdc] sm:$0xf] %v2689_v27  ;;  %v2755_v27 = vld [vmem:[#allocation2 + $0x10a] sm:$0xff] }
 0x142   : > { %6215 = vst [vmem:[#allocation28_spill] sm:$0xff] %v5752_v10  ;;  %v2756_v10 = vld [vmem:[#allocation2 + $0x112] sm:$0xff]  ;;  %v2787_v24 = vpack.c.bf16 %v2755_v27, %v2755_v27 }
 0x143   : > { %989 = vst [vmem:[#allocation3 + $0xe8] sm:$0xf] %v2690_v34  ;;  %v2788_v35 = vpack.c.bf16 %v2756_v10, %v2756_v10  ;;  %v5769_v36 = vpop.f32.mrf.mxu2  ;;  %v4175_v10 = vor.u32 %v4667_v52, %v4172_v49  ;;  %v4159_v52 = vor.u32 %v5259_v48, %v5253_v45  ;;  %v2661_v49 = vld [vmem:[#allocation2 + $0x121] sm:$0xff] }
 0x144   : > { %1084 = vst [vmem:[#allocation3 + $0xe0] sm:$0xf] %v2785_v11  ;;  %v2692_v11 = vpack.c.bf16 %v2660_v38, %v2660_v38  ;;  %v5777_v38 = vld [vmem:[#allocation3 + $0xf4] sm:$0xf] }
 0x145   : > { %6216 = vst [vmem:[#allocation29_spill] sm:$0xff] %v5756_v5  ;;  %v5765_v5 = vpop.f32.mrf.mxu0  ;;  %2320 = vmatmul.bf16.gmra.mxu3 %v4147_v8  ;;  %v5779_v8 = vld [vmem:[#allocation3 + $0xfc] sm:$0xf0] }
 0x146   : > { %6217 = vst [vmem:[#allocation30_spill] sm:$0xff] %v5758_v41  ;;  %1747 = vmatmul.bf16.gmra.mxu1 %v3875_v2  ;;  %v5773_v62 = vpop.f32.mrf.mxu3  ;;  %v5781_v27 = vld [vmem:[#allocation3 + $0xf8] sm:$0xf] }
 0x147   : > { %1085 = vst [vmem:[#allocation3 + $0xec] sm:$0xf] %v2786_v7 }
 0x148   : > { %687 = vst [vmem:[#allocation3 + $0x104] sm:$0xf] %v2786_v7  ;;  %v5763_v34 = vld [vmem:[#allocation3 + $0xdc] sm:$0xf]  ;;  %v1710_v30 = vpop.f32.mrf.mxu1 }
 0x149   : > { %2723 = vst [vmem:[#allocation3 + $0xdc] sm:$0xf] %v2691_v6  ;;  %1836 = vmatmul.bf16.gmra.mxu2 %v3879_v12  ;;  %v1711_v45 = vadd.f32 %v1710_v30, %v5606_v0 }
 0x14a   : > { %v3884_v41 = vld [vmem:[#allocation3 + $0xe4] sm:$0xf0]  ;;  %6218 = vst [vmem:[#allocation31_spill] sm:$0xff] %v5769_v36 }
 0x14b   : > { %2724 = vst [vmem:[#allocation3 + $0xe8] sm:$0xf] %v2692_v11  ;;  %v5767_v7 = vld [vmem:[#allocation3 + $0xe0] sm:$0xf]  ;;  %v1797_v17 = vpop.f32.mrf.mxu2 }
 0x14c   : > { %2819 = vst [vmem:[#allocation3 + $0xe0] sm:$0xf] %v2787_v24 }
 0x14d   : > { %6219 = vst [vmem:[#allocation32_spill] sm:$0xff] %v5773_v62  ;;  %v5785_v2 = vpop.f32.mrf.mxu0  ;;  %v1709_v62 = vadd.f32 %v1708_v3, %v5578_v40  ;;  %2419 = vmatmul.bf16.gmra.mxu0 %v4175_v10  ;;  %v3887_v40 = vor.u32 %v5763_v34, %v3884_v41  ;;  %v4834_v41 = vld [vmem:[%s6189_s3 + $0x190] sm:$0xff] }
 0x14e   : > { %v5771_v26 = vld [vmem:[#allocation3 + $0xe8] sm:$0xf0]  ;;  %592 = vst [vmem:[#allocation3 + $0x10c] sm:$0xf] %v2691_v6  ;;  %v5788_v22 = vpop.f32.mrf.mxu3  ;;  %v4842_v34 = vld [vmem:[%s6189_s3 + $0x1d0] sm:$0xff]  ;;  %3350 = vmatpush.bf16.msra.mxu2 %v4834_v41 }
 0x14f   : > { %2820 = vst [vmem:[#allocation3 + $0xec] sm:$0xf] %v2788_v35  ;;  %v5783_v36 = vld [vmem:[#allocation3 + $0x100] sm:$0xf0]  ;;  %v1798_v31 = vadd.f32 %v1797_v17, %v1709_v62  ;;  %3439 = vmatpush.bf16.msra.mxu3 %v4842_v34 }
 0x150   : > { %593 = vst [vmem:[#allocation3 + $0x118] sm:$0xf] %v2692_v11  ;;  %v1713_v46 = vpop.f32.mrf.mxu1 }
 0x151   : > { %6220 = vst [vmem:[#allocation33_spill] sm:$0xff] %v5781_v27  ;;  %v2693_v27 = vpack.c.bf16 %v2661_v49, %v2661_v49 }
 0x152   : > { %990 = vst [vmem:[#allocation3 + $0xf4] sm:$0xf] %v2691_v6  ;;  %v2662_v6 = vld [vmem:[#allocation2 + $0x129] sm:$0xff] }
 0x153   : > { %6221 = vst [vmem:[#allocation34_spill] sm:$0xff] %v5783_v36  ;;  %v2757_v36 = vld [vmem:[#allocation2 + $0x122] sm:$0xff]  ;;  %v2694_v12 = vpack.c.bf16 %v2662_v6, %v2662_v6  ;;  %v1799_v17 = vpop.f32.mrf.mxu2  ;;  %v4706_v6 = vld [vmem:[%s6189_s3 + $0x90] sm:$0xff] }
 0x154   : > { %991 = vst [vmem:[#allocation3 + $0x100] sm:$0xf] %v2692_v11  ;;  %v2758_v11 = vld [vmem:[#allocation2 + $0x12a] sm:$0xff]  ;;  %2460 = vmatpush.bf16.msra.mxu1 %v4706_v6  ;;  %v4171_v6 = vor.u32 %v5362_v44, %v5360_v43 }
 0x155   : > { %1086 = vst [vmem:[#allocation3 + $0xf8] sm:$0xf] %v2787_v24  ;;  %v5795_v62 = vpop.f32.mrf.mxu0  ;;  %2325 = vmatmul.bf16.gmra.mxu3 %v4159_v52  ;;  %v2790_v10 = vpack.c.bf16 %v2758_v11, %v2758_v11  ;;  %v3891_v52 = vor.u32 %v5771_v26, %v5767_v7  ;;  %v4850_v11 = vld [vmem:[%s6189_s3 + $0x210] sm:$0xff] }
 0x156   : > { %1087 = vst [vmem:[#allocation3 + $0x104] sm:$0xf] %v2788_v35  ;;  %1752 = vmatmul.bf16.gmra.mxu1 %v3887_v40  ;;  %v2286_v0 = vpop.f32.mrf.mxu3  ;;  %3528 = vmatpush.bf16.msra.mxu0 %v4850_v11  ;;  %v2664_v11 = vld [vmem:[#allocation2 + $0x141] sm:$0xff] }
 0x157   : > { %688 = vst [vmem:[#allocation3 + $0x110] sm:$0xf] %v2787_v24  ;;  %v2287_v30 = vadd.f32 %v2286_v0, %v1798_v31  ;;  %v5820_v40 = vld [vmem:[#allocation3 + $0x114] sm:$0xf0]  ;;  %v4187_v31 = vor.u32 %v5777_v38, %v5779_v8  ;;  %v1714_v0 = vadd.f32 %v1713_v46, %v5622_v20  ;;  %v2696_v20 = vpack.c.bf16 %v2664_v11, %v2664_v11 }
 0x158   : > { %689 = vst [vmem:[#allocation3 + $0x11c] sm:$0xf] %v2788_v35  ;;  %v2789_v35 = vpack.c.bf16 %v2757_v36, %v2757_v36  ;;  %v1800_v36 = vadd.f32 %v1799_v17, %v1711_v45  ;;  %v5818_v45 = vld [vmem:[#allocation3 + $0x10c] sm:$0xf]  ;;  %v1715_v34 = vpop.f32.mrf.mxu1 }
 0x159   : > { %v5793_v3 = vld [vmem:[#allocation3 + $0xf4] sm:$0xf]  ;;  %594 = vst [vmem:[#allocation3 + $0x124] sm:$0xf] %v2693_v27  ;;  %v5829_v26 = vadd.f32 %v5754_v19, %v2287_v30  ;;  %1841 = vmatmul.bf16.gmra.mxu2 %v3891_v52  ;;  %v2663_v30 = vld [vmem:[#allocation2 + $0x139] sm:$0xff] }
 0x15a   : > { %2725 = vst [vmem:[#allocation3 + $0xf4] sm:$0xf] %v2693_v27 }
 0x15b   : > { %v5797_v24 = vld [vmem:[#allocation3 + $0xfc] sm:$0xf0]  ;;  %595 = vst [vmem:[#allocation3 + $0x130] sm:$0xf] %v2694_v12 }
 0x15c   : > { %2726 = vst [vmem:[#allocation3 + $0x100] sm:$0xf] %v2694_v12  ;;  %v5800_v48 = vld [vmem:[#allocation3 + $0xf8] sm:$0xf]  ;;  %v1802_v8 = vpop.f32.mrf.mxu2  ;;  %v3899_v52 = vor.u32 %v5793_v3, %v5797_v24  ;;  %v1716_v3 = vadd.f32 %v1715_v34, %v5649_v50  ;;  %v4199_v50 = vor.u32 %v5818_v45, %v5820_v40  ;;  %v4183_v40 = vor.u32 %v5438_v14, %v5436_v32 }
 0x15d   : > { %v5808_v49 = vld [vmem:[#allocation3 + $0x100] sm:$0xf0]  ;;  %2821 = vst [vmem:[#allocation3 + $0xf8] sm:$0xf] %v2789_v35  ;;  %v5831_v17 = vpop.f32.mrf.mxu0  ;;  %2424 = vmatmul.bf16.gmra.mxu0 %v4187_v31  ;;  %v1803_v19 = vadd.f32 %v1802_v8, %v1714_v0 }
 0x15e   : > { %2822 = vst [vmem:[#allocation3 + $0x104] sm:$0xf] %v2790_v10  ;;  %v5822_v41 = vld [vmem:[#allocation3 + $0x110] sm:$0xf]  ;;  %v2288_v38 = vpop.f32.mrf.mxu3 }
 0x15f   : > { %6222 = vst [vmem:[#allocation35_spill] sm:$0xff] %v5822_v41  ;;  %v5826_v7 = vld [vmem:[#allocation3 + $0x118] sm:$0xf0]  ;;  %v2695_v41 = vpack.c.bf16 %v2663_v30, %v2663_v30 }
 0x160   : > { %992 = vst [vmem:[#allocation3 + $0x10c] sm:$0xf] %v2693_v27  ;;  %v2289_v27 = vadd.f32 %v2288_v38, %v1800_v36 }
 0x161   : > { %6223 = vst [vmem:[#allocation36_spill] sm:$0xff] %v5826_v7  ;;  %v2759_v7 = vld [vmem:[#allocation2 + $0x13a] sm:$0xff] }
 0x162   : > { %6224 = vst [vmem:[#allocation37_spill] sm:$0xff] %v5829_v26  ;;  %v5841_v46 = vadd.f32 %v5765_v5, %v2289_v27  ;;  %v2791_v43 = vpack.c.bf16 %v2759_v7, %v2759_v7  ;;  %v3903_v7 = vor.u32 %v5808_v49, %v5800_v48  ;;  %v5854_v27 = vld [vmem:[#allocation3 + $0x124] sm:$0xf] }
 0x163   : > { %993 = vst [vmem:[#allocation3 + $0x118] sm:$0xf] %v2694_v12  ;;  %v2760_v12 = vld [vmem:[#allocation2 + $0x142] sm:$0xff] }
 0x164   : > { %1088 = vst [vmem:[#allocation3 + $0x110] sm:$0xf] %v2789_v35  ;;  %v2792_v31 = vpack.c.bf16 %v2760_v12, %v2760_v12  ;;  %v1804_v24 = vpop.f32.mrf.mxu2 }
 0x165   : > { %1089 = vst [vmem:[#allocation3 + $0x11c] sm:$0xf] %v2790_v10  ;;  %2330 = vmatmul.bf16.gmra.mxu3 %v4171_v6  ;;  %v1805_v8 = vadd.f32 %v1804_v24, %v1716_v3  ;;  %v5856_v6 = vld [vmem:[#allocation3 + $0x12c] sm:$0xf0] }
 0x166   : > { %690 = vst [vmem:[#allocation3 + $0x128] sm:$0xf] %v2789_v35  ;;  %v1718_v35 = vpop.f32.mrf.mxu1  ;;  %1757 = vmatmul.bf16.gmra.mxu1 %v3899_v52  ;;  %v2291_v5 = vpop.f32.mrf.mxu3  ;;  %v2666_v3 = vld [vmem:[#allocation2 + $0x159] sm:$0xff] }
 0x167   : > { %691 = vst [vmem:[#allocation3 + $0x134] sm:$0xf] %v2790_v10  ;;  %v5838_v26 = vld [vmem:[#allocation3 + $0x10c] sm:$0xf]  ;;  %v5843_v10 = vpop.f32.mrf.mxu0  ;;  %v2292_v38 = vadd.f32 %v2291_v5, %v1803_v19  ;;  %v1719_v48 = vadd.f32 %v1718_v35, %v5679_v9  ;;  %v2761_v5 = vld [vmem:[#allocation2 + $0x152] sm:$0xff]  ;;  %v2698_v9 = vpack.c.bf16 %v2666_v3, %v2666_v3  ;;  %v4705_v3 = vld [vmem:[%s6189_s3 + $0x88] sm:$0xff] }
 0x168   : > { %2727 = vst [vmem:[#allocation3 + $0x10c] sm:$0xf] %v2695_v41  ;;  %v2793_v32 = vpack.c.bf16 %v2761_v5, %v2761_v5  ;;  %2461 = vmatpush.bf16.msra.mxu1 %v4705_v3 }
 0x169   : > { %596 = vst [vmem:[#allocation3 + $0x13c] sm:$0xf] %v2695_v41  ;;  %v5865_v11 = vadd.f32 %v5785_v2, %v2292_v38  ;;  %1846 = vmatmul.bf16.gmra.mxu2 %v3903_v7 }
 0x16a   : > { %v5845_v36 = vld [vmem:[#allocation3 + $0x114] sm:$0xf0]  ;;  %597 = vst [vmem:[#allocation3 + $0x148] sm:$0xf] %v2696_v20 }
 0x16b   : > { %2728 = vst [vmem:[#allocation3 + $0x118] sm:$0xf] %v2696_v20  ;;  %v5847_v44 = vld [vmem:[#allocation3 + $0x110] sm:$0xf]  ;;  %v3911_v38 = vor.u32 %v5838_v26, %v5845_v36  ;;  %v4833_v26 = vld [vmem:[%s6189_s3 + $0x188] sm:$0xff] }
 0x16c   : > { %v5849_v0 = vld [vmem:[#allocation3 + $0x118] sm:$0xf0]  ;;  %2823 = vst [vmem:[#allocation3 + $0x110] sm:$0xf] %v2791_v43  ;;  %v1807_v52 = vpop.f32.mrf.mxu2  ;;  %3351 = vmatpush.bf16.msra.mxu2 %v4833_v26 }
 0x16d   : > { %2824 = vst [vmem:[#allocation3 + $0x11c] sm:$0xf] %v2792_v31  ;;  %v5858_v30 = vld [vmem:[#allocation3 + $0x128] sm:$0xf]  ;;  %2429 = vmatmul.bf16.gmra.mxu0 %v4199_v50  ;;  %v1808_v2 = vadd.f32 %v1807_v52, %v1719_v48 }
 0x16e   : > { %994 = vst [vmem:[#allocation3 + $0x124] sm:$0xf] %v2695_v41  ;;  %v5862_v34 = vld [vmem:[#allocation3 + $0x130] sm:$0xf0]  ;;  %v1720_v19 = vpop.f32.mrf.mxu1  ;;  %v2293_v49 = vpop.f32.mrf.mxu3  ;;  %v2665_v41 = vld [vmem:[#allocation2 + $0x151] sm:$0xff] }
 0x16f   : > { %v5867_v12 = vpop.f32.mrf.mxu0  ;;  %995 = vst [vmem:[#allocation3 + $0x130] sm:$0xf] %v2696_v20  ;;  %v2294_v45 = vadd.f32 %v2293_v49, %v1805_v8  ;;  %v2697_v24 = vpack.c.bf16 %v2665_v41, %v2665_v41  ;;  %v2762_v20 = vld [vmem:[#allocation2 + $0x15a] sm:$0xff]  ;;  %v1721_v48 = vadd.f32 %v1720_v19, %v5696_v21  ;;  %v3915_v41 = vor.u32 %v5849_v0, %v5847_v44  ;;  %v4849_v21 = vld [vmem:[%s6189_s3 + $0x208] sm:$0xff] }
 0x170   : > { %1090 = vst [vmem:[#allocation3 + $0x128] sm:$0xf] %v2791_v43  ;;  %v2794_v50 = vpack.c.bf16 %v2762_v20, %v2762_v20  ;;  %v5902_v19 = vld [vmem:[#allocation3 + $0x13c] sm:$0xf]  ;;  %3529 = vmatpush.bf16.msra.mxu0 %v4849_v21 }
 0x171   : > { %1091 = vst [vmem:[#allocation3 + $0x134] sm:$0xf] %v2792_v31  ;;  %v5877_v35 = vadd.f32 %v5795_v62, %v2294_v45  ;;  %v4841_v62 = vld [vmem:[%s6189_s3 + $0x1c8] sm:$0xff]  ;;  %v5904_v5 = vld [vmem:[#allocation3 + $0x144] sm:$0xf0] }
 0x172   : > { %692 = vst [vmem:[#allocation3 + $0x140] sm:$0xf] %v2791_v43  ;;  %3440 = vmatpush.bf16.msra.mxu3 %v4841_v62 }
 0x173   : > { %693 = vst [vmem:[#allocation3 + $0x14c] sm:$0xf] %v2792_v31 }
 0x174   : > { %v1809_v52 = vpop.f32.mrf.mxu2  ;;  %598 = vst [vmem:[#allocation3 + $0x154] sm:$0xf] %v2697_v24 }
 0x175   : > { %v5874_v7 = vld [vmem:[#allocation3 + $0x124] sm:$0xf]  ;;  %2335 = vmatmul.bf16.gmra.mxu3 %v4183_v40  ;;  %v1810_v40 = vadd.f32 %v1809_v52, %v1721_v48  ;;  %599 = vst [vmem:[#allocation3 + $0x160] sm:$0xf] %v2698_v9  ;;  %v4195_v48 = vor.u32 %v5512_v56, %v5510_v54 }
 0x176   : > { %v1723_v43 = vpop.f32.mrf.mxu1  ;;  %v5881_v8 = vld [vmem:[#allocation3 + $0x12c] sm:$0xf0]  ;;  %2729 = vst [vmem:[#allocation3 + $0x124] sm:$0xf] %v2697_v24  ;;  %1762 = vmatmul.bf16.gmra.mxu1 %v3911_v38  ;;  %v2296_v49 = vpop.f32.mrf.mxu3  ;;  %v2668_v52 = vld [vmem:[#allocation2 + $0x171] sm:$0xff] }
 0x177   : > { %v5879_v31 = vpop.f32.mrf.mxu0  ;;  %2730 = vst [vmem:[#allocation3 + $0x130] sm:$0xf] %v2698_v9  ;;  %v5883_v14 = vld [vmem:[#allocation3 + $0x128] sm:$0xf]  ;;  %v2297_v45 = vadd.f32 %v2296_v49, %v1808_v2  ;;  %v4211_v2 = vor.u32 %v5854_v27, %v5856_v6  ;;  %v1724_v62 = vadd.f32 %v1723_v43, %v5716_v13  ;;  %v2667_v49 = vld [vmem:[#allocation2 + $0x169] sm:$0xff]  ;;  %v2700_v13 = vpack.c.bf16 %v2668_v52, %v2668_v52 }
 0x178   : > { %v5891_v36 = vld [vmem:[#allocation3 + $0x130] sm:$0xf0]  ;;  %2825 = vst [vmem:[#allocation3 + $0x128] sm:$0xf] %v2793_v32  ;;  %v2699_v3 = vpack.c.bf16 %v2667_v49, %v2667_v49 }
 0x179   : > { %2826 = vst [vmem:[#allocation3 + $0x134] sm:$0xf] %v2794_v50  ;;  %v5906_v20 = vld [vmem:[#allocation3 + $0x140] sm:$0xf]  ;;  %v5913_v0 = vadd.f32 %v5831_v17, %v2297_v45  ;;  %1851 = vmatmul.bf16.gmra.mxu2 %v3915_v41  ;;  %v3923_v41 = vor.u32 %v5874_v7, %v5881_v8 }
 0x17a   : > { %996 = vst [vmem:[#allocation3 + $0x13c] sm:$0xf] %v2697_v24  ;;  %v5910_v44 = vld [vmem:[#allocation3 + $0x148] sm:$0xf0]  ;;  %v2763_v45 = vld [vmem:[#allocation2 + $0x16a] sm:$0xff] }
 0x17b   : > { %997 = vst [vmem:[#allocation3 + $0x148] sm:$0xf] %v2698_v9  ;;  %v2764_v9 = vld [vmem:[#allocation2 + $0x172] sm:$0xff]  ;;  %v2795_v54 = vpack.c.bf16 %v2763_v45, %v2763_v45 }
 0x17c   : > { %1092 = vst [vmem:[#allocation3 + $0x140] sm:$0xf] %v2793_v32  ;;  %v1812_v6 = vpop.f32.mrf.mxu2  ;;  %v5940_v49 = vld [vmem:[#allocation3 + $0x15c] sm:$0xf0] }
 0x17d   : > { %1093 = vst [vmem:[#allocation3 + $0x14c] sm:$0xf] %v2794_v50  ;;  %2434 = vmatmul.bf16.gmra.mxu0 %v4211_v2  ;;  %v1813_v17 = vadd.f32 %v1812_v6, %v1724_v62  ;;  %v2796_v2 = vpack.c.bf16 %v2764_v9, %v2764_v9 }
 0x17e   : > { %v1725_v38 = vpop.f32.mrf.mxu1  ;;  %694 = vst [vmem:[#allocation3 + $0x158] sm:$0xf] %v2793_v32  ;;  %v2298_v27 = vpop.f32.mrf.mxu3 }
 0x17f   : > { %v5915_v26 = vpop.f32.mrf.mxu0  ;;  %695 = vst [vmem:[#allocation3 + $0x164] sm:$0xf] %v2794_v50  ;;  %v2299_v24 = vadd.f32 %v2298_v27, %v1810_v40  ;;  %v1726_v7 = vadd.f32 %v1725_v38, %v5728_v15  ;;  %v4223_v15 = vor.u32 %v5902_v19, %v5904_v5  ;;  %v4207_v5 = vor.u32 %v5288_v18, %v5285_v16 }
 0x180   : > { %600 = vst [vmem:[#allocation3 + $0x16c] sm:$0xf] %v2699_v3 }
 0x181   : > { %v5922_v21 = vld [vmem:[#allocation3 + $0x13c] sm:$0xf]  ;;  %v5925_v43 = vadd.f32 %v5843_v10, %v2299_v24  ;;  %v3927_v24 = vor.u32 %v5891_v36, %v5883_v14  ;;  %601 = vst [vmem:[#allocation3 + $0x178] sm:$0xf] %v2700_v13 }
 0x182   : > { %v5929_v40 = vld [vmem:[#allocation3 + $0x144] sm:$0xf0]  ;;  %2731 = vst [vmem:[#allocation3 + $0x13c] sm:$0xf] %v2699_v3 }
 0x183   : > { %2732 = vst [vmem:[#allocation3 + $0x148] sm:$0xf] %v2700_v13  ;;  %v5931_v56 = vld [vmem:[#allocation3 + $0x140] sm:$0xf] }
 0x184   : > { %v5933_v62 = vld [vmem:[#allocation3 + $0x148] sm:$0xf0]  ;;  %2827 = vst [vmem:[#allocation3 + $0x140] sm:$0xf] %v2795_v54  ;;  %v1814_v8 = vpop.f32.mrf.mxu2 }
 0x185   : > { %2340 = vmatmul.bf16.gmra.mxu3 %v4195_v48  ;;  %2828 = vst [vmem:[#allocation3 + $0x14c] sm:$0xf] %v2796_v2  ;;  %v1815_v6 = vadd.f32 %v1814_v8, %v1726_v7  ;;  %v5938_v48 = vld [vmem:[#allocation3 + $0x154] sm:$0xf]  ;;  %v5942_v52 = vld [vmem:[#allocation3 + $0x158] sm:$0xf] }
 0x186   : > { %v1728_v32 = vpop.f32.mrf.mxu1  ;;  %1767 = vmatmul.bf16.gmra.mxu1 %v3923_v41  ;;  %v2301_v10 = vpop.f32.mrf.mxu3  ;;  %998 = vst [vmem:[#allocation3 + $0x154] sm:$0xf] %v2699_v3  ;;  %v5946_v38 = vld [vmem:[#allocation3 + $0x160] sm:$0xf0]  ;;  %v2669_v3 = vld [vmem:[#allocation2 + $0x181] sm:$0xff]  ;;  %v2670_v7 = vld [vmem:[#allocation2 + $0x189] sm:$0xff] }
 0x187   : > { %v5927_v50 = vpop.f32.mrf.mxu0  ;;  %v2302_v27 = vadd.f32 %v2301_v10, %v1813_v17  ;;  %999 = vst [vmem:[#allocation3 + $0x160] sm:$0xf] %v2700_v13  ;;  %v1729_v14 = vadd.f32 %v1728_v32, %v5584_v29  ;;  %v2765_v10 = vld [vmem:[#allocation2 + $0x182] sm:$0xff]  ;;  %v2701_v8 = vpack.c.bf16 %v2669_v3, %v2669_v3  ;;  %v2766_v13 = vld [vmem:[#allocation2 + $0x18a] sm:$0xff]  ;;  %v2702_v29 = vpack.c.bf16 %v2670_v7, %v2670_v7 }
 0x188   : > { %1094 = vst [vmem:[#allocation3 + $0x158] sm:$0xf] %v2795_v54  ;;  %v2797_v16 = vpack.c.bf16 %v2765_v10, %v2765_v10  ;;  %v3939_v3 = vor.u32 %v5933_v62, %v5931_v56  ;;  %v4704_v7 = vld [vmem:[%s6189_s3 + $0x80] sm:$0xff] }
 0x189   : > { %v5949_v45 = vadd.f32 %v5867_v12, %v2302_v27  ;;  %1856 = vmatmul.bf16.gmra.mxu2 %v3927_v24  ;;  %1095 = vst [vmem:[#allocation3 + $0x164] sm:$0xf] %v2796_v2  ;;  %v3935_v27 = vor.u32 %v5922_v21, %v5929_v40  ;;  %v4832_v21 = vld [vmem:[%s6189_s3 + $0x180] sm:$0xff]  ;;  %2462 = vmatpush.bf16.msra.mxu1 %v4704_v7 }
 0x18a   : > { %696 = vst [vmem:[#allocation3 + $0x170] sm:$0xf] %v2795_v54  ;;  %3352 = vmatpush.bf16.msra.mxu2 %v4832_v21  ;;  %v4848_v10 = vld [vmem:[%s6189_s3 + $0x200] sm:$0xff] }
 0x18b   : > { %697 = vst [vmem:[#allocation3 + $0x17c] sm:$0xf] %v2796_v2  ;;  %3530 = vmatpush.bf16.msra.mxu0 %v4848_v10 }
 0x18c   : > { %v1817_v41 = vpop.f32.mrf.mxu2 }
 0x18d   : > { %2439 = vmatmul.bf16.gmra.mxu0 %v4223_v15  ;;  %v1818_v12 = vadd.f32 %v1817_v41, %v1729_v14  ;;  %v5958_v24 = vld [vmem:[#allocation3 + $0x154] sm:$0xf]  ;;  %v2798_v15 = vpack.c.bf16 %v2766_v13, %v2766_v13 }
 0x18e   : > { %v1730_v17 = vpop.f32.mrf.mxu1  ;;  %v2303_v36 = vpop.f32.mrf.mxu3  ;;  %2733 = vst [vmem:[#allocation3 + $0x154] sm:$0xf] %v2701_v8 }
 0x18f   : > { %v5951_v9 = vpop.f32.mrf.mxu0  ;;  %v2304_v19 = vadd.f32 %v2303_v36, %v1815_v6  ;;  %v5965_v6 = vld [vmem:[#allocation3 + $0x15c] sm:$0xf0]  ;;  %v5967_v18 = vld [vmem:[#allocation3 + $0x158] sm:$0xf]  ;;  %v1731_v14 = vadd.f32 %v1730_v17, %v5609_v1  ;;  %v4685_v1 = vld [vmem:[#allocation3 + $0x16c] sm:$0xf] }
 0x190   : > { %2734 = vst [vmem:[#allocation3 + $0x160] sm:$0xf] %v2702_v29  ;;  %v5975_v40 = vld [vmem:[#allocation3 + $0x160] sm:$0xf0]  ;;  %v4244_v17 = vld [vmem:[#allocation3 + $0x174] sm:$0xf0] }
 0x191   : > { %v5961_v32 = vadd.f32 %v5879_v31, %v2304_v19  ;;  %v4840_v31 = vld [vmem:[%s6189_s3 + $0x1c0] sm:$0xff]  ;;  %2829 = vst [vmem:[#allocation3 + $0x158] sm:$0xf] %v2797_v16 }
 0x192   : > { %2830 = vst [vmem:[#allocation3 + $0x164] sm:$0xf] %v2798_v15  ;;  %3441 = vmatpush.bf16.msra.mxu3 %v4840_v31  ;;  %v5986_v13 = vld [vmem:[#allocation3 + $0x170] sm:$0xf] }
 0x193   : > { %1000 = vst [vmem:[#allocation3 + $0x16c] sm:$0xf] %v2701_v8  ;;  %v4219_v8 = vor.u32 %v5371_v51, %v5367_v47 }
 0x194   : > { %v1819_v41 = vpop.f32.mrf.mxu2  ;;  %1001 = vst [vmem:[#allocation3 + $0x178] sm:$0xf] %v2702_v29 }
 0x195   : > { %2345 = vmatmul.bf16.gmra.mxu3 %v4207_v5  ;;  %v1820_v5 = vadd.f32 %v1819_v41, %v1731_v14  ;;  %1096 = vst [vmem:[#allocation3 + $0x170] sm:$0xf] %v2797_v16  ;;  %v2671_v41 = vld [vmem:[#allocation2 + $0x199] sm:$0xff]  ;;  %v3947_v16 = vor.u32 %v5958_v24, %v5965_v6 }
 0x196   : > { %v1733_v54 = vpop.f32.mrf.mxu1  ;;  %1772 = vmatmul.bf16.gmra.mxu1 %v3935_v27  ;;  %v4235_v27 = vor.u32 %v5938_v48, %v5940_v49  ;;  %v2703_v7 = vpack.c.bf16 %v2671_v41, %v2671_v41 }
 0x197   : > { %v5963_v2 = vpop.f32.mrf.mxu0  ;;  %v1734_v31 = vadd.f32 %v1733_v54, %v5633_v23 }
 0x198   : > { %v2306_v36 = vpop.f32.mrf.mxu3 }
 0x199   : > { %v2307_v19 = vadd.f32 %v2306_v36, %v1818_v12  ;;  %v5990_v12 = vld [vmem:[#allocation3 + $0x178] sm:$0xf0]  ;;  %1861 = vmatmul.bf16.gmra.mxu2 %v3939_v3 }
 0x19a   : > { %6225 = vst [vmem:[#allocation38_spill] sm:$0xff] %v5990_v12  ;;  %v2768_v12 = vld [vmem:[#allocation2 + $0x1a2] sm:$0xff] }
 0x19b   : > { %v5993_v56 = vadd.f32 %v5915_v26, %v2307_v19  ;;  %1097 = vst [vmem:[#allocation3 + $0x17c] sm:$0xf] %v2798_v15  ;;  %v2672_v26 = vld [vmem:[#allocation2 + $0x1a1] sm:$0xff]  ;;  %v4757_v15 = vld [vmem:[#allocation3 + $0x16c] sm:$0xf]  ;;  %v2800_v23 = vpack.c.bf16 %v2768_v12, %v2768_v12 }
 0x19c   : > { %v1822_v48 = vpop.f32.mrf.mxu2  ;;  %v2767_v19 = vld [vmem:[#allocation2 + $0x19a] sm:$0xff]  ;;  %v2704_v10 = vpack.c.bf16 %v2672_v26, %v2672_v26  ;;  %2735 = vst [vmem:[#allocation3 + $0x16c] sm:$0xf] %v2703_v7 }
 0x19d   : > { %2444 = vmatmul.bf16.gmra.mxu0 %v4235_v27  ;;  %v1823_v36 = vadd.f32 %v1822_v48, %v1734_v31  ;;  %v2799_v29 = vpack.c.bf16 %v2767_v19, %v2767_v19  ;;  %v3956_v27 = vld [vmem:[#allocation3 + $0x174] sm:$0xf0]  ;;  %v3962_v47 = vld [vmem:[#allocation3 + $0x170] sm:$0xf]  ;;  %v4247_v48 = vor.u32 %v4685_v1, %v4244_v17 }
 0x19e   : > { %v1735_v62 = vpop.f32.mrf.mxu1  ;;  %2736 = vst [vmem:[#allocation3 + $0x178] sm:$0xf] %v2704_v10  ;;  %v3959_v10 = vor.u32 %v4757_v15, %v3956_v27 }
 0x19f   : > { %v5995_v21 = vpop.f32.mrf.mxu0  ;;  %2831 = vst [vmem:[#allocation3 + $0x170] sm:$0xf] %v2799_v29  ;;  %v1736_v31 = vadd.f32 %v1735_v62, %v5659_v42  ;;  %v4358_v29 = vld [vmem:[#allocation3 + $0x8] sm:$0xf] }
 0x1a0   : > { %v2308_v14 = vpop.f32.mrf.mxu3 }
 0x1a1   : > { %v2309_v49 = vadd.f32 %v2308_v14, %v1820_v5 }
 0x1a2   : > { %v4759_v51 = vld [vmem:[#allocation3 + $0x178] sm:$0xf0] }
 0x1a3   : > { %v6003_v54 = vadd.f32 %v5927_v50, %v2309_v49  ;;  %2832 = vst [vmem:[#allocation3 + $0x17c] sm:$0xf] %v2800_v23  ;;  %v3951_v50 = vor.u32 %v5975_v40, %v5967_v18 }
 0x1a4   : > { %v1824_v24 = vpop.f32.mrf.mxu2 }
 0x1a5   : > { %2350 = vmatmul.bf16.gmra.mxu3 %v4219_v8  ;;  %v1825_v12 = vadd.f32 %v1824_v24, %v1736_v31  ;;  %v3963_v31 = vor.u32 %v4759_v51, %v3962_v47  ;;  %v4071_v47 = vor.u32 %v5540_v25, %v5538_v63 }
 0x1a6   : > { %v1738_v5 = vpop.f32.mrf.mxu1  ;;  %1777 = vmatmul.bf16.gmra.mxu1 %v3947_v16  ;;  %v4786_v16 = vld [vmem:[#allocation3 + $0x10] sm:$0xf0] }
 0x1a7   : > { %v2407_v3 = vpop.f32.mrf.mxu0  ;;  %v1739_v26 = vadd.f32 %v1738_v5, %v5688_v60 }
 0x1a8   : > { %v2311_v14 = vpop.f32.mrf.mxu3 }
 0x1a9   : > { %v2312_v6 = vadd.f32 %v2311_v14, %v1823_v36  ;;  %1866 = vmatmul.bf16.gmra.mxu2 %v3951_v50  ;;  %v4231_v36 = vor.u32 %v5452_v28, %v5450_v4  ;;  %v4359_v14 = vor.u32 %v4786_v16, %v4358_v29 }
 0x1ab   : > { %v6009_v49 = vadd.f32 %v5951_v9, %v2312_v6  ;;  %v4243_v6 = vor.u32 %v5534_v59, %v5532_v55 }
 0x1ac   : > { %v1827_v62 = vpop.f32.mrf.mxu2 }
 0x1ad   : > { %2449 = vmatmul.bf16.gmra.mxu0 %v4247_v48  ;;  %v1828_v7 = vadd.f32 %v1827_v62, %v1739_v26  ;;  %v4350_v48 = vld [vmem:[#allocation3] sm:$0xf] }
 0x1ae   : > { %v1740_v8 = vpop.f32.mrf.mxu1  ;;  %v4370_v62 = vld [vmem:[#allocation3 + $0x20] sm:$0xf] }
 0x1af   : > { %v2410_v41 = vpop.f32.mrf.mxu0  ;;  %v1741_v1 = vadd.f32 %v1740_v8, %v5704_v53  ;;  %v4785_v8 = vld [vmem:[#allocation3 + $0x8] sm:$0xf0] }
 0x1b0   : > { %v2313_v42 = vpop.f32.mrf.mxu3  ;;  %v4351_v59 = vor.u32 %v4785_v8, %v4350_v48  ;;  %v4364_v8 = vld [vmem:[#allocation3 + $0x24] sm:$0xf0] }
 0x1b1   : > { %v2314_v19 = vadd.f32 %v2313_v42, %v1825_v12 }
 0x1b3   : > { %v6015_v18 = vadd.f32 %v5963_v2, %v2314_v19  ;;  %v4789_v19 = vld [vmem:[#allocation3 + $0x28] sm:$0xf0] }
 0x1b4   : > { %v1829_v60 = vpop.f32.mrf.mxu2 }
 0x1b5   : > { %2355 = vmatmul.bf16.gmra.mxu3 %v4231_v36  ;;  %v1830_v5 = vadd.f32 %v1829_v60, %v1741_v1 }
 0x1b6   : > { %v1743_v40 = vpop.f32.mrf.mxu1  ;;  %1782 = vmatmul.bf16.gmra.mxu1 %v3959_v10 }
 0x1b7   : > { %v2412_v9 = vpop.f32.mrf.mxu0  ;;  %v1744_v15 = vadd.f32 %v1743_v40, %v5718_v37  ;;  %v4352_v40 = vld [vmem:[#allocation3 + $0xc] sm:$0xf0] }
 0x1b8   : > { %v2316_v17 = vpop.f32.mrf.mxu3 }
 0x1b9   : > { %v2317_v23 = vadd.f32 %v2316_v17, %v1828_v7  ;;  %1871 = vmatmul.bf16.gmra.mxu2 %v3963_v31  ;;  %v4371_v7 = vor.u32 %v4789_v19, %v4370_v62 }
 0x1bb   : > { %v6019_v4 = vadd.f32 %v5995_v21, %v2317_v23  ;;  %v4083_v23 = vor.u32 %v5546_v57, %v5544_v61 }
 0x1bc   : > { %v1832_v53 = vpop.f32.mrf.mxu2 }
 0x1bd   : > { %3531 = vmatmul.bf16.vlgmr.msra.gmra.mxu0 %v4359_v14  ;;  %v1833_v12 = vadd.f32 %v1832_v53, %v1744_v15  ;;  %v4362_v14 = vld [vmem:[#allocation3 + $0x18] sm:$0xf] }
 0x1be   : > { %v1745_v28 = vpop.f32.mrf.mxu1  ;;  %v4382_v53 = vld [vmem:[#allocation3 + $0x38] sm:$0xf] }
 0x1bf   : > { %v2415_v2 = vpop.f32.mrf.mxu0  ;;  %v1746_v37 = vadd.f32 %v1745_v28, %v5748_v33  ;;  %v4788_v28 = vld [vmem:[#allocation3 + $0x20] sm:$0xf0] }
 0x1c0   : > { %v2318_v27 = vpop.f32.mrf.mxu3 }
 0x1c1   : > { %v2319_v24 = vadd.f32 %v2318_v27, %v1830_v5 }
 0x1c3   : > { %v6026_v51 = vadd.f32 %v2407_v3, %v2319_v24  ;;  %v4784_v3 = vld [vmem:[#allocation3 + $0x4] sm:$0xf] }
 0x1c4   : > { %v1834_v42 = vpop.f32.mrf.mxu2  ;;  %v4355_v29 = vor.u32 %v4784_v3, %v4352_v40  ;;  %v4792_v24 = vld [vmem:[#allocation3 + $0x40] sm:$0xf0]  ;;  %v4374_v40 = vld [vmem:[#allocation3 + $0x30] sm:$0xf] }
 0x1c5   : > { %2360 = vmatmul.bf16.gmra.mxu3 %v4243_v6  ;;  %v1835_v55 = vadd.f32 %v1834_v42, %v1746_v37  ;;  %v6226_v37 = vld [vmem:[#allocation15_spill] sm:$0xff] }
 0x1c6   : > { %v1748_v21 = vpop.f32.mrf.mxu1  ;;  %2463 = vmatmul.bf16.vlgmr.msra.gmra.mxu1 %v4071_v47  ;;  %v4363_v47 = vor.u32 %v4788_v28, %v4362_v14 }
 0x1c7   : > { %v2417_v50 = vpop.f32.mrf.mxu0  ;;  %v1749_v1 = vadd.f32 %v1748_v21, %v5615_v58  ;;  %v4383_v21 = vor.u32 %v4792_v24, %v4382_v53  ;;  %v4790_v53 = vld [vmem:[#allocation3 + $0x34] sm:$0xf]  ;;  %v4376_v24 = vld [vmem:[#allocation3 + $0x3c] sm:$0xf0] }
 0x1c8   : > { %v2321_v26 = vpop.f32.mrf.mxu3 }
 0x1c9   : > { %v2322_v36 = vadd.f32 %v2321_v26, %v1833_v12  ;;  %3353 = vmatmul.bf16.vlgmr.msra.gmra.mxu2 %v4351_v59  ;;  %v6228_v59 = vld [vmem:[#allocation5_spill] sm:$0xff] }
 0x1cb   : > { %v6029_v10 = vadd.f32 %v2410_v41, %v2322_v36 }
 0x1cc   : > { %v1837_v17 = vpop.f32.mrf.mxu2 }
 0x1cd   : > { %3536 = vmatmul.bf16.gmra.mxu0 %v4371_v7  ;;  %v1838_v16 = vadd.f32 %v1837_v17, %v1749_v1  ;;  %v4791_v1 = vld [vmem:[#allocation3 + $0x38] sm:$0xf0] }
 0x1ce   : > { %v1750_v63 = vpop.f32.mrf.mxu1  ;;  %v4375_v28 = vor.u32 %v4791_v1, %v4374_v40  ;;  %v4406_v40 = vld [vmem:[#allocation3 + $0x68] sm:$0xf]  ;;  %v4798_v1 = vld [vmem:[#allocation3 + $0x70] sm:$0xf0] }
 0x1cf   : > { %v2420_v25 = vpop.f32.mrf.mxu0  ;;  %v1751_v15 = vadd.f32 %v1750_v63, %v5641_v39 }
 0x1d0   : > { %v2323_v33 = vpop.f32.mrf.mxu3 }
 0x1d1   : > { %v2324_v60 = vadd.f32 %v2323_v33, %v1835_v55  ;;  %v6227_v55 = vld [vmem:[#allocation4_spill] sm:$0xff]  ;;  %v6229_v33 = vld [vmem:[#allocation19_spill] sm:$0xff] }
 0x1d2   : > { %v4095_v7 = vor.u32 %v6228_v59, %v6227_v55  ;;  %v6233_v55 = vld [vmem:[#allocation25_spill] sm:$0xff] }
 0x1d3   : > { %v6034_v5 = vadd.f32 %v2412_v9, %v2324_v60  ;;  %v4787_v9 = vld [vmem:[#allocation3 + $0x1c] sm:$0xf] }
 0x1d4   : > { %v1839_v27 = vpop.f32.mrf.mxu2  ;;  %v4367_v19 = vor.u32 %v4787_v9, %v4364_v8  ;;  %v4379_v9 = vor.u32 %v4790_v53, %v4376_v24 }
 0x1d5   : > { %3442 = vmatmul.bf16.vlgmr.msra.gmra.mxu3 %v4355_v29  ;;  %v1840_v12 = vadd.f32 %v1839_v27, %v1751_v15 }
 0x1d6   : > { %v1753_v41 = vpop.f32.mrf.mxu1  ;;  %2468 = vmatmul.bf16.gmra.mxu1 %v4083_v23  ;;  %v4795_v23 = vld [vmem:[#allocation3 + $0x58] sm:$0xf0] }
 0x1d7   : > { %v2422_v31 = vpop.f32.mrf.mxu0  ;;  %v1754_v26 = vadd.f32 %v1753_v41, %v6226_v37  ;;  %v6231_v37 = vld [vmem:[#allocation6_spill] sm:$0xff] }
 0x1d8   : > { %v2326_v58 = vpop.f32.mrf.mxu3 }
 0x1d9   : > { %v2327_v6 = vadd.f32 %v2326_v58, %v1838_v16  ;;  %3358 = vmatmul.bf16.gmra.mxu2 %v4363_v47  ;;  %v4394_v16 = vld [vmem:[#allocation3 + $0x50] sm:$0xf] }
 0x1da   : > { %v4395_v15 = vor.u32 %v4795_v23, %v4394_v16 }
 0x1db   : > { %v6037_v48 = vadd.f32 %v2415_v2, %v2327_v6  ;;  %v6230_v6 = vld [vmem:[#allocation21_spill] sm:$0xff] }
 0x1dc   : > { %v1842_v42 = vpop.f32.mrf.mxu2 }
 0x1dd   : > { %3541 = vmatmul.bf16.gmra.mxu0 %v4383_v21  ;;  %v1843_v36 = vadd.f32 %v1842_v42, %v1754_v26  ;;  %v6232_v26 = vld [vmem:[#allocation7_spill] sm:$0xff] }
 0x1de   : > { %v1755_v61 = vpop.f32.mrf.mxu1 }
 0x1df   : > { %v2425_v57 = vpop.f32.mrf.mxu0  ;;  %v1756_v17 = vadd.f32 %v1755_v61, %v6229_v33 }
 0x1e0   : > { %v2328_v39 = vpop.f32.mrf.mxu3 }
 0x1e1   : > { %v2329_v62 = vadd.f32 %v2328_v39, %v1840_v12  ;;  %v4107_v39 = vor.u32 %v6232_v26, %v6231_v37  ;;  %v4398_v37 = vld [vmem:[#allocation3 + $0x60] sm:$0xf]  ;;  %v4797_v26 = vld [vmem:[#allocation3 + $0x68] sm:$0xf0] }
 0x1e3   : > { %v6042_v63 = vadd.f32 %v2417_v50, %v2329_v62 }
 0x1e4   : > { %v1844_v29 = vpop.f32.mrf.mxu2 }
 0x1e5   : > { %3447 = vmatmul.bf16.gmra.mxu3 %v4367_v19  ;;  %v1845_v14 = vadd.f32 %v1844_v29, %v1756_v17  ;;  %v4386_v19 = vld [vmem:[#allocation3 + $0x48] sm:$0xf]  ;;  %v4407_v29 = vor.u32 %v4798_v1, %v4406_v40  ;;  %v4399_v40 = vor.u32 %v4797_v26, %v4398_v37  ;;  %v4800_v37 = vld [vmem:[#allocation3 + $0x80] sm:$0xf0] }
 0x1e6   : > { %v1758_v2 = vpop.f32.mrf.mxu1  ;;  %2473 = vmatmul.bf16.gmra.mxu1 %v4095_v7  ;;  %v6241_v26 = vld [vmem:[#allocation16_spill] sm:$0xff] }
 0x1e7   : > { %v2427_v3 = vpop.f32.mrf.mxu0  ;;  %v1759_v12 = vadd.f32 %v1758_v2, %v6230_v6 }
 0x1e8   : > { %v2331_v60 = vpop.f32.mrf.mxu3 }
 0x1e9   : > { %v2332_v41 = vadd.f32 %v2331_v60, %v1843_v36  ;;  %3363 = vmatmul.bf16.gmra.mxu2 %v4375_v28  ;;  %v4794_v36 = vld [vmem:[#allocation3 + $0x50] sm:$0xf0] }
 0x1ea   : > { %v4387_v60 = vor.u32 %v4794_v36, %v4386_v19  ;;  %v6234_v28 = vld [vmem:[#allocation30_spill] sm:$0xff] }
 0x1eb   : > { %v6045_v58 = vadd.f32 %v2420_v25, %v2332_v41  ;;  %v4793_v41 = vld [vmem:[#allocation3 + $0x4c] sm:$0xf] }
 0x1ec   : > { %v1847_v21 = vpop.f32.mrf.mxu2 }
 0x1ed   : > { %3546 = vmatmul.bf16.gmra.mxu0 %v4395_v15  ;;  %v1848_v8 = vadd.f32 %v1847_v21, %v1759_v12  ;;  %v6236_v21 = vld [vmem:[#allocation9_spill] sm:$0xff] }
 0x1ee   : > { %v1760_v50 = vpop.f32.mrf.mxu1 }
 0x1ef   : > { %v2430_v27 = vpop.f32.mrf.mxu0  ;;  %v1761_v59 = vadd.f32 %v1760_v50, %v6233_v55  ;;  %v4418_v55 = vld [vmem:[#allocation3 + $0x80] sm:$0xf] }
 0x1f0   : > { %v2333_v47 = vpop.f32.mrf.mxu3 }
 0x1f1   : > { %v2334_v61 = vadd.f32 %v2333_v47, %v1845_v14  ;;  %v4388_v14 = vld [vmem:[#allocation3 + $0x54] sm:$0xf0]  ;;  %v6235_v47 = vld [vmem:[#allocation8_spill] sm:$0xff] }
 0x1f2   : > { %v4391_v6 = vor.u32 %v4793_v41, %v4388_v14  ;;  %v6238_v41 = vld [vmem:[#allocation14_spill] sm:$0xff] }
 0x1f3   : > { %v6050_v42 = vadd.f32 %v2422_v31, %v2334_v61  ;;  %v4119_v61 = vor.u32 %v6236_v21, %v6235_v47 }
 0x1f4   : > { %v1849_v2 = vpop.f32.mrf.mxu2 }
 0x1f5   : > { %3452 = vmatmul.bf16.gmra.mxu3 %v4379_v9  ;;  %v1850_v17 = vadd.f32 %v1849_v2, %v1761_v59  ;;  %v4801_v59 = vld [vmem:[#allocation3 + $0x88] sm:$0xf0] }
 0x1f6   : > { %v1763_v25 = vpop.f32.mrf.mxu1  ;;  %2478 = vmatmul.bf16.gmra.mxu1 %v4107_v39  ;;  %v6237_v39 = vld [vmem:[#allocation31_spill] sm:$0xff]  ;;  %v4419_v1 = vor.u32 %v4801_v59, %v4418_v55 }
 0x1f7   : > { %v2432_v62 = vpop.f32.mrf.mxu0  ;;  %v1764_v15 = vadd.f32 %v1763_v25, %v6234_v28 }
 0x1f8   : > { %v2336_v7 = vpop.f32.mrf.mxu3 }
 0x1f9   : > { %v2337_v33 = vadd.f32 %v2336_v7, %v1848_v8  ;;  %3368 = vmatmul.bf16.gmra.mxu2 %v4387_v60  ;;  %v4796_v60 = vld [vmem:[#allocation3 + $0x64] sm:$0xf] }
 0x1fb   : > { %v6053_v16 = vadd.f32 %v2425_v57, %v2337_v33 }
 0x1fc   : > { %v1852_v53 = vpop.f32.mrf.mxu2 }
 0x1fd   : > { %3551 = vmatmul.bf16.gmra.mxu0 %v4407_v29  ;;  %v1853_v12 = vadd.f32 %v1852_v53, %v1764_v15  ;;  %v4400_v29 = vld [vmem:[#allocation3 + $0x6c] sm:$0xf0] }
 0x1fe   : > { %v1765_v31 = vpop.f32.mrf.mxu1 }
 0x1ff   : > { %v2435_v23 = vpop.f32.mrf.mxu0  ;;  %v1766_v19 = vadd.f32 %v1765_v31, %v6237_v39 }
 0x200   : > { %v2338_v50 = vpop.f32.mrf.mxu3 }
 0x201   : > { %v2339_v24 = vadd.f32 %v2338_v50, %v1850_v17  ;;  %v4403_v50 = vor.u32 %v4796_v60, %v4400_v29  ;;  %v4799_v60 = vld [vmem:[#allocation3 + $0x7c] sm:$0xf]  ;;  %v4412_v29 = vld [vmem:[#allocation3 + $0x84] sm:$0xf0] }
 0x203   : > { %v6058_v9 = vadd.f32 %v2427_v3, %v2339_v24  ;;  %v6239_v24 = vld [vmem:[#allocation10_spill] sm:$0xff] }
 0x204   : > { %v1854_v36 = vpop.f32.mrf.mxu2 }
 0x205   : > { %3457 = vmatmul.bf16.gmra.mxu3 %v4391_v6  ;;  %v1855_v2 = vadd.f32 %v1854_v36, %v1766_v19  ;;  %v6240_v6 = vld [vmem:[#allocation11_spill] sm:$0xff]  ;;  %v4804_v36 = vld [vmem:[#allocation3 + $0xa0] sm:$0xf0] }
 0x206   : > { %v1768_v57 = vpop.f32.mrf.mxu1  ;;  %2483 = vmatmul.bf16.gmra.mxu1 %v4119_v61  ;;  %v4410_v61 = vld [vmem:[#allocation3 + $0x78] sm:$0xf] }
 0x207   : > { %v2437_v8 = vpop.f32.mrf.mxu0  ;;  %v1769_v14 = vadd.f32 %v1768_v57, %v6238_v41  ;;  %v6242_v41 = vld [vmem:[#allocation20_spill] sm:$0xff] }
 0x208   : > { %v2341_v25 = vpop.f32.mrf.mxu3 }
 0x209   : > { %v2342_v7 = vadd.f32 %v2341_v25, %v1853_v12  ;;  %3373 = vmatmul.bf16.gmra.mxu2 %v4399_v40  ;;  %v4131_v12 = vor.u32 %v6240_v6, %v6239_v24  ;;  %v4430_v25 = vld [vmem:[#allocation3 + $0x98] sm:$0xf]  ;;  %v6243_v24 = vld [vmem:[#allocation12_spill] sm:$0xff] }
 0x20b   : > { %v6061_v33 = vadd.f32 %v2430_v27, %v2342_v7  ;;  %v4411_v7 = vor.u32 %v4800_v37, %v4410_v61  ;;  %v4422_v37 = vld [vmem:[#allocation3 + $0x90] sm:$0xf] }
 0x20c   : > { %v1857_v28 = vpop.f32.mrf.mxu2 }
 0x20d   : > { %3556 = vmatmul.bf16.gmra.mxu0 %v4419_v1  ;;  %v1858_v53 = vadd.f32 %v1857_v28, %v1769_v14 }
 0x20e   : > { %v1770_v3 = vpop.f32.mrf.mxu1 }
 0x20f   : > { %v2440_v17 = vpop.f32.mrf.mxu0  ;;  %v1771_v39 = vadd.f32 %v1770_v3, %v6241_v26  ;;  %v4803_v26 = vld [vmem:[#allocation3 + $0x98] sm:$0xf0] }
 0x210   : > { %v2343_v31 = vpop.f32.mrf.mxu3 }
 0x211   : > { %v2344_v15 = vadd.f32 %v2343_v31, %v1855_v2  ;;  %v4431_v2 = vor.u32 %v4804_v36, %v4430_v25  ;;  %v4442_v25 = vld [vmem:[#allocation3 + $0xb0] sm:$0xf]  ;;  %v4807_v36 = vld [vmem:[#allocation3 + $0xb8] sm:$0xf0] }
 0x213   : > { %v6066_v47 = vadd.f32 %v2432_v62, %v2344_v15  ;;  %v4415_v15 = vor.u32 %v4799_v60, %v4412_v29 }
 0x214   : > { %v1859_v19 = vpop.f32.mrf.mxu2 }
 0x215   : > { %3462 = vmatmul.bf16.gmra.mxu3 %v4403_v50  ;;  %v1860_v59 = vadd.f32 %v1859_v19, %v1771_v39  ;;  %v6245_v39 = vld [vmem:[#allocation22_spill] sm:$0xff] }
 0x216   : > { %v1773_v27 = vpop.f32.mrf.mxu1  ;;  %2488 = vmatmul.bf16.gmra.mxu1 %v4131_v12 }
 0x217   : > { %v2442_v21 = vpop.f32.mrf.mxu0  ;;  %v1774_v14 = vadd.f32 %v1773_v27, %v6242_v41  ;;  %v4802_v41 = vld [vmem:[#allocation3 + $0x94] sm:$0xf] }
 0x218   : > { %v2346_v57 = vpop.f32.mrf.mxu3 }
 0x219   : > { %v2347_v55 = vadd.f32 %v2346_v57, %v1858_v53  ;;  %3378 = vmatmul.bf16.gmra.mxu2 %v4411_v7  ;;  %v6244_v53 = vld [vmem:[#allocation13_spill] sm:$0xff]  ;;  %v4423_v7 = vor.u32 %v4803_v26, %v4422_v37 }
 0x21a   : > { %v4143_v6 = vor.u32 %v6244_v53, %v6243_v24 }
 0x21b   : > { %v6069_v40 = vadd.f32 %v2435_v23, %v2347_v55 }
 0x21c   : > { %v1862_v31 = vpop.f32.mrf.mxu2 }
 0x21d   : > { %3561 = vmatmul.bf16.gmra.mxu0 %v4431_v2  ;;  %v1863_v50 = vadd.f32 %v1862_v31, %v1774_v14  ;;  %v4443_v2 = vor.u32 %v4807_v36, %v4442_v25  ;;  %v4424_v14 = vld [vmem:[#allocation3 + $0x9c] sm:$0xf0] }
 0x21e   : > { %v1775_v62 = vpop.f32.mrf.mxu1  ;;  %v4427_v24 = vor.u32 %v4802_v41, %v4424_v14 }
 0x21f   : > { %v2445_v1 = vpop.f32.mrf.mxu0  ;;  %v1776_v57 = vadd.f32 %v1775_v62, %v6245_v39 }
 0x220   : > { %v2348_v3 = vpop.f32.mrf.mxu3 }
 0x221   : > { %v2349_v28 = vadd.f32 %v2348_v3, %v1860_v59  ;;  %v6246_v3 = vld [vmem:[#allocation26_spill] sm:$0xff] }
 0x223   : > { %v6074_v12 = vadd.f32 %v2437_v8, %v2349_v28 }
 0x224   : > { %v1864_v19 = vpop.f32.mrf.mxu2 }
 0x225   : > { %3467 = vmatmul.bf16.gmra.mxu3 %v4415_v15  ;;  %v1865_v59 = vadd.f32 %v1864_v19, %v1776_v57  ;;  %v4434_v57 = vld [vmem:[#allocation3 + $0xa8] sm:$0xf] }
 0x226   : > { %v1778_v23 = vpop.f32.mrf.mxu1  ;;  %2493 = vmatmul.bf16.gmra.mxu1 %v4143_v6  ;;  %v6247_v6 = vld [vmem:[#allocation17_spill] sm:$0xff] }
 0x227   : > { %v2447_v61 = vpop.f32.mrf.mxu0  ;;  %v1779_v31 = vadd.f32 %v1778_v23, %v6246_v3  ;;  %v6250_v19 = vld [vmem:[#allocation29_spill] sm:$0xff] }
 0x228   : > { %v2351_v27 = vpop.f32.mrf.mxu3 }
 0x229   : > { %v2352_v55 = vadd.f32 %v2351_v27, %v1863_v50  ;;  %3383 = vmatmul.bf16.gmra.mxu2 %v4423_v7  ;;  %v6248_v50 = vld [vmem:[#allocation18_spill] sm:$0xff] }
 0x22a   : > { %v4155_v39 = vor.u32 %v6248_v50, %v6247_v6  ;;  %v4806_v27 = vld [vmem:[#allocation3 + $0xb0] sm:$0xf0] }
 0x22b   : > { %v6077_v60 = vadd.f32 %v2440_v17, %v2352_v55  ;;  %v4454_v55 = vld [vmem:[#allocation3 + $0xc8] sm:$0xf]  ;;  %v4810_v7 = vld [vmem:[#allocation3 + $0xd0] sm:$0xf0]  ;;  %v4435_v41 = vor.u32 %v4806_v27, %v4434_v57 }
 0x22c   : > { %v1867_v28 = vpop.f32.mrf.mxu2  ;;  %v4455_v14 = vor.u32 %v4810_v7, %v4454_v55 }
 0x22d   : > { %3566 = vmatmul.bf16.gmra.mxu0 %v4443_v2  ;;  %v1868_v53 = vadd.f32 %v1867_v28, %v1779_v31  ;;  %v4436_v28 = vld [vmem:[#allocation3 + $0xb4] sm:$0xf0] }
 0x22e   : > { %v1780_v8 = vpop.f32.mrf.mxu1 }
 0x22f   : > { %v2450_v29 = vpop.f32.mrf.mxu0  ;;  %v1781_v25 = vadd.f32 %v1780_v8, %v6250_v19 }
 0x230   : > { %v2353_v62 = vpop.f32.mrf.mxu3 }
 0x231   : > { %v2354_v15 = vadd.f32 %v2353_v62, %v1865_v59  ;;  %v4805_v62 = vld [vmem:[#allocation3 + $0xac] sm:$0xf] }
 0x233   : > { %v6082_v37 = vadd.f32 %v2442_v21, %v2354_v15  ;;  %v6251_v15 = vld [vmem:[#allocation32_spill] sm:$0xff] }
 0x234   : > { %v1869_v36 = vpop.f32.mrf.mxu2 }
 0x235   : > { %6249 = vst [vmem:[#allocation15_spill] sm:$0xff] %v6082_v37  ;;  %3472 = vmatmul.bf16.gmra.mxu3 %v4427_v24  ;;  %v1870_v2 = vadd.f32 %v1869_v36, %v1781_v25  ;;  %v6252_v37 = vld [vmem:[#allocation23_spill] sm:$0xff]  ;;  %v4809_v36 = vld [vmem:[#allocation3 + $0xc8] sm:$0xf0] }
 0x236   : > { %v1783_v17 = vpop.f32.mrf.mxu1  ;;  %2498 = vmatmul.bf16.gmra.mxu1 %v4155_v39  ;;  %v4439_v39 = vor.u32 %v4805_v62, %v4436_v28 }
 0x237   : > { %v2452_v26 = vpop.f32.mrf.mxu0  ;;  %v1784_v24 = vadd.f32 %v1783_v17, %v6251_v15 }
 0x238   : > { %v2356_v23 = vpop.f32.mrf.mxu3 }
 0x239   : > { %v2357_v59 = vadd.f32 %v2356_v23, %v1868_v53  ;;  %3388 = vmatmul.bf16.gmra.mxu2 %v4435_v41  ;;  %v6253_v53 = vld [vmem:[#allocation24_spill] sm:$0xff]  ;;  %v4813_v41 = vld [vmem:[#allocation3 + $0xe8] sm:$0xf0] }
 0x23a   : > { %v4167_v25 = vor.u32 %v6253_v53, %v6252_v37  ;;  %v4446_v23 = vld [vmem:[#allocation3 + $0xc0] sm:$0xf] }
 0x23b   : > { %v6085_v3 = vadd.f32 %v2445_v1, %v2357_v59  ;;  %v4466_v59 = vld [vmem:[#allocation3 + $0xe0] sm:$0xf]  ;;  %v4447_v62 = vor.u32 %v4809_v36, %v4446_v23 }
 0x23c   : > { %v1872_v6 = vpop.f32.mrf.mxu2  ;;  %v4467_v28 = vor.u32 %v4813_v41, %v4466_v59  ;;  %v6257_v53 = vld [vmem:[#allocation28_spill] sm:$0xff]  ;;  %v4478_v59 = vld [vmem:[#allocation3 + $0xf8] sm:$0xf] }
 0x23d   : > { %3571 = vmatmul.bf16.gmra.mxu0 %v4455_v14  ;;  %v1873_v19 = vadd.f32 %v1872_v6, %v1784_v24  ;;  %v4808_v24 = vld [vmem:[#allocation3 + $0xc4] sm:$0xf] }
 0x23e   : > { %v1785_v21 = vpop.f32.mrf.mxu1  ;;  %v4816_v41 = vld [vmem:[#allocation3 + $0x100] sm:$0xf0] }
 0x23f   : > { %v3532_v31 = vpop.f32.mrf.mxu0  ;;  %v1786_v55 = vadd.f32 %v1785_v21, %v5788_v22 }
 0x240   : > { %v2358_v8 = vpop.f32.mrf.mxu3 }
 0x241   : > { %v2359_v50 = vadd.f32 %v2358_v8, %v1870_v2  ;;  %v4448_v8 = vld [vmem:[#allocation3 + $0xcc] sm:$0xf0] }
 0x243   : > { %v6090_v57 = vadd.f32 %v2447_v61, %v2359_v50  ;;  %v4451_v50 = vor.u32 %v4808_v24, %v4448_v8  ;;  %v4460_v8 = vld [vmem:[#allocation3 + $0xe4] sm:$0xf0] }
 0x244   : > { %v1874_v7 = vpop.f32.mrf.mxu2 }
 0x245   : > { %6254 = vst [vmem:[#allocation4_spill] sm:$0xff] %v6090_v57  ;;  %3477 = vmatmul.bf16.gmra.mxu3 %v4439_v39  ;;  %v1875_v14 = vadd.f32 %v1874_v7, %v1786_v55  ;;  %v6256_v39 = vld [vmem:[#allocation27_spill] sm:$0xff]  ;;  %v4812_v55 = vld [vmem:[#allocation3 + $0xe0] sm:$0xf0] }
 0x246   : > { %v2464_v1 = vpop.f32.mrf.mxu1  ;;  %2503 = vmatmul.bf16.gmra.mxu1 %v4167_v25  ;;  %v4179_v25 = vor.u32 %v6257_v53, %v6256_v39 }
 0x247   : > { %v3534_v27 = vpop.f32.mrf.mxu0 }
 0x248   : > { %v2361_v17 = vpop.f32.mrf.mxu3 }
 0x249   : > { %v2362_v2 = vadd.f32 %v2361_v17, %v1873_v19  ;;  %3393 = vmatmul.bf16.gmra.mxu2 %v4447_v62  ;;  %v4479_v62 = vor.u32 %v4816_v41, %v4478_v59  ;;  %v6261_v59 = vld [vmem:[#allocation34_spill] sm:$0xff] }
 0x24b   : > { %v6093_v15 = vadd.f32 %v2450_v29, %v2362_v2  ;;  %v4458_v29 = vld [vmem:[#allocation3 + $0xd8] sm:$0xf] }
 0x24c   : > { %v3354_v22 = vpop.f32.mrf.mxu2  ;;  %v4459_v2 = vor.u32 %v4812_v55, %v4458_v29  ;;  %v6260_v55 = vld [vmem:[#allocation33_spill] sm:$0xff] }
 0x24d   : > { %6255 = vst [vmem:[#allocation5_spill] sm:$0xff] %v6093_v15  ;;  %3576 = vmatmul.bf16.gmra.mxu0 %v4467_v28  ;;  %v4191_v41 = vor.u32 %v6261_v59, %v6260_v55 }
 0x24e   : > { %v2466_v61 = vpop.f32.mrf.mxu1 }
 0x24f   : > { %v6095_v37 = vpop.f32.mrf.mxu0  ;;  %v2467_v15 = vadd.f32 %v2466_v61, %v5841_v46  ;;  %v4490_v61 = vld [vmem:[#allocation3 + $0x110] sm:$0xf] }
 0x250   : > { %v2363_v6 = vpop.f32.mrf.mxu3 }
 0x251   : > { %v2364_v21 = vadd.f32 %v2363_v6, %v1875_v14 }
 0x253   : > { %v6099_v19 = vadd.f32 %v2452_v26, %v2364_v21  ;;  %v4811_v26 = vld [vmem:[#allocation3 + $0xdc] sm:$0xf] }
 0x254   : > { %v3356_v7 = vpop.f32.mrf.mxu2  ;;  %v4463_v53 = vor.u32 %v4811_v26, %v4460_v8 }
 0x255   : > { %6258 = vst [vmem:[#allocation19_spill] sm:$0xff] %v6099_v19  ;;  %3482 = vmatmul.bf16.gmra.mxu3 %v4451_v50 }
 0x256   : > { %v2469_v23 = vpop.f32.mrf.mxu1  ;;  %2508 = vmatmul.bf16.gmra.mxu1 %v4179_v25  ;;  %v6259_v25 = vld [vmem:[#allocation37_spill] sm:$0xff] }
 0x257   : > { %v3539_v36 = vpop.f32.mrf.mxu0  ;;  %v2465_v19 = vadd.f32 %v2464_v1, %v6259_v25  ;;  %v4815_v1 = vld [vmem:[#allocation3 + $0xf8] sm:$0xf0]  ;;  %v2470_v59 = vadd.f32 %v2469_v23, %v5865_v11  ;;  %v4822_v11 = vld [vmem:[#allocation3 + $0x130] sm:$0xf0] }
 0x258   : > { %v3443_v17 = vpop.f32.mrf.mxu3 }
 0x259   : > { %v3444_v24 = vadd.f32 %v3443_v17, %v3354_v22  ;;  %3398 = vmatmul.bf16.gmra.mxu2 %v4459_v2 }
 0x25b   : > { %v3533_v50 = vadd.f32 %v3532_v31, %v3444_v24  ;;  %v4470_v31 = vld [vmem:[#allocation3 + $0xf0] sm:$0xf] }
 0x25c   : > { %v3359_v21 = vpop.f32.mrf.mxu2  ;;  %v4471_v24 = vor.u32 %v4815_v1, %v4470_v31  ;;  %v6263_v31 = vld [vmem:[#allocation36_spill] sm:$0xff] }
 0x25d   : > { %3581 = vmatmul.bf16.gmra.mxu0 %v4479_v62  ;;  %v3612_v17 = vadd.f32 %v3533_v50, %v2465_v19  ;;  %v4819_v62 = vld [vmem:[#allocation3 + $0x118] sm:$0xf0]  ;;  %v4472_v50 = vld [vmem:[#allocation3 + $0xfc] sm:$0xf0] }
 0x25e   : > { %v2471_v14 = vpop.f32.mrf.mxu1  ;;  %v4491_v26 = vor.u32 %v4819_v62, %v4490_v61  ;;  %v4482_v62 = vld [vmem:[#allocation3 + $0x108] sm:$0xf] }
 0x25f   : > { %v6101_v28 = vpop.f32.mrf.mxu0 }
 0x260   : > { %v3445_v6 = vpop.f32.mrf.mxu3 }
 0x261   : > { %v3446_v39 = vadd.f32 %v3445_v6, %v3356_v7  ;;  %v4814_v6 = vld [vmem:[#allocation3 + $0xf4] sm:$0xf] }
 0x262   : > { %v4475_v55 = vor.u32 %v4814_v6, %v4472_v50  ;;  %v4817_v50 = vld [vmem:[#allocation3 + $0x10c] sm:$0xf] }
 0x263   : > { %v3535_v29 = vadd.f32 %v3534_v27, %v3446_v39 }
 0x264   : > { %v3361_v27 = vpop.f32.mrf.mxu2 }
 0x265   : > { %v3613_v2 = vadd.f32 %v3535_v29, %v2467_v15  ;;  %3487 = vmatmul.bf16.gmra.mxu3 %v4463_v53 }
 0x266   : > { %v2474_v57 = vpop.f32.mrf.mxu1  ;;  %2513 = vmatmul.bf16.gmra.mxu1 %v4191_v41  ;;  %v2472_v41 = vadd.f32 %v2471_v14, %v5877_v35 }
 0x267   : > { %v3544_v22 = vpop.f32.mrf.mxu0  ;;  %v4859_v7 = vpack.c.bf16 %v3613_v2, %v3612_v17  ;;  %v6262_v2 = vld [vmem:[#allocation35_spill] sm:$0xff] }
 0x268   : > { %v3448_v46 = vpop.f32.mrf.mxu3  ;;  %v4203_v1 = vor.u32 %v6263_v31, %v6262_v2 }
 0x269   : > { %4860 = vst [vmem:[%s6111_s29] sm:$0xff] %v4859_v7   ;;  %v3449_v8 = vadd.f32 %v3448_v46, %v3359_v21  ;;  %3403 = vmatmul.bf16.gmra.mxu2 %v4471_v24  ;;  %v4818_v24 = vld [vmem:[#allocation3 + $0x110] sm:$0xf0] }
 0x26a   : > { %v4483_v35 = vor.u32 %v4818_v24, %v4482_v62  ;;  %v4494_v24 = vld [vmem:[#allocation3 + $0x120] sm:$0xf] }
 0x26b   : > { %v3538_v25 = vadd.f32 %v6095_v37, %v3449_v8  ;;  %v4502_v8 = vld [vmem:[#allocation3 + $0x128] sm:$0xf] }
 0x26c   : > { %v3364_v53 = vpop.f32.mrf.mxu2  ;;  %v4503_v23 = vor.u32 %v4822_v11, %v4502_v8  ;;  %v4514_v8 = vld [vmem:[#allocation3 + $0x140] sm:$0xf]  ;;  %v4496_v11 = vld [vmem:[#allocation3 + $0x12c] sm:$0xf0] }
 0x26d   : > { %3586 = vmatmul.bf16.gmra.mxu0 %v4491_v26  ;;  %v3614_v46 = vadd.f32 %v3538_v25, %v2470_v59 }
 0x26e   : > { %v2476_v19 = vpop.f32.mrf.mxu1 }
 0x26f   : > { %v6114_v15 = vpop.f32.mrf.mxu0  ;;  %v2477_v2 = vadd.f32 %v2476_v19, %v5925_v43 }
 0x270   : > { %v3450_v39 = vpop.f32.mrf.mxu3 }
 0x271   : > { %v3451_v29 = vadd.f32 %v3450_v39, %v3361_v27  ;;  %v4484_v39 = vld [vmem:[#allocation3 + $0x114] sm:$0xf0] }
 0x273   : > { %v3540_v17 = vadd.f32 %v3539_v36, %v3451_v29 }
 0x274   : > { %v3366_v27 = vpop.f32.mrf.mxu2 }
 0x275   : > { %v3615_v61 = vadd.f32 %v3540_v17, %v2472_v41  ;;  %3492 = vmatmul.bf16.gmra.mxu3 %v4475_v55  ;;  %v4487_v41 = vor.u32 %v4817_v50, %v4484_v39  ;;  %v2475_v17 = vadd.f32 %v2474_v57, %v5913_v0  ;;  %v4825_v0 = vld [vmem:[#allocation3 + $0x148] sm:$0xf0] }
 0x276   : > { %v2479_v21 = vpop.f32.mrf.mxu1  ;;  %2518 = vmatmul.bf16.gmra.mxu1 %v4203_v1  ;;  %v4215_v1 = vor.u32 %v5862_v34, %v5858_v30  ;;  %v4515_v57 = vor.u32 %v4825_v0, %v4514_v8  ;;  %v4820_v34 = vld [vmem:[#allocation3 + $0x124] sm:$0xf] }
 0x277   : > { %v3549_v7 = vpop.f32.mrf.mxu0  ;;  %v4864_v26 = vpack.c.bf16 %v3615_v61, %v3614_v46  ;;  %v4499_v39 = vor.u32 %v4820_v34, %v4496_v11  ;;  %v4239_v11 = vor.u32 %v5946_v38, %v5942_v52  ;;  %v4826_v52 = vld [vmem:[#allocation3 + $0x154] sm:$0xf]  ;;  %v4520_v38 = vld [vmem:[#allocation3 + $0x15c] sm:$0xf0] }
 0x278   : > { %v3453_v37 = vpop.f32.mrf.mxu3 }
 0x279   : > { %4936 = vst [vmem:[%s6111_s29 + $0x8] sm:$0xff] %v4864_v26   ;;  %v3454_v6 = vadd.f32 %v3453_v37, %v3364_v53  ;;  %3408 = vmatmul.bf16.gmra.mxu2 %v4483_v35  ;;  %v4821_v26 = vld [vmem:[#allocation3 + $0x128] sm:$0xf0] }
 0x27a   : > { %v4495_v43 = vor.u32 %v4821_v26, %v4494_v24  ;;  %v4526_v26 = vld [vmem:[#allocation3 + $0x158] sm:$0xf] }
 0x27b   : > { %v3543_v55 = vadd.f32 %v6101_v28, %v3454_v6 }
 0x27c   : > { %v3369_v29 = vpop.f32.mrf.mxu2 }
 0x27d   : > { %3591 = vmatmul.bf16.gmra.mxu0 %v4503_v23  ;;  %v3616_v61 = vadd.f32 %v3543_v55, %v2475_v17 }
 0x27e   : > { %v2481_v36 = vpop.f32.mrf.mxu1 }
 0x27f   : > { %v6122_v14 = vpop.f32.mrf.mxu0  ;;  %v2482_v55 = vadd.f32 %v2481_v36, %v5961_v32 }
 0x280   : > { %v3455_v25 = vpop.f32.mrf.mxu3 }
 0x281   : > { %v3456_v59 = vadd.f32 %v3455_v25, %v3366_v27  ;;  %v2480_v25 = vadd.f32 %v2479_v21, %v5949_v45  ;;  %v4828_v45 = vld [vmem:[#allocation3 + $0x160] sm:$0xf0] }
 0x282   : > { %v4527_v21 = vor.u32 %v4828_v45, %v4526_v26 }
 0x283   : > { %v3545_v31 = vadd.f32 %v3544_v22, %v3456_v59 }
 0x284   : > { %v3371_v27 = vpop.f32.mrf.mxu2 }
 0x285   : > { %v3617_v62 = vadd.f32 %v3545_v31, %v2477_v2  ;;  %3497 = vmatmul.bf16.gmra.mxu3 %v4487_v41  ;;  %v4227_v41 = vor.u32 %v5910_v44, %v5906_v20  ;;  %v4823_v44 = vld [vmem:[#allocation3 + $0x13c] sm:$0xf] }
 0x286   : > { %v2484_v53 = vpop.f32.mrf.mxu1  ;;  %2523 = vmatmul.bf16.gmra.mxu1 %v4215_v1  ;;  %v4506_v1 = vld [vmem:[#allocation3 + $0x138] sm:$0xf] }
 0x287   : > { %v3554_v46 = vpop.f32.mrf.mxu0  ;;  %v4869_v37 = vpack.c.bf16 %v3617_v62, %v3616_v61  ;;  %v4824_v61 = vld [vmem:[#allocation3 + $0x140] sm:$0xf0] }
 0x288   : > { %v3458_v28 = vpop.f32.mrf.mxu3  ;;  %v4507_v32 = vor.u32 %v4824_v61, %v4506_v1 }
 0x289   : > { %4937 = vst [vmem:[%s6111_s29 + $0x10] sm:$0xff] %v4869_v37   ;;  %v3459_v30 = vadd.f32 %v3458_v28, %v3369_v29  ;;  %3413 = vmatmul.bf16.gmra.mxu2 %v4495_v43  ;;  %v4508_v37 = vld [vmem:[#allocation3 + $0x144] sm:$0xf0] }
 0x28a   : > { %v4511_v43 = vor.u32 %v4823_v44, %v4508_v37 }
 0x28b   : > { %v3548_v6 = vadd.f32 %v6114_v15, %v3459_v30 }
 0x28c   : > { %v3374_v23 = vpop.f32.mrf.mxu2 }
 0x28d   : > { %3596 = vmatmul.bf16.gmra.mxu0 %v4515_v57  ;;  %v3618_v2 = vadd.f32 %v3548_v6, %v2480_v25  ;;  %v2485_v57 = vadd.f32 %v2484_v53, %v5993_v56  ;;  %v4827_v25 = vld [vmem:[#allocation3 + $0x158] sm:$0xf0] }
 0x28e   : > { %v2486_v22 = vpop.f32.mrf.mxu1  ;;  %v4831_v56 = vld [vmem:[#allocation3 + $0x178] sm:$0xf0] }
 0x28f   : > { %v6130_v19 = vpop.f32.mrf.mxu0  ;;  %v2487_v30 = vadd.f32 %v2486_v22, %v6003_v54 }
 0x290   : > { %v3460_v35 = vpop.f32.mrf.mxu3 }
 0x291   : > { %v3461_v50 = vadd.f32 %v3460_v35, %v3371_v27 }
 0x293   : > { %v3550_v59 = vadd.f32 %v3549_v7, %v3461_v50 }
 0x294   : > { %v3376_v24 = vpop.f32.mrf.mxu2 }
 0x295   : > { %v3619_v31 = vadd.f32 %v3550_v59, %v2482_v55  ;;  %3502 = vmatmul.bf16.gmra.mxu3 %v4499_v39  ;;  %v4518_v39 = vld [vmem:[#allocation3 + $0x150] sm:$0xf] }
 0x296   : > { %v2489_v29 = vpop.f32.mrf.mxu1  ;;  %2528 = vmatmul.bf16.gmra.mxu1 %v4227_v41  ;;  %v4538_v41 = vld [vmem:[#allocation3 + $0x170] sm:$0xf]  ;;  %v4519_v54 = vor.u32 %v4827_v25, %v4518_v39 }
 0x297   : > { %v3559_v17 = vpop.f32.mrf.mxu0  ;;  %v4874_v62 = vpack.c.bf16 %v3619_v31, %v3618_v2  ;;  %v4539_v53 = vor.u32 %v4831_v56, %v4538_v41 }
 0x298   : > { %v3463_v15 = vpop.f32.mrf.mxu3 }
 0x299   : > { %4938 = vst [vmem:[%s6111_s29 + $0x18] sm:$0xff] %v4874_v62   ;;  %v3464_v20 = vadd.f32 %v3463_v15, %v3374_v23  ;;  %3418 = vmatmul.bf16.gmra.mxu2 %v4507_v32  ;;  %v4523_v15 = vor.u32 %v4826_v52, %v4520_v38  ;;  %v6264_v32 = vld [vmem:[#allocation38_spill] sm:$0xff] }
 0x29b   : > { %v3553_v8 = vadd.f32 %v6122_v14, %v3464_v20 }
 0x29c   : > { %v3379_v27 = vpop.f32.mrf.mxu2 }
 0x29d   : > { %3601 = vmatmul.bf16.gmra.mxu0 %v4527_v21  ;;  %v3620_v6 = vadd.f32 %v3553_v8, %v2485_v57  ;;  %v4251_v21 = vor.u32 %v6264_v32, %v5986_v13  ;;  %v4830_v8 = vld [vmem:[#allocation3 + $0x170] sm:$0xf0] }
 0x29e   : > { %v2491_v7 = vpop.f32.mrf.mxu1 }
 0x29f   : > { %v6138_v36 = vpop.f32.mrf.mxu0  ;;  %v2492_v26 = vadd.f32 %v2491_v7, %v6015_v18  ;;  %v4532_v7 = vld [vmem:[#allocation3 + $0x174] sm:$0xf0] }
 0x2a0   : > { %v3465_v28 = vpop.f32.mrf.mxu3 }
 0x2a1   : > { %v3466_v0 = vadd.f32 %v3465_v28, %v3376_v24  ;;  %v2490_v24 = vadd.f32 %v2489_v29, %v6009_v49 }
 0x2a3   : > { %v3555_v34 = vadd.f32 %v3554_v46, %v3466_v0 }
 0x2a4   : > { %v3381_v59 = vpop.f32.mrf.mxu2 }
 0x2a5   : > { %v3621_v50 = vadd.f32 %v3555_v34, %v2487_v30  ;;  %3507 = vmatmul.bf16.gmra.mxu3 %v4511_v43 }
 0x2a6   : > { %v2494_v35 = vpop.f32.mrf.mxu1  ;;  %2533 = vmatmul.bf16.gmra.mxu1 %v4239_v11 }
 0x2a7   : > { %v3564_v23 = vpop.f32.mrf.mxu0  ;;  %v4879_v55 = vpack.c.bf16 %v3621_v50, %v3620_v6  ;;  %v2495_v50 = vadd.f32 %v2494_v35, %v6019_v4 }
 0x2a8   : > { %v3468_v14 = vpop.f32.mrf.mxu3 }
 0x2a9   : > { %4939 = vst [vmem:[%s6111_s29 + $0x20] sm:$0xff] %v4879_v55   ;;  %v3469_v2 = vadd.f32 %v3468_v14, %v3379_v27  ;;  %3423 = vmatmul.bf16.gmra.mxu2 %v4519_v54  ;;  %v4530_v27 = vld [vmem:[#allocation3 + $0x168] sm:$0xf] }
 0x2aa   : > { %v4531_v57 = vor.u32 %v4830_v8, %v4530_v27 }
 0x2ab   : > { %v3558_v61 = vadd.f32 %v6130_v19, %v3469_v2 }
 0x2ac   : > { %v3384_v1 = vpop.f32.mrf.mxu2 }
 0x2ad   : > { %3606 = vmatmul.bf16.gmra.mxu0 %v4539_v53  ;;  %v3622_v37 = vadd.f32 %v3558_v61, %v2490_v24 }
 0x2ae   : > { %v2496_v46 = vpop.f32.mrf.mxu1 }
 0x2af   : > { %v3567_v22 = vpop.f32.mrf.mxu0  ;;  %v2497_v39 = vadd.f32 %v2496_v46, %v6026_v51 }
 0x2b0   : > { %v3470_v31 = vpop.f32.mrf.mxu3 }
 0x2b1   : > { %v3471_v62 = vadd.f32 %v3470_v31, %v3381_v59 }
 0x2b3   : > { %v3560_v45 = vadd.f32 %v3559_v17, %v3471_v62  ;;  %v4829_v17 = vld [vmem:[#allocation3 + $0x16c] sm:$0xf] }
 0x2b4   : > { %v3386_v43 = vpop.f32.mrf.mxu2  ;;  %v4535_v6 = vor.u32 %v4829_v17, %v4532_v7 }
 0x2b5   : > { %v3623_v28 = vadd.f32 %v3560_v45, %v2492_v26  ;;  %3512 = vmatmul.bf16.gmra.mxu3 %v4523_v15 }
 0x2b6   : > { %v2499_v20 = vpop.f32.mrf.mxu1  ;;  %2538 = vmatmul.bf16.gmra.mxu1 %v4251_v21 }
 0x2b7   : > { %v3569_v44 = vpop.f32.mrf.mxu0  ;;  %v4884_v0 = vpack.c.bf16 %v3623_v28, %v3622_v37  ;;  %v2500_v51 = vadd.f32 %v2499_v20, %v6029_v10 }
 0x2b8   : > { %v3473_v19 = vpop.f32.mrf.mxu3 }
 0x2b9   : > { %4940 = vst [vmem:[%s6111_s29 + $0x28] sm:$0xff] %v4884_v0   ;;  %v3474_v18 = vadd.f32 %v3473_v19, %v3384_v1  ;;  %3428 = vmatmul.bf16.gmra.mxu2 %v4531_v57 }
 0x2bb   : > { %v3563_v34 = vadd.f32 %v6138_v36, %v3474_v18 }
 0x2bc   : > { %v3389_v30 = vpop.f32.mrf.mxu2 }
 0x2bd   : > { %v3624_v14 = vadd.f32 %v3563_v34, %v2495_v50 }
 0x2be   : > { %v2501_v49 = vpop.f32.mrf.mxu1 }
 0x2bf   : > { %v3572_v29 = vpop.f32.mrf.mxu0  ;;  %v2502_v35 = vadd.f32 %v2501_v49, %v6034_v5 }
 0x2c0   : > { %v3475_v13 = vpop.f32.mrf.mxu3 }
 0x2c1   : > { %v3476_v11 = vadd.f32 %v3475_v13, %v3386_v43 }
 0x2c3   : > { %v3565_v25 = vadd.f32 %v3564_v23, %v3476_v11 }
 0x2c4   : > { %v3391_v53 = vpop.f32.mrf.mxu2 }
 0x2c5   : > { %v3625_v59 = vadd.f32 %v3565_v25, %v2497_v39  ;;  %3517 = vmatmul.bf16.gmra.mxu3 %v4535_v6 }
 0x2c6   : > { %v2504_v55 = vpop.f32.mrf.mxu1 }
 0x2c7   : > { %v3574_v41 = vpop.f32.mrf.mxu0  ;;  %v4889_v56 = vpack.c.bf16 %v3625_v59, %v3624_v14  ;;  %v2505_v10 = vadd.f32 %v2504_v55, %v6037_v48 }
 0x2c8   : > { %v3478_v54 = vpop.f32.mrf.mxu3 }
 0x2c9   : > { %4941 = vst [vmem:[%s6111_s29 + $0x30] sm:$0xff] %v4889_v56   ;;  %v3479_v52 = vadd.f32 %v3478_v54, %v3389_v30 }
 0x2cb   : > { %v3568_v1 = vadd.f32 %v3567_v22, %v3479_v52 }
 0x2cc   : > { %v3394_v31 = vpop.f32.mrf.mxu2 }
 0x2cd   : > { %v3626_v61 = vadd.f32 %v3568_v1, %v2500_v51 }
 0x2ce   : > { %v2506_v2 = vpop.f32.mrf.mxu1 }
 0x2cf   : > { %v3577_v36 = vpop.f32.mrf.mxu0  ;;  %v2507_v5 = vadd.f32 %v2506_v2, %v6042_v63 }
 0x2d0   : > { %v3480_v38 = vpop.f32.mrf.mxu3 }
 0x2d1   : > { %v3481_v4 = vadd.f32 %v3480_v38, %v3391_v53 }
 0x2d3   : > { %v3570_v23 = vadd.f32 %v3569_v44, %v3481_v4 }
 0x2d4   : > { %v3396_v26 = vpop.f32.mrf.mxu2 }
 0x2d5   : > { %v3627_v62 = vadd.f32 %v3570_v23, %v2502_v35 }
 0x2d6   : > { %v2509_v46 = vpop.f32.mrf.mxu1 }
 0x2d7   : > { %v4894_v15 = vpack.c.bf16 %v3627_v62, %v3626_v61  ;;  %v3579_v45 = vpop.f32.mrf.mxu0  ;;  %v2510_v48 = vadd.f32 %v2509_v46, %v6045_v58 }
 0x2d8   : > { %v3483_v24 = vpop.f32.mrf.mxu3 }
 0x2d9   : > { %4942 = vst [vmem:[%s6111_s29 + $0x38] sm:$0xff] %v4894_v15   ;;  %v3484_v21 = vadd.f32 %v3483_v24, %v3394_v31 }
 0x2db   : > { %v3573_v22 = vadd.f32 %v3572_v29, %v3484_v21 }
 0x2dc   : > { %v3399_v28 = vpop.f32.mrf.mxu2 }
 0x2dd   : > { %v3628_v0 = vadd.f32 %v3573_v22, %v2505_v10 }
 0x2de   : > { %v2511_v32 = vpop.f32.mrf.mxu1 }
 0x2df   : > { %v3582_v44 = vpop.f32.mrf.mxu0  ;;  %v2512_v63 = vadd.f32 %v2511_v32, %v6050_v42 }
 0x2e0   : > { %v3485_v37 = vpop.f32.mrf.mxu3 }
 0x2e1   : > { %v3486_v27 = vadd.f32 %v3485_v37, %v3396_v26 }
 0x2e3   : > { %v3575_v20 = vadd.f32 %v3574_v41, %v3486_v27 }
 0x2e4   : > { %v3401_v49 = vpop.f32.mrf.mxu2 }
 0x2e5   : > { %v3629_v19 = vadd.f32 %v3575_v20, %v2507_v5 }
 0x2e6   : > { %v2514_v8 = vpop.f32.mrf.mxu1 }
 0x2e7   : > { %v4899_v43 = vpack.c.bf16 %v3629_v19, %v3628_v0  ;;  %v3584_v7 = vpop.f32.mrf.mxu0  ;;  %v2515_v58 = vadd.f32 %v2514_v8, %v6053_v16 }
 0x2e8   : > { %v3488_v57 = vpop.f32.mrf.mxu3 }
 0x2e9   : > { %4943 = vst [vmem:[%s6111_s29 + $0x40] sm:$0xff] %v4899_v43   ;;  %v3489_v17 = vadd.f32 %v3488_v57, %v3399_v28 }
 0x2eb   : > { %v3578_v30 = vadd.f32 %v3577_v36, %v3489_v17 }
 0x2ec   : > { %v3404_v29 = vpop.f32.mrf.mxu2 }
 0x2ed   : > { %v3630_v6 = vadd.f32 %v3578_v30, %v2510_v48 }
 0x2ee   : > { %v2516_v18 = vpop.f32.mrf.mxu1 }
 0x2ef   : > { %v3587_v55 = vpop.f32.mrf.mxu0  ;;  %v2517_v42 = vadd.f32 %v2516_v18, %v6058_v9 }
 0x2f0   : > { %v3490_v13 = vpop.f32.mrf.mxu3 }
 0x2f1   : > { %v3491_v34 = vadd.f32 %v3490_v13, %v3401_v49 }
 0x2f3   : > { %v3580_v11 = vadd.f32 %v3579_v45, %v3491_v34 }
 0x2f4   : > { %v3406_v59 = vpop.f32.mrf.mxu2 }
 0x2f5   : > { %v3631_v50 = vadd.f32 %v3580_v11, %v2512_v63 }
 0x2f6   : > { %v2519_v39 = vpop.f32.mrf.mxu1 }
 0x2f7   : > { %v4904_v25 = vpack.c.bf16 %v3631_v50, %v3630_v6  ;;  %v3589_v36 = vpop.f32.mrf.mxu0  ;;  %v2520_v45 = vadd.f32 %v2519_v39, %v6061_v33  ;;  %v6265_v39 = vld [vmem:[#allocation15_spill] sm:$0xff] }
 0x2f8   : > { %v3493_v14 = vpop.f32.mrf.mxu3 }
 0x2f9   : > { %4944 = vst [vmem:[%s6111_s29 + $0x48] sm:$0xff] %v4904_v25   ;;  %v3494_v41 = vadd.f32 %v3493_v14, %v3404_v29 }
 0x2fb   : > { %v3583_v2 = vadd.f32 %v3582_v44, %v3494_v41 }
 0x2fc   : > { %v3409_v53 = vpop.f32.mrf.mxu2 }
 0x2fd   : > { %v3632_v31 = vadd.f32 %v3583_v2, %v2515_v58 }
 0x2fe   : > { %v2521_v56 = vpop.f32.mrf.mxu1 }
 0x2ff   : > { %v3592_v46 = vpop.f32.mrf.mxu0  ;;  %v2522_v16 = vadd.f32 %v2521_v56, %v6066_v47 }
 0x300   : > { %v3495_v54 = vpop.f32.mrf.mxu3 }
 0x301   : > { %v3496_v52 = vadd.f32 %v3495_v54, %v3406_v59 }
 0x303   : > { %v3585_v38 = vadd.f32 %v3584_v7, %v3496_v52 }
 0x304   : > { %v3411_v35 = vpop.f32.mrf.mxu2 }
 0x305   : > { %v3633_v1 = vadd.f32 %v3585_v38, %v2517_v42 }
 0x306   : > { %v2524_v23 = vpop.f32.mrf.mxu1 }
 0x307   : > { %v4909_v4 = vpack.c.bf16 %v3633_v1, %v3632_v31  ;;  %v3594_v28 = vpop.f32.mrf.mxu0  ;;  %v2525_v33 = vadd.f32 %v2524_v23, %v6069_v40 }
 0x308   : > { %v3498_v51 = vpop.f32.mrf.mxu3 }
 0x309   : > { %4945 = vst [vmem:[%s6111_s29 + $0x50] sm:$0xff] %v4909_v4   ;;  %v3499_v61 = vadd.f32 %v3498_v51, %v3409_v53 }
 0x30b   : > { %v3588_v24 = vadd.f32 %v3587_v55, %v3499_v61 }
 0x30c   : > { %v3414_v15 = vpop.f32.mrf.mxu2 }
 0x30d   : > { %v3634_v21 = vadd.f32 %v3588_v24, %v2520_v45 }
 0x30e   : > { %v2526_v32 = vpop.f32.mrf.mxu1 }
 0x30f   : > { %v3597_v44 = vpop.f32.mrf.mxu0  ;;  %v2527_v47 = vadd.f32 %v2526_v32, %v6074_v12 }
 0x310   : > { %v3500_v62 = vpop.f32.mrf.mxu3 }
 0x311   : > { %v3501_v26 = vadd.f32 %v3500_v62, %v3411_v35 }
 0x313   : > { %v3590_v9 = vadd.f32 %v3589_v36, %v3501_v26 }
 0x314   : > { %v3416_v10 = vpop.f32.mrf.mxu2 }
 0x315   : > { %v3635_v37 = vadd.f32 %v3590_v9, %v2522_v16 }
 0x316   : > { %v2529_v20 = vpop.f32.mrf.mxu1 }
 0x317   : > { %v4914_v22 = vpack.c.bf16 %v3635_v37, %v3634_v21  ;;  %v3599_v30 = vpop.f32.mrf.mxu0  ;;  %v2530_v40 = vadd.f32 %v2529_v20, %v6077_v60  ;;  %v6266_v60 = vld [vmem:[#allocation4_spill] sm:$0xff]  ;;  %v6268_v37 = vld [vmem:[#allocation19_spill] sm:$0xff] }
 0x318   : > { %v3503_v27 = vpop.f32.mrf.mxu3 }
 0x319   : > { %4946 = vst [vmem:[%s6111_s29 + $0x58] sm:$0xff] %v4914_v22   ;;  %v3504_v5 = vadd.f32 %v3503_v27, %v3414_v15 }
 0x31b   : > { %v3593_v19 = vadd.f32 %v3592_v46, %v3504_v5 }
 0x31c   : > { %v3419_v0 = vpop.f32.mrf.mxu2 }
 0x31d   : > { %v3636_v49 = vadd.f32 %v3593_v19, %v2525_v33 }
 0x31e   : > { %v2531_v7 = vpop.f32.mrf.mxu1 }
 0x31f   : > { %v2532_v12 = vadd.f32 %v2531_v7, %v6265_v39  ;;  %v3602_v55 = vpop.f32.mrf.mxu0 }
 0x320   : > { %v3505_v8 = vpop.f32.mrf.mxu3 }
 0x321   : > { %v3506_v43 = vadd.f32 %v3505_v8, %v3416_v10 }
 0x323   : > { %v3595_v57 = vadd.f32 %v3594_v28, %v3506_v43 }
 0x324   : > { %v3421_v29 = vpop.f32.mrf.mxu2 }
 0x325   : > { %v3637_v18 = vadd.f32 %v3595_v57, %v2527_v47 }
 0x326   : > { %v2534_v50 = vpop.f32.mrf.mxu1 }
 0x327   : > { %v4919_v17 = vpack.c.bf16 %v3637_v18, %v3636_v49  ;;  %v3604_v52 = vpop.f32.mrf.mxu0  ;;  %v2535_v38 = vadd.f32 %v2534_v50, %v6085_v3  ;;  %v6267_v3 = vld [vmem:[#allocation5_spill] sm:$0xff] }
 0x328   : > { %v3508_v13 = vpop.f32.mrf.mxu3 }
 0x329   : > { %4947 = vst [vmem:[%s6111_s29 + $0x60] sm:$0xff] %v4919_v17   ;;  %v3509_v34 = vadd.f32 %v3508_v13, %v3419_v0 }
 0x32b   : > { %v3598_v11 = vadd.f32 %v3597_v44, %v3509_v34 }
 0x32c   : > { %v3424_v63 = vpop.f32.mrf.mxu2 }
 0x32d   : > { %v3638_v14 = vadd.f32 %v3598_v11, %v2530_v40 }
 0x32e   : > { %v2536_v53 = vpop.f32.mrf.mxu1 }
 0x32f   : > { %v2537_v31 = vadd.f32 %v2536_v53, %v6266_v60  ;;  %v3607_v61 = vpop.f32.mrf.mxu0 }
 0x330   : > { %v3510_v48 = vpop.f32.mrf.mxu3 }
 0x331   : > { %v3511_v6 = vadd.f32 %v3510_v48, %v3421_v29 }
 0x333   : > { %v3600_v25 = vadd.f32 %v3599_v30, %v3511_v6 }
 0x334   : > { %v3426_v54 = vpop.f32.mrf.mxu2 }
 0x335   : > { %v3639_v59 = vadd.f32 %v3600_v25, %v2532_v12 }
 0x336   : > { %v2539_v23 = vpop.f32.mrf.mxu1 }
 0x337   : > { %v4924_v41 = vpack.c.bf16 %v3639_v59, %v3638_v14  ;;  %v3609_v32 = vpop.f32.mrf.mxu0  ;;  %v2540_v21 = vadd.f32 %v2539_v23, %v6267_v3 }
 0x338   : > { %v3513_v56 = vpop.f32.mrf.mxu3 }
 0x339   : > { %4948 = vst [vmem:[%s6111_s29 + $0x68] sm:$0xff] %v4924_v41   ;;  %v3514_v2 = vadd.f32 %v3513_v56, %v3424_v63 }
 0x33b   : > { %v3603_v58 = vadd.f32 %v3602_v55, %v3514_v2 }
 0x33c   : > { %v3429_v4 = vpop.f32.mrf.mxu2 }
 0x33d   : > { %v3640_v51 = vadd.f32 %v3603_v58, %v2535_v38 }
 0x33e   : > { %v2541_v26 = vpop.f32.mrf.mxu1 }
 0x33f   : > { %v2542_v28 = vadd.f32 %v2541_v26, %v6268_v37 }
 0x340   : > { %v3515_v36 = vpop.f32.mrf.mxu3 }
 0x341   : > { %v3516_v42 = vadd.f32 %v3515_v36, %v3426_v54 }
 0x343   : > { %v3605_v1 = vadd.f32 %v3604_v52, %v3516_v42 }
 0x344   : > { %v3431_v24 = vpop.f32.mrf.mxu2 }
 0x345   : > { %v3641_v35 = vadd.f32 %v3605_v1, %v2537_v31 }
 0x347   : > { %v4929_v46 = vpack.c.bf16 %v3641_v35, %v3640_v51 }
 0x348   : > { %v3518_v62 = vpop.f32.mrf.mxu3 }
 0x349   : > { %4949 = vst [vmem:[%s6111_s29 + $0x70] sm:$0xff] %v4929_v46   ;;  %v3519_v15 = vadd.f32 %v3518_v62, %v3429_v4 }
 0x34b   : > { %v3608_v16 = vadd.f32 %v3607_v61, %v3519_v15 }
 0x34d   : > { %v3642_v27 = vadd.f32 %v3608_v16, %v2540_v21 }
 0x350   : > { %v3520_v45 = vpop.f32.mrf.mxu3 }
 0x351   : > { %v3521_v9 = vadd.f32 %v3520_v45, %v3431_v24 }
 0x353   : > { %v3610_v22 = vadd.f32 %v3609_v32, %v3521_v9 }
 0x355   : > { %v3643_v10 = vadd.f32 %v3610_v22, %v2542_v28 }
 0x357   : > { %v4934_v5 = vpack.c.bf16 %v3643_v10, %v3642_v27 }
 0x359   : > { %4950 = vst [vmem:[%s6111_s29 + $0x78] sm:$0xff] %v4934_v5  }
 0x35a PF: > { %s14_s15 = sadd.s32 1, %s4993_s15  }
 0x35b   : > { %p11_p4 = scmp.ge.s32.totalorder %s14_s15, 4  }
 0x35d   :  { %13 = sbr.rel (!%p11_p4) target bundleno = 1 (0x1), region = 69 }

// kernel: wide_basic_forward.3
= control target key start
LH: loop header
LB: loop body
LE: loop exit
PB: predicated region body
PF: predicated region fallthrough
CT: control target
= control target key end

     0   :  { %s5441_s24 = smov 0   ;;  %s6899_s0 = inlined_call_operand.vmem [shape: bf16[2,16,16,128], index: 0, kind: input, shape index: {}]   ;;  %s6900_s1 = inlined_call_operand.vmem [shape: f32[1,128], index: 1, kind: input, shape index: {}]   ;;  %s6901_s2 = inlined_call_operand.vmem [shape: f32[1,128], index: 2, kind: input, shape index: {}]   ;;  %s6902_s3 = inlined_call_operand.vmem [shape: bf16[1152,128], index: 3, kind: input, shape index: {}]   ;;  %s6903_s4 = inlined_call_operand.vmem [shape: f32[1,128], index: 4, kind: input, shape index: {}]   ;;  %s6904_s5 = inlined_call_operand.vmem [shape: f32[2,16,16,128], index: 5, kind: input, shape index: {}]   ;;  %s6905_s6 = inlined_call_operand.vmem [shape: bf16[128,128], index: 6, kind: input, shape index: {}]   ;;  %s6906_s7 = inlined_call_operand.vmem [shape: f32[2,256,128], index: 7, kind: output, shape index: {}]  }
   0x1 LB: > { %s4145_s25 = sadd.s32 4294967295, %s5397_s24   ;;  %p4149_p0 = scmp.ge.s32.totalorder %s5397_s24, 1  ;;  %s5397_s24 = sphi %s5441_s24, %s17_s24  }
   0x2   : > { %p247_p1 = scmp.lt.s32.totalorder %s5397_s24, 3 }
   0x4   : > { %p248_p2 = pnand %p4149_p0, %p247_p1 }
   0x6   : > { %251 = sbr.rel (%p248_p2) target bundleno = 970 (0x3ca), region = 48 }
   0xb   : > { %v5184_v0 = vld [vmem:[%s6902_s3 + $0xf8] sm:$0xff]  ;;  %p284_p3 = scmp.lt.s32.totalorder %s4145_s25, 1  ;;  %v5399_v2 = vmov 0.0   ;;  %v5183_v3 = vld [vmem:[%s6902_s3 + $0xf0] sm:$0xff]  ;;  %v5182_v5 = vld [vmem:[%s6902_s3 + $0xe8] sm:$0xff]  ;;  %v5400_v14 = vmov 0.0|0.0  }
   0xc   : > { %v5192_v1 = vld [vmem:[%s6902_s3 + $0x138] sm:$0xff]  ;;  %299 = vst [vmem:[#allocation2] sm:$0xff] %v5399_v2  ;;  %1743 = vmatpush.bf16.msra.mxu0 %v5184_v0  ;;  %5360 = vmatpush.bf16.msra.mxu2 %v5184_v0  ;;  %v5191_v4 = vld [vmem:[%s6902_s3 + $0x130] sm:$0xff]  ;;  %v5190_v8 = vld [vmem:[%s6902_s3 + $0x128] sm:$0xff] }
   0xd   : > { %s6978_s25 = smov (!%p284_p3, %s4145_s25), 1  ;;  %300 = vst [vmem:[#allocation2 + $0x8] sm:$0xff] %v5399_v2  ;;  %1832 = vmatpush.bf16.msra.mxu1 %v5192_v1  ;;  %5368 = vmatpush.bf16.msra.mxu3 %v5192_v1  ;;  %v5486_v13 = vld [vmem:[%s6900_s1] ss:$0 sm:$0xff]  ;;  %v5180_v31 = vld [vmem:[%s6902_s3 + $0xd8] sm:$0xff]  ;;  %v5179_v34 = vld [vmem:[%s6902_s3 + $0xd0] sm:$0xff] }
   0xe   : > { %306 = vst [vmem:[#allocation2] sm:$0x1] %v5399_v2  ;;  %s5054_s11 = sshll.u32 %s6978_s25, 7  ;;  %v5496_v19 = vld [vmem:[%s6901_s2] ss:$0 sm:$0xff]  ;;  %v5188_v33 = vld [vmem:[%s6902_s3 + $0x118] sm:$0xff] }
   0xf   : > { %303 = vst [vmem:[#allocation2 + $0x198] sm:$0xff] %v5399_v2  ;;  %s5474_s16 = scalar_lea.vmem %s6899_s0, %s5054_s11  ;;  %v5181_v20 = vld [vmem:[%s6902_s3 + $0xe0] sm:$0xff]  ;;  %v5187_v35 = vld [vmem:[%s6902_s3 + $0x110] sm:$0xff]  ;;  %v5178_v36 = vld [vmem:[%s6902_s3 + $0xc8] sm:$0xff]  ;;  %s5055_s10 = sshll.u32 %s6978_s25, 8 }
  0x10   : > { %307 = vst [vmem:[#allocation2 + $0x18] sm:$0x1] %v5399_v2  ;;  %1744 = vmatpush.bf16.msra.mxu0 %v5183_v3  ;;  %5361 = vmatpush.bf16.msra.mxu2 %v5183_v3  ;;  %v5282_v6 = vld [vmem:[%s5474_s16] sm:$0xff]   ;;  %v5345_v7 = vld [vmem:[%s5474_s16 + $0x8] sm:$0xff]   ;;  %v5351_v49 = vld [vmem:[%s5474_s16 + $0x38] sm:$0xff]   ;;  %s6695_s13 = scalar_lea.vmem %s6904_s5, %s5055_s10  ;;  %s6787_s18 = scalar_lea.vmem %s6906_s7, %s5055_s10 }
  0x11   : > { %308 = vst [vmem:[#allocation2 + $0x30] sm:$0x1] %v5399_v2  ;;  %1833 = vmatpush.bf16.msra.mxu1 %v5191_v4  ;;  %5369 = vmatpush.bf16.msra.mxu3 %v5191_v4  ;;  %v5283_v9 = vunpack.c.l.bf16 %v5282_v6  ;;  %v5284_v10 = vunpack.c.h.bf16 %v5282_v6  ;;  %v5287_v11 = vunpack.c.l.bf16 %v5345_v7  ;;  %v5288_v12 = vunpack.c.h.bf16 %v5345_v7  ;;  %v5189_v22 = vld [vmem:[%s6902_s3 + $0x120] sm:$0xff]  ;;  %v5186_v39 = vld [vmem:[%s6902_s3 + $0x108] sm:$0xff] }
  0x12   : > { %608 = vst [vmem:[#allocation3 + $0xc] sm:$0xf] %v5400_v14  ;;  %v5177_v44 = vld [vmem:[%s6902_s3 + $0xc0] sm:$0xff]  ;;  %v5311_v55 = vunpack.c.l.bf16 %v5351_v49  ;;  %v5312_v56 = vunpack.c.h.bf16 %v5351_v49  ;;  %v5353_v57 = vld [vmem:[%s5474_s16 + $0x48] sm:$0xff]  }
  0x13   : > { %301 = vst [vmem:[#allocation2 + $0x10] sm:$0x3] %v5399_v2  ;;  %v411_v15 = vmul.f32 %v5486_v13, %v5283_v9  ;;  %v412_v16 = vmul.f32 %v5486_v13, %v5284_v10  ;;  %v413_v17 = vmul.f32 %v5486_v13, %v5287_v11  ;;  %v414_v18 = vmul.f32 %v5486_v13, %v5288_v12  ;;  %v5185_v45 = vld [vmem:[%s6902_s3 + $0x100] sm:$0xff] }
  0x14   : > { %304 = vst [vmem:[#allocation2 + $0x1a0] sm:$0xff] %v5399_v2  ;;  %1745 = vmatpush.bf16.msra.mxu0 %v5182_v5  ;;  %5362 = vmatpush.bf16.msra.mxu2 %v5182_v5  ;;  %v5352_v53 = vld [vmem:[%s5474_s16 + $0x40] sm:$0xff]   ;;  %v5319_v60 = vunpack.c.l.bf16 %v5353_v57  ;;  %v425_v61 = vmul.f32 %v5486_v13, %v5311_v55  ;;  %v5320_v62 = vunpack.c.h.bf16 %v5353_v57  ;;  %v426_v63 = vmul.f32 %v5486_v13, %v5312_v56 }
  0x15   : > { %v543_v21 = vld [vmem:[#allocation2] sm:$0xff]  ;;  %305 = vst [vmem:[#allocation2 + $0x1a8] sm:$0x3] %v5399_v2  ;;  %1834 = vmatpush.bf16.msra.mxu1 %v5190_v8  ;;  %5370 = vmatpush.bf16.msra.mxu3 %v5190_v8  ;;  %v446_v23 = vadd.f32 %v5496_v19, %v411_v15  ;;  %v447_v24 = vadd.f32 %v5496_v19, %v412_v16  ;;  %v5315_v58 = vunpack.c.l.bf16 %v5352_v53  ;;  %v5316_v59 = vunpack.c.h.bf16 %v5352_v53 }
  0x16   : > { %v448_v25 = vadd.f32 %v5496_v19, %v413_v17  ;;  %309 = vst [vmem:[#allocation2 + $0x48] sm:$0x1] %v5399_v2  ;;  %v449_v26 = vadd.f32 %v5496_v19, %v414_v18  ;;  %v575_v27 = vpack.c.bf16 %v543_v21, %v543_v21  ;;  %v429_v3 = vmul.f32 %v5486_v13, %v5319_v60  ;;  %v5200_v17 = vld [vmem:[%s6902_s3 + $0x178] sm:$0xff] }
  0x17   : > { %310 = vst [vmem:[#allocation2 + $0x60] sm:$0x1] %v5399_v2  ;;  %v5512_v28 = vmax.f32 %v446_v23, 0.0  ;;  %v5514_v29 = vmax.f32 %v447_v24, 0.0  ;;  %v427_v0 = vmul.f32 %v5486_v13, %v5315_v58  ;;  %v428_v1 = vmul.f32 %v5486_v13, %v5316_v59  ;;  %v5112_v18 = vld [vmem:[%s6902_s3 + $0x38] sm:$0xff]  ;;  %v5346_v23 = vld [vmem:[%s5474_s16 + $0x10] sm:$0xff]  }
  0x18   : > { %v5516_v30 = vmax.f32 %v448_v25, 0.0  ;;  %311 = vst [vmem:[#allocation2 + $0x78] sm:$0x1] %v5399_v2  ;;  %1746 = vmatpush.bf16.msra.mxu0 %v5181_v20  ;;  %5363 = vmatpush.bf16.msra.mxu2 %v5181_v20  ;;  %v5522_v32 = vmax.f32 %v449_v26, 0.0  ;;  %v460_v4 = vadd.f32 %v5496_v19, %v425_v61  ;;  %v430_v5 = vmul.f32 %v5486_v13, %v5320_v62  ;;  %v5120_v20 = vld [vmem:[%s6902_s3 + $0x78] sm:$0xff]  ;;  %v639_v24 = vld [vmem:[#allocation2 + $0x1] sm:$0xff] }
  0x19   : > { %607 = vst [vmem:[#allocation3] sm:$0xf] %v575_v27  ;;  %1835 = vmatpush.bf16.msra.mxu1 %v5189_v22  ;;  %5371 = vmatpush.bf16.msra.mxu3 %v5189_v22  ;;  %v5549_v40 = vld [vmem:[#allocation3 + $0x8] sm:$0xf0]  ;;  %v461_v6 = vadd.f32 %v5496_v19, %v426_v63  ;;  %v462_v7 = vadd.f32 %v5496_v19, %v427_v0  ;;  %v5291_v25 = vunpack.c.l.bf16 %v5346_v23  ;;  %v5292_v26 = vunpack.c.h.bf16 %v5346_v23  ;;  %v5199_v23 = vld [vmem:[%s6902_s3 + $0x170] sm:$0xff] }
  0x1a   : > { %511 = vst [vmem:[#allocation2 + $0x19] sm:$0xff] %v5512_v28  ;;  %v463_v8 = vadd.f32 %v5496_v19, %v428_v1  ;;  %v464_v9 = vadd.f32 %v5496_v19, %v429_v3  ;;  %v492_v10 = vmax.f32 %v460_v4, 0.0  ;;  %v465_v11 = vadd.f32 %v5496_v19, %v430_v5  ;;  %v5128_v22 = vld [vmem:[%s6902_s3 + $0xb8] sm:$0xff] }
  0x1b   : > { %512 = vst [vmem:[#allocation2 + $0x21] sm:$0xff] %v5514_v29  ;;  %v493_v12 = vmax.f32 %v461_v6, 0.0  ;;  %v494_v14 = vmax.f32 %v462_v7, 0.0  ;;  %v415_v27 = vmul.f32 %v5486_v13, %v5291_v25  ;;  %v5651_v59 = vpack.c.bf16 %v5514_v29, %v5514_v29  ;;  %v5119_v25 = vld [vmem:[%s6902_s3 + $0x70] sm:$0xff] }
  0x1c   : > { %513 = vst [vmem:[#allocation2 + $0x31] sm:$0xff] %v5516_v30  ;;  %1747 = vmatpush.bf16.msra.mxu0 %v5180_v31  ;;  %5364 = vmatpush.bf16.msra.mxu2 %v5180_v31  ;;  %v495_v15 = vmax.f32 %v463_v8, 0.0  ;;  %v5607_v16 = vmax.f32 %v464_v9, 0.0  ;;  %v5618_v21 = vmax.f32 %v465_v11, 0.0  ;;  %v416_v31 = vmul.f32 %v5486_v13, %v5292_v26 }
  0x1d   : > { %514 = vst [vmem:[#allocation2 + $0x39] sm:$0xff] %v5522_v32  ;;  %1836 = vmatpush.bf16.msra.mxu1 %v5188_v33  ;;  %5372 = vmatpush.bf16.msra.mxu3 %v5188_v33  ;;  %v640_v33 = vld [vmem:[#allocation2 + $0x9] sm:$0xff]  ;;  %v5678_v7 = vpack.c.bf16 %v5516_v30, %v5516_v30  ;;  %v5691_v30 = vpack.c.bf16 %v5522_v32, %v5522_v32 }
  0x1e   : > { %312 = vst [vmem:[#allocation2 + $0x90] sm:$0x1] %v5399_v2  ;;  %v5662_v62 = vpack.c.bf16 %v495_v15, %v495_v15  ;;  %v5704_v32 = vpack.c.bf16 %v5618_v21, %v5618_v21 }
  0x1f   : > { %313 = vst [vmem:[#allocation2 + $0xa8] sm:$0x1] %v5399_v2 }
  0x20   : > { %314 = vst [vmem:[#allocation2 + $0xc0] sm:$0x1] %v5399_v2  ;;  %1748 = vmatpush.bf16.msra.mxu0 %v5179_v34  ;;  %5365 = vmatpush.bf16.msra.mxu2 %v5179_v34  ;;  %v5543_v37 = vld [vmem:[#allocation3] sm:$0xf]  ;;  %v671_v34 = vpack.c.bf16 %v639_v24, %v639_v24 }
  0x21   : > { %v943_v38 = vld [vmem:[#allocation2 + $0x18] sm:$0xff]  ;;  %315 = vst [vmem:[#allocation2 + $0xd8] sm:$0x1] %v5399_v2  ;;  %1837 = vmatpush.bf16.msra.mxu1 %v5187_v35  ;;  %5373 = vmatpush.bf16.msra.mxu3 %v5187_v35 }
  0x22   : > { %v944_v41 = vld [vmem:[#allocation2 + $0x20] sm:$0xff]  ;;  %v5551_v42 = vpack.c.bf16 %v943_v38, %v943_v38  ;;  %316 = vst [vmem:[#allocation2 + $0xf0] sm:$0x1] %v5399_v2 }
  0x23   : > { %v5554_v43 = vpack.c.bf16 %v944_v41, %v944_v41  ;;  %317 = vst [vmem:[#allocation2 + $0x108] sm:$0x1] %v5399_v2  ;;  %v2678_v46 = vld [vmem:[#allocation2 + $0x30] sm:$0xff]  ;;  %v672_v41 = vpack.c.bf16 %v640_v33, %v640_v33  ;;  %v5347_v33 = vld [vmem:[%s5474_s16 + $0x18] sm:$0xff]  }
  0x24   : > { %1007 = vst [vmem:[#allocation3] sm:$0xf] %v5551_v42  ;;  %1749 = vmatpush.bf16.msra.mxu0 %v5178_v36  ;;  %5366 = vmatpush.bf16.msra.mxu2 %v5178_v36  ;;  %v2679_v47 = vld [vmem:[#allocation2 + $0x38] sm:$0xff]  ;;  %v5569_v48 = vpack.c.bf16 %v2678_v46, %v2678_v46  ;;  %v450_v36 = vadd.f32 %v5496_v19, %v415_v27 }
  0x25   : > { %1008 = vst [vmem:[#allocation3 + $0xc] sm:$0xf] %v5554_v43  ;;  %1838 = vmatpush.bf16.msra.mxu1 %v5186_v39  ;;  %5374 = vmatpush.bf16.msra.mxu3 %v5186_v39  ;;  %v5573_v51 = vpack.c.bf16 %v2679_v47, %v2679_v47  ;;  %v687_v46 = vpack.c.bf16 %v492_v10, %v492_v10 }
  0x26   : > { %318 = vst [vmem:[#allocation2 + $0x120] sm:$0x1] %v5399_v2  ;;  %v688_v47 = vpack.c.bf16 %v493_v12, %v493_v12 }
  0x27   : > { %319 = vst [vmem:[#allocation2 + $0x138] sm:$0x1] %v5399_v2 }
  0x28   : > { %320 = vst [vmem:[#allocation2 + $0x150] sm:$0x1] %v5399_v2  ;;  %1750 = vmatpush.bf16.msra.mxu0 %v5177_v44  ;;  %5367 = vmatpush.bf16.msra.mxu2 %v5177_v44  ;;  %v451_v44 = vadd.f32 %v5496_v19, %v416_v31 }
  0x29   : > { %321 = vst [vmem:[#allocation2 + $0x168] sm:$0x1] %v5399_v2  ;;  %1839 = vmatpush.bf16.msra.mxu1 %v5185_v45  ;;  %5375 = vmatpush.bf16.msra.mxu3 %v5185_v45 }
  0x2a   : > { %322 = vst [vmem:[#allocation2 + $0x180] sm:$0x1] %v5399_v2  ;;  %v5635_v53 = vmax.f32 %v451_v44, 0.0 }
  0x2b   : > { %v4158_v50 = vld [vmem:[#allocation3] sm:$0xf]  ;;  %325 = vst [vmem:[#allocation2 + $0x29] sm:$0x1] %v5399_v2 }
  0x2c   : > { %v5130_v52 = vld [vmem:[#allocation3 + $0x8] sm:$0xf0]  ;;  %2742 = vst [vmem:[#allocation3] sm:$0xf] %v5569_v48  ;;  %1921 = vmatpush.bf16.msrb.mxu2 %v5200_v17  ;;  %2499 = vmatpush.bf16.msrb.mxu0 %v5120_v20 }
  0x2d   : > { %v4159_v54 = vor.u32 %v5130_v52, %v4158_v50  ;;  %2743 = vst [vmem:[#allocation3 + $0xc] sm:$0xf] %v5573_v51  ;;  %2410 = vmatpush.bf16.msrb.mxu3 %v5112_v18  ;;  %2588 = vmatpush.bf16.msrb.mxu1 %v5128_v22  ;;  %v5633_v50 = vmax.f32 %v450_v36, 0.0  ;;  %v5296_v36 = vunpack.c.h.bf16 %v5347_v33 }
  0x2e   : > { %326 = vst [vmem:[#allocation2 + $0x41] sm:$0x1] %v5399_v2 }
  0x2f   : > { %1751 = vmatmul.bf16.vlgmr.msra.gmra.mxu0 %v4159_v54  ;;  %327 = vst [vmem:[#allocation2 + $0x59] sm:$0x1] %v5399_v2  ;;  %v5354_v54 = vld [vmem:[%s5474_s16 + $0x50] sm:$0xff]   ;;  %v418_v44 = vmul.f32 %v5486_v13, %v5296_v36 }
  0x30   : > { %328 = vst [vmem:[#allocation2 + $0x71] sm:$0x1] %v5399_v2  ;;  %v5323_v57 = vunpack.c.l.bf16 %v5354_v54  ;;  %v5324_v63 = vunpack.c.h.bf16 %v5354_v54  ;;  %1922 = vmatpush.bf16.msrb.mxu2 %v5199_v23  ;;  %2500 = vmatpush.bf16.msrb.mxu0 %v5119_v25  ;;  %v5787_v25 = vpack.c.bf16 %v5635_v53, %v5635_v53 }
  0x31   : > { %329 = vst [vmem:[#allocation2 + $0x89] sm:$0x1] %v5399_v2 }
  0x32   : > { %330 = vst [vmem:[#allocation2 + $0xa1] sm:$0x1] %v5399_v2  ;;  %v431_v29 = vmul.f32 %v5486_v13, %v5323_v57  ;;  %v432_v6 = vmul.f32 %v5486_v13, %v5324_v63 }
  0x33   : > { %331 = vst [vmem:[#allocation2 + $0xb9] sm:$0x1] %v5399_v2 }
  0x34   : > { %332 = vst [vmem:[#allocation2 + $0xd1] sm:$0x1] %v5399_v2  ;;  %v466_v8 = vadd.f32 %v5496_v19, %v431_v29 }
  0x35   : > { %333 = vst [vmem:[#allocation2 + $0xe9] sm:$0x1] %v5399_v2 }
  0x36   : > { %334 = vst [vmem:[#allocation2 + $0x101] sm:$0x1] %v5399_v2  ;;  %v5699_v18 = vmax.f32 %v466_v8, 0.0 }
  0x37   : > { %335 = vst [vmem:[#allocation2 + $0x119] sm:$0x1] %v5399_v2 }
  0x38   : > { %336 = vst [vmem:[#allocation2 + $0x131] sm:$0x1] %v5399_v2 }
  0x39   : > { %337 = vst [vmem:[#allocation2 + $0x149] sm:$0x1] %v5399_v2 }
  0x3a   : > { %338 = vst [vmem:[#allocation2 + $0x161] sm:$0x1] %v5399_v2 }
  0x3b   : > { %339 = vst [vmem:[#allocation2 + $0x179] sm:$0x1] %v5399_v2 }
  0x3c   : > { %340 = vst [vmem:[#allocation2 + $0x191] sm:$0x1] %v5399_v2 }
  0x3d   : > { %525 = vst [vmem:[#allocation2 + $0xc1] sm:$0xff] %v492_v10 }
  0x3e   : > { %526 = vst [vmem:[#allocation2 + $0xc9] sm:$0xff] %v493_v12 }
  0x3f   : > { %527 = vst [vmem:[#allocation2 + $0xd9] sm:$0xff] %v494_v14 }
  0x40   : > { %528 = vst [vmem:[#allocation2 + $0xe1] sm:$0xff] %v495_v15 }
  0x41   : > { %529 = vst [vmem:[#allocation2 + $0xf1] sm:$0xff] %v5607_v16 }
  0x42   : > { %530 = vst [vmem:[#allocation2 + $0xf9] sm:$0xff] %v5618_v21  ;;  %v5127_v21 = vld [vmem:[%s6902_s3 + $0xb0] sm:$0xff] }
  0x43   : > { %323 = vst [vmem:[#allocation2 + $0x198] sm:$0x1] %v5399_v2  ;;  %2589 = vmatpush.bf16.msrb.mxu1 %v5127_v21 }
  0x44   : > { %v559_v35 = vld [vmem:[#allocation2 + $0xc0] sm:$0xff]  ;;  %324 = vst [vmem:[#allocation2 + $0x11] sm:$0x1] %v5399_v2 }
  0x45   : > { %v560_v38 = vld [vmem:[#allocation2 + $0xc8] sm:$0xff]  ;;  %v591_v39 = vpack.c.bf16 %v559_v35, %v559_v35  ;;  %341 = vst [vmem:[#allocation2 + $0x1a9] sm:$0x1] %v5399_v2  ;;  %v5640_v2 = vpack.c.bf16 %v5512_v28, %v5512_v28  ;;  %v5657_v28 = vpack.c.bf16 %v494_v14, %v494_v14  ;;  %v5295_v35 = vunpack.c.l.bf16 %v5347_v33 }
  0x46   : > { %v592_v45 = vpack.c.bf16 %v560_v38, %v560_v38  ;;  %703 = vst [vmem:[#allocation3 + $0x4] sm:$0xf] %v671_v34  ;;  %v959_v49 = vld [vmem:[#allocation2 + $0xd8] sm:$0xff] }
  0x47   : > { %623 = vst [vmem:[#allocation3 + $0xc0] sm:$0xf] %v591_v39  ;;  %v960_v52 = vld [vmem:[#allocation2 + $0xe0] sm:$0xff]  ;;  %v5642_v55 = vpack.c.bf16 %v959_v49, %v959_v49 }
  0x48   : > { %624 = vst [vmem:[#allocation3 + $0xcc] sm:$0xf] %v592_v45  ;;  %v5644_v56 = vpack.c.bf16 %v960_v52, %v960_v52  ;;  %v2694_v3 = vld [vmem:[#allocation2 + $0xf0] sm:$0xff] }
  0x49   : > { %704 = vst [vmem:[#allocation3 + $0x10] sm:$0xf] %v672_v41  ;;  %v2695_v5 = vld [vmem:[#allocation2 + $0xf8] sm:$0xff]  ;;  %v5682_v9 = vpack.c.bf16 %v2694_v3, %v2694_v3  ;;  %v417_v41 = vmul.f32 %v5486_v13, %v5295_v35  ;;  %v5110_v35 = vld [vmem:[%s6902_s3 + $0x28] sm:$0xff] }
  0x4a   : > { %719 = vst [vmem:[#allocation3 + $0xc4] sm:$0xf] %v687_v46  ;;  %v5685_v12 = vpack.c.bf16 %v2695_v5, %v2695_v5 }
  0x4b   : > { %720 = vst [vmem:[#allocation3 + $0xd0] sm:$0xf] %v688_v47  ;;  %v452_v52 = vadd.f32 %v5496_v19, %v417_v41 }
  0x4c   : > { %515 = vst [vmem:[#allocation2 + $0x49] sm:$0xff] %v5633_v50 }
  0x4d   : > { %v5647_v58 = vld [vmem:[#allocation3 + $0x4] sm:$0xf]  ;;  %516 = vst [vmem:[#allocation2 + $0x51] sm:$0xff] %v5635_v53  ;;  %v5800_v53 = vpack.c.bf16 %v5699_v18, %v5699_v18 }
  0x4e   : > { %v5654_v60 = vld [vmem:[#allocation3 + $0xc0] sm:$0xf]  ;;  %1103 = vst [vmem:[#allocation3 + $0x4] sm:$0xf] %v5640_v2 }
  0x4f   : > { %v5659_v61 = vld [vmem:[#allocation3 + $0xc8] sm:$0xf0]  ;;  %1023 = vst [vmem:[#allocation3 + $0xc0] sm:$0xf] %v5642_v55 }
  0x50   : > { %1024 = vst [vmem:[#allocation3 + $0xcc] sm:$0xf] %v5644_v56  ;;  %v5665_v0 = vld [vmem:[#allocation3 + $0xc] sm:$0xf0] }
  0x51   : > { %1104 = vst [vmem:[#allocation3 + $0x10] sm:$0xf] %v5651_v59  ;;  %v5669_v1 = vld [vmem:[#allocation3 + $0xc4] sm:$0xf] }
  0x52   : > { %v5671_v4 = vld [vmem:[#allocation3 + $0xcc] sm:$0xf0]  ;;  %1119 = vst [vmem:[#allocation3 + $0xc4] sm:$0xf] %v5657_v28 }
  0x53   : > { %1120 = vst [vmem:[#allocation3 + $0xd0] sm:$0xf] %v5662_v62  ;;  %v2680_v38 = vld [vmem:[#allocation2 + $0x48] sm:$0xff] }
  0x54   : > { %609 = vst [vmem:[#allocation3 + $0x18] sm:$0xf] %v5551_v42  ;;  %v467_v42 = vadd.f32 %v5496_v19, %v432_v6  ;;  %v2681_v39 = vld [vmem:[#allocation2 + $0x50] sm:$0xff]  ;;  %v5735_v45 = vpack.c.bf16 %v2680_v38, %v2680_v38  ;;  %v5118_v38 = vld [vmem:[%s6902_s3 + $0x68] sm:$0xff] }
  0x55   : > { %v5129_v10 = vld [vmem:[#allocation3 + $0x4] sm:$0xf]  ;;  %610 = vst [vmem:[#allocation3 + $0x24] sm:$0xf] %v5554_v43  ;;  %v5697_v43 = vpack.c.bf16 %v5607_v16, %v5607_v16  ;;  %v5738_v47 = vpack.c.bf16 %v2681_v39, %v2681_v39  ;;  %v5126_v39 = vld [vmem:[%s6902_s3 + $0xa8] sm:$0xff]  ;;  %2501 = vmatpush.bf16.msrb.mxu0 %v5118_v38 }
  0x56   : > { %v4254_v11 = vld [vmem:[#allocation3 + $0xc0] sm:$0xf]  ;;  %2838 = vst [vmem:[#allocation3 + $0x4] sm:$0xf] %v5678_v7  ;;  %v5722_v31 = vmax.f32 %v467_v42, 0.0  ;;  %2590 = vmatpush.bf16.msrb.mxu1 %v5126_v39 }
  0x57   : > { %v5154_v14 = vld [vmem:[#allocation3 + $0xc8] sm:$0xf0]  ;;  %2758 = vst [vmem:[#allocation3 + $0xc0] sm:$0xf] %v5682_v9  ;;  %v5111_v16 = vld [vmem:[%s6902_s3 + $0x30] sm:$0xff] }
  0x58   : > { %v4255_v15 = vor.u32 %v5154_v14, %v4254_v11  ;;  %2759 = vst [vmem:[#allocation3 + $0xcc] sm:$0xf] %v5685_v12  ;;  %v4160_v17 = vld [vmem:[#allocation3 + $0xc] sm:$0xf0]  ;;  %2411 = vmatpush.bf16.msrb.mxu3 %v5111_v16 }
  0x59   : > { %v4163_v20 = vor.u32 %v5129_v10, %v4160_v17  ;;  %2839 = vst [vmem:[#allocation3 + $0x10] sm:$0xf] %v5691_v30  ;;  %v5153_v22 = vld [vmem:[#allocation3 + $0xc4] sm:$0xf] }
  0x5a   : > { %1791 = vmatmul.bf16.vlgmr.msra.gmra.mxu2 %v4255_v15  ;;  %v4256_v24 = vld [vmem:[#allocation3 + $0xcc] sm:$0xf0]  ;;  %2854 = vst [vmem:[#allocation3 + $0xc4] sm:$0xf] %v5697_v43 }
  0x5b   : > { %1840 = vmatmul.bf16.vlgmr.msra.gmra.mxu1 %v4163_v20  ;;  %v4259_v26 = vor.u32 %v5153_v22, %v4256_v24  ;;  %2855 = vst [vmem:[#allocation3 + $0xd0] sm:$0xf] %v5704_v32  ;;  %v5720_v27 = vld [vmem:[#allocation3 + $0x18] sm:$0xf]  ;;  %v5781_v22 = vpack.c.bf16 %v5633_v50, %v5633_v50 }
  0x5c   : > { %v5725_v34 = vld [vmem:[#allocation3 + $0x20] sm:$0xf0]  ;;  %1009 = vst [vmem:[#allocation3 + $0x18] sm:$0xf] %v5569_v48  ;;  %v5198_v50 = vld [vmem:[%s6902_s3 + $0x168] sm:$0xff]  ;;  %2412 = vmatpush.bf16.msrb.mxu3 %v5110_v35 }
  0x5d   : > { %1880 = vmatmul.bf16.vlgmr.msra.gmra.mxu3 %v4259_v26  ;;  %1010 = vst [vmem:[#allocation3 + $0x24] sm:$0xf] %v5573_v51  ;;  %1923 = vmatpush.bf16.msrb.mxu2 %v5198_v50 }
  0x5e   : > { %531 = vst [vmem:[#allocation2 + $0x109] sm:$0xff] %v5699_v18 }
  0x5f   : > { %532 = vst [vmem:[#allocation2 + $0x111] sm:$0xff] %v5722_v31 }
  0x60   : > { %625 = vst [vmem:[#allocation3 + $0xd8] sm:$0xf] %v5642_v55  ;;  %v453_v55 = vadd.f32 %v5496_v19, %v418_v44  ;;  %v5813_v44 = vpack.c.bf16 %v5722_v31, %v5722_v31  ;;  %v5348_v31 = vld [vmem:[%s5474_s16 + $0x20] sm:$0xff]  }
  0x61   : > { %626 = vst [vmem:[#allocation3 + $0xe4] sm:$0xf] %v5644_v56  ;;  %v5355_v56 = vld [vmem:[%s5474_s16 + $0x58] sm:$0xff]  }
  0x62   : > { %705 = vst [vmem:[#allocation3 + $0x1c] sm:$0xf] %v5640_v2  ;;  %v5327_v63 = vunpack.c.l.bf16 %v5355_v56  ;;  %v5758_v3 = vmax.f32 %v453_v55, 0.0  ;;  %v5328_v5 = vunpack.c.h.bf16 %v5355_v56  ;;  %v5356_v56 = vld [vmem:[%s5474_s16 + $0x60] sm:$0xff]  }
  0x63   : > { %v4170_v46 = vld [vmem:[#allocation3 + $0x18] sm:$0xf]  ;;  %706 = vst [vmem:[#allocation3 + $0x28] sm:$0xf] %v5651_v59  ;;  %v5753_v59 = vmax.f32 %v452_v52, 0.0  ;;  %v5299_v52 = vunpack.c.l.bf16 %v5348_v31 }
  0x64   : > { %v5133_v49 = vld [vmem:[#allocation3 + $0x20] sm:$0xf0]  ;;  %2744 = vst [vmem:[#allocation3 + $0x18] sm:$0xf] %v5735_v45  ;;  %v433_v8 = vmul.f32 %v5486_v13, %v5327_v63  ;;  %v434_v11 = vmul.f32 %v5486_v13, %v5328_v5 }
  0x65   : > { %v4171_v54 = vor.u32 %v5133_v49, %v4170_v46  ;;  %2745 = vst [vmem:[#allocation3 + $0x24] sm:$0xf] %v5738_v47  ;;  %v2696_v6 = vld [vmem:[#allocation2 + $0x108] sm:$0xff] }
  0x66   : > { %721 = vst [vmem:[#allocation3 + $0xdc] sm:$0xf] %v5657_v28  ;;  %v5770_v14 = vpack.c.bf16 %v2696_v6, %v2696_v6  ;;  %v468_v23 = vadd.f32 %v5496_v19, %v433_v8  ;;  %v469_v21 = vadd.f32 %v5496_v19, %v434_v11 }
  0x67   : > { %1756 = vmatmul.bf16.gmra.mxu0 %v4171_v54  ;;  %v5747_v2 = vld [vmem:[#allocation3 + $0xd8] sm:$0xf]  ;;  %722 = vst [vmem:[#allocation3 + $0xe8] sm:$0xf] %v5662_v62  ;;  %v2697_v62 = vld [vmem:[#allocation2 + $0x110] sm:$0xff]  ;;  %v5300_v54 = vunpack.c.h.bf16 %v5348_v31 }
  0x68   : > { %v5750_v57 = vld [vmem:[#allocation3 + $0xe0] sm:$0xf0]  ;;  %1025 = vst [vmem:[#allocation3 + $0xd8] sm:$0xf] %v5682_v9  ;;  %v5775_v17 = vpack.c.bf16 %v2697_v62, %v2697_v62  ;;  %v5803_v36 = vmax.f32 %v468_v23, 0.0 }
  0x69   : > { %6907 = vst [vmem:[#allocation4_spill] sm:$0xff] %v5750_v57  ;;  %v5756_v29 = vld [vmem:[#allocation3 + $0x1c] sm:$0xf]  ;;  %v420_v5 = vmul.f32 %v5486_v13, %v5300_v54 }
  0x6a   : > { %1026 = vst [vmem:[#allocation3 + $0xe4] sm:$0xf] %v5685_v12  ;;  %v5760_v28 = vld [vmem:[#allocation3 + $0x24] sm:$0xf0] }
  0x6b   : > { %1105 = vst [vmem:[#allocation3 + $0x1c] sm:$0xf] %v5678_v7  ;;  %v455_v23 = vadd.f32 %v5496_v19, %v420_v5 }
  0x6c   : > { %1106 = vst [vmem:[#allocation3 + $0x28] sm:$0xf] %v5691_v30 }
  0x6d   : > { %517 = vst [vmem:[#allocation2 + $0x61] sm:$0xff] %v5753_v59  ;;  %v5766_v10 = vld [vmem:[#allocation3 + $0xdc] sm:$0xf] }
  0x6e   : > { %518 = vst [vmem:[#allocation2 + $0x69] sm:$0xff] %v5758_v3  ;;  %v5772_v42 = vld [vmem:[#allocation3 + $0xe4] sm:$0xf0] }
  0x6f   : > { %1121 = vst [vmem:[#allocation3 + $0xdc] sm:$0xf] %v5697_v43  ;;  %v4266_v15 = vld [vmem:[#allocation3 + $0xd8] sm:$0xf] }
  0x70   : > { %1122 = vst [vmem:[#allocation3 + $0xe8] sm:$0xf] %v5704_v32 }
  0x71   : > { %v5157_v20 = vld [vmem:[#allocation3 + $0xe0] sm:$0xf0]  ;;  %2760 = vst [vmem:[#allocation3 + $0xd8] sm:$0xf] %v5770_v14 }
  0x72   : > { %v4267_v16 = vor.u32 %v5157_v20, %v4266_v15  ;;  %2761 = vst [vmem:[#allocation3 + $0xe4] sm:$0xf] %v5775_v17  ;;  %v5132_v24 = vld [vmem:[#allocation3 + $0x1c] sm:$0xf] }
  0x73   : > { %v4172_v26 = vld [vmem:[#allocation3 + $0x24] sm:$0xf0]  ;;  %2840 = vst [vmem:[#allocation3 + $0x1c] sm:$0xf] %v5781_v22 }
  0x74   : > { %1796 = vmatmul.bf16.gmra.mxu2 %v4267_v16  ;;  %v4175_v33 = vor.u32 %v5132_v24, %v4172_v26  ;;  %2841 = vst [vmem:[#allocation3 + $0x28] sm:$0xf] %v5787_v25  ;;  %v2682_v55 = vld [vmem:[#allocation2 + $0x60] sm:$0xff]  ;;  %v5332_v16 = vunpack.c.h.bf16 %v5356_v56 }
  0x75   : > { %611 = vst [vmem:[#allocation3 + $0x30] sm:$0xf] %v5569_v48  ;;  %v5816_v48 = vmax.f32 %v469_v21, 0.0  ;;  %v2683_v63 = vld [vmem:[#allocation2 + $0x68] sm:$0xff]  ;;  %v5840_v6 = vpack.c.bf16 %v2682_v55, %v2682_v55  ;;  %v5879_v55 = vpack.c.bf16 %v5753_v59, %v5753_v59 }
  0x76   : > { %1845 = vmatmul.bf16.gmra.mxu1 %v4175_v33  ;;  %v5156_v41 = vld [vmem:[#allocation3 + $0xdc] sm:$0xf]  ;;  %612 = vst [vmem:[#allocation3 + $0x3c] sm:$0xf] %v5573_v51  ;;  %v5845_v8 = vpack.c.bf16 %v2683_v63, %v2683_v63  ;;  %v5884_v63 = vpack.c.bf16 %v5758_v3, %v5758_v3 }
  0x77   : > { %v4268_v18 = vld [vmem:[#allocation3 + $0xe4] sm:$0xf0]  ;;  %2856 = vst [vmem:[#allocation3 + $0xdc] sm:$0xf] %v5800_v53  ;;  %v5898_v3 = vpack.c.bf16 %v5816_v48, %v5816_v48 }
  0x78   : > { %v4271_v46 = vor.u32 %v5156_v41, %v4268_v18  ;;  %2857 = vst [vmem:[#allocation3 + $0xe8] sm:$0xf] %v5813_v44  ;;  %v5871_v18 = vmax.f32 %v455_v23, 0.0 }
  0x79   : > { %533 = vst [vmem:[#allocation2 + $0x121] sm:$0xff] %v5803_v36 }
  0x7a   : > { %1885 = vmatmul.bf16.gmra.mxu3 %v4271_v46  ;;  %534 = vst [vmem:[#allocation2 + $0x129] sm:$0xff] %v5816_v48  ;;  %v436_v46 = vmul.f32 %v5486_v13, %v5332_v16  ;;  %v5125_v48 = vld [vmem:[%s6902_s3 + $0xa0] sm:$0xff] }
  0x7b   : > { %627 = vst [vmem:[#allocation3 + $0xf0] sm:$0xf] %v5682_v9  ;;  %v419_v9 = vmul.f32 %v5486_v13, %v5299_v52  ;;  %2591 = vmatpush.bf16.msrb.mxu1 %v5125_v48 }
  0x7c   : > { %v5824_v51 = vld [vmem:[#allocation3 + $0x30] sm:$0xf]  ;;  %628 = vst [vmem:[#allocation3 + $0xfc] sm:$0xf] %v5685_v12 }
  0x7d   : > { %v5827_v49 = vld [vmem:[#allocation3 + $0x38] sm:$0xf0]  ;;  %1011 = vst [vmem:[#allocation3 + $0x30] sm:$0xf] %v5735_v45  ;;  %v454_v11 = vadd.f32 %v5496_v19, %v419_v9  ;;  %v471_v9 = vadd.f32 %v5496_v19, %v436_v46 }
  0x7e   : > { %1012 = vst [vmem:[#allocation3 + $0x3c] sm:$0xf] %v5738_v47 }
  0x7f   : > { %707 = vst [vmem:[#allocation3 + $0x34] sm:$0xf] %v5678_v7  ;;  %v5331_v7 = vunpack.c.l.bf16 %v5356_v56  ;;  %v5866_v38 = vmax.f32 %v454_v11, 0.0  ;;  %v5197_v11 = vld [vmem:[%s6902_s3 + $0x160] sm:$0xff]  ;;  %v5914_v16 = vmax.f32 %v471_v9, 0.0 }
  0x80   : > { %708 = vst [vmem:[#allocation3 + $0x40] sm:$0xf] %v5691_v30  ;;  %v2698_v15 = vld [vmem:[#allocation2 + $0x120] sm:$0xff]  ;;  %1924 = vmatpush.bf16.msrb.mxu2 %v5197_v11 }
  0x81   : > { %723 = vst [vmem:[#allocation3 + $0xf4] sm:$0xf] %v5697_v43  ;;  %v2699_v24 = vld [vmem:[#allocation2 + $0x128] sm:$0xff]  ;;  %v435_v26 = vmul.f32 %v5486_v13, %v5331_v7  ;;  %v5861_v50 = vpack.c.bf16 %v2698_v15, %v2698_v15  ;;  %v5891_v7 = vpack.c.bf16 %v5803_v36, %v5803_v36  ;;  %v5117_v15 = vld [vmem:[%s6902_s3 + $0x60] sm:$0xff] }
  0x82   : > { %v5836_v12 = vld [vmem:[#allocation3 + $0xf0] sm:$0xf]  ;;  %724 = vst [vmem:[#allocation3 + $0x100] sm:$0xf] %v5704_v32  ;;  %v5868_v41 = vpack.c.bf16 %v2699_v24, %v2699_v24  ;;  %2502 = vmatpush.bf16.msrb.mxu0 %v5117_v15  ;;  %v5349_v24 = vld [vmem:[%s5474_s16 + $0x28] sm:$0xff]  }
  0x83   : > { %6908 = vst [vmem:[#allocation5_spill] sm:$0xff] %v5836_v12  ;;  %v5842_v62 = vld [vmem:[#allocation3 + $0xf8] sm:$0xf0]  ;;  %v470_v52 = vadd.f32 %v5496_v19, %v435_v26 }
  0x84   : > { %6909 = vst [vmem:[#allocation6_spill] sm:$0xff] %v5842_v62  ;;  %v4182_v30 = vld [vmem:[#allocation3 + $0x30] sm:$0xf] }
  0x85   : > { %1027 = vst [vmem:[#allocation3 + $0xf0] sm:$0xf] %v5770_v14  ;;  %v5136_v43 = vld [vmem:[#allocation3 + $0x38] sm:$0xf0]  ;;  %v5893_v59 = vmax.f32 %v470_v52, 0.0 }
  0x86   : > { %1028 = vst [vmem:[#allocation3 + $0xfc] sm:$0xf] %v5775_v17  ;;  %v4183_v32 = vor.u32 %v5136_v43, %v4182_v30  ;;  %v5851_v20 = vld [vmem:[#allocation3 + $0x34] sm:$0xf] }
  0x87   : > { %2746 = vst [vmem:[#allocation3 + $0x30] sm:$0xf] %v5840_v6  ;;  %v5854_v21 = vld [vmem:[#allocation3 + $0x3c] sm:$0xf0] }
  0x88   : > { %2747 = vst [vmem:[#allocation3 + $0x3c] sm:$0xf] %v5845_v8  ;;  %1761 = vmatmul.bf16.gmra.mxu0 %v4183_v32  ;;  %v5859_v33 = vld [vmem:[#allocation3 + $0xf4] sm:$0xf] }
  0x89   : > { %1107 = vst [vmem:[#allocation3 + $0x34] sm:$0xf] %v5781_v22  ;;  %v5863_v35 = vld [vmem:[#allocation3 + $0xfc] sm:$0xf0]  ;;  %v5109_v32 = vld [vmem:[%s6902_s3 + $0x20] sm:$0xff] }
  0x8a   : > { %1108 = vst [vmem:[#allocation3 + $0x40] sm:$0xf] %v5787_v25  ;;  %2413 = vmatpush.bf16.msrb.mxu3 %v5109_v32 }
  0x8b   : > { %6910 = vst [vmem:[#allocation7_spill] sm:$0xff] %v5859_v33 }
  0x8c   : > { %6911 = vst [vmem:[#allocation8_spill] sm:$0xff] %v5863_v35  ;;  %v4278_v39 = vld [vmem:[#allocation3 + $0xf0] sm:$0xf] }
  0x8d   : > { %1123 = vst [vmem:[#allocation3 + $0xf4] sm:$0xf] %v5800_v53  ;;  %v5160_v31 = vld [vmem:[#allocation3 + $0xf8] sm:$0xf0] }
  0x8e   : > { %1124 = vst [vmem:[#allocation3 + $0x100] sm:$0xf] %v5813_v44  ;;  %v4279_v54 = vor.u32 %v5160_v31, %v4278_v39  ;;  %v5304_v39 = vunpack.c.h.bf16 %v5349_v24 }
  0x8f   : > { %2762 = vst [vmem:[#allocation3 + $0xf0] sm:$0xf] %v5861_v50 }
  0x90   : > { %2763 = vst [vmem:[#allocation3 + $0xfc] sm:$0xf] %v5868_v41  ;;  %1801 = vmatmul.bf16.gmra.mxu2 %v4279_v54  ;;  %v5135_v56 = vld [vmem:[#allocation3 + $0x34] sm:$0xf]  ;;  %v422_v54 = vmul.f32 %v5486_v13, %v5304_v39 }
  0x91   : > { %519 = vst [vmem:[#allocation2 + $0x79] sm:$0xff] %v5866_v38  ;;  %v4184_v5 = vld [vmem:[#allocation3 + $0x3c] sm:$0xf0] }
  0x92   : > { %520 = vst [vmem:[#allocation2 + $0x81] sm:$0xff] %v5871_v18  ;;  %v4187_v30 = vor.u32 %v5135_v56, %v4184_v5 }
  0x93   : > { %2842 = vst [vmem:[#allocation3 + $0x34] sm:$0xf] %v5879_v55 }
  0x94   : > { %2843 = vst [vmem:[#allocation3 + $0x40] sm:$0xf] %v5884_v63  ;;  %v5159_v43 = vld [vmem:[#allocation3 + $0xf4] sm:$0xf]  ;;  %1850 = vmatmul.bf16.gmra.mxu1 %v4187_v30 }
  0x95   : > { %v4280_v36 = vld [vmem:[#allocation3 + $0xfc] sm:$0xf0]  ;;  %2858 = vst [vmem:[#allocation3 + $0xf4] sm:$0xf] %v5891_v7 }
  0x96   : > { %v4283_v23 = vor.u32 %v5159_v43, %v4280_v36  ;;  %2859 = vst [vmem:[#allocation3 + $0x100] sm:$0xf] %v5898_v3 }
  0x97   : > { %613 = vst [vmem:[#allocation3 + $0x48] sm:$0xf] %v5735_v45 }
  0x98   : > { %1890 = vmatmul.bf16.gmra.mxu3 %v4283_v23  ;;  %614 = vst [vmem:[#allocation3 + $0x54] sm:$0xf] %v5738_v47  ;;  %v5303_v47 = vunpack.c.l.bf16 %v5349_v24  ;;  %v2684_v46 = vld [vmem:[#allocation2 + $0x78] sm:$0xff]  ;;  %v457_v23 = vadd.f32 %v5496_v19, %v422_v54  ;;  %v5971_v54 = vpack.c.bf16 %v5866_v38, %v5866_v38 }
  0x99   : > { %535 = vst [vmem:[#allocation2 + $0x139] sm:$0xff] %v5893_v59  ;;  %v5944_v56 = vpack.c.bf16 %v2684_v46, %v2684_v46 }
  0x9a   : > { %536 = vst [vmem:[#allocation2 + $0x141] sm:$0xff] %v5914_v16 }
  0x9b   : > { %629 = vst [vmem:[#allocation3 + $0x108] sm:$0xf] %v5770_v14  ;;  %v5357_v14 = vld [vmem:[%s5474_s16 + $0x68] sm:$0xff]  }
  0x9c   : > { %630 = vst [vmem:[#allocation3 + $0x114] sm:$0xf] %v5775_v17  ;;  %v5336_v43 = vunpack.c.h.bf16 %v5357_v14 }
  0x9d   : > { %709 = vst [vmem:[#allocation3 + $0x4c] sm:$0xf] %v5781_v22  ;;  %v2685_v22 = vld [vmem:[#allocation2 + $0x80] sm:$0xff] }
  0x9e   : > { %v5924_v26 = vld [vmem:[#allocation3 + $0x48] sm:$0xf]  ;;  %710 = vst [vmem:[#allocation3 + $0x58] sm:$0xf] %v5787_v25  ;;  %v421_v25 = vmul.f32 %v5486_v13, %v5303_v47  ;;  %v5949_v5 = vpack.c.bf16 %v2685_v22, %v2685_v22  ;;  %v438_v22 = vmul.f32 %v5486_v13, %v5336_v43 }
  0x9f   : > { %v5927_v45 = vld [vmem:[#allocation3 + $0x50] sm:$0xf0]  ;;  %1013 = vst [vmem:[#allocation3 + $0x48] sm:$0xf] %v5840_v6 }
  0xa0   : > { %1014 = vst [vmem:[#allocation3 + $0x54] sm:$0xf] %v5845_v8  ;;  %v2700_v30 = vld [vmem:[#allocation2 + $0x138] sm:$0xff]  ;;  %v456_v36 = vadd.f32 %v5496_v19, %v421_v25 }
  0xa1   : > { %725 = vst [vmem:[#allocation3 + $0x10c] sm:$0xf] %v5800_v53  ;;  %v5335_v53 = vunpack.c.l.bf16 %v5357_v14  ;;  %v2701_v32 = vld [vmem:[#allocation2 + $0x140] sm:$0xff]  ;;  %v5959_v47 = vpack.c.bf16 %v2700_v30, %v2700_v30 }
  0xa2   : > { %v5933_v17 = vld [vmem:[#allocation3 + $0x108] sm:$0xf]  ;;  %726 = vst [vmem:[#allocation3 + $0x118] sm:$0xf] %v5813_v44  ;;  %v5964_v46 = vpack.c.bf16 %v2701_v32, %v2701_v32  ;;  %v5980_v32 = vmax.f32 %v457_v23, 0.0  ;;  %v5993_v23 = vpack.c.bf16 %v5914_v16, %v5914_v16 }
  0xa3   : > { %6912 = vst [vmem:[#allocation9_spill] sm:$0xff] %v5933_v17  ;;  %v5936_v31 = vld [vmem:[#allocation3 + $0x110] sm:$0xf0]  ;;  %v437_v24 = vmul.f32 %v5486_v13, %v5335_v53  ;;  %v5973_v53 = vmax.f32 %v456_v36, 0.0  ;;  %v473_v36 = vadd.f32 %v5496_v19, %v438_v22  ;;  %v5116_v16 = vld [vmem:[%s6902_s3 + $0x58] sm:$0xff] }
  0xa4   : > { %6913 = vst [vmem:[#allocation10_spill] sm:$0xff] %v5936_v31  ;;  %v5941_v52 = vld [vmem:[#allocation3 + $0x4c] sm:$0xf]  ;;  %2503 = vmatpush.bf16.msrb.mxu0 %v5116_v16 }
  0xa5   : > { %1029 = vst [vmem:[#allocation3 + $0x108] sm:$0xf] %v5861_v50  ;;  %v5946_v9 = vld [vmem:[#allocation3 + $0x54] sm:$0xf0]  ;;  %v472_v13 = vadd.f32 %v5496_v19, %v437_v24  ;;  %v5196_v19 = vld [vmem:[%s6902_s3 + $0x158] sm:$0xff] }
  0xa6   : > { %1030 = vst [vmem:[#allocation3 + $0x114] sm:$0xf] %v5868_v41  ;;  %v4194_v44 = vld [vmem:[#allocation3 + $0x48] sm:$0xf]  ;;  %1925 = vmatpush.bf16.msrb.mxu2 %v5196_v19 }
  0xa7   : > { %1109 = vst [vmem:[#allocation3 + $0x4c] sm:$0xf] %v5879_v55  ;;  %v5139_v11 = vld [vmem:[#allocation3 + $0x50] sm:$0xf0]  ;;  %v5996_v24 = vmax.f32 %v472_v13, 0.0  ;;  %v5124_v22 = vld [vmem:[%s6902_s3 + $0x98] sm:$0xff] }
  0xa8   : > { %1110 = vst [vmem:[#allocation3 + $0x58] sm:$0xf] %v5884_v63  ;;  %v4195_v15 = vor.u32 %v5139_v11, %v4194_v44  ;;  %v5955_v48 = vld [vmem:[#allocation3 + $0x10c] sm:$0xf]  ;;  %v5978_v11 = vpack.c.bf16 %v5871_v18, %v5871_v18  ;;  %2592 = vmatpush.bf16.msrb.mxu1 %v5124_v22 }
  0xa9   : > { %2748 = vst [vmem:[#allocation3 + $0x48] sm:$0xf] %v5944_v56  ;;  %v5961_v39 = vld [vmem:[#allocation3 + $0x114] sm:$0xf0] }
  0xaa   : > { %2749 = vst [vmem:[#allocation3 + $0x54] sm:$0xf] %v5949_v5  ;;  %1766 = vmatmul.bf16.gmra.mxu0 %v4195_v15  ;;  %v5988_v15 = vpack.c.bf16 %v5893_v59, %v5893_v59  ;;  %v5108_v59 = vld [vmem:[%s6902_s3 + $0x18] sm:$0xff] }
  0xab   : > { %6914 = vst [vmem:[#allocation11_spill] sm:$0xff] %v5955_v48  ;;  %2414 = vmatpush.bf16.msrb.mxu3 %v5108_v59 }
  0xac   : > { %6915 = vst [vmem:[#allocation12_spill] sm:$0xff] %v5961_v39  ;;  %v4290_v14 = vld [vmem:[#allocation3 + $0x108] sm:$0xf] }
  0xad   : > { %1125 = vst [vmem:[#allocation3 + $0x10c] sm:$0xf] %v5891_v7  ;;  %v5163_v25 = vld [vmem:[#allocation3 + $0x110] sm:$0xf0] }
  0xae   : > { %1126 = vst [vmem:[#allocation3 + $0x118] sm:$0xf] %v5898_v3  ;;  %v4291_v44 = vor.u32 %v5163_v25, %v4290_v14  ;;  %v5138_v30 = vld [vmem:[#allocation3 + $0x4c] sm:$0xf] }
  0xaf   : > { %2764 = vst [vmem:[#allocation3 + $0x108] sm:$0xf] %v5959_v47  ;;  %v4196_v43 = vld [vmem:[#allocation3 + $0x54] sm:$0xf0] }
  0xb0   : > { %2765 = vst [vmem:[#allocation3 + $0x114] sm:$0xf] %v5964_v46  ;;  %1806 = vmatmul.bf16.gmra.mxu2 %v4291_v44  ;;  %v4199_v38 = vor.u32 %v5138_v30, %v4196_v43  ;;  %v6012_v44 = vmax.f32 %v473_v36, 0.0  ;;  %v5350_v30 = vld [vmem:[%s5474_s16 + $0x30] sm:$0xff]  }
  0xb1   : > { %2844 = vst [vmem:[#allocation3 + $0x4c] sm:$0xf] %v5971_v54  ;;  %v5308_v43 = vunpack.c.h.bf16 %v5350_v30 }
  0xb2   : > { %2845 = vst [vmem:[#allocation3 + $0x58] sm:$0xf] %v5978_v11  ;;  %1855 = vmatmul.bf16.gmra.mxu1 %v4199_v38 }
  0xb3   : > { %521 = vst [vmem:[#allocation2 + $0x91] sm:$0xff] %v5973_v53 }
  0xb4   : > { %v5162_v18 = vld [vmem:[#allocation3 + $0x10c] sm:$0xf]  ;;  %522 = vst [vmem:[#allocation2 + $0x99] sm:$0xff] %v5980_v32 }
  0xb5   : > { %v4292_v14 = vld [vmem:[#allocation3 + $0x114] sm:$0xf0]  ;;  %2860 = vst [vmem:[#allocation3 + $0x10c] sm:$0xf] %v5988_v15 }
  0xb6   : > { %v4295_v25 = vor.u32 %v5162_v18, %v4292_v14  ;;  %2861 = vst [vmem:[#allocation3 + $0x118] sm:$0xf] %v5993_v23 }
  0xb7   : > { %615 = vst [vmem:[#allocation3 + $0x60] sm:$0xf] %v5840_v6 }
  0xb8   : > { %1895 = vmatmul.bf16.gmra.mxu3 %v4295_v25  ;;  %616 = vst [vmem:[#allocation3 + $0x6c] sm:$0xf] %v5845_v8  ;;  %v5307_v8 = vunpack.c.l.bf16 %v5350_v30 }
  0xb9   : > { %537 = vst [vmem:[#allocation2 + $0x151] sm:$0xff] %v5996_v24 }
  0xba   : > { %538 = vst [vmem:[#allocation2 + $0x159] sm:$0xff] %v6012_v44  ;;  %v2686_v38 = vld [vmem:[#allocation2 + $0x90] sm:$0xff] }
  0xbb   : > { %631 = vst [vmem:[#allocation3 + $0x120] sm:$0xf] %v5861_v50  ;;  %v5358_v50 = vld [vmem:[%s5474_s16 + $0x70] sm:$0xff]  }
  0xbc   : > { %632 = vst [vmem:[#allocation3 + $0x12c] sm:$0xf] %v5868_v41  ;;  %v5339_v59 = vunpack.c.l.bf16 %v5358_v50  ;;  %v5340_v30 = vunpack.c.h.bf16 %v5358_v50 }
  0xbd   : > { %711 = vst [vmem:[#allocation3 + $0x64] sm:$0xf] %v5879_v55  ;;  %v2687_v55 = vld [vmem:[#allocation2 + $0x98] sm:$0xff] }
  0xbe   : > { %v6022_v13 = vld [vmem:[#allocation3 + $0x60] sm:$0xf]  ;;  %712 = vst [vmem:[#allocation3 + $0x70] sm:$0xf] %v5884_v63  ;;  %v6040_v63 = vld [vmem:[%s6900_s1] ss:$0 sm:$0xff]  ;;  %v6052_v22 = vpack.c.bf16 %v2687_v55, %v2687_v55 }
  0xbf   : > { %v6025_v6 = vld [vmem:[#allocation3 + $0x68] sm:$0xf0]  ;;  %1015 = vst [vmem:[#allocation3 + $0x60] sm:$0xf] %v5944_v56  ;;  %v423_v18 = vmul.f32 %v6040_v63, %v5307_v8  ;;  %v424_v19 = vmul.f32 %v6040_v63, %v5308_v43  ;;  %v6059_v43 = vld [vmem:[%s6901_s2] ss:$0 sm:$0xff]  ;;  %v439_v50 = vmul.f32 %v6040_v63, %v5339_v59 }
  0xc0   : > { %1016 = vst [vmem:[#allocation3 + $0x6c] sm:$0xf] %v5949_v5  ;;  %v2702_v25 = vld [vmem:[#allocation2 + $0x150] sm:$0xff] }
  0xc1   : > { %727 = vst [vmem:[#allocation3 + $0x124] sm:$0xf] %v5891_v7  ;;  %v459_v31 = vadd.f32 %v6059_v43, %v424_v19  ;;  %v6067_v17 = vpack.c.bf16 %v2702_v25, %v2702_v25  ;;  %v6079_v19 = vpack.c.bf16 %v5973_v53, %v5973_v53 }
  0xc2   : > { %v6031_v41 = vld [vmem:[#allocation3 + $0x120] sm:$0xf]  ;;  %728 = vst [vmem:[#allocation3 + $0x130] sm:$0xf] %v5898_v3  ;;  %v6047_v3 = vpack.c.bf16 %v2686_v38, %v2686_v38  ;;  %v458_v38 = vadd.f32 %v6059_v43, %v423_v18  ;;  %v440_v18 = vmul.f32 %v6040_v63, %v5340_v30  ;;  %v474_v30 = vadd.f32 %v6059_v43, %v439_v50 }
  0xc3   : > { %6916 = vst [vmem:[#allocation13_spill] sm:$0xff] %v6031_v41  ;;  %v6034_v36 = vld [vmem:[#allocation3 + $0x128] sm:$0xf0] }
  0xc4   : > { %6917 = vst [vmem:[#allocation14_spill] sm:$0xff] %v6034_v36  ;;  %v6044_v7 = vld [vmem:[#allocation3 + $0x64] sm:$0xf]  ;;  %v2703_v36 = vld [vmem:[#allocation2 + $0x158] sm:$0xff]  ;;  %v6081_v59 = vmax.f32 %v458_v38, 0.0  ;;  %v6096_v38 = vpack.c.bf16 %v5996_v24, %v5996_v24  ;;  %v6104_v50 = vmax.f32 %v474_v30, 0.0 }
  0xc5   : > { %1031 = vst [vmem:[#allocation3 + $0x120] sm:$0xf] %v5959_v47  ;;  %v6049_v14 = vld [vmem:[#allocation3 + $0x6c] sm:$0xf0]  ;;  %v6072_v62 = vpack.c.bf16 %v2703_v36, %v2703_v36  ;;  %v6086_v36 = vpack.c.bf16 %v5980_v32, %v5980_v32  ;;  %v6101_v32 = vpack.c.bf16 %v6012_v44, %v6012_v44  ;;  %v5107_v24 = vld [vmem:[%s6902_s3 + $0x10] sm:$0xff] }
  0xc6   : > { %1032 = vst [vmem:[#allocation3 + $0x12c] sm:$0xf] %v5964_v46  ;;  %v4206_v16 = vld [vmem:[#allocation3 + $0x60] sm:$0xf]  ;;  %2415 = vmatpush.bf16.msrb.mxu3 %v5107_v24 }
  0xc7   : > { %1111 = vst [vmem:[#allocation3 + $0x64] sm:$0xf] %v5971_v54  ;;  %v5142_v8 = vld [vmem:[#allocation3 + $0x68] sm:$0xf0]  ;;  %v5115_v44 = vld [vmem:[%s6902_s3 + $0x50] sm:$0xff] }
  0xc8   : > { %1112 = vst [vmem:[#allocation3 + $0x70] sm:$0xf] %v5978_v11  ;;  %v4207_v41 = vor.u32 %v5142_v8, %v4206_v16  ;;  %v6063_v55 = vld [vmem:[#allocation3 + $0x124] sm:$0xf]  ;;  %v6088_v8 = vmax.f32 %v459_v31, 0.0  ;;  %2504 = vmatpush.bf16.msrb.mxu0 %v5115_v44 }
  0xc9   : > { %2750 = vst [vmem:[#allocation3 + $0x60] sm:$0xf] %v6047_v3  ;;  %v6069_v48 = vld [vmem:[#allocation3 + $0x12c] sm:$0xf0] }
  0xca   : > { %2751 = vst [vmem:[#allocation3 + $0x6c] sm:$0xf] %v6052_v22  ;;  %1771 = vmatmul.bf16.gmra.mxu0 %v4207_v41 }
  0xcb   : > { %6918 = vst [vmem:[#allocation15_spill] sm:$0xff] %v6063_v55 }
  0xcc   : > { %6919 = vst [vmem:[#allocation16_spill] sm:$0xff] %v6069_v48  ;;  %v4302_v39 = vld [vmem:[#allocation3 + $0x120] sm:$0xf] }
  0xcd   : > { %1127 = vst [vmem:[#allocation3 + $0x124] sm:$0xf] %v5988_v15  ;;  %v5166_v16 = vld [vmem:[#allocation3 + $0x128] sm:$0xf0] }
  0xce   : > { %1128 = vst [vmem:[#allocation3 + $0x130] sm:$0xf] %v5993_v23  ;;  %v4303_v25 = vor.u32 %v5166_v16, %v4302_v39  ;;  %v5141_v41 = vld [vmem:[#allocation3 + $0x64] sm:$0xf]  ;;  %v475_v39 = vadd.f32 %v6059_v43, %v440_v18 }
  0xcf   : > { %2766 = vst [vmem:[#allocation3 + $0x120] sm:$0xf] %v6067_v17  ;;  %v4208_v55 = vld [vmem:[#allocation3 + $0x6c] sm:$0xf0]  ;;  %v5123_v16 = vld [vmem:[%s6902_s3 + $0x90] sm:$0xff] }
  0xd0   : > { %2767 = vst [vmem:[#allocation3 + $0x12c] sm:$0xf] %v6072_v62  ;;  %1811 = vmatmul.bf16.gmra.mxu2 %v4303_v25  ;;  %v4211_v53 = vor.u32 %v5141_v41, %v4208_v55  ;;  %v5195_v55 = vld [vmem:[%s6902_s3 + $0x150] sm:$0xff]  ;;  %v6120_v41 = vmax.f32 %v475_v39, 0.0  ;;  %2593 = vmatpush.bf16.msrb.mxu1 %v5123_v16 }
  0xd1   : > { %2846 = vst [vmem:[#allocation3 + $0x64] sm:$0xf] %v6079_v19  ;;  %1926 = vmatpush.bf16.msrb.mxu2 %v5195_v55 }
  0xd2   : > { %2847 = vst [vmem:[#allocation3 + $0x70] sm:$0xf] %v6086_v36  ;;  %1860 = vmatmul.bf16.gmra.mxu1 %v4211_v53 }
  0xd3   : > { %523 = vst [vmem:[#allocation2 + $0xa9] sm:$0xff] %v6081_v59 }
  0xd4   : > { %v5165_v31 = vld [vmem:[#allocation3 + $0x124] sm:$0xf]  ;;  %524 = vst [vmem:[#allocation2 + $0xb1] sm:$0xff] %v6088_v8 }
  0xd5   : > { %v4304_v18 = vld [vmem:[#allocation3 + $0x12c] sm:$0xf0]  ;;  %2862 = vst [vmem:[#allocation3 + $0x124] sm:$0xf] %v6096_v38 }
  0xd6   : > { %v4307_v25 = vor.u32 %v5165_v31, %v4304_v18  ;;  %2863 = vst [vmem:[#allocation3 + $0x130] sm:$0xf] %v6101_v32 }
  0xd7   : > { %617 = vst [vmem:[#allocation3 + $0x78] sm:$0xf] %v5944_v56 }
  0xd8   : > { %1900 = vmatmul.bf16.gmra.mxu3 %v4307_v25  ;;  %618 = vst [vmem:[#allocation3 + $0x84] sm:$0xf] %v5949_v5  ;;  %v5359_v5 = vld [vmem:[%s5474_s16 + $0x78] sm:$0xff]  }
  0xd9   : > { %539 = vst [vmem:[#allocation2 + $0x169] sm:$0xff] %v6104_v50  ;;  %v5344_v31 = vunpack.c.h.bf16 %v5359_v5 }
  0xda   : > { %540 = vst [vmem:[#allocation2 + $0x171] sm:$0xff] %v6120_v41  ;;  %v2688_v53 = vld [vmem:[#allocation2 + $0xa8] sm:$0xff] }
  0xdb   : > { %633 = vst [vmem:[#allocation3 + $0x138] sm:$0xf] %v5959_v47  ;;  %v2689_v47 = vld [vmem:[#allocation2 + $0xb0] sm:$0xff]  ;;  %v6147_v55 = vpack.c.bf16 %v2688_v53, %v2688_v53  ;;  %v442_v53 = vmul.f32 %v6040_v63, %v5344_v31 }
  0xdc   : > { %634 = vst [vmem:[#allocation3 + $0x144] sm:$0xf] %v5964_v46  ;;  %v6152_v18 = vpack.c.bf16 %v2689_v47, %v2689_v47 }
  0xdd   : > { %713 = vst [vmem:[#allocation3 + $0x7c] sm:$0xf] %v5971_v54  ;;  %v5343_v54 = vunpack.c.l.bf16 %v5359_v5 }
  0xde   : > { %v6129_v30 = vld [vmem:[#allocation3 + $0x78] sm:$0xf]  ;;  %714 = vst [vmem:[#allocation3 + $0x88] sm:$0xf] %v5978_v11 }
  0xdf   : > { %v6132_v56 = vld [vmem:[#allocation3 + $0x80] sm:$0xf0]  ;;  %1017 = vst [vmem:[#allocation3 + $0x78] sm:$0xf] %v6047_v3  ;;  %v441_v25 = vmul.f32 %v6040_v63, %v5343_v54 }
  0xe0   : > { %1018 = vst [vmem:[#allocation3 + $0x84] sm:$0xf] %v6052_v22 }
  0xe1   : > { %729 = vst [vmem:[#allocation3 + $0x13c] sm:$0xf] %v5988_v15  ;;  %v2705_v16 = vld [vmem:[#allocation2 + $0x170] sm:$0xff]  ;;  %v476_v63 = vadd.f32 %v6059_v43, %v441_v25 }
  0xe2   : > { %v6138_v39 = vld [vmem:[#allocation3 + $0x138] sm:$0xf]  ;;  %730 = vst [vmem:[#allocation3 + $0x148] sm:$0xf] %v5993_v23  ;;  %v6166_v12 = vpack.c.bf16 %v2705_v16, %v2705_v16 }
  0xe3   : > { %6920 = vst [vmem:[#allocation17_spill] sm:$0xff] %v6138_v39  ;;  %v6141_v46 = vld [vmem:[#allocation3 + $0x140] sm:$0xf0]  ;;  %v2704_v23 = vld [vmem:[#allocation2 + $0x168] sm:$0xff]  ;;  %v6197_v25 = vmax.f32 %v476_v63, 0.0 }
  0xe4   : > { %6921 = vst [vmem:[#allocation18_spill] sm:$0xff] %v6141_v46  ;;  %v6145_v11 = vld [vmem:[#allocation3 + $0x7c] sm:$0xf]  ;;  %v6161_v39 = vpack.c.bf16 %v2704_v23, %v2704_v23 }
  0xe5   : > { %1033 = vst [vmem:[#allocation3 + $0x138] sm:$0xf] %v6067_v17  ;;  %v6149_v24 = vld [vmem:[#allocation3 + $0x84] sm:$0xf0]  ;;  %v2691_v63 = vld [vmem:[#allocation2 + $0xc8] sm:$0xff]  ;;  %v6269_v33 = vpack.c.bf16 %v6197_v25, %v6197_v25 }
  0xe6   : > { %1034 = vst [vmem:[#allocation3 + $0x144] sm:$0xf] %v6072_v62  ;;  %v4218_v15 = vld [vmem:[#allocation3 + $0x78] sm:$0xf] }
  0xe7   : > { %1113 = vst [vmem:[#allocation3 + $0x7c] sm:$0xf] %v6079_v19  ;;  %v5145_v44 = vld [vmem:[#allocation3 + $0x80] sm:$0xf0] }
  0xe8   : > { %1114 = vst [vmem:[#allocation3 + $0x88] sm:$0xf] %v6086_v36  ;;  %v4219_v46 = vor.u32 %v5145_v44, %v4218_v15  ;;  %v6158_v5 = vld [vmem:[#allocation3 + $0x13c] sm:$0xf]  ;;  %v6172_v15 = vpack.c.bf16 %v6081_v59, %v6081_v59  ;;  %v477_v44 = vadd.f32 %v6059_v43, %v442_v53  ;;  %v6194_v43 = vpack.c.bf16 %v6104_v50, %v6104_v50 }
  0xe9   : > { %2752 = vst [vmem:[#allocation3 + $0x78] sm:$0xf] %v6147_v55  ;;  %v6163_v47 = vld [vmem:[#allocation3 + $0x144] sm:$0xf0]  ;;  %v5106_v59 = vld [vmem:[%s6902_s3 + $0x8] sm:$0xff] }
  0xea   : > { %2753 = vst [vmem:[#allocation3 + $0x84] sm:$0xf] %v6152_v18  ;;  %1776 = vmatmul.bf16.gmra.mxu0 %v4219_v46  ;;  %v6178_v46 = vpack.c.bf16 %v6088_v8, %v6088_v8  ;;  %v5114_v8 = vld [vmem:[%s6902_s3 + $0x48] sm:$0xff]  ;;  %2416 = vmatpush.bf16.msrb.mxu3 %v5106_v59 }
  0xeb   : > { %6922 = vst [vmem:[#allocation19_spill] sm:$0xff] %v6158_v5  ;;  %v5122_v53 = vld [vmem:[%s6902_s3 + $0x88] sm:$0xff]  ;;  %2505 = vmatpush.bf16.msrb.mxu0 %v5114_v8 }
  0xec   : > { %6923 = vst [vmem:[#allocation20_spill] sm:$0xff] %v6163_v47  ;;  %v4314_v48 = vld [vmem:[#allocation3 + $0x138] sm:$0xf]  ;;  %2594 = vmatpush.bf16.msrb.mxu1 %v5122_v53 }
  0xed   : > { %1129 = vst [vmem:[#allocation3 + $0x13c] sm:$0xf] %v6096_v38  ;;  %v5169_v54 = vld [vmem:[#allocation3 + $0x140] sm:$0xf0] }
  0xee   : > { %1130 = vst [vmem:[#allocation3 + $0x148] sm:$0xf] %v6101_v32  ;;  %v4315_v31 = vor.u32 %v5169_v54, %v4314_v48  ;;  %v5144_v23 = vld [vmem:[#allocation3 + $0x7c] sm:$0xf] }
  0xef   : > { %2768 = vst [vmem:[#allocation3 + $0x138] sm:$0xf] %v6161_v39  ;;  %v4220_v16 = vld [vmem:[#allocation3 + $0x84] sm:$0xf0]  ;;  %v5194_v48 = vld [vmem:[%s6902_s3 + $0x148] sm:$0xff] }
  0xf0   : > { %2769 = vst [vmem:[#allocation3 + $0x144] sm:$0xf] %v6166_v12  ;;  %1816 = vmatmul.bf16.gmra.mxu2 %v4315_v31  ;;  %v4223_v5 = vor.u32 %v5144_v23, %v4220_v16  ;;  %v6204_v31 = vpack.c.bf16 %v6120_v41, %v6120_v41  ;;  %v6207_v23 = vmax.f32 %v477_v44, 0.0 }
  0xf1   : > { %2848 = vst [vmem:[#allocation3 + $0x7c] sm:$0xf] %v6172_v15  ;;  %1927 = vmatpush.bf16.msrb.mxu2 %v5194_v48  ;;  %v2723_v48 = vpack.c.bf16 %v2691_v63, %v2691_v63  ;;  %v2786_v63 = vld [vmem:[#allocation2 + $0xc1] sm:$0xff] }
  0xf2   : > { %2849 = vst [vmem:[#allocation3 + $0x88] sm:$0xf] %v6178_v46  ;;  %1865 = vmatmul.bf16.gmra.mxu1 %v4223_v5  ;;  %v2690_v5 = vld [vmem:[#allocation2 + $0xc0] sm:$0xff] }
  0xf3   : > { %619 = vst [vmem:[#allocation3 + $0x90] sm:$0xf] %v6047_v3 }
  0xf4   : > { %v5168_v54 = vld [vmem:[#allocation3 + $0x13c] sm:$0xf]  ;;  %620 = vst [vmem:[#allocation3 + $0x9c] sm:$0xf] %v6052_v22 }
  0xf5   : > { %v4316_v50 = vld [vmem:[#allocation3 + $0x144] sm:$0xf0]  ;;  %2864 = vst [vmem:[#allocation3 + $0x13c] sm:$0xf] %v6194_v43 }
  0xf6   : > { %v4319_v3 = vor.u32 %v5168_v54, %v4316_v50  ;;  %2865 = vst [vmem:[#allocation3 + $0x148] sm:$0xf] %v6204_v31 }
  0xf7   : > { %541 = vst [vmem:[#allocation2 + $0x181] sm:$0xff] %v6197_v25 }
  0xf8   : > { %1905 = vmatmul.bf16.gmra.mxu3 %v4319_v3  ;;  %542 = vst [vmem:[#allocation2 + $0x189] sm:$0xff] %v6207_v23 }
  0xf9   : > { %635 = vst [vmem:[#allocation3 + $0x150] sm:$0xf] %v6067_v17  ;;  %v6227_v17 = vpack.c.bf16 %v2690_v5, %v2690_v5 }
  0xfa   : > { %v6214_v22 = vld [vmem:[#allocation3 + $0x90] sm:$0xf]  ;;  %636 = vst [vmem:[#allocation3 + $0x15c] sm:$0xf] %v6072_v62 }
  0xfb   : > { %v6217_v41 = vld [vmem:[#allocation3 + $0x98] sm:$0xf0]  ;;  %1019 = vst [vmem:[#allocation3 + $0x90] sm:$0xf] %v6147_v55 }
  0xfc   : > { %1020 = vst [vmem:[#allocation3 + $0x9c] sm:$0xf] %v6152_v18 }
  0xfd   : > { %715 = vst [vmem:[#allocation3 + $0x94] sm:$0xf] %v6079_v19 }
  0xfe   : > { %716 = vst [vmem:[#allocation3 + $0xa0] sm:$0xf] %v6086_v36 }
  0xff   : > { %731 = vst [vmem:[#allocation3 + $0x154] sm:$0xf] %v6096_v38  ;;  %v2706_v38 = vld [vmem:[#allocation2 + $0x180] sm:$0xff]  ;;  %v2707_v8 = vld [vmem:[#allocation2 + $0x188] sm:$0xff] }
 0x100   : > { %v6224_v44 = vld [vmem:[#allocation3 + $0x150] sm:$0xf]  ;;  %732 = vst [vmem:[#allocation3 + $0x160] sm:$0xf] %v6101_v32  ;;  %v2738_v54 = vpack.c.bf16 %v2706_v38, %v2706_v38  ;;  %v2739_v5 = vpack.c.bf16 %v2707_v8, %v2707_v8  ;;  %v1841_v38 = vpop.f32.mrf.mxu1 }
 0x101   : > { %6924 = vst [vmem:[#allocation21_spill] sm:$0xff] %v6224_v44  ;;  %v6229_v62 = vld [vmem:[#allocation3 + $0x158] sm:$0xf0]  ;;  %v1752_v44 = vpop.f32.mrf.mxu0  ;;  %v5105_v8 = vld [vmem:[%s6902_s3] sm:$0xff] }
 0x102   : > { %6925 = vst [vmem:[#allocation22_spill] sm:$0xff] %v6229_v62  ;;  %v4230_v16 = vld [vmem:[#allocation3 + $0x90] sm:$0xf]  ;;  %2417 = vmatpush.bf16.msrb.mxu3 %v5105_v8 }
 0x103   : > { %1035 = vst [vmem:[#allocation3 + $0x150] sm:$0xf] %v6161_v39  ;;  %v5148_v19 = vld [vmem:[#allocation3 + $0x98] sm:$0xf0] }
 0x104   : > { %1036 = vst [vmem:[#allocation3 + $0x15c] sm:$0xf] %v6166_v12  ;;  %v4231_v36 = vor.u32 %v5148_v19, %v4230_v16  ;;  %v6234_v59 = vld [vmem:[#allocation3 + $0x94] sm:$0xf]  ;;  %v2787_v19 = vld [vmem:[#allocation2 + $0xc9] sm:$0xff] }
 0x105   : > { %2754 = vst [vmem:[#allocation3 + $0x90] sm:$0xf] %v6227_v17  ;;  %v6236_v32 = vld [vmem:[#allocation3 + $0x9c] sm:$0xf0] }
 0x106   : > { %2755 = vst [vmem:[#allocation3 + $0x9c] sm:$0xf] %v2723_v48  ;;  %1781 = vmatmul.bf16.gmra.mxu0 %v4231_v36  ;;  %v6240_v53 = vld [vmem:[#allocation3 + $0x154] sm:$0xf] }
 0x107   : > { %1115 = vst [vmem:[#allocation3 + $0x94] sm:$0xf] %v6172_v15  ;;  %v6242_v50 = vld [vmem:[#allocation3 + $0x15c] sm:$0xf0]  ;;  %v5193_v36 = vld [vmem:[%s6902_s3 + $0x140] sm:$0xff] }
 0x108   : > { %1116 = vst [vmem:[#allocation3 + $0xa0] sm:$0xf] %v6178_v46  ;;  %1928 = vmatpush.bf16.msrb.mxu2 %v5193_v36 }
 0x109   : > { %6926 = vst [vmem:[#allocation23_spill] sm:$0xff] %v6240_v53  ;;  %v6249_v53 = vpack.c.bf16 %v2786_v63, %v2786_v63  ;;  %v6263_v63 = vpack.c.bf16 %v2787_v19, %v2787_v19 }
 0x10a   : > { %6927 = vst [vmem:[#allocation24_spill] sm:$0xff] %v6242_v50  ;;  %v4326_v3 = vld [vmem:[#allocation3 + $0x150] sm:$0xf] }
 0x10b   : > { %1131 = vst [vmem:[#allocation3 + $0x154] sm:$0xf] %v6194_v43  ;;  %v5172_v16 = vld [vmem:[#allocation3 + $0x158] sm:$0xf0]  ;;  %v5113_v50 = vld [vmem:[%s6902_s3 + $0x40] sm:$0xff] }
 0x10c   : > { %1132 = vst [vmem:[#allocation3 + $0x160] sm:$0xf] %v6204_v31  ;;  %v4327_v62 = vor.u32 %v5172_v16, %v4326_v3  ;;  %v5121_v3 = vld [vmem:[%s6902_s3 + $0x80] sm:$0xff]  ;;  %v6261_v16 = vadd.f32 %v1841_v38, %v1752_v44  ;;  %2506 = vmatpush.bf16.msrb.mxu0 %v5113_v50  ;;  %v2708_v38 = vld [vmem:[#allocation2 + $0x198] sm:$0xff] }
 0x10d   : > { %2770 = vst [vmem:[#allocation3 + $0x150] sm:$0xf] %v2738_v54  ;;  %2595 = vmatpush.bf16.msrb.mxu1 %v5121_v3  ;;  %v2693_v50 = vld [vmem:[#allocation2 + $0xe0] sm:$0xff] }
 0x10e   : > { %2771 = vst [vmem:[#allocation3 + $0x15c] sm:$0xf] %v2739_v5  ;;  %1821 = vmatmul.bf16.gmra.mxu2 %v4327_v62  ;;  %v5147_v47 = vld [vmem:[#allocation3 + $0x94] sm:$0xf]  ;;  %v2835_v62 = vpack.c.bf16 %v6207_v23, %v6207_v23  ;;  %v2692_v23 = vld [vmem:[#allocation2 + $0xd8] sm:$0xff] }
 0x10f   : > { %621 = vst [vmem:[#allocation3 + $0xa8] sm:$0xf] %v6147_v55  ;;  %v4232_v55 = vld [vmem:[#allocation3 + $0x9c] sm:$0xf0] }
 0x110   : > { %622 = vst [vmem:[#allocation3 + $0xb4] sm:$0xf] %v6152_v18  ;;  %v4235_v35 = vor.u32 %v5147_v47, %v4232_v55  ;;  %v5280_v55 = vld [vmem:[%s6905_s6 + $0x38] sm:$0xff] }
 0x111   : > { %2850 = vst [vmem:[#allocation3 + $0x94] sm:$0xf] %v6249_v53  ;;  %3889 = vmatpush.bf16.msra.mxu1 %v5280_v55 }
 0x112   : > { %2851 = vst [vmem:[#allocation3 + $0xa0] sm:$0xf] %v6263_v63  ;;  %v5171_v44 = vld [vmem:[#allocation3 + $0x154] sm:$0xf]  ;;  %1870 = vmatmul.bf16.gmra.mxu1 %v4235_v35  ;;  %v2724_v35 = vpack.c.bf16 %v2692_v23, %v2692_v23  ;;  %v2740_v23 = vpack.c.bf16 %v2708_v38, %v2708_v38 }
 0x113   : > { %v4328_v19 = vld [vmem:[#allocation3 + $0x15c] sm:$0xf0]  ;;  %2866 = vst [vmem:[#allocation3 + $0x154] sm:$0xf] %v6269_v33 }
 0x114   : > { %v4331_v18 = vor.u32 %v5171_v44, %v4328_v19  ;;  %2867 = vst [vmem:[#allocation3 + $0x160] sm:$0xf] %v2835_v62 }
 0x115   : > { %637 = vst [vmem:[#allocation3 + $0x168] sm:$0xf] %v6161_v39  ;;  %v2725_v39 = vpack.c.bf16 %v2693_v50, %v2693_v50 }
 0x116   : > { %1910 = vmatmul.bf16.gmra.mxu3 %v4331_v18  ;;  %v6276_v25 = vld [vmem:[#allocation3 + $0xa8] sm:$0xf]  ;;  %638 = vst [vmem:[#allocation3 + $0x174] sm:$0xf] %v6166_v12  ;;  %v735_v18 = vld [vmem:[#allocation2 + $0x2] sm:$0xff] }
 0x117   : > { %v6279_v47 = vld [vmem:[#allocation3 + $0xb0] sm:$0xf0]  ;;  %1021 = vst [vmem:[#allocation3 + $0xa8] sm:$0xf] %v6227_v17  ;;  %v767_v38 = vpack.c.bf16 %v735_v18, %v735_v18 }
 0x118   : > { %1022 = vst [vmem:[#allocation3 + $0xb4] sm:$0xf] %v2723_v48  ;;  %v1881_v48 = vpop.f32.mrf.mxu3 }
 0x119   : > { %717 = vst [vmem:[#allocation3 + $0xac] sm:$0xf] %v6172_v15  ;;  %v5256_v15 = vld [vmem:[%s6902_s3 + $0x1b8] sm:$0xff] }
 0x11a   : > { %718 = vst [vmem:[#allocation3 + $0xb8] sm:$0xf] %v6178_v46  ;;  %v5264_v46 = vld [vmem:[%s6902_s3 + $0x1f8] sm:$0xff]  ;;  %3478 = vmatpush.bf16.msra.mxu2 %v5256_v15 }
 0x11b   : > { %733 = vst [vmem:[#allocation3 + $0x16c] sm:$0xf] %v6194_v43  ;;  %v1792_v43 = vpop.f32.mrf.mxu2  ;;  %3567 = vmatpush.bf16.msra.mxu3 %v5264_v46 }
 0x11c   : > { %v6285_v36 = vld [vmem:[#allocation3 + $0x168] sm:$0xf]  ;;  %734 = vst [vmem:[#allocation3 + $0x178] sm:$0xf] %v6204_v31  ;;  %v6296_v3 = vadd.f32 %v1881_v48, %v1792_v43  ;;  %v6298_v31 = vpop.f32.mrf.mxu0  ;;  %v5390_v43 = vld [vmem:[#allocation2 + $0x8] sm:$0xff] }
 0x11d   : > { %6928 = vst [vmem:[#allocation25_spill] sm:$0xff] %v6285_v36  ;;  %v6288_v12 = vld [vmem:[#allocation3 + $0x170] sm:$0xf0]  ;;  %v2741_v48 = vpack.c.bf16 %v5390_v43, %v5390_v43 }
 0x11e   : > { %6929 = vst [vmem:[#allocation26_spill] sm:$0xff] %v6288_v12  ;;  %v4242_v17 = vld [vmem:[#allocation3 + $0xa8] sm:$0xf] }
 0x11f   : > { %1037 = vst [vmem:[#allocation3 + $0x168] sm:$0xf] %v2738_v54  ;;  %v5151_v8 = vld [vmem:[#allocation3 + $0xb0] sm:$0xf0]  ;;  %v6300_v54 = vpop.f32.mrf.mxu1 }
 0x120   : > { %1038 = vst [vmem:[#allocation3 + $0x174] sm:$0xf] %v2739_v5  ;;  %v5272_v5 = vld [vmem:[%s6902_s3 + $0x238] sm:$0xff]  ;;  %v4243_v44 = vor.u32 %v5151_v8, %v4242_v17  ;;  %v2789_v8 = vld [vmem:[#allocation2 + $0xe1] sm:$0xff]  ;;  %v6321_v36 = vpop.f32.mrf.mxu3 }
 0x121   : > { %2756 = vst [vmem:[#allocation3 + $0xa8] sm:$0xf] %v2724_v35  ;;  %v6308_v19 = vld [vmem:[#allocation3 + $0xac] sm:$0xf]  ;;  %v6310_v50 = vld [vmem:[#allocation3 + $0xb4] sm:$0xf0]  ;;  %3656 = vmatpush.bf16.msra.mxu0 %v5272_v5 }
 0x122   : > { %6930 = vst [vmem:[#allocation27_spill] sm:$0xff] %v6296_v3  ;;  %v736_v35 = vld [vmem:[#allocation2 + $0xa] sm:$0xff]  ;;  %1786 = vmatmul.bf16.gmra.mxu0 %v4243_v44  ;;  %v2788_v17 = vld [vmem:[#allocation2 + $0xd9] sm:$0xff]  ;;  %v2805_v44 = vld [vmem:[#allocation2 + $0x1a1] sm:$0xff] }
 0x123   : > { %2757 = vst [vmem:[#allocation3 + $0xb4] sm:$0xf] %v2725_v39  ;;  %v6314_v39 = vld [vmem:[#allocation3 + $0x16c] sm:$0xf]  ;;  %v6316_v3 = vld [vmem:[#allocation3 + $0x174] sm:$0xf0]  ;;  %v768_v46 = vpack.c.bf16 %v736_v35, %v736_v35  ;;  %v2820_v55 = vpack.c.bf16 %v2788_v17, %v2788_v17  ;;  %v6319_v12 = vpop.f32.mrf.mxu2 }
 0x124   : > { %1117 = vst [vmem:[#allocation3 + $0xac] sm:$0xf] %v6249_v53  ;;  %v2804_v53 = vld [vmem:[#allocation2 + $0x199] sm:$0xff]  ;;  %v1136_v17 = vld [vmem:[#allocation2 + $0x22] sm:$0xff] }
 0x125   : > { %1118 = vst [vmem:[#allocation3 + $0xb8] sm:$0xf] %v6263_v63  ;;  %v2821_v63 = vpack.c.bf16 %v2789_v8, %v2789_v8  ;;  %v1135_v35 = vld [vmem:[#allocation2 + $0x1a] sm:$0xff] }
 0x126   : > { %6931 = vst [vmem:[#allocation28_spill] sm:$0xff] %v6314_v39  ;;  %v4338_v15 = vld [vmem:[#allocation3 + $0x168] sm:$0xf]  ;;  %v2836_v39 = vpack.c.bf16 %v2804_v53, %v2804_v53  ;;  %v1168_v53 = vpack.c.bf16 %v1136_v17, %v1136_v17 }
 0x127   : > { %6932 = vst [vmem:[#allocation29_spill] sm:$0xff] %v6316_v3  ;;  %v5175_v5 = vld [vmem:[#allocation3 + $0x170] sm:$0xf0]  ;;  %v1757_v3 = vpop.f32.mrf.mxu0 }
 0x128   : > { %1133 = vst [vmem:[#allocation3 + $0x16c] sm:$0xf] %v6269_v33  ;;  %v4339_v43 = vor.u32 %v5175_v5, %v4338_v15  ;;  %v1846_v33 = vpop.f32.mrf.mxu1  ;;  %v1167_v5 = vpack.c.bf16 %v1135_v35, %v1135_v35 }
 0x129   : > { %1134 = vst [vmem:[#allocation3 + $0x178] sm:$0xf] %v2835_v62  ;;  %v2837_v62 = vpack.c.bf16 %v2805_v44, %v2805_v44  ;;  %v6323_v57 = vadd.f32 %v1846_v33, %v1757_v3  ;;  %v4451_v3 = vor.u32 %v5647_v58, %v5665_v0 }
 0x12a   : > { %2772 = vst [vmem:[#allocation3 + $0x168] sm:$0xf] %v2740_v23  ;;  %1826 = vmatmul.bf16.gmra.mxu2 %v4339_v43  ;;  %v2870_v43 = vld [vmem:[#allocation2 + $0x32] sm:$0xff] }
 0x12b   : > { %2773 = vst [vmem:[#allocation3 + $0x174] sm:$0xf] %v2741_v48  ;;  %v5150_v18 = vld [vmem:[#allocation3 + $0xac] sm:$0xf]  ;;  %v1797_v44 = vpop.f32.mrf.mxu2 }
 0x12c   : > { %6933 = vst [vmem:[#allocation30_spill] sm:$0xff] %v6319_v12  ;;  %v4244_v23 = vld [vmem:[#allocation3 + $0xb4] sm:$0xf0] }
 0x12d   : > { %6934 = vst [vmem:[#allocation31_spill] sm:$0xff] %v6321_v36  ;;  %v4247_v48 = vor.u32 %v5150_v18, %v4244_v23  ;;  %v2871_v36 = vld [vmem:[#allocation2 + $0x3a] sm:$0xff]  ;;  %v2873_v18 = vld [vmem:[#allocation2 + $0x52] sm:$0xff] }
 0x12e   : > { %799 = vst [vmem:[#allocation3 + $0x8] sm:$0xf] %v767_v38  ;;  %v2903_v17 = vpack.c.bf16 %v2871_v36, %v2871_v36  ;;  %v2905_v58 = vpack.c.bf16 %v2873_v18, %v2873_v18 }
 0x12f   : > { %800 = vst [vmem:[#allocation3 + $0x14] sm:$0xf] %v768_v46  ;;  %v5174_v8 = vld [vmem:[#allocation3 + $0x16c] sm:$0xf]  ;;  %1875 = vmatmul.bf16.gmra.mxu1 %v4247_v48 }
 0x130   : > { %2852 = vst [vmem:[#allocation3 + $0xac] sm:$0xf] %v2820_v55  ;;  %v4340_v15 = vld [vmem:[#allocation3 + $0x174] sm:$0xf0]  ;;  %v6331_v23 = vpop.f32.mrf.mxu1 }
 0x131   : > { %2853 = vst [vmem:[#allocation3 + $0xb8] sm:$0xf] %v2821_v63  ;;  %v4343_v38 = vor.u32 %v5174_v8, %v4340_v15  ;;  %v2872_v55 = vld [vmem:[#allocation2 + $0x4a] sm:$0xff]  ;;  %v1886_v63 = vpop.f32.mrf.mxu3 }
 0x132   : > { %2868 = vst [vmem:[#allocation3 + $0x16c] sm:$0xf] %v2836_v39  ;;  %v2902_v39 = vpack.c.bf16 %v2870_v43, %v2870_v43  ;;  %v6327_v35 = vadd.f32 %v1886_v63, %v1797_v44  ;;  %v2904_v48 = vpack.c.bf16 %v2872_v55, %v2872_v55  ;;  %2507 = vmatmul.bf16.vlgmr.msrb.gmra.mxu0 %v4451_v3 }
 0x133   : > { %2869 = vst [vmem:[#allocation3 + $0x178] sm:$0xf] %v2837_v62  ;;  %1915 = vmatmul.bf16.gmra.mxu3 %v4343_v38  ;;  %v6329_v62 = vpop.f32.mrf.mxu0 }
 0x134   : > { %801 = vst [vmem:[#allocation3 + $0x20] sm:$0xf] %v1167_v5 }
 0x135   : > { %v4454_v46 = vld [vmem:[#allocation3 + $0x8] sm:$0xf]  ;;  %802 = vst [vmem:[#allocation3 + $0x2c] sm:$0xf] %v1168_v53 }
 0x136   : > { %v5059_v33 = vld [vmem:[#allocation3 + $0x10] sm:$0xf0]  ;;  %1199 = vst [vmem:[#allocation3 + $0x8] sm:$0xf] %v1167_v5  ;;  %v6337_v5 = vpop.f32.mrf.mxu2 }
 0x137   : > { %6935 = vst [vmem:[#allocation32_spill] sm:$0xff] %v6327_v35  ;;  %v4455_v55 = vor.u32 %v5059_v33, %v4454_v46  ;;  %v2875_v35 = vld [vmem:[#allocation2 + $0x6a] sm:$0xff]  ;;  %v4463_v46 = vor.u32 %v5756_v29, %v5760_v28 }
 0x138   : > { %1200 = vst [vmem:[#allocation3 + $0x14] sm:$0xf] %v1168_v53  ;;  %v1851_v43 = vpop.f32.mrf.mxu1  ;;  %v5255_v33 = vld [vmem:[%s6902_s3 + $0x1b0] sm:$0xff] }
 0x139   : > { %803 = vst [vmem:[#allocation3 + $0x38] sm:$0xf] %v2902_v39  ;;  %v6339_v38 = vpop.f32.mrf.mxu3  ;;  %v5279_v28 = vld [vmem:[%s6905_s6 + $0x30] sm:$0xff]  ;;  %3479 = vmatpush.bf16.msra.mxu2 %v5255_v33 }
 0x13a   : > { %804 = vst [vmem:[#allocation3 + $0x44] sm:$0xf] %v2903_v17  ;;  %3890 = vmatpush.bf16.msra.mxu1 %v5279_v28  ;;  %v2877_v28 = vld [vmem:[#allocation2 + $0x82] sm:$0xff] }
 0x13b   : > { %805 = vst [vmem:[#allocation3 + $0x50] sm:$0xf] %v2904_v48  ;;  %v6333_v0 = vld [vmem:[#allocation3 + $0x20] sm:$0xf]  ;;  %v1762_v36 = vpop.f32.mrf.mxu0 }
 0x13c   : > { %806 = vst [vmem:[#allocation3 + $0x5c] sm:$0xf] %v2905_v58  ;;  %v6335_v8 = vld [vmem:[#allocation3 + $0x28] sm:$0xf0]  ;;  %v6341_v44 = vadd.f32 %v1851_v43, %v1762_v36 }
 0x13d   : > { %1201 = vst [vmem:[#allocation3 + $0x20] sm:$0xf] %v2902_v39  ;;  %v4166_v15 = vld [vmem:[#allocation3 + $0x8] sm:$0xf] }
 0x13e   : > { %1202 = vst [vmem:[#allocation3 + $0x2c] sm:$0xf] %v2903_v17 }
 0x13f   : > { %6936 = vst [vmem:[#allocation33_spill] sm:$0xff] %v6337_v5  ;;  %v5131_v53 = vld [vmem:[#allocation3 + $0x10] sm:$0xf0]  ;;  %v4447_v5 = vor.u32 %v5549_v40, %v5543_v37  ;;  %2596 = vmatmul.bf16.vlgmr.msrb.gmra.mxu1 %v4455_v55  ;;  %v5263_v37 = vld [vmem:[%s6902_s3 + $0x1f0] sm:$0xff]  ;;  %v1802_v40 = vpop.f32.mrf.mxu2 }
 0x140   : > { %6937 = vst [vmem:[#allocation34_spill] sm:$0xff] %v6339_v38  ;;  %v4167_v3 = vor.u32 %v5131_v53, %v4166_v15  ;;  %v6343_v63 = vld [vmem:[#allocation3 + $0x38] sm:$0xf]  ;;  %v6364_v29 = vpop.f32.mrf.mxu1  ;;  %3568 = vmatpush.bf16.msra.mxu3 %v5263_v37  ;;  %v4467_v37 = vor.u32 %v6335_v8, %v6333_v0 }
 0x141   : > { %2934 = vst [vmem:[#allocation3 + $0x8] sm:$0xf] %v2902_v39  ;;  %v6345_v18 = vld [vmem:[#allocation3 + $0x40] sm:$0xf0]  ;;  %v2874_v38 = vld [vmem:[#allocation2 + $0x62] sm:$0xff] }
 0x142   : > { %2935 = vst [vmem:[#allocation3 + $0x14] sm:$0xf] %v2903_v17  ;;  %1929 = vmatmul.bf16.vlgmr.msrb.gmra.mxu2 %v4167_v3  ;;  %v2906_v12 = vpack.c.bf16 %v2874_v38, %v2874_v38  ;;  %v1891_v17 = vpop.f32.mrf.mxu3  ;;  %v5271_v38 = vld [vmem:[%s6902_s3 + $0x230] sm:$0xff]  ;;  %v6369_v53 = vld [vmem:[#allocation3 + $0x50] sm:$0xf]  ;;  %2512 = vmatmul.bf16.gmra.mxu0 %v4463_v46  ;;  %v4459_v46 = vor.u32 %v5725_v34, %v5720_v27 }
 0x143   : > { %1203 = vst [vmem:[#allocation3 + $0x38] sm:$0xf] %v2904_v48  ;;  %2418 = vmatmul.bf16.vlgmr.msrb.gmra.mxu3 %v4447_v5  ;;  %v6360_v5 = vadd.f32 %v1891_v17, %v1802_v40  ;;  %v6371_v43 = vld [vmem:[#allocation3 + $0x58] sm:$0xf0]  ;;  %3657 = vmatpush.bf16.msra.mxu0 %v5271_v38  ;;  %v2876_v38 = vld [vmem:[#allocation2 + $0x7a] sm:$0xff] }
 0x144   : > { %1204 = vst [vmem:[#allocation3 + $0x44] sm:$0xf] %v2905_v58  ;;  %v4178_v39 = vld [vmem:[#allocation3 + $0x20] sm:$0xf] }
 0x145   : > { %v5134_v15 = vld [vmem:[#allocation3 + $0x28] sm:$0xf0]  ;;  %2936 = vst [vmem:[#allocation3 + $0x20] sm:$0xf] %v2904_v48  ;;  %v2907_v48 = vpack.c.bf16 %v2875_v35, %v2875_v35 }
 0x146   : > { %2937 = vst [vmem:[#allocation3 + $0x2c] sm:$0xf] %v2905_v58  ;;  %v6362_v58 = vpop.f32.mrf.mxu0  ;;  %v4179_v35 = vor.u32 %v5134_v15, %v4178_v39  ;;  %v2909_v15 = vpack.c.bf16 %v2877_v28, %v2877_v28 }
 0x147   : > { %6938 = vst [vmem:[#allocation35_spill] sm:$0xff] %v6360_v5  ;;  %v6373_v55 = vpop.f32.mrf.mxu2 }
 0x148   : > { %1205 = vst [vmem:[#allocation3 + $0x50] sm:$0xf] %v2906_v12  ;;  %v1856_v33 = vpop.f32.mrf.mxu1 }
 0x149   : > { %1206 = vst [vmem:[#allocation3 + $0x5c] sm:$0xf] %v2907_v48 }
 0x14a   : > { %v4190_v36 = vld [vmem:[#allocation3 + $0x38] sm:$0xf]  ;;  %807 = vst [vmem:[#allocation3 + $0x68] sm:$0xf] %v2906_v12  ;;  %v6375_v40 = vpop.f32.mrf.mxu3 }
 0x14b   : > { %v5137_v3 = vld [vmem:[#allocation3 + $0x40] sm:$0xf0]  ;;  %2938 = vst [vmem:[#allocation3 + $0x38] sm:$0xf] %v2906_v12  ;;  %v2908_v12 = vpack.c.bf16 %v2876_v38, %v2876_v38 }
 0x14c   : > { %2939 = vst [vmem:[#allocation3 + $0x44] sm:$0xf] %v2907_v48 }
 0x14d   : > { %808 = vst [vmem:[#allocation3 + $0x74] sm:$0xf] %v2907_v48 }
 0x14e   : > { %6939 = vst [vmem:[#allocation36_spill] sm:$0xff] %v6375_v40  ;;  %v1767_v17 = vpop.f32.mrf.mxu0  ;;  %v4475_v40 = vor.u32 %v5851_v20, %v5854_v21  ;;  %v4479_v21 = vor.u32 %v6345_v18, %v6343_v63  ;;  %v4487_v63 = vor.u32 %v5941_v52, %v5946_v9  ;;  %v5254_v18 = vld [vmem:[%s6902_s3 + $0x1a8] sm:$0xff] }
 0x14f   : > { %v6379_v5 = vadd.f32 %v1856_v33, %v1767_v17  ;;  %2601 = vmatmul.bf16.gmra.mxu1 %v4467_v37  ;;  %v4202_v39 = vld [vmem:[#allocation3 + $0x50] sm:$0xf]  ;;  %v1807_v0 = vpop.f32.mrf.mxu2  ;;  %809 = vst [vmem:[#allocation3 + $0x80] sm:$0xf] %v2908_v12  ;;  %v4191_v37 = vor.u32 %v5137_v3, %v4190_v36  ;;  %3480 = vmatpush.bf16.msra.mxu2 %v5254_v18  ;;  %v2880_v18 = vld [vmem:[#allocation2 + $0xaa] sm:$0xff] }
 0x150   : > { %v5140_v48 = vld [vmem:[#allocation3 + $0x58] sm:$0xf0]  ;;  %2940 = vst [vmem:[#allocation3 + $0x50] sm:$0xf] %v2908_v12  ;;  %v6393_v33 = vpop.f32.mrf.mxu1 }
 0x151   : > { %2941 = vst [vmem:[#allocation3 + $0x5c] sm:$0xf] %v2909_v15  ;;  %v6385_v17 = vld [vmem:[#allocation3 + $0x68] sm:$0xf] }
 0x152   : > { %1934 = vmatmul.bf16.gmra.mxu2 %v4179_v35  ;;  %v1896_v8 = vpop.f32.mrf.mxu3  ;;  %1207 = vst [vmem:[#allocation3 + $0x68] sm:$0xf] %v2908_v12  ;;  %2517 = vmatmul.bf16.gmra.mxu0 %v4475_v40  ;;  %v2879_v12 = vld [vmem:[#allocation2 + $0x9a] sm:$0xff] }
 0x153   : > { %2423 = vmatmul.bf16.gmra.mxu3 %v4459_v46  ;;  %v6389_v27 = vadd.f32 %v1896_v8, %v1807_v0  ;;  %810 = vst [vmem:[#allocation3 + $0x8c] sm:$0xf] %v2909_v15  ;;  %v4471_v0 = vor.u32 %v5827_v49, %v5824_v51  ;;  %v2911_v3 = vpack.c.bf16 %v2879_v12, %v2879_v12  ;;  %v5262_v51 = vld [vmem:[%s6902_s3 + $0x1e8] sm:$0xff] }
 0x154   : > { %v6387_v35 = vld [vmem:[#allocation3 + $0x70] sm:$0xf0]  ;;  %v5270_v49 = vld [vmem:[%s6902_s3 + $0x228] sm:$0xff]  ;;  %3569 = vmatpush.bf16.msra.mxu3 %v5262_v51  ;;  %v4483_v12 = vor.u32 %v5927_v45, %v5924_v26  ;;  %v2881_v51 = vld [vmem:[#allocation2 + $0xb2] sm:$0xff] }
 0x155   : > { %6940 = vst [vmem:[#allocation37_spill] sm:$0xff] %v6389_v27  ;;  %v2878_v27 = vld [vmem:[#allocation2 + $0x92] sm:$0xff]  ;;  %3658 = vmatpush.bf16.msra.mxu0 %v5270_v49 }
 0x156   : > { %v6391_v34 = vpop.f32.mrf.mxu0  ;;  %1208 = vst [vmem:[#allocation3 + $0x74] sm:$0xf] %v2909_v15  ;;  %v2910_v40 = vpack.c.bf16 %v2878_v27, %v2878_v27  ;;  %v5278_v27 = vld [vmem:[%s6905_s6 + $0x28] sm:$0xff] }
 0x157   : > { %v6395_v20 = vpop.f32.mrf.mxu2  ;;  %3891 = vmatpush.bf16.msra.mxu1 %v5278_v27  ;;  %812 = vst [vmem:[#allocation3 + $0xa4] sm:$0xf] %v2911_v3 }
 0x158   : > { %v1861_v28 = vpop.f32.mrf.mxu1  ;;  %811 = vst [vmem:[#allocation3 + $0x98] sm:$0xf] %v2910_v40 }
 0x159   : > { %v4214_v36 = vld [vmem:[#allocation3 + $0x68] sm:$0xf] }
 0x15a   : > { %v6399_v46 = vpop.f32.mrf.mxu3  ;;  %2942 = vst [vmem:[#allocation3 + $0x68] sm:$0xf] %v2910_v40  ;;  %v6421_v52 = vld [vmem:[#allocation3 + $0x88] sm:$0xf0] }
 0x15b   : > { %6941 = vst [vmem:[#allocation38_spill] sm:$0xff] %v6399_v46 }
 0x15c   : > { %1210 = vst [vmem:[#allocation3 + $0x8c] sm:$0xf] %v2911_v3 }
 0x15d   : > { %v5143_v15 = vld [vmem:[#allocation3 + $0x70] sm:$0xf0] }
 0x15e   : > { %v1772_v38 = vpop.f32.mrf.mxu0  ;;  %2943 = vst [vmem:[#allocation3 + $0x74] sm:$0xf] %v2911_v3  ;;  %v2913_v3 = vpack.c.bf16 %v2881_v51, %v2881_v51  ;;  %v6437_v45 = vld [vmem:[#allocation3 + $0xa0] sm:$0xf0] }
 0x15f   : > { %v6403_v8 = vadd.f32 %v1861_v28, %v1772_v38  ;;  %2606 = vmatmul.bf16.gmra.mxu1 %v4479_v21  ;;  %v1812_v9 = vpop.f32.mrf.mxu2  ;;  %v4203_v28 = vor.u32 %v5140_v48, %v4202_v39  ;;  %v6435_v26 = vld [vmem:[#allocation3 + $0x98] sm:$0xf] }
 0x160   : > { %v6431_v49 = vpop.f32.mrf.mxu1  ;;  %814 = vst [vmem:[#allocation3 + $0xbc] sm:$0xf] %v2913_v3 }
 0x161   : > { %1212 = vst [vmem:[#allocation3 + $0xa4] sm:$0xf] %v2913_v3 }
 0x162   : > { %1939 = vmatmul.bf16.gmra.mxu2 %v4191_v37  ;;  %v6419_v37 = vld [vmem:[#allocation3 + $0x80] sm:$0xf]  ;;  %2522 = vmatmul.bf16.gmra.mxu0 %v4487_v63  ;;  %v1901_v21 = vpop.f32.mrf.mxu3  ;;  %v2912_v63 = vpack.c.bf16 %v2880_v18, %v2880_v18 }
 0x163   : > { %2428 = vmatmul.bf16.gmra.mxu3 %v4471_v0  ;;  %1209 = vst [vmem:[#allocation3 + $0x80] sm:$0xf] %v2910_v40  ;;  %v6423_v38 = vadd.f32 %v1901_v21, %v1812_v9  ;;  %v4491_v0 = vor.u32 %v6371_v43, %v6369_v53  ;;  %v5146_v27 = vld [vmem:[#allocation3 + $0x88] sm:$0xf0]  ;;  %v4499_v53 = vor.u32 %v6044_v7, %v6049_v14 }
 0x164   : > { %2945 = vst [vmem:[#allocation3 + $0x8c] sm:$0xf] %v2913_v3  ;;  %v4215_v21 = vor.u32 %v5143_v15, %v4214_v36  ;;  %v4503_v7 = vor.u32 %v6387_v35, %v6385_v17  ;;  %v4495_v14 = vor.u32 %v6025_v6, %v6022_v13  ;;  %v4511_v36 = vor.u32 %v6145_v11, %v6149_v24  ;;  %v5253_v17 = vld [vmem:[%s6902_s3 + $0x1a0] sm:$0xff] }
 0x165   : > { %813 = vst [vmem:[#allocation3 + $0xb0] sm:$0xf] %v2912_v63  ;;  %v5261_v13 = vld [vmem:[%s6902_s3 + $0x1e0] sm:$0xff]  ;;  %3481 = vmatpush.bf16.msra.mxu2 %v5253_v17 }
 0x166   : > { %v6429_v46 = vpop.f32.mrf.mxu0  ;;  %1211 = vst [vmem:[#allocation3 + $0x98] sm:$0xf] %v2912_v63  ;;  %v5269_v6 = vld [vmem:[%s6902_s3 + $0x220] sm:$0xff]  ;;  %3570 = vmatpush.bf16.msra.mxu3 %v5261_v13 }
 0x167   : > { %v6439_v43 = vpop.f32.mrf.mxu2  ;;  %3659 = vmatpush.bf16.msra.mxu0 %v5269_v6  ;;  %v5277_v24 = vld [vmem:[%s6905_s6 + $0x20] sm:$0xff] }
 0x168   : > { %v5149_v3 = vld [vmem:[#allocation3 + $0xa0] sm:$0xf0]  ;;  %3892 = vmatpush.bf16.msra.mxu1 %v5277_v24  ;;  %v2885_v17 = vld [vmem:[#allocation2 + $0xe2] sm:$0xff]  ;;  %v4527_v24 = vor.u32 %v6437_v45, %v6435_v26  ;;  %v5260_v45 = vld [vmem:[%s6902_s3 + $0x1d8] sm:$0xff] }
 0x16a   : > { %v4226_v40 = vld [vmem:[#allocation3 + $0x80] sm:$0xf]  ;;  %v6441_v39 = vpop.f32.mrf.mxu3  ;;  %3571 = vmatpush.bf16.msra.mxu3 %v5260_v45 }
 0x16b   : > { %2944 = vst [vmem:[#allocation3 + $0x80] sm:$0xf] %v2912_v63 }
 0x16d   : > { %v4238_v51 = vld [vmem:[#allocation3 + $0x98] sm:$0xf] }
 0x16e   : > { %v1777_v48 = vpop.f32.mrf.mxu0 }
 0x16f   : > { %2611 = vmatmul.bf16.gmra.mxu1 %v4491_v0  ;;  %v1866_v9 = vpop.f32.mrf.mxu1  ;;  %v2882_v0 = vld [vmem:[#allocation2 + $0xc2] sm:$0xff] }
 0x170   : > { %v2914_v18 = vpack.c.bf16 %v2882_v0, %v2882_v0  ;;  %v6475_v0 = vld [vmem:[#allocation3 + $0xb8] sm:$0xf0] }
 0x172   : > { %1944 = vmatmul.bf16.gmra.mxu2 %v4203_v28  ;;  %2527 = vmatmul.bf16.gmra.mxu0 %v4499_v53  ;;  %v6443_v28 = vadd.f32 %v1866_v9, %v1777_v48  ;;  %2946 = vst [vmem:[#allocation3 + $0x98] sm:$0xf] %v2914_v18  ;;  %v4227_v48 = vor.u32 %v5146_v27, %v4226_v40 }
 0x173   : > { %2433 = vmatmul.bf16.gmra.mxu3 %v4483_v12  ;;  %v2883_v12 = vld [vmem:[#allocation2 + $0xca] sm:$0xff]  ;;  %v1817_v53 = vpop.f32.mrf.mxu2  ;;  %815 = vst [vmem:[#allocation3 + $0xc8] sm:$0xf] %v2914_v18  ;;  %v2917_v27 = vpack.c.bf16 %v2885_v17, %v2885_v17 }
 0x174   : > { %v2915_v63 = vpack.c.bf16 %v2883_v12, %v2883_v12  ;;  %v2884_v12 = vld [vmem:[#allocation2 + $0xda] sm:$0xff] }
 0x175   : > { %v2916_v40 = vpack.c.bf16 %v2884_v12, %v2884_v12  ;;  %818 = vst [vmem:[#allocation3 + $0xec] sm:$0xf] %v2917_v27  ;;  %v2886_v12 = vld [vmem:[#allocation2 + $0xf2] sm:$0xff] }
 0x176   : > { %2947 = vst [vmem:[#allocation3 + $0xa4] sm:$0xf] %v2915_v63  ;;  %v6462_v11 = vpop.f32.mrf.mxu0  ;;  %v2918_v17 = vpack.c.bf16 %v2886_v12, %v2886_v12  ;;  %v4531_v12 = vor.u32 %v6279_v47, %v6276_v25 }
 0x177   : > { %816 = vst [vmem:[#allocation3 + $0xd4] sm:$0xf] %v2915_v63  ;;  %v6467_v9 = vpop.f32.mrf.mxu1 }
 0x178   : > { %1214 = vst [vmem:[#allocation3 + $0xbc] sm:$0xf] %v2915_v63  ;;  %v4239_v63 = vor.u32 %v5149_v3, %v4238_v51 }
 0x179   : > { %817 = vst [vmem:[#allocation3 + $0xe0] sm:$0xf] %v2916_v40 }
 0x17a   : > { %819 = vst [vmem:[#allocation3 + $0xf8] sm:$0xf] %v2918_v17 }
 0x17b   : > { %v1906_v35 = vpop.f32.mrf.mxu3 }
 0x17c   : > { %v6460_v15 = vadd.f32 %v1906_v35, %v1817_v53  ;;  %v6477_v53 = vpop.f32.mrf.mxu2 }
 0x17f   : > { %2616 = vmatmul.bf16.gmra.mxu1 %v4503_v7  ;;  %v4507_v7 = vor.u32 %v6132_v56, %v6129_v30  ;;  %v5152_v6 = vld [vmem:[#allocation3 + $0xb8] sm:$0xf0] }
 0x180   : > { %2949 = vst [vmem:[#allocation3 + $0xbc] sm:$0xf] %v2917_v27 }
 0x182   : > { %1949 = vmatmul.bf16.gmra.mxu2 %v4215_v21  ;;  %2532 = vmatmul.bf16.gmra.mxu0 %v4511_v36  ;;  %v4515_v21 = vor.u32 %v6421_v52, %v6419_v37  ;;  %v4523_v37 = vor.u32 %v6234_v59, %v6236_v32  ;;  %v4519_v59 = vor.u32 %v6217_v41, %v6214_v22  ;;  %v5252_v41 = vld [vmem:[%s6902_s3 + $0x198] sm:$0xff] }
 0x183   : > { %2438 = vmatmul.bf16.gmra.mxu3 %v4495_v14  ;;  %v6473_v14 = vld [vmem:[#allocation3 + $0xb0] sm:$0xf]  ;;  %v1782_v36 = vpop.f32.mrf.mxu0  ;;  %v6481_v30 = vpop.f32.mrf.mxu3  ;;  %v4535_v22 = vor.u32 %v6308_v19, %v6310_v50  ;;  %3482 = vmatpush.bf16.msra.mxu2 %v5252_v41  ;;  %v5268_v50 = vld [vmem:[%s6902_s3 + $0x218] sm:$0xff] }
 0x184   : > { %1213 = vst [vmem:[#allocation3 + $0xb0] sm:$0xf] %v2914_v18  ;;  %3660 = vmatpush.bf16.msra.mxu0 %v5268_v50  ;;  %v2889_v41 = vld [vmem:[#allocation2 + $0x112] sm:$0xff] }
 0x185   : > { %v2921_v47 = vpack.c.bf16 %v2889_v41, %v2889_v41 }
 0x187   : > { %822 = vst [vmem:[#allocation3 + $0x11c] sm:$0xf] %v2921_v47 }
 0x18b   : > { %v4250_v13 = vld [vmem:[#allocation3 + $0xb0] sm:$0xf]  ;;  %v6485_v35 = vpop.f32.mrf.mxu0 }
 0x18c   : > { %2948 = vst [vmem:[#allocation3 + $0xb0] sm:$0xf] %v2916_v40  ;;  %v4251_v19 = vor.u32 %v5152_v6, %v4250_v13  ;;  %v6520_v13 = vld [vmem:[#allocation3 + $0xe8] sm:$0xf0]  ;;  %v2888_v6 = vld [vmem:[#allocation2 + $0x10a] sm:$0xff] }
 0x18d   : > { %v2920_v25 = vpack.c.bf16 %v2888_v6, %v2888_v6 }
 0x18f   : > { %2621 = vmatmul.bf16.gmra.mxu1 %v4515_v21  ;;  %v1871_v56 = vpop.f32.mrf.mxu1  ;;  %v6493_v21 = vld [vmem:[#allocation3 + $0xc8] sm:$0xf]  ;;  %821 = vst [vmem:[#allocation3 + $0x110] sm:$0xf] %v2920_v25 }
 0x190   : > { %v6483_v52 = vadd.f32 %v1871_v56, %v1782_v36  ;;  %1215 = vst [vmem:[#allocation3 + $0xc8] sm:$0xf] %v2916_v40  ;;  %v2887_v36 = vld [vmem:[#allocation2 + $0xfa] sm:$0xff] }
 0x191   : > { %v1822_v18 = vpop.f32.mrf.mxu2  ;;  %v2919_v51 = vpack.c.bf16 %v2887_v36, %v2887_v36 }
 0x192   : > { %1954 = vmatmul.bf16.gmra.mxu2 %v4227_v48  ;;  %2537 = vmatmul.bf16.gmra.mxu0 %v4523_v37 }
 0x193   : > { %2443 = vmatmul.bf16.gmra.mxu3 %v4507_v7  ;;  %v6495_v7 = vld [vmem:[#allocation3 + $0xd0] sm:$0xf0]  ;;  %820 = vst [vmem:[#allocation3 + $0x104] sm:$0xf] %v2919_v51 }
 0x194   : > { %1216 = vst [vmem:[#allocation3 + $0xd4] sm:$0xf] %v2917_v27 }
 0x195   : > { %1218 = vst [vmem:[#allocation3 + $0xec] sm:$0xf] %v2919_v51 }
 0x197   : > { %v6497_v26 = vpop.f32.mrf.mxu1  ;;  %v4262_v56 = vld [vmem:[#allocation3 + $0xc8] sm:$0xf] }
 0x198   : > { %2950 = vst [vmem:[#allocation3 + $0xc8] sm:$0xf] %v2918_v17 }
 0x199   : > { %v1911_v48 = vpop.f32.mrf.mxu3  ;;  %v1824_v3 = vpop.f32.mrf.mxu2 }
 0x19a   : > { %v6491_v32 = vadd.f32 %v1911_v48, %v1822_v18 }
 0x19b   : > { %v5155_v18 = vld [vmem:[#allocation3 + $0xd0] sm:$0xf0] }
 0x19c   : > { %2951 = vst [vmem:[#allocation3 + $0xd4] sm:$0xf] %v2919_v51  ;;  %v5158_v51 = vld [vmem:[#allocation3 + $0xe8] sm:$0xf0] }
 0x19d   : > { %2953 = vst [vmem:[#allocation3 + $0xec] sm:$0xf] %v2921_v47 }
 0x19f   : > { %2626 = vmatmul.bf16.gmra.mxu1 %v4527_v24  ;;  %v1787_v40 = vpop.f32.mrf.mxu0  ;;  %v4539_v24 = vor.u32 %v6475_v0, %v6473_v14  ;;  %v4547_v14 = vor.u32 %v5669_v1, %v5671_v4  ;;  %v5276_v0 = vld [vmem:[%s6905_s6 + $0x18] sm:$0xff] }
 0x1a0   : > { %3893 = vmatpush.bf16.msra.mxu1 %v5276_v0 }
 0x1a1   : > { %v1913_v27 = vpop.f32.mrf.mxu3 }
 0x1a2   : > { %1959 = vmatmul.bf16.gmra.mxu2 %v4239_v63  ;;  %v6507_v37 = vadd.f32 %v1913_v27, %v1824_v3  ;;  %2542 = vmatmul.bf16.gmra.mxu0 %v4535_v22  ;;  %v6518_v22 = vld [vmem:[#allocation3 + $0xe0] sm:$0xf] }
 0x1a3   : > { %2448 = vmatmul.bf16.gmra.mxu3 %v4519_v59  ;;  %1217 = vst [vmem:[#allocation3 + $0xe0] sm:$0xf] %v2918_v17 }
 0x1a7   : > { %v1789_v63 = vpop.f32.mrf.mxu0 }
 0x1aa   : > { %v4274_v4 = vld [vmem:[#allocation3 + $0xe0] sm:$0xf] }
 0x1ab   : > { %2952 = vst [vmem:[#allocation3 + $0xe0] sm:$0xf] %v2920_v25 }
 0x1ac   : > { %v1876_v48 = vpop.f32.mrf.mxu1 }
 0x1ad   : > { %v6514_v59 = vadd.f32 %v1876_v48, %v1787_v40  ;;  %v1827_v36 = vpop.f32.mrf.mxu2 }
 0x1af   : > { %2631 = vmatmul.bf16.gmra.mxu1 %v4539_v24  ;;  %v2508_v45 = vpop.f32.mrf.mxu0  ;;  %v4551_v24 = vor.u32 %v6495_v7, %v6493_v21  ;;  %v4559_v21 = vor.u32 %v5766_v10, %v5772_v42  ;;  %v2890_v7 = vld [vmem:[#allocation2 + $0x122] sm:$0xff]  ;;  %v1844_v42 = vadd.f32 %v6300_v54, %v6298_v31 }
 0x1b0   : > { %v2922_v41 = vpack.c.bf16 %v2890_v7, %v2890_v7  ;;  %v5267_v7 = vld [vmem:[%s6902_s3 + $0x210] sm:$0xff] }
 0x1b1   : > { %3661 = vmatpush.bf16.msra.mxu0 %v5267_v7  ;;  %v1849_v7 = vadd.f32 %v6331_v23, %v6329_v62 }
 0x1b2   : > { %1964 = vmatmul.bf16.gmra.mxu2 %v4251_v19  ;;  %2547 = vmatmul.bf16.gmra.mxu0 %v4547_v14  ;;  %v4263_v19 = vor.u32 %v5155_v18, %v4262_v56  ;;  %v6539_v14 = vld [vmem:[#allocation3 + $0x100] sm:$0xf0]  ;;  %v2891_v18 = vld [vmem:[#allocation2 + $0x12a] sm:$0xff]  ;;  %823 = vst [vmem:[#allocation3 + $0x128] sm:$0xf] %v2922_v41 }
 0x1b3   : > { %2453 = vmatmul.bf16.gmra.mxu3 %v4531_v12  ;;  %1220 = vst [vmem:[#allocation3 + $0x104] sm:$0xf] %v2921_v47 }
 0x1b4   : > { %v1878_v40 = vpop.f32.mrf.mxu1 }
 0x1b5   : > { %v6529_v17 = vadd.f32 %v1878_v40, %v1789_v63  ;;  %v1829_v1 = vpop.f32.mrf.mxu2  ;;  %v4543_v63 = vor.u32 %v5659_v61, %v5654_v60  ;;  %v5251_v60 = vld [vmem:[%s6902_s3 + $0x190] sm:$0xff] }
 0x1b6   : > { %v1916_v3 = vpop.f32.mrf.mxu3  ;;  %3483 = vmatpush.bf16.msra.mxu2 %v5251_v60 }
 0x1b7   : > { %v6527_v27 = vadd.f32 %v1916_v3, %v1827_v36  ;;  %v2510_v50 = vpop.f32.mrf.mxu0  ;;  %v6537_v36 = vld [vmem:[#allocation3 + $0xf8] sm:$0xf]  ;;  %v2923_v3 = vpack.c.bf16 %v2891_v18, %v2891_v18 }
 0x1b8   : > { %1219 = vst [vmem:[#allocation3 + $0xf8] sm:$0xf] %v2920_v25  ;;  %v5259_v25 = vld [vmem:[%s6902_s3 + $0x1d0] sm:$0xff] }
 0x1b9   : > { %3572 = vmatpush.bf16.msra.mxu3 %v5259_v25  ;;  %824 = vst [vmem:[#allocation3 + $0x134] sm:$0xf] %v2923_v3  ;;  %v6563_v25 = vld [vmem:[#allocation3 + $0x118] sm:$0xf0]  ;;  %v6581_v23 = vld [vmem:[#allocation3 + $0x128] sm:$0xf] }
 0x1ba   : > { %1222 = vst [vmem:[#allocation3 + $0x11c] sm:$0xf] %v2923_v3 }
 0x1bc   : > { %v2597_v12 = vpop.f32.mrf.mxu1 }
 0x1be   : > { %v1918_v48 = vpop.f32.mrf.mxu3 }
 0x1bf   : > { %v6533_v0 = vadd.f32 %v1918_v48, %v1829_v1  ;;  %2636 = vmatmul.bf16.gmra.mxu1 %v4551_v24  ;;  %v2513_v61 = vpop.f32.mrf.mxu0  ;;  %v4286_v10 = vld [vmem:[#allocation3 + $0xf8] sm:$0xf] }
 0x1c0   : > { %2954 = vst [vmem:[#allocation3 + $0xf8] sm:$0xf] %v2922_v41 }
 0x1c2   : > { %1969 = vmatmul.bf16.gmra.mxu2 %v4263_v19  ;;  %2552 = vmatmul.bf16.gmra.mxu0 %v4559_v21  ;;  %v5161_v19 = vld [vmem:[#allocation3 + $0x100] sm:$0xf0]  ;;  %v4563_v21 = vor.u32 %v6520_v13, %v6518_v22 }
 0x1c3   : > { %2458 = vmatmul.bf16.gmra.mxu3 %v4543_v63  ;;  %2955 = vst [vmem:[#allocation3 + $0x104] sm:$0xf] %v2923_v3  ;;  %v6943_v13 = vld [vmem:[#allocation8_spill] sm:$0xff] }
 0x1c4   : > { %v2599_v40 = vpop.f32.mrf.mxu1 }
 0x1c5   : > { %v1930_v6 = vpop.f32.mrf.mxu2 }
 0x1c6   : > { %v1931_v56 = vadd.f32 %v1930_v6, %v6261_v16  ;;  %v2419_v47 = vpop.f32.mrf.mxu3  ;;  %v4275_v6 = vor.u32 %v5158_v51, %v4274_v4 }
 0x1c8   : > { %v2420_v16 = vadd.f32 %v2419_v47, %v1931_v56  ;;  %v2515_v56 = vpop.f32.mrf.mxu0 }
 0x1ca   : > { %v2509_v1 = vadd.f32 %v2508_v45, %v2420_v16  ;;  %v6942_v45 = vld [vmem:[#allocation4_spill] sm:$0xff]  ;;  %v6944_v16 = vld [vmem:[#allocation7_spill] sm:$0xff] }
 0x1cb   : > { %v4555_v60 = vor.u32 %v6942_v45, %v5747_v2  ;;  %v5275_v2 = vld [vmem:[%s6905_s6 + $0x10] sm:$0xff] }
 0x1cc   : > { %v6552_v48 = vadd.f32 %v2597_v12, %v2509_v1  ;;  %v2602_v31 = vpop.f32.mrf.mxu1  ;;  %v6561_v12 = vld [vmem:[#allocation3 + $0x110] sm:$0xf]  ;;  %3894 = vmatpush.bf16.msra.mxu1 %v5275_v2  ;;  %v6945_v2 = vld [vmem:[#allocation5_spill] sm:$0xff] }
 0x1cd   : > { %v1932_v24 = vpop.f32.mrf.mxu2  ;;  %1221 = vst [vmem:[#allocation3 + $0x110] sm:$0xf] %v2922_v41  ;;  %v2892_v1 = vld [vmem:[#allocation2 + $0x13a] sm:$0xff] }
 0x1ce   : > { %v1933_v63 = vadd.f32 %v1932_v24, %v1844_v42  ;;  %v2421_v18 = vpop.f32.mrf.mxu3  ;;  %v4571_v42 = vor.u32 %v6944_v16, %v6943_v13  ;;  %v2893_v24 = vld [vmem:[#allocation2 + $0x142] sm:$0xff]  ;;  %v4575_v13 = vor.u32 %v6539_v14, %v6537_v36  ;;  %v6947_v14 = vld [vmem:[#allocation12_spill] sm:$0xff] }
 0x1cf   : > { %2641 = vmatmul.bf16.gmra.mxu1 %v4563_v21  ;;  %v2925_v41 = vpack.c.bf16 %v2893_v24, %v2893_v24 }
 0x1d0   : > { %v2422_v54 = vadd.f32 %v2421_v18, %v1933_v63  ;;  %v2518_v63 = vpop.f32.mrf.mxu0  ;;  %v5164_v18 = vld [vmem:[#allocation3 + $0x118] sm:$0xf0] }
 0x1d1   : > { %826 = vst [vmem:[#allocation3 + $0x14c] sm:$0xf] %v2925_v41 }
 0x1d2   : > { %1974 = vmatmul.bf16.gmra.mxu2 %v4275_v6  ;;  %v2511_v4 = vadd.f32 %v2510_v50, %v2422_v54  ;;  %v2924_v50 = vpack.c.bf16 %v2892_v1, %v2892_v1  ;;  %2557 = vmatmul.bf16.gmra.mxu0 %v4571_v42  ;;  %2957 = vst [vmem:[#allocation3 + $0x11c] sm:$0xf] %v2925_v41  ;;  %v6946_v1 = vld [vmem:[#allocation6_spill] sm:$0xff] }
 0x1d3   : > { %2463 = vmatmul.bf16.gmra.mxu3 %v4555_v60  ;;  %v4567_v62 = vor.u32 %v6946_v1, %v6945_v2 }
 0x1d4   : > { %v6565_v47 = vadd.f32 %v2599_v40, %v2511_v4  ;;  %v2604_v3 = vpop.f32.mrf.mxu1  ;;  %825 = vst [vmem:[#allocation3 + $0x140] sm:$0xf] %v2924_v50  ;;  %v4287_v4 = vor.u32 %v5161_v19, %v4286_v10  ;;  %v6948_v19 = vld [vmem:[#allocation11_spill] sm:$0xff] }
 0x1d5   : > { %v1935_v51 = vpop.f32.mrf.mxu2  ;;  %1223 = vst [vmem:[#allocation3 + $0x128] sm:$0xf] %v2924_v50 }
 0x1d6   : > { %v1936_v22 = vadd.f32 %v1935_v51, %v6323_v57  ;;  %v2424_v6 = vpop.f32.mrf.mxu3  ;;  %v4298_v57 = vld [vmem:[#allocation3 + $0x110] sm:$0xf] }
 0x1d7   : > { %2956 = vst [vmem:[#allocation3 + $0x110] sm:$0xf] %v2924_v50  ;;  %v5258_v50 = vld [vmem:[%s6902_s3 + $0x1c8] sm:$0xff] }
 0x1d8   : > { %v2425_v40 = vadd.f32 %v2424_v6, %v1936_v22  ;;  %v2520_v51 = vpop.f32.mrf.mxu0  ;;  %v4583_v6 = vor.u32 %v6948_v19, %v6947_v14  ;;  %3573 = vmatpush.bf16.msra.mxu3 %v5258_v50  ;;  %v4587_v14 = vor.u32 %v6563_v25, %v6561_v12  ;;  %v6951_v25 = vld [vmem:[#allocation16_spill] sm:$0xff]  ;;  %v6952_v50 = vld [vmem:[#allocation15_spill] sm:$0xff] }
 0x1da   : > { %v2514_v21 = vadd.f32 %v2513_v61, %v2425_v40  ;;  %v6583_v61 = vld [vmem:[#allocation3 + $0x130] sm:$0xf0]  ;;  %v2894_v40 = vld [vmem:[#allocation2 + $0x152] sm:$0xff] }
 0x1db   : > { %1224 = vst [vmem:[#allocation3 + $0x134] sm:$0xf] %v2925_v41 }
 0x1dc   : > { %v6575_v45 = vadd.f32 %v2602_v31, %v2514_v21  ;;  %v2607_v16 = vpop.f32.mrf.mxu1  ;;  %v5250_v21 = vld [vmem:[%s6902_s3 + $0x188] sm:$0xff] }
 0x1dd   : > { %v1937_v54 = vpop.f32.mrf.mxu2  ;;  %3484 = vmatpush.bf16.msra.mxu2 %v5250_v21 }
 0x1de   : > { %v1938_v60 = vadd.f32 %v1937_v54, %v1849_v7  ;;  %v2426_v22 = vpop.f32.mrf.mxu3  ;;  %v2895_v7 = vld [vmem:[#allocation2 + $0x15a] sm:$0xff] }
 0x1df   : > { %2646 = vmatmul.bf16.gmra.mxu1 %v4575_v13  ;;  %v2927_v41 = vpack.c.bf16 %v2895_v7, %v2895_v7  ;;  %v1854_v13 = vadd.f32 %v6364_v29, %v6362_v58  ;;  %v6609_v7 = vld [vmem:[#allocation3 + $0x148] sm:$0xf0] }
 0x1e0   : > { %v2427_v42 = vadd.f32 %v2426_v22, %v1938_v60  ;;  %v2523_v54 = vpop.f32.mrf.mxu0 }
 0x1e1   : > { %828 = vst [vmem:[#allocation3 + $0x164] sm:$0xf] %v2927_v41 }
 0x1e2   : > { %1979 = vmatmul.bf16.gmra.mxu2 %v4287_v4  ;;  %v2516_v24 = vadd.f32 %v2515_v56, %v2427_v42  ;;  %v2926_v56 = vpack.c.bf16 %v2894_v40, %v2894_v40  ;;  %2562 = vmatmul.bf16.gmra.mxu0 %v4583_v6  ;;  %v4310_v4 = vld [vmem:[#allocation3 + $0x128] sm:$0xf]  ;;  %v5167_v42 = vld [vmem:[#allocation3 + $0x130] sm:$0xf0]  ;;  %1226 = vst [vmem:[#allocation3 + $0x14c] sm:$0xf] %v2927_v41 }
 0x1e3   : > { %2468 = vmatmul.bf16.gmra.mxu3 %v4567_v62  ;;  %2959 = vst [vmem:[#allocation3 + $0x134] sm:$0xf] %v2927_v41  ;;  %v6950_v6 = vld [vmem:[#allocation10_spill] sm:$0xff] }
 0x1e4   : > { %v6585_v10 = vadd.f32 %v2604_v3, %v2516_v24  ;;  %v2609_v60 = vpop.f32.mrf.mxu1  ;;  %827 = vst [vmem:[#allocation3 + $0x158] sm:$0xf] %v2926_v56  ;;  %v4299_v24 = vor.u32 %v5164_v18, %v4298_v57 }
 0x1e5   : > { %v1940_v31 = vpop.f32.mrf.mxu2  ;;  %2958 = vst [vmem:[#allocation3 + $0x128] sm:$0xf] %v2926_v56 }
 0x1e6   : > { %v1941_v36 = vadd.f32 %v1940_v31, %v6341_v44  ;;  %v2429_v3 = vpop.f32.mrf.mxu3  ;;  %v5266_v31 = vld [vmem:[%s6902_s3 + $0x208] sm:$0xff] }
 0x1e7   : > { %3662 = vmatpush.bf16.msra.mxu0 %v5266_v31 }
 0x1e8   : > { %v2430_v44 = vadd.f32 %v2429_v3, %v1941_v36  ;;  %v2525_v36 = vpop.f32.mrf.mxu0  ;;  %v4595_v3 = vor.u32 %v6952_v50, %v6951_v25  ;;  %v6953_v50 = vld [vmem:[#allocation13_spill] sm:$0xff] }
 0x1ea   : > { %v2519_v22 = vadd.f32 %v2518_v63, %v2430_v44  ;;  %v6949_v63 = vld [vmem:[#allocation9_spill] sm:$0xff]  ;;  %v5274_v44 = vld [vmem:[%s6905_s6 + $0x8] sm:$0xff] }
 0x1eb   : > { %v4579_v40 = vor.u32 %v6950_v6, %v6949_v63  ;;  %3895 = vmatpush.bf16.msra.mxu1 %v5274_v44  ;;  %v4311_v6 = vor.u32 %v5167_v42, %v4310_v4  ;;  %v6956_v42 = vld [vmem:[#allocation19_spill] sm:$0xff] }
 0x1ec   : > { %v6598_v1 = vadd.f32 %v2607_v16, %v2519_v22  ;;  %v2612_v58 = vpop.f32.mrf.mxu1  ;;  %v6607_v16 = vld [vmem:[#allocation3 + $0x140] sm:$0xf] }
 0x1ed   : > { %v1942_v2 = vpop.f32.mrf.mxu2  ;;  %1225 = vst [vmem:[#allocation3 + $0x140] sm:$0xf] %v2926_v56  ;;  %v2897_v22 = vld [vmem:[#allocation2 + $0x172] sm:$0xff] }
 0x1ee   : > { %v1943_v62 = vadd.f32 %v1942_v2, %v1854_v13  ;;  %v2431_v19 = vpop.f32.mrf.mxu3  ;;  %v2896_v13 = vld [vmem:[#allocation2 + $0x16a] sm:$0xff]  ;;  %v2929_v56 = vpack.c.bf16 %v2897_v22, %v2897_v22  ;;  %v5249_v22 = vld [vmem:[%s6902_s3 + $0x180] sm:$0xff] }
 0x1ef   : > { %2651 = vmatmul.bf16.gmra.mxu1 %v4587_v14  ;;  %v5170_v14 = vld [vmem:[#allocation3 + $0x148] sm:$0xf0]  ;;  %3485 = vmatpush.bf16.msra.mxu2 %v5249_v22 }
 0x1f0   : > { %v2432_v29 = vadd.f32 %v2431_v19, %v1943_v62  ;;  %v2528_v2 = vpop.f32.mrf.mxu0  ;;  %830 = vst [vmem:[#allocation3 + $0x17c] sm:$0xf] %v2929_v56 }
 0x1f1   : > { %2961 = vst [vmem:[#allocation3 + $0x14c] sm:$0xf] %v2929_v56 }
 0x1f2   : > { %1984 = vmatmul.bf16.gmra.mxu2 %v4299_v24  ;;  %v2521_v57 = vadd.f32 %v2520_v51, %v2432_v29  ;;  %v2928_v51 = vpack.c.bf16 %v2896_v13, %v2896_v13  ;;  %2567 = vmatmul.bf16.gmra.mxu0 %v4595_v3  ;;  %v1859_v24 = vadd.f32 %v6393_v33, %v6391_v34  ;;  %v6954_v3 = vld [vmem:[#allocation14_spill] sm:$0xff]  ;;  %v6627_v33 = vld [vmem:[#allocation3 + $0x158] sm:$0xf] }
 0x1f3   : > { %2473 = vmatmul.bf16.gmra.mxu3 %v4579_v40  ;;  %v4591_v34 = vor.u32 %v6954_v3, %v6953_v50 }
 0x1f4   : > { %v6611_v21 = vadd.f32 %v2609_v60, %v2521_v57  ;;  %v2614_v41 = vpop.f32.mrf.mxu1  ;;  %829 = vst [vmem:[#allocation3 + $0x170] sm:$0xf] %v2928_v51  ;;  %v4599_v57 = vor.u32 %v6583_v61, %v6581_v23  ;;  %v6955_v61 = vld [vmem:[#allocation20_spill] sm:$0xff] }
 0x1f5   : > { %v1945_v18 = vpop.f32.mrf.mxu2  ;;  %1227 = vst [vmem:[#allocation3 + $0x158] sm:$0xf] %v2928_v51  ;;  %v4607_v13 = vor.u32 %v6956_v42, %v6955_v61  ;;  %v6958_v61 = vld [vmem:[#allocation18_spill] sm:$0xff] }
 0x1f6   : > { %v1946_v12 = vadd.f32 %v1945_v18, %v6379_v5  ;;  %v2434_v62 = vpop.f32.mrf.mxu3  ;;  %v4322_v5 = vld [vmem:[#allocation3 + $0x140] sm:$0xf] }
 0x1f7   : > { %2960 = vst [vmem:[#allocation3 + $0x140] sm:$0xf] %v2928_v51  ;;  %v2899_v51 = vld [vmem:[#allocation2 + $0x18a] sm:$0xff]  ;;  %v4323_v3 = vor.u32 %v5170_v14, %v4322_v5 }
 0x1f8   : > { %v2435_v60 = vadd.f32 %v2434_v62, %v1946_v12  ;;  %v2530_v40 = vpop.f32.mrf.mxu0 }
 0x1fa   : > { %v2524_v31 = vadd.f32 %v2523_v54, %v2435_v60  ;;  %v6629_v54 = vld [vmem:[#allocation3 + $0x160] sm:$0xf0]  ;;  %v2898_v60 = vld [vmem:[#allocation2 + $0x182] sm:$0xff] }
 0x1fb   : > { %1228 = vst [vmem:[#allocation3 + $0x164] sm:$0xf] %v2929_v56 }
 0x1fc   : > { %v6621_v29 = vadd.f32 %v2612_v58, %v2524_v31  ;;  %v2617_v12 = vpop.f32.mrf.mxu1  ;;  %v4334_v31 = vld [vmem:[#allocation3 + $0x158] sm:$0xf] }
 0x1fd   : > { %v1947_v19 = vpop.f32.mrf.mxu2 }
 0x1fe   : > { %v1948_v63 = vadd.f32 %v1947_v19, %v1859_v24  ;;  %v2436_v18 = vpop.f32.mrf.mxu3  ;;  %v2931_v19 = vpack.c.bf16 %v2899_v51, %v2899_v51  ;;  %v5273_v51 = vld [vmem:[%s6905_s6] sm:$0xff] }
 0x1ff   : > { %2656 = vmatmul.bf16.gmra.mxu1 %v4599_v57 }
 0x200   : > { %v2437_v25 = vadd.f32 %v2436_v18, %v1948_v63  ;;  %v2533_v62 = vpop.f32.mrf.mxu0  ;;  %v1864_v63 = vadd.f32 %v6431_v49, %v6429_v46  ;;  %3896 = vmatpush.bf16.msra.mxu1 %v5273_v51 }
 0x202   : > { %1989 = vmatmul.bf16.gmra.mxu2 %v4311_v6  ;;  %v2526_v44 = vadd.f32 %v2525_v36, %v2437_v25  ;;  %v5257_v36 = vld [vmem:[%s6902_s3 + $0x1c0] sm:$0xff]  ;;  %2572 = vmatmul.bf16.gmra.mxu0 %v4607_v13  ;;  %v5173_v57 = vld [vmem:[#allocation3 + $0x160] sm:$0xf0]  ;;  %v6655_v13 = vld [vmem:[#allocation3 + $0x178] sm:$0xf0] }
 0x203   : > { %2478 = vmatmul.bf16.gmra.mxu3 %v4591_v34  ;;  %2963 = vst [vmem:[#allocation3 + $0x164] sm:$0xf] %v2931_v19  ;;  %v5265_v34 = vld [vmem:[%s6902_s3 + $0x200] sm:$0xff] }
 0x204   : > { %v6631_v4 = vadd.f32 %v2614_v41, %v2526_v44  ;;  %v2619_v41 = vpop.f32.mrf.mxu1  ;;  %3574 = vmatpush.bf16.msra.mxu3 %v5257_v36  ;;  %3663 = vmatpush.bf16.msra.mxu0 %v5265_v34  ;;  %1230 = vst [vmem:[#allocation3 + $0x17c] sm:$0xf] %v2931_v19 }
 0x205   : > { %v1950_v58 = vpop.f32.mrf.mxu2 }
 0x206   : > { %v1951_v23 = vadd.f32 %v1950_v58, %v6403_v8  ;;  %v2439_v56 = vpop.f32.mrf.mxu3  ;;  %v2930_v8 = vpack.c.bf16 %v2898_v60, %v2898_v60  ;;  %v4611_v58 = vor.u32 %v6609_v7, %v6607_v16  ;;  %v6959_v7 = vld [vmem:[#allocation24_spill] sm:$0xff]  ;;  %v6960_v60 = vld [vmem:[#allocation23_spill] sm:$0xff] }
 0x207   : > { %v4619_v36 = vor.u32 %v6960_v60, %v6959_v7  ;;  %v6962_v7 = vld [vmem:[#allocation22_spill] sm:$0xff] }
 0x208   : > { %v2440_v24 = vadd.f32 %v2439_v56, %v1951_v23  ;;  %2962 = vst [vmem:[#allocation3 + $0x158] sm:$0xf] %v2930_v8  ;;  %v2535_v44 = vpop.f32.mrf.mxu0  ;;  %v2900_v56 = vld [vmem:[#allocation2 + $0x19a] sm:$0xff] }
 0x20a   : > { %v2529_v6 = vadd.f32 %v2528_v2, %v2440_v24  ;;  %v6957_v2 = vld [vmem:[#allocation17_spill] sm:$0xff]  ;;  %v2901_v24 = vld [vmem:[#allocation2 + $0x1a2] sm:$0xff] }
 0x20b   : > { %v4603_v42 = vor.u32 %v6958_v61, %v6957_v2  ;;  %v2933_v19 = vpack.c.bf16 %v2901_v24, %v2901_v24  ;;  %v4623_v61 = vor.u32 %v6629_v54, %v6627_v33  ;;  %v1874_v24 = vadd.f32 %v6497_v26, %v6485_v35  ;;  %v4742_v35 = vld [vmem:[#allocation3 + $0x8] sm:$0xf]  ;;  %v5203_v26 = vld [vmem:[#allocation3 + $0x10] sm:$0xf0] }
 0x20c   : > { %v6644_v25 = vadd.f32 %v2617_v12, %v2529_v6  ;;  %v2622_v46 = vpop.f32.mrf.mxu1  ;;  %v6653_v12 = vld [vmem:[#allocation3 + $0x170] sm:$0xf] }
 0x20d   : > { %v1952_v18 = vpop.f32.mrf.mxu2  ;;  %1229 = vst [vmem:[#allocation3 + $0x170] sm:$0xf] %v2930_v8 }
 0x20e   : > { %v1953_v50 = vadd.f32 %v1952_v18, %v1864_v63  ;;  %v2441_v23 = vpop.f32.mrf.mxu3 }
 0x20f   : > { %2661 = vmatmul.bf16.gmra.mxu1 %v4611_v58 }
 0x210   : > { %v2442_v49 = vadd.f32 %v2441_v23, %v1953_v50  ;;  %v2538_v63 = vpop.f32.mrf.mxu0 }
 0x212   : > { %1994 = vmatmul.bf16.gmra.mxu2 %v4323_v3  ;;  %v2531_v5 = vadd.f32 %v2530_v40, %v2442_v49  ;;  %v2932_v40 = vpack.c.bf16 %v2900_v56, %v2900_v56  ;;  %2577 = vmatmul.bf16.gmra.mxu0 %v4619_v36  ;;  %v5176_v3 = vld [vmem:[#allocation3 + $0x178] sm:$0xf0]  ;;  %v4335_v49 = vor.u32 %v5173_v57, %v4334_v31  ;;  %v6963_v31 = vld [vmem:[#allocation29_spill] sm:$0xff]  ;;  %v6964_v57 = vld [vmem:[#allocation28_spill] sm:$0xff] }
 0x213   : > { %2483 = vmatmul.bf16.gmra.mxu3 %v4603_v42  ;;  %2965 = vst [vmem:[#allocation3 + $0x17c] sm:$0xf] %v2933_v19  ;;  %v4631_v36 = vor.u32 %v6964_v57, %v6963_v31 }
 0x214   : > { %v6657_v22 = vadd.f32 %v2619_v41, %v2531_v5  ;;  %v2624_v6 = vpop.f32.mrf.mxu1  ;;  %v4346_v18 = vld [vmem:[#allocation3 + $0x170] sm:$0xf] }
 0x215   : > { %v1955_v14 = vpop.f32.mrf.mxu2  ;;  %2964 = vst [vmem:[#allocation3 + $0x170] sm:$0xf] %v2932_v40  ;;  %v4347_v19 = vor.u32 %v5176_v3, %v4346_v18  ;;  %v4743_v3 = vor.u32 %v5203_v26, %v4742_v35 }
 0x216   : > { %v1956_v16 = vadd.f32 %v1955_v14, %v6443_v28  ;;  %v2444_v8 = vpop.f32.mrf.mxu3  ;;  %v1869_v28 = vadd.f32 %v6467_v9, %v6462_v11 }
 0x218   : > { %v2445_v41 = vadd.f32 %v2444_v8, %v1956_v16  ;;  %v2540_v2 = vpop.f32.mrf.mxu0  ;;  %v6961_v16 = vld [vmem:[#allocation21_spill] sm:$0xff] }
 0x219   : > { %v4615_v11 = vor.u32 %v6962_v7, %v6961_v16  ;;  %v4734_v16 = vld [vmem:[#allocation3] sm:$0xf]  ;;  %v5202_v7 = vld [vmem:[#allocation3 + $0x8] sm:$0xf0] }
 0x21a   : > { %v2534_v50 = vadd.f32 %v2533_v62, %v2445_v41  ;;  %v4735_v57 = vor.u32 %v5202_v7, %v4734_v16  ;;  %v3779_v16 = vld [vmem:[%s6695_s13 + $0x10] sm:$0xff]  ;;  %v3780_v7 = vld [vmem:[%s6695_s13 + $0x18] sm:$0xff] }
 0x21c   : > { %v6667_v58 = vadd.f32 %v2622_v46, %v2534_v50  ;;  %v2627_v5 = vpop.f32.mrf.mxu1 }
 0x21d   : > { %v1957_v34 = vpop.f32.mrf.mxu2 }
 0x21e   : > { %v1958_v23 = vadd.f32 %v1957_v34, %v1869_v28  ;;  %v2446_v42 = vpop.f32.mrf.mxu3 }
 0x21f   : > { %2666 = vmatmul.bf16.gmra.mxu1 %v4623_v61 }
 0x220   : > { %v2447_v14 = vadd.f32 %v2446_v42, %v1958_v23  ;;  %v2543_v51 = vpop.f32.mrf.mxu0  ;;  %v6965_v23 = vld [vmem:[#allocation25_spill] sm:$0xff] }
 0x222   : > { %1999 = vmatmul.bf16.gmra.mxu2 %v4335_v49  ;;  %v2536_v9 = vadd.f32 %v2535_v44, %v2447_v14  ;;  %2582 = vmatmul.bf16.gmra.mxu0 %v4631_v36  ;;  %v6966_v49 = vld [vmem:[#allocation26_spill] sm:$0xff]  ;;  %v5201_v36 = vld [vmem:[#allocation3 + $0x4] sm:$0xf] }
 0x223   : > { %2488 = vmatmul.bf16.gmra.mxu3 %v4615_v11  ;;  %v4627_v61 = vor.u32 %v6966_v49, %v6965_v23 }
 0x224   : > { %v6673_v60 = vadd.f32 %v2624_v6, %v2536_v9  ;;  %v2629_v54 = vpop.f32.mrf.mxu1 }
 0x225   : > { %v1960_v62 = vpop.f32.mrf.mxu2 }
 0x226   : > { %v1961_v46 = vadd.f32 %v1960_v62, %v6483_v52  ;;  %v2449_v33 = vpop.f32.mrf.mxu3  ;;  %v4635_v52 = vor.u32 %v6655_v13, %v6653_v12  ;;  %v3778_v62 = vld [vmem:[%s6695_s13 + $0x8] sm:$0xff] }
 0x228   : > { %v2450_v56 = vadd.f32 %v2449_v33, %v1961_v46  ;;  %v2545_v41 = vpop.f32.mrf.mxu0  ;;  %v4736_v33 = vld [vmem:[#allocation3 + $0xc] sm:$0xf0] }
 0x22a   : > { %v2539_v40 = vadd.f32 %v2538_v63, %v2450_v56 }
 0x22c   : > { %v6680_v8 = vadd.f32 %v2627_v5, %v2539_v40  ;;  %v2632_v50 = vpop.f32.mrf.mxu1 }
 0x22d   : > { %v1962_v44 = vpop.f32.mrf.mxu2 }
 0x22e   : > { %v1963_v6 = vadd.f32 %v1962_v44, %v1874_v24  ;;  %v2451_v28 = vpop.f32.mrf.mxu3 }
 0x22f   : > { %2671 = vmatmul.bf16.gmra.mxu1 %v4635_v52  ;;  %v5206_v52 = vld [vmem:[#allocation3 + $0x28] sm:$0xf0] }
 0x230   : > { %v2452_v34 = vadd.f32 %v2451_v28, %v1963_v6  ;;  %v2548_v12 = vpop.f32.mrf.mxu0  ;;  %v4739_v6 = vor.u32 %v5201_v36, %v4736_v33 }
 0x232   : > { %2004 = vmatmul.bf16.gmra.mxu2 %v4347_v19  ;;  %v2541_v63 = vadd.f32 %v2540_v2, %v2452_v34  ;;  %3664 = vmatmul.bf16.vlgmr.msra.gmra.mxu0 %v4743_v3  ;;  %v4754_v19 = vld [vmem:[#allocation3 + $0x20] sm:$0xf]  ;;  %v6969_v3 = vld [vmem:[#allocation31_spill] sm:$0xff] }
 0x233   : > { %2493 = vmatmul.bf16.gmra.mxu3 %v4627_v61  ;;  %v4755_v23 = vor.u32 %v5206_v52, %v4754_v19  ;;  %v6970_v52 = vld [vmem:[#allocation32_spill] sm:$0xff] }
 0x234   : > { %v6686_v5 = vadd.f32 %v2629_v54, %v2541_v63  ;;  %v2634_v14 = vpop.f32.mrf.mxu1  ;;  %v4746_v63 = vld [vmem:[#allocation3 + $0x18] sm:$0xf] }
 0x235   : > { %v1965_v42 = vpop.f32.mrf.mxu2 }
 0x236   : > { %v1966_v18 = vadd.f32 %v1965_v42, %v6514_v59  ;;  %v2454_v13 = vpop.f32.mrf.mxu3  ;;  %v3777_v59 = vld [vmem:[%s6695_s13] sm:$0xff]  ;;  %v5205_v42 = vld [vmem:[#allocation3 + $0x20] sm:$0xf0] }
 0x237   : > { %v3809_v56 = vpack.c.bf16 %v3778_v62, %v3777_v59  ;;  %v5204_v59 = vld [vmem:[#allocation3 + $0x1c] sm:$0xf]  ;;  %v4748_v62 = vld [vmem:[#allocation3 + $0x24] sm:$0xf0] }
 0x238   : > { %v2455_v2 = vadd.f32 %v2454_v13, %v1966_v18  ;;  %v2550_v54 = vpop.f32.mrf.mxu0  ;;  %v6968_v18 = vld [vmem:[#allocation30_spill] sm:$0xff] }
 0x23a   : > { %v2544_v11 = vadd.f32 %v2543_v51, %v2455_v2 }
 0x23c   : > { %v6699_v46 = vadd.f32 %v2632_v50, %v2544_v11  ;;  %v2637_v40 = vpop.f32.mrf.mxu1 }
 0x23d   : > { %v1967_v9 = vpop.f32.mrf.mxu2 }
 0x23e   : > { %v1968_v31 = vadd.f32 %v1967_v9, %v6529_v17  ;;  %v2456_v24 = vpop.f32.mrf.mxu3  ;;  %v6967_v17 = vld [vmem:[#allocation27_spill] sm:$0xff]  ;;  %v4747_v9 = vor.u32 %v5205_v42, %v4746_v63  ;;  %v6971_v42 = vld [vmem:[#allocation33_spill] sm:$0xff] }
 0x23f   : > { %3897 = vmatmul.bf16.vlgmr.msra.gmra.mxu1 %v3809_v56  ;;  %v5208_v63 = vld [vmem:[#allocation3 + $0x38] sm:$0xf0] }
 0x240   : > { %v2457_v44 = vadd.f32 %v2456_v24, %v1968_v31  ;;  %v2553_v49 = vpop.f32.mrf.mxu0  ;;  %v4751_v24 = vor.u32 %v5204_v59, %v4748_v62 }
 0x242   : > { %3486 = vmatmul.bf16.vlgmr.msra.gmra.mxu2 %v4735_v57  ;;  %v2546_v51 = vadd.f32 %v2545_v41, %v2457_v44  ;;  %3669 = vmatmul.bf16.gmra.mxu0 %v4755_v23  ;;  %v1884_v41 = vadd.f32 %v6969_v3, %v6968_v18  ;;  %v3810_v57 = vpack.c.bf16 %v3780_v7, %v3779_v16  ;;  %v4766_v44 = vld [vmem:[#allocation3 + $0x38] sm:$0xf]  ;;  %v6972_v18 = vld [vmem:[#allocation34_spill] sm:$0xff] }
 0x243   : > { %3575 = vmatmul.bf16.vlgmr.msra.gmra.mxu3 %v4739_v6  ;;  %v5209_v6 = vld [vmem:[#allocation3 + $0x40] sm:$0xf0] }
 0x244   : > { %v6702_v50 = vadd.f32 %v2634_v14, %v2546_v51  ;;  %v2639_v35 = vpop.f32.mrf.mxu1 }
 0x245   : > { %v1970_v28 = vpop.f32.mrf.mxu2 }
 0x246   : > { %v1971_v34 = vadd.f32 %v1970_v28, %v6967_v17  ;;  %v2459_v61 = vpop.f32.mrf.mxu3  ;;  %v4767_v28 = vor.u32 %v5209_v6, %v4766_v44  ;;  %v4778_v44 = vld [vmem:[#allocation3 + $0x50] sm:$0xf]  ;;  %v5212_v6 = vld [vmem:[#allocation3 + $0x58] sm:$0xf0] }
 0x248   : > { %v2460_v26 = vadd.f32 %v2459_v61, %v1971_v34  ;;  %v2555_v31 = vpop.f32.mrf.mxu0 }
 0x24a   : > { %v2549_v13 = vadd.f32 %v2548_v12, %v2460_v26  ;;  %v4758_v26 = vld [vmem:[#allocation3 + $0x30] sm:$0xf] }
 0x24b   : > { %v4759_v7 = vor.u32 %v5208_v63, %v4758_v26  ;;  %v4770_v63 = vld [vmem:[#allocation3 + $0x48] sm:$0xf] }
 0x24c   : > { %v6709_v14 = vadd.f32 %v2637_v40, %v2549_v13  ;;  %v2642_v33 = vpop.f32.mrf.mxu1  ;;  %v3781_v13 = vld [vmem:[%s6695_s13 + $0x20] sm:$0xff] }
 0x24d   : > { %v1972_v2 = vpop.f32.mrf.mxu2 }
 0x24e   : > { %v1973_v11 = vadd.f32 %v1972_v2, %v1884_v41  ;;  %v2461_v36 = vpop.f32.mrf.mxu3  ;;  %v3782_v2 = vld [vmem:[%s6695_s13 + $0x28] sm:$0xff] }
 0x24f   : > { %3902 = vmatmul.bf16.gmra.mxu1 %v3810_v57  ;;  %v3811_v62 = vpack.c.bf16 %v3782_v2, %v3781_v13  ;;  %v3784_v13 = vld [vmem:[%s6695_s13 + $0x38] sm:$0xff] }
 0x250   : > { %v2462_v56 = vadd.f32 %v2461_v36, %v1973_v11  ;;  %v2558_v17 = vpop.f32.mrf.mxu0  ;;  %v5207_v11 = vld [vmem:[#allocation3 + $0x34] sm:$0xf] }
 0x252   : > { %3491 = vmatmul.bf16.gmra.mxu2 %v4747_v9  ;;  %v2551_v19 = vadd.f32 %v2550_v54, %v2462_v56  ;;  %3674 = vmatmul.bf16.gmra.mxu0 %v4767_v28  ;;  %v1889_v54 = vadd.f32 %v6972_v18, %v6971_v42  ;;  %v4760_v9 = vld [vmem:[#allocation3 + $0x3c] sm:$0xf0]  ;;  %v5211_v42 = vld [vmem:[#allocation3 + $0x50] sm:$0xf0] }
 0x253   : > { %3580 = vmatmul.bf16.gmra.mxu3 %v4751_v24  ;;  %v4763_v24 = vor.u32 %v5207_v11, %v4760_v9  ;;  %v6974_v18 = vld [vmem:[#allocation36_spill] sm:$0xff]  ;;  %v4772_v11 = vld [vmem:[#allocation3 + $0x54] sm:$0xf0] }
 0x254   : > { %v6711_v40 = vadd.f32 %v2639_v35, %v2551_v19  ;;  %v2644_v23 = vpop.f32.mrf.mxu1 }
 0x255   : > { %v1975_v12 = vpop.f32.mrf.mxu2 }
 0x256   : > { %v1976_v51 = vadd.f32 %v1975_v12, %v6970_v52  ;;  %v2464_v34 = vpop.f32.mrf.mxu3  ;;  %v6973_v12 = vld [vmem:[#allocation35_spill] sm:$0xff] }
 0x258   : > { %v2465_v61 = vadd.f32 %v2464_v34, %v1976_v51  ;;  %v2560_v59 = vpop.f32.mrf.mxu0  ;;  %v4779_v51 = vor.u32 %v5212_v6, %v4778_v44  ;;  %v4790_v6 = vld [vmem:[#allocation3 + $0x68] sm:$0xf] }
 0x25a   : > { %v2554_v3 = vadd.f32 %v2553_v49, %v2465_v61 }
 0x25c   : > { %v6718_v35 = vadd.f32 %v2642_v33, %v2554_v3  ;;  %v2647_v36 = vpop.f32.mrf.mxu1 }
 0x25d   : > { %v1977_v41 = vpop.f32.mrf.mxu2 }
 0x25e   : > { %v1978_v16 = vadd.f32 %v1977_v41, %v1889_v54  ;;  %v2466_v57 = vpop.f32.mrf.mxu3  ;;  %v3783_v41 = vld [vmem:[%s6695_s13 + $0x30] sm:$0xff] }
 0x25f   : > { %3907 = vmatmul.bf16.gmra.mxu1 %v3811_v62  ;;  %v3812_v62 = vpack.c.bf16 %v3784_v13, %v3783_v41  ;;  %v3785_v41 = vld [vmem:[%s6695_s13 + $0x40] sm:$0xff]  ;;  %v3786_v13 = vld [vmem:[%s6695_s13 + $0x48] sm:$0xff] }
 0x260   : > { %v2467_v56 = vadd.f32 %v2466_v57, %v1978_v16  ;;  %v2563_v28 = vpop.f32.mrf.mxu0  ;;  %v4771_v16 = vor.u32 %v5211_v42, %v4770_v63  ;;  %v4782_v42 = vld [vmem:[#allocation3 + $0x60] sm:$0xf] }
 0x262   : > { %3496 = vmatmul.bf16.gmra.mxu2 %v4759_v7  ;;  %v2556_v19 = vadd.f32 %v2555_v31, %v2467_v56  ;;  %3679 = vmatmul.bf16.gmra.mxu0 %v4779_v51  ;;  %v1894_v31 = vadd.f32 %v6974_v18, %v6373_v55  ;;  %v5210_v7 = vld [vmem:[#allocation3 + $0x4c] sm:$0xf] }
 0x263   : > { %3585 = vmatmul.bf16.gmra.mxu3 %v4763_v24  ;;  %v4775_v44 = vor.u32 %v5210_v7, %v4772_v11  ;;  %v5214_v18 = vld [vmem:[#allocation3 + $0x68] sm:$0xf0]  ;;  %v5213_v7 = vld [vmem:[#allocation3 + $0x64] sm:$0xf]  ;;  %v4784_v11 = vld [vmem:[#allocation3 + $0x6c] sm:$0xf0] }
 0x264   : > { %v6720_v33 = vadd.f32 %v2644_v23, %v2556_v19  ;;  %v2649_v61 = vpop.f32.mrf.mxu1  ;;  %v5215_v19 = vld [vmem:[#allocation3 + $0x70] sm:$0xf0] }
 0x265   : > { %v1980_v49 = vpop.f32.mrf.mxu2 }
 0x266   : > { %v1981_v52 = vadd.f32 %v1980_v49, %v6973_v12  ;;  %v2469_v34 = vpop.f32.mrf.mxu3  ;;  %v6975_v49 = vld [vmem:[#allocation37_spill] sm:$0xff] }
 0x268   : > { %v2470_v26 = vadd.f32 %v2469_v34, %v1981_v52  ;;  %v2565_v9 = vpop.f32.mrf.mxu0  ;;  %v4791_v52 = vor.u32 %v5215_v19, %v4790_v6  ;;  %v4787_v19 = vor.u32 %v5213_v7, %v4784_v11 }
 0x26a   : > { %v2559_v54 = vadd.f32 %v2558_v17, %v2470_v26 }
 0x26c   : > { %v6727_v23 = vadd.f32 %v2647_v36, %v2559_v54  ;;  %v2652_v56 = vpop.f32.mrf.mxu1 }
 0x26d   : > { %v1982_v3 = vpop.f32.mrf.mxu2 }
 0x26e   : > { %v1983_v2 = vadd.f32 %v1982_v3, %v1894_v31  ;;  %v2471_v57 = vpop.f32.mrf.mxu3  ;;  %v6976_v31 = vld [vmem:[#allocation38_spill] sm:$0xff] }
 0x26f   : > { %3912 = vmatmul.bf16.gmra.mxu1 %v3812_v62 }
 0x270   : > { %v2472_v24 = vadd.f32 %v2471_v57, %v1983_v2  ;;  %v2568_v51 = vpop.f32.mrf.mxu0  ;;  %v3813_v57 = vpack.c.bf16 %v3786_v13, %v3785_v41  ;;  %v3788_v41 = vld [vmem:[%s6695_s13 + $0x58] sm:$0xff] }
 0x272   : > { %3501 = vmatmul.bf16.gmra.mxu2 %v4771_v16  ;;  %v2561_v55 = vadd.f32 %v2560_v59, %v2472_v24  ;;  %3684 = vmatmul.bf16.gmra.mxu0 %v4791_v52  ;;  %v1899_v59 = vadd.f32 %v6976_v31, %v6395_v20  ;;  %v4783_v16 = vor.u32 %v5214_v18, %v4782_v42  ;;  %v4794_v18 = vld [vmem:[#allocation3 + $0x78] sm:$0xf]  ;;  %v5217_v31 = vld [vmem:[#allocation3 + $0x80] sm:$0xf0] }
 0x273   : > { %3590 = vmatmul.bf16.gmra.mxu3 %v4775_v44 }
 0x274   : > { %v6729_v36 = vadd.f32 %v2649_v61, %v2561_v55  ;;  %v2654_v26 = vpop.f32.mrf.mxu1  ;;  %v4802_v55 = vld [vmem:[#allocation3 + $0x80] sm:$0xf] }
 0x275   : > { %v1985_v17 = vpop.f32.mrf.mxu2 }
 0x276   : > { %v1986_v12 = vadd.f32 %v1985_v17, %v6975_v49  ;;  %v2474_v34 = vpop.f32.mrf.mxu3  ;;  %v5218_v17 = vld [vmem:[#allocation3 + $0x88] sm:$0xf0] }
 0x278   : > { %v2475_v63 = vadd.f32 %v2474_v34, %v1986_v12  ;;  %v2570_v62 = vpop.f32.mrf.mxu0  ;;  %v4803_v12 = vor.u32 %v5218_v17, %v4802_v55  ;;  %v4814_v55 = vld [vmem:[#allocation3 + $0x98] sm:$0xf]  ;;  %v5221_v17 = vld [vmem:[#allocation3 + $0xa0] sm:$0xf0] }
 0x27a   : > { %v2564_v54 = vadd.f32 %v2563_v28, %v2475_v63 }
 0x27c   : > { %v6736_v61 = vadd.f32 %v2652_v56, %v2564_v54  ;;  %v2657_v44 = vpop.f32.mrf.mxu1 }
 0x27d   : > { %v1987_v3 = vpop.f32.mrf.mxu2 }
 0x27e   : > { %v1988_v2 = vadd.f32 %v1987_v3, %v1899_v59  ;;  %v2476_v24 = vpop.f32.mrf.mxu3  ;;  %v3787_v3 = vld [vmem:[%s6695_s13 + $0x50] sm:$0xff] }
 0x27f   : > { %3917 = vmatmul.bf16.gmra.mxu1 %v3813_v57  ;;  %v3814_v11 = vpack.c.bf16 %v3788_v41, %v3787_v3 }
 0x280   : > { %v2477_v6 = vadd.f32 %v2476_v24, %v1988_v2  ;;  %v2573_v52 = vpop.f32.mrf.mxu0  ;;  %v4795_v2 = vor.u32 %v5217_v31, %v4794_v18  ;;  %v5220_v18 = vld [vmem:[#allocation3 + $0x98] sm:$0xf0] }
 0x282   : > { %3506 = vmatmul.bf16.gmra.mxu2 %v4783_v16  ;;  %v2566_v20 = vadd.f32 %v2565_v9, %v2477_v6  ;;  %3689 = vmatmul.bf16.gmra.mxu0 %v4803_v12  ;;  %v1904_v9 = vadd.f32 %v6441_v39, %v6439_v43  ;;  %v4796_v16 = vld [vmem:[#allocation3 + $0x84] sm:$0xf0] }
 0x283   : > { %3595 = vmatmul.bf16.gmra.mxu3 %v4787_v19 }
 0x284   : > { %v6738_v56 = vadd.f32 %v2654_v26, %v2566_v20  ;;  %v2659_v63 = vpop.f32.mrf.mxu1  ;;  %v4815_v20 = vor.u32 %v5221_v17, %v4814_v55  ;;  %v5224_v55 = vld [vmem:[#allocation3 + $0xb8] sm:$0xf0] }
 0x285   : > { %v1990_v28 = vpop.f32.mrf.mxu2 }
 0x286   : > { %v1991_v49 = vadd.f32 %v1990_v28, %v6423_v38  ;;  %v2479_v34 = vpop.f32.mrf.mxu3  ;;  %v5216_v38 = vld [vmem:[#allocation3 + $0x7c] sm:$0xf] }
 0x287   : > { %v4799_v19 = vor.u32 %v5216_v38, %v4796_v16 }
 0x288   : > { %v2480_v42 = vadd.f32 %v2479_v34, %v1991_v49  ;;  %v2575_v7 = vpop.f32.mrf.mxu0 }
 0x28a   : > { %v2569_v59 = vadd.f32 %v2568_v51, %v2480_v42  ;;  %v4806_v42 = vld [vmem:[#allocation3 + $0x90] sm:$0xf] }
 0x28b   : > { %v4807_v41 = vor.u32 %v5220_v18, %v4806_v42 }
 0x28c   : > { %v6745_v26 = vadd.f32 %v2657_v44, %v2569_v59  ;;  %v2662_v24 = vpop.f32.mrf.mxu1  ;;  %v3789_v59 = vld [vmem:[%s6695_s13 + $0x60] sm:$0xff] }
 0x28d   : > { %v1992_v54 = vpop.f32.mrf.mxu2 }
 0x28e   : > { %v1993_v13 = vadd.f32 %v1992_v54, %v1904_v9  ;;  %v2481_v57 = vpop.f32.mrf.mxu3  ;;  %v3790_v54 = vld [vmem:[%s6695_s13 + $0x68] sm:$0xff] }
 0x28f   : > { %3922 = vmatmul.bf16.gmra.mxu1 %v3814_v11  ;;  %v3815_v38 = vpack.c.bf16 %v3790_v54, %v3789_v59  ;;  %v5222_v59 = vld [vmem:[#allocation3 + $0xac] sm:$0xf]  ;;  %v4820_v54 = vld [vmem:[#allocation3 + $0xb4] sm:$0xf0] }
 0x290   : > { %v2482_v6 = vadd.f32 %v2481_v57, %v1993_v13  ;;  %v2578_v28 = vpop.f32.mrf.mxu0  ;;  %v4808_v13 = vld [vmem:[#allocation3 + $0x9c] sm:$0xf0] }
 0x292   : > { %3511 = vmatmul.bf16.gmra.mxu2 %v4795_v2  ;;  %v2571_v43 = vadd.f32 %v2570_v62, %v2482_v6  ;;  %3694 = vmatmul.bf16.gmra.mxu0 %v4815_v20  ;;  %v1909_v62 = vadd.f32 %v6481_v30, %v6477_v53 }
 0x293   : > { %3600 = vmatmul.bf16.gmra.mxu3 %v4799_v19  ;;  %v4826_v19 = vld [vmem:[#allocation3 + $0xb0] sm:$0xf] }
 0x294   : > { %v6747_v51 = vadd.f32 %v2659_v63, %v2571_v43  ;;  %v2664_v12 = vpop.f32.mrf.mxu1  ;;  %v4827_v17 = vor.u32 %v5224_v55, %v4826_v19 }
 0x295   : > { %v1995_v39 = vpop.f32.mrf.mxu2 }
 0x296   : > { %v1996_v44 = vadd.f32 %v1995_v39, %v6460_v15  ;;  %v2484_v49 = vpop.f32.mrf.mxu3  ;;  %v5219_v15 = vld [vmem:[#allocation3 + $0x94] sm:$0xf] }
 0x297   : > { %v4811_v6 = vor.u32 %v5219_v15, %v4808_v13 }
 0x298   : > { %v2485_v34 = vadd.f32 %v2484_v49, %v1996_v44  ;;  %v2580_v2 = vpop.f32.mrf.mxu0  ;;  %v4818_v49 = vld [vmem:[#allocation3 + $0xa8] sm:$0xf] }
 0x29a   : > { %v2574_v31 = vadd.f32 %v2573_v52, %v2485_v34  ;;  %v5223_v34 = vld [vmem:[#allocation3 + $0xb0] sm:$0xf0] }
 0x29c   : > { %v6754_v63 = vadd.f32 %v2662_v24, %v2574_v31  ;;  %v2667_v11 = vpop.f32.mrf.mxu1 }
 0x29d   : > { %v1997_v9 = vpop.f32.mrf.mxu2 }
 0x29e   : > { %v1998_v3 = vadd.f32 %v1997_v9, %v1909_v62  ;;  %v2486_v16 = vpop.f32.mrf.mxu3  ;;  %v3792_v62 = vld [vmem:[%s6695_s13 + $0x78] sm:$0xff]  ;;  %v4819_v9 = vor.u32 %v5223_v34, %v4818_v49  ;;  %v3794_v34 = vld [vmem:[%s6695_s13 + $0x88] sm:$0xff] }
 0x29f   : > { %3927 = vmatmul.bf16.gmra.mxu1 %v3815_v38  ;;  %v4823_v38 = vor.u32 %v5222_v59, %v4820_v54 }
 0x2a0   : > { %v2487_v57 = vadd.f32 %v2486_v16, %v1998_v3  ;;  %v2583_v43 = vpop.f32.mrf.mxu0  ;;  %v4838_v16 = vld [vmem:[#allocation3 + $0xc8] sm:$0xf] }
 0x2a2   : > { %3516 = vmatmul.bf16.gmra.mxu2 %v4807_v41  ;;  %v2576_v53 = vadd.f32 %v2575_v7, %v2487_v57  ;;  %3699 = vmatmul.bf16.gmra.mxu0 %v4827_v17  ;;  %v3791_v7 = vld [vmem:[%s6695_s13 + $0x70] sm:$0xff]  ;;  %v5227_v57 = vld [vmem:[#allocation3 + $0xd0] sm:$0xf0] }
 0x2a3   : > { %3605 = vmatmul.bf16.gmra.mxu3 %v4811_v6  ;;  %v3816_v3 = vpack.c.bf16 %v3792_v62, %v3791_v7  ;;  %v4839_v19 = vor.u32 %v5227_v57, %v4838_v16  ;;  %v4830_v17 = vld [vmem:[#allocation3 + $0xc0] sm:$0xf]  ;;  %v5225_v7 = vld [vmem:[#allocation3 + $0xc4] sm:$0xf]  ;;  %v4832_v62 = vld [vmem:[#allocation3 + $0xcc] sm:$0xf0] }
 0x2a4   : > { %v6756_v52 = vadd.f32 %v2664_v12, %v2576_v53  ;;  %v2669_v44 = vpop.f32.mrf.mxu1 }
 0x2a5   : > { %v2000_v30 = vpop.f32.mrf.mxu2 }
 0x2a6   : > { %v2001_v24 = vadd.f32 %v2000_v30, %v6491_v32  ;;  %v2489_v39 = vpop.f32.mrf.mxu3 }
 0x2a8   : > { %v2490_v20 = vadd.f32 %v2489_v39, %v2001_v24  ;;  %v2585_v32 = vpop.f32.mrf.mxu0  ;;  %v5226_v39 = vld [vmem:[#allocation3 + $0xc8] sm:$0xf0] }
 0x2aa   : > { %v2579_v42 = vadd.f32 %v2578_v28, %v2490_v20 }
 0x2ac   : > { %v6761_v31 = vadd.f32 %v2667_v11, %v2579_v42  ;;  %v2672_v15 = vpop.f32.mrf.mxu1 }
 0x2ad   : > { %v2002_v18 = vpop.f32.mrf.mxu2 }
 0x2ae   : > { %v2003_v12 = vadd.f32 %v2002_v18, %v6507_v37  ;;  %v2491_v41 = vpop.f32.mrf.mxu3  ;;  %v4831_v18 = vor.u32 %v5226_v39, %v4830_v17  ;;  %v3795_v17 = vld [vmem:[%s6695_s13 + $0x90] sm:$0xff]  ;;  %v3796_v39 = vld [vmem:[%s6695_s13 + $0x98] sm:$0xff] }
 0x2af   : > { %3932 = vmatmul.bf16.gmra.mxu1 %v3816_v3  ;;  %v4835_v3 = vor.u32 %v5225_v7, %v4832_v62 }
 0x2b0   : > { %v2492_v13 = vadd.f32 %v2491_v41, %v2003_v12  ;;  %v3665_v55 = vpop.f32.mrf.mxu0  ;;  %v4850_v41 = vld [vmem:[#allocation3 + $0xe0] sm:$0xf] }
 0x2b2   : > { %3521 = vmatmul.bf16.gmra.mxu2 %v4819_v9  ;;  %v2581_v28 = vadd.f32 %v2580_v2, %v2492_v13  ;;  %3704 = vmatmul.bf16.gmra.mxu0 %v4839_v19  ;;  %v3793_v2 = vld [vmem:[%s6695_s13 + $0x80] sm:$0xff]  ;;  %v5230_v13 = vld [vmem:[#allocation3 + $0xe8] sm:$0xf0]  ;;  %v5229_v19 = vld [vmem:[#allocation3 + $0xe0] sm:$0xf0] }
 0x2b3   : > { %3610 = vmatmul.bf16.gmra.mxu3 %v4823_v38  ;;  %v3817_v12 = vpack.c.bf16 %v3794_v34, %v3793_v2  ;;  %v4844_v2 = vld [vmem:[#allocation3 + $0xe4] sm:$0xf0] }
 0x2b4   : > { %v6764_v6 = vadd.f32 %v2669_v44, %v2581_v28  ;;  %v2674_v30 = vpop.f32.mrf.mxu1 }
 0x2b5   : > { %v2005_v11 = vpop.f32.mrf.mxu2 }
 0x2b6   : > { %v2006_v37 = vadd.f32 %v2005_v11, %v6527_v27  ;;  %v2494_v53 = vpop.f32.mrf.mxu3 }
 0x2b8   : > { %v2495_v24 = vadd.f32 %v2494_v53, %v2006_v37  ;;  %v3667_v27 = vpop.f32.mrf.mxu0  ;;  %v4842_v37 = vld [vmem:[#allocation3 + $0xd8] sm:$0xf] }
 0x2ba   : > { %v2584_v20 = vadd.f32 %v2583_v43, %v2495_v24 }
 0x2bc   : > { %v6769_v42 = vadd.f32 %v2672_v15, %v2584_v20  ;;  %v3898_v59 = vpop.f32.mrf.mxu1  ;;  %v4843_v20 = vor.u32 %v5229_v19, %v4842_v37  ;;  %v4854_v19 = vld [vmem:[#allocation3 + $0xf0] sm:$0xf] }
 0x2bd   : > { %v2007_v49 = vpop.f32.mrf.mxu2 }
 0x2be   : > { %v2008_v44 = vadd.f32 %v2007_v49, %v6533_v0  ;;  %v2496_v9 = vpop.f32.mrf.mxu3  ;;  %v4851_v0 = vor.u32 %v5230_v13, %v4850_v41  ;;  %v5228_v49 = vld [vmem:[#allocation3 + $0xdc] sm:$0xf] }
 0x2bf   : > { %3937 = vmatmul.bf16.gmra.mxu1 %v3817_v12  ;;  %v4847_v12 = vor.u32 %v5228_v49, %v4844_v2  ;;  %v4856_v49 = vld [vmem:[#allocation3 + $0xfc] sm:$0xf0] }
 0x2c0   : > { %v2497_v54 = vadd.f32 %v2496_v9, %v2008_v44  ;;  %v3670_v16 = vpop.f32.mrf.mxu0  ;;  %v4862_v9 = vld [vmem:[#allocation3 + $0xf8] sm:$0xf] }
 0x2c2   : > { %3526 = vmatmul.bf16.gmra.mxu2 %v4831_v18  ;;  %v2586_v43 = vadd.f32 %v2585_v32, %v2497_v54  ;;  %3709 = vmatmul.bf16.gmra.mxu0 %v4851_v0  ;;  %v3818_v18 = vpack.c.bf16 %v3796_v39, %v3795_v17  ;;  %v5233_v54 = vld [vmem:[#allocation3 + $0x100] sm:$0xf0]  ;;  %v3797_v17 = vld [vmem:[%s6695_s13 + $0xa0] sm:$0xff]  ;;  %v3798_v39 = vld [vmem:[%s6695_s13 + $0xa8] sm:$0xff] }
 0x2c3   : > { %3615 = vmatmul.bf16.gmra.mxu3 %v4835_v3  ;;  %v4863_v13 = vor.u32 %v5233_v54, %v4862_v9  ;;  %v5236_v9 = vld [vmem:[#allocation3 + $0x118] sm:$0xf0] }
 0x2c4   : > { %v6772_v38 = vadd.f32 %v2674_v30, %v2586_v43  ;;  %v3900_v28 = vpop.f32.mrf.mxu1  ;;  %v6780_v30 = vld [vmem:[%s6903_s4] ss:$0 sm:$0xff] }
 0x2c5   : > { %v3487_v15 = vpop.f32.mrf.mxu2 }
 0x2c6   : > { %v3576_v57 = vpop.f32.mrf.mxu3 }
 0x2c7   : > { %v3577_v11 = vadd.f32 %v3576_v57, %v3487_v15 }
 0x2c8   : > { %v3672_v34 = vpop.f32.mrf.mxu0 }
 0x2c9   : > { %v3666_v53 = vadd.f32 %v3665_v55, %v3577_v11 }
 0x2cb   : > { %v3745_v32 = vadd.f32 %v3666_v53, %v6552_v48  ;;  %v5232_v53 = vld [vmem:[#allocation3 + $0xf8] sm:$0xf0] }
 0x2cc   : > { %v3903_v48 = vpop.f32.mrf.mxu1 }
 0x2cd   : > { %v3489_v24 = vpop.f32.mrf.mxu2  ;;  %v3978_v44 = vadd.f32 %v3898_v59, %v3745_v32  ;;  %v4855_v32 = vor.u32 %v5232_v53, %v4854_v19  ;;  %v5235_v19 = vld [vmem:[#allocation3 + $0x110] sm:$0xf0] }
 0x2ce   : > { %v3578_v55 = vpop.f32.mrf.mxu3 }
 0x2cf   : > { %v4014_v7 = vadd.f32 %v6780_v30, %v3978_v44  ;;  %v3579_v62 = vadd.f32 %v3578_v55, %v3489_v24  ;;  %3942 = vmatmul.bf16.gmra.mxu1 %v3818_v18  ;;  %v3819_v44 = vpack.c.bf16 %v3798_v39, %v3797_v17  ;;  %v5234_v39 = vld [vmem:[#allocation3 + $0x10c] sm:$0xf] }
 0x2d0   : > { %v3675_v43 = vpop.f32.mrf.mxu0 }
 0x2d1   : > { %4046 = vst [vmem:[%s6787_s18] sm:$0xff] %v4014_v7  ;;  %v3668_v59 = vadd.f32 %v3667_v27, %v3579_v62 }
 0x2d2   : > { %3531 = vmatmul.bf16.gmra.mxu2 %v4843_v20  ;;  %3714 = vmatmul.bf16.gmra.mxu0 %v4863_v13  ;;  %v5231_v20 = vld [vmem:[#allocation3 + $0xf4] sm:$0xf] }
 0x2d3   : > { %v3746_v41 = vadd.f32 %v3668_v59, %v6565_v47  ;;  %3620 = vmatmul.bf16.gmra.mxu3 %v4847_v12  ;;  %v4859_v12 = vor.u32 %v5231_v20, %v4856_v49 }
 0x2d4   : > { %v3905_v57 = vpop.f32.mrf.mxu1 }
 0x2d5   : > { %v3492_v3 = vpop.f32.mrf.mxu2  ;;  %v3979_v15 = vadd.f32 %v3900_v28, %v3746_v41 }
 0x2d6   : > { %v3581_v0 = vpop.f32.mrf.mxu3 }
 0x2d7   : > { %v4015_v11 = vadd.f32 %v6780_v30, %v3979_v15  ;;  %v3582_v37 = vadd.f32 %v3581_v0, %v3492_v3 }
 0x2d8   : > { %v3677_v28 = vpop.f32.mrf.mxu0 }
 0x2d9   : > { %4047 = vst [vmem:[%s6787_s18 + $0x8] sm:$0xff] %v4015_v11  ;;  %v3671_v27 = vadd.f32 %v3670_v16, %v3582_v37  ;;  %v4874_v16 = vld [vmem:[#allocation3 + $0x110] sm:$0xf]  ;;  %v4866_v37 = vld [vmem:[#allocation3 + $0x108] sm:$0xf] }
 0x2da   : > { %v4867_v17 = vor.u32 %v5235_v19, %v4866_v37  ;;  %v3801_v37 = vld [vmem:[%s6695_s13 + $0xc0] sm:$0xff]  ;;  %v3802_v19 = vld [vmem:[%s6695_s13 + $0xc8] sm:$0xff] }
 0x2db   : > { %v3747_v47 = vadd.f32 %v3671_v27, %v6575_v45  ;;  %v3799_v27 = vld [vmem:[%s6695_s13 + $0xb0] sm:$0xff] }
 0x2dc   : > { %v3908_v55 = vpop.f32.mrf.mxu1 }
 0x2dd   : > { %v3494_v24 = vpop.f32.mrf.mxu2  ;;  %v3980_v2 = vadd.f32 %v3903_v48, %v3747_v47  ;;  %v4875_v48 = vor.u32 %v5236_v9, %v4874_v16  ;;  %v4868_v47 = vld [vmem:[#allocation3 + $0x114] sm:$0xf0] }
 0x2de   : > { %v3583_v18 = vpop.f32.mrf.mxu3 }
 0x2df   : > { %v4016_v7 = vadd.f32 %v6780_v30, %v3980_v2  ;;  %v3584_v62 = vadd.f32 %v3583_v18, %v3494_v24  ;;  %3947 = vmatmul.bf16.gmra.mxu1 %v3819_v44  ;;  %v3800_v24 = vld [vmem:[%s6695_s13 + $0xb8] sm:$0xff] }
 0x2e0   : > { %v3680_v3 = vpop.f32.mrf.mxu0  ;;  %v3820_v20 = vpack.c.bf16 %v3800_v24, %v3799_v27  ;;  %v4880_v27 = vld [vmem:[#allocation3 + $0x12c] sm:$0xf0] }
 0x2e1   : > { %4048 = vst [vmem:[%s6787_s18 + $0x10] sm:$0xff] %v4016_v7  ;;  %v3673_v54 = vadd.f32 %v3672_v34, %v3584_v62  ;;  %v4871_v7 = vor.u32 %v5234_v39, %v4868_v47  ;;  %v5239_v62 = vld [vmem:[#allocation3 + $0x130] sm:$0xf0] }
 0x2e2   : > { %3536 = vmatmul.bf16.gmra.mxu2 %v4855_v32  ;;  %3719 = vmatmul.bf16.gmra.mxu0 %v4875_v48 }
 0x2e3   : > { %v3748_v59 = vadd.f32 %v3673_v54, %v6585_v10  ;;  %3625 = vmatmul.bf16.gmra.mxu3 %v4859_v12 }
 0x2e4   : > { %v3910_v15 = vpop.f32.mrf.mxu1 }
 0x2e5   : > { %v3497_v45 = vpop.f32.mrf.mxu2  ;;  %v3981_v41 = vadd.f32 %v3905_v57, %v3748_v59 }
 0x2e6   : > { %v3586_v13 = vpop.f32.mrf.mxu3 }
 0x2e7   : > { %v4017_v0 = vadd.f32 %v6780_v30, %v3981_v41  ;;  %v3587_v11 = vadd.f32 %v3586_v13, %v3497_v45  ;;  %v4878_v13 = vld [vmem:[#allocation3 + $0x120] sm:$0xf] }
 0x2e8   : > { %v3682_v57 = vpop.f32.mrf.mxu0 }
 0x2e9   : > { %4049 = vst [vmem:[%s6787_s18 + $0x18] sm:$0xff] %v4017_v0  ;;  %v3676_v34 = vadd.f32 %v3675_v43, %v3587_v11  ;;  %v4886_v43 = vld [vmem:[#allocation3 + $0x128] sm:$0xf]  ;;  %v5238_v0 = vld [vmem:[#allocation3 + $0x128] sm:$0xf0] }
 0x2eb   : > { %v3749_v10 = vadd.f32 %v3676_v34, %v6598_v1  ;;  %v4879_v34 = vor.u32 %v5238_v0, %v4878_v13  ;;  %v5240_v0 = vld [vmem:[#allocation3 + $0x13c] sm:$0xf] }
 0x2ec   : > { %v3913_v2 = vpop.f32.mrf.mxu1 }
 0x2ed   : > { %v3499_v53 = vpop.f32.mrf.mxu2  ;;  %v3982_v32 = vadd.f32 %v3908_v55, %v3749_v10  ;;  %v4887_v55 = vor.u32 %v5239_v62, %v4886_v43  ;;  %v3821_v10 = vpack.c.bf16 %v3802_v19, %v3801_v37 }
 0x2ee   : > { %v3588_v49 = vpop.f32.mrf.mxu3 }
 0x2ef   : > { %v4018_v44 = vadd.f32 %v6780_v30, %v3982_v32  ;;  %v3589_v18 = vadd.f32 %v3588_v49, %v3499_v53  ;;  %3952 = vmatmul.bf16.gmra.mxu1 %v3820_v20  ;;  %v5237_v53 = vld [vmem:[#allocation3 + $0x124] sm:$0xf]  ;;  %v5242_v49 = vld [vmem:[#allocation3 + $0x148] sm:$0xf0] }
 0x2f0   : > { %v3685_v9 = vpop.f32.mrf.mxu0  ;;  %v4883_v20 = vor.u32 %v5237_v53, %v4880_v27 }
 0x2f1   : > { %4050 = vst [vmem:[%s6787_s18 + $0x20] sm:$0xff] %v4018_v44  ;;  %v3678_v12 = vadd.f32 %v3677_v28, %v3589_v18 }
 0x2f2   : > { %3541 = vmatmul.bf16.gmra.mxu2 %v4867_v17  ;;  %3724 = vmatmul.bf16.gmra.mxu0 %v4887_v55  ;;  %v4890_v55 = vld [vmem:[#allocation3 + $0x138] sm:$0xf] }
 0x2f3   : > { %v3750_v16 = vadd.f32 %v3678_v12, %v6611_v21  ;;  %3630 = vmatmul.bf16.gmra.mxu3 %v4871_v7 }
 0x2f4   : > { %v3915_v59 = vpop.f32.mrf.mxu1 }
 0x2f5   : > { %v3502_v1 = vpop.f32.mrf.mxu2  ;;  %v3983_v54 = vadd.f32 %v3910_v15, %v3750_v16 }
 0x2f6   : > { %v3591_v45 = vpop.f32.mrf.mxu3 }
 0x2f7   : > { %v4019_v48 = vadd.f32 %v6780_v30, %v3983_v54  ;;  %v3592_v41 = vadd.f32 %v3591_v45, %v3502_v1  ;;  %v5241_v54 = vld [vmem:[#allocation3 + $0x140] sm:$0xf0] }
 0x2f8   : > { %v3687_v15 = vpop.f32.mrf.mxu0  ;;  %v4891_v13 = vor.u32 %v5241_v54, %v4890_v55  ;;  %v4904_v55 = vld [vmem:[#allocation3 + $0x15c] sm:$0xf0] }
 0x2f9   : > { %4051 = vst [vmem:[%s6787_s18 + $0x28] sm:$0xff] %v4019_v48  ;;  %v3681_v28 = vadd.f32 %v3680_v3, %v3592_v41  ;;  %v4898_v3 = vld [vmem:[#allocation3 + $0x140] sm:$0xf]  ;;  %v3804_v41 = vld [vmem:[%s6695_s13 + $0xd8] sm:$0xff] }
 0x2fa   : > { %v3803_v48 = vld [vmem:[%s6695_s13 + $0xd0] sm:$0xff] }
 0x2fb   : > { %v3751_v21 = vadd.f32 %v3681_v28, %v6621_v29  ;;  %v4892_v28 = vld [vmem:[#allocation3 + $0x144] sm:$0xf0]  ;;  %v3822_v37 = vpack.c.bf16 %v3804_v41, %v3803_v48 }
 0x2fc   : > { %v3918_v39 = vpop.f32.mrf.mxu1  ;;  %v4895_v27 = vor.u32 %v5240_v0, %v4892_v28  ;;  %v5248_v0 = vld [vmem:[#allocation3 + $0x178] sm:$0xf0] }
 0x2fd   : > { %v3504_v11 = vpop.f32.mrf.mxu2  ;;  %v3984_v24 = vadd.f32 %v3913_v2, %v3751_v21  ;;  %v4899_v2 = vor.u32 %v5242_v49, %v4898_v3 }
 0x2fe   : > { %v3593_v17 = vpop.f32.mrf.mxu3 }
 0x2ff   : > { %v4020_v47 = vadd.f32 %v6780_v30, %v3984_v24  ;;  %v3594_v32 = vadd.f32 %v3593_v17, %v3504_v11  ;;  %3957 = vmatmul.bf16.gmra.mxu1 %v3821_v10  ;;  %v5245_v24 = vld [vmem:[#allocation3 + $0x160] sm:$0xf0] }
 0x300   : > { %v3690_v7 = vpop.f32.mrf.mxu0 }
 0x301   : > { %4052 = vst [vmem:[%s6787_s18 + $0x30] sm:$0xff] %v4020_v47  ;;  %v3683_v44 = vadd.f32 %v3682_v57, %v3594_v32 }
 0x302   : > { %3546 = vmatmul.bf16.gmra.mxu2 %v4879_v34  ;;  %3729 = vmatmul.bf16.gmra.mxu0 %v4899_v2 }
 0x303   : > { %v3752_v18 = vadd.f32 %v3683_v44, %v6631_v4  ;;  %3635 = vmatmul.bf16.gmra.mxu3 %v4883_v20 }
 0x304   : > { %v3920_v12 = vpop.f32.mrf.mxu1 }
 0x305   : > { %v3507_v29 = vpop.f32.mrf.mxu2  ;;  %v3985_v43 = vadd.f32 %v3915_v59, %v3752_v18  ;;  %v5244_v18 = vld [vmem:[#allocation3 + $0x158] sm:$0xf0] }
 0x306   : > { %v3596_v62 = vpop.f32.mrf.mxu3 }
 0x307   : > { %v4021_v1 = vadd.f32 %v6780_v30, %v3985_v43  ;;  %v3597_v16 = vadd.f32 %v3596_v62, %v3507_v29  ;;  %v4902_v29 = vld [vmem:[#allocation3 + $0x150] sm:$0xf]  ;;  %v3806_v62 = vld [vmem:[%s6695_s13 + $0xe8] sm:$0xff] }
 0x308   : > { %v3692_v59 = vpop.f32.mrf.mxu0  ;;  %v3805_v43 = vld [vmem:[%s6695_s13 + $0xe0] sm:$0xff] }
 0x309   : > { %4053 = vst [vmem:[%s6787_s18 + $0x38] sm:$0xff] %v4021_v1  ;;  %v3686_v57 = vadd.f32 %v3685_v9, %v3597_v16  ;;  %v4910_v9 = vld [vmem:[#allocation3 + $0x158] sm:$0xf]  ;;  %v4903_v1 = vor.u32 %v5244_v18, %v4902_v29  ;;  %v5243_v16 = vld [vmem:[#allocation3 + $0x154] sm:$0xf] }
 0x30b   : > { %v3753_v4 = vadd.f32 %v3686_v57, %v6644_v25  ;;  %v3823_v57 = vpack.c.bf16 %v3806_v62, %v3805_v43 }
 0x30c   : > { %v3923_v21 = vpop.f32.mrf.mxu1 }
 0x30d   : > { %v3509_v45 = vpop.f32.mrf.mxu2  ;;  %v3986_v11 = vadd.f32 %v3918_v39, %v3753_v4  ;;  %v4911_v39 = vor.u32 %v5245_v24, %v4910_v9  ;;  %v4914_v24 = vld [vmem:[#allocation3 + $0x168] sm:$0xf] }
 0x30e   : > { %v3598_v19 = vpop.f32.mrf.mxu3 }
 0x30f   : > { %v4022_v34 = vadd.f32 %v6780_v30, %v3986_v11  ;;  %v3599_v53 = vadd.f32 %v3598_v19, %v3509_v45  ;;  %3962 = vmatmul.bf16.gmra.mxu1 %v3822_v37 }
 0x310   : > { %v3695_v47 = vpop.f32.mrf.mxu0 }
 0x311   : > { %4054 = vst [vmem:[%s6787_s18 + $0x40] sm:$0xff] %v4022_v34  ;;  %v3688_v10 = vadd.f32 %v3687_v15, %v3599_v53 }
 0x312   : > { %3551 = vmatmul.bf16.gmra.mxu2 %v4891_v13  ;;  %3734 = vmatmul.bf16.gmra.mxu0 %v4911_v39  ;;  %v4907_v13 = vor.u32 %v5243_v16, %v4904_v55  ;;  %v3808_v39 = vld [vmem:[%s6695_s13 + $0xf8] sm:$0xff] }
 0x313   : > { %v3754_v17 = vadd.f32 %v3688_v10, %v6657_v22  ;;  %3640 = vmatmul.bf16.gmra.mxu3 %v4895_v27  ;;  %v5247_v10 = vld [vmem:[#allocation3 + $0x170] sm:$0xf0] }
 0x314   : > { %v3925_v3 = vpop.f32.mrf.mxu1 }
 0x315   : > { %v3512_v25 = vpop.f32.mrf.mxu2  ;;  %v3987_v32 = vadd.f32 %v3920_v12, %v3754_v17  ;;  %v3807_v17 = vld [vmem:[%s6695_s13 + $0xf0] sm:$0xff] }
 0x316   : > { %v3601_v20 = vpop.f32.mrf.mxu3  ;;  %v3824_v29 = vpack.c.bf16 %v3808_v39, %v3807_v17 }
 0x317   : > { %v4023_v49 = vadd.f32 %v6780_v30, %v3987_v32  ;;  %v3602_v44 = vadd.f32 %v3601_v20, %v3512_v25  ;;  %v4915_v32 = vor.u32 %v5247_v10, %v4914_v24  ;;  %v5246_v20 = vld [vmem:[#allocation3 + $0x16c] sm:$0xf] }
 0x318   : > { %v3697_v12 = vpop.f32.mrf.mxu0 }
 0x319   : > { %4055 = vst [vmem:[%s6787_s18 + $0x48] sm:$0xff] %v4023_v49  ;;  %v3691_v15 = vadd.f32 %v3690_v7, %v3602_v44  ;;  %v4922_v7 = vld [vmem:[#allocation3 + $0x170] sm:$0xf]  ;;  %v4916_v49 = vld [vmem:[#allocation3 + $0x174] sm:$0xf0] }
 0x31a   : > { %v4923_v37 = vor.u32 %v5248_v0, %v4922_v7 }
 0x31b   : > { %v3755_v22 = vadd.f32 %v3691_v15, %v6667_v58 }
 0x31c   : > { %v3928_v48 = vpop.f32.mrf.mxu1 }
 0x31d   : > { %v3514_v2 = vpop.f32.mrf.mxu2  ;;  %v3988_v54 = vadd.f32 %v3923_v21, %v3755_v22 }
 0x31e   : > { %v3603_v45 = vpop.f32.mrf.mxu3 }
 0x31f   : > { %v4024_v41 = vadd.f32 %v6780_v30, %v3988_v54  ;;  %v3604_v4 = vadd.f32 %v3603_v45, %v3514_v2  ;;  %3967 = vmatmul.bf16.gmra.mxu1 %v3823_v57 }
 0x320   : > { %v3700_v19 = vpop.f32.mrf.mxu0 }
 0x321   : > { %4056 = vst [vmem:[%s6787_s18 + $0x50] sm:$0xff] %v4024_v41  ;;  %v3693_v28 = vadd.f32 %v3692_v59, %v3604_v4 }
 0x322   : > { %3556 = vmatmul.bf16.gmra.mxu2 %v4903_v1  ;;  %3739 = vmatmul.bf16.gmra.mxu0 %v4923_v37 }
 0x323   : > { %v3756_v11 = vadd.f32 %v3693_v28, %v6673_v60  ;;  %3645 = vmatmul.bf16.gmra.mxu3 %v4907_v13 }
 0x324   : > { %v3930_v53 = vpop.f32.mrf.mxu1 }
 0x325   : > { %v3517_v58 = vpop.f32.mrf.mxu2  ;;  %v3989_v21 = vadd.f32 %v3925_v3, %v3756_v11 }
 0x326   : > { %v3606_v34 = vpop.f32.mrf.mxu3 }
 0x327   : > { %v4025_v27 = vadd.f32 %v6780_v30, %v3989_v21  ;;  %v3607_v9 = vadd.f32 %v3606_v34, %v3517_v58 }
 0x328   : > { %v3702_v3 = vpop.f32.mrf.mxu0 }
 0x329   : > { %4057 = vst [vmem:[%s6787_s18 + $0x58] sm:$0xff] %v4025_v27  ;;  %v3696_v59 = vadd.f32 %v3695_v47, %v3607_v9  ;;  %v4919_v47 = vor.u32 %v5246_v20, %v4916_v49 }
 0x32b   : > { %v3757_v60 = vadd.f32 %v3696_v59, %v6680_v8 }
 0x32c   : > { %v3933_v15 = vpop.f32.mrf.mxu1 }
 0x32d   : > { %v3519_v25 = vpop.f32.mrf.mxu2  ;;  %v3990_v44 = vadd.f32 %v3928_v48, %v3757_v60 }
 0x32e   : > { %v3608_v18 = vpop.f32.mrf.mxu3 }
 0x32f   : > { %v4026_v2 = vadd.f32 %v6780_v30, %v3990_v44  ;;  %v3609_v43 = vadd.f32 %v3608_v18, %v3519_v25  ;;  %3972 = vmatmul.bf16.gmra.mxu1 %v3824_v29 }
 0x330   : > { %v3705_v1 = vpop.f32.mrf.mxu0 }
 0x331   : > { %4058 = vst [vmem:[%s6787_s18 + $0x60] sm:$0xff] %v4026_v2  ;;  %v3698_v62 = vadd.f32 %v3697_v12, %v3609_v43 }
 0x332   : > { %3561 = vmatmul.bf16.gmra.mxu2 %v4915_v32 }
 0x333   : > { %v3758_v8 = vadd.f32 %v3698_v62, %v6686_v5  ;;  %3650 = vmatmul.bf16.gmra.mxu3 %v4919_v47 }
 0x334   : > { %v3935_v54 = vpop.f32.mrf.mxu1 }
 0x335   : > { %v3522_v22 = vpop.f32.mrf.mxu2  ;;  %v3991_v16 = vadd.f32 %v3930_v53, %v3758_v8 }
 0x336   : > { %v3611_v55 = vpop.f32.mrf.mxu3 }
 0x337   : > { %v4027_v57 = vadd.f32 %v6780_v30, %v3991_v16  ;;  %v3612_v45 = vadd.f32 %v3611_v55, %v3522_v22 }
 0x338   : > { %v3707_v13 = vpop.f32.mrf.mxu0 }
 0x339   : > { %4059 = vst [vmem:[%s6787_s18 + $0x68] sm:$0xff] %v4027_v57  ;;  %v3701_v48 = vadd.f32 %v3700_v19, %v3612_v45 }
 0x33b   : > { %v3759_v4 = vadd.f32 %v3701_v48, %v6699_v46 }
 0x33c   : > { %v3938_v0 = vpop.f32.mrf.mxu1 }
 0x33d   : > { %v3524_v41 = vpop.f32.mrf.mxu2  ;;  %v3992_v12 = vadd.f32 %v3933_v15, %v3759_v4 }
 0x33e   : > { %v3613_v7 = vpop.f32.mrf.mxu3 }
 0x33f   : > { %v4028_v5 = vadd.f32 %v6780_v30, %v3992_v12  ;;  %v3614_v28 = vadd.f32 %v3613_v7, %v3524_v41 }
 0x340   : > { %v3710_v21 = vpop.f32.mrf.mxu0 }
 0x341   : > { %4060 = vst [vmem:[%s6787_s18 + $0x70] sm:$0xff] %v4028_v5  ;;  %v3703_v58 = vadd.f32 %v3702_v3, %v3614_v28 }
 0x343   : > { %v3760_v37 = vadd.f32 %v3703_v58, %v6702_v50 }
 0x344   : > { %v3940_v53 = vpop.f32.mrf.mxu1 }
 0x345   : > { %v3527_v11 = vpop.f32.mrf.mxu2  ;;  %v3993_v34 = vadd.f32 %v3935_v54, %v3760_v37 }
 0x346   : > { %v3616_v19 = vpop.f32.mrf.mxu3 }
 0x347   : > { %v4029_v46 = vadd.f32 %v6780_v30, %v3993_v34  ;;  %v3617_v27 = vadd.f32 %v3616_v19, %v3527_v11 }
 0x348   : > { %v3712_v59 = vpop.f32.mrf.mxu0 }
 0x349   : > { %4061 = vst [vmem:[%s6787_s18 + $0x78] sm:$0xff] %v4029_v46  ;;  %v3706_v9 = vadd.f32 %v3705_v1, %v3617_v27 }
 0x34b   : > { %v3761_v10 = vadd.f32 %v3706_v9, %v6709_v14 }
 0x34c   : > { %v3943_v39 = vpop.f32.mrf.mxu1 }
 0x34d   : > { %v3529_v24 = vpop.f32.mrf.mxu2  ;;  %v3994_v25 = vadd.f32 %v3938_v0, %v3761_v10 }
 0x34e   : > { %v3618_v17 = vpop.f32.mrf.mxu3 }
 0x34f   : > { %v4030_v50 = vadd.f32 %v6780_v30, %v3994_v25  ;;  %v3619_v60 = vadd.f32 %v3618_v17, %v3529_v24 }
 0x350   : > { %v3715_v3 = vpop.f32.mrf.mxu0 }
 0x351   : > { %4062 = vst [vmem:[%s6787_s18 + $0x80] sm:$0xff] %v4030_v50  ;;  %v3708_v32 = vadd.f32 %v3707_v13, %v3619_v60 }
 0x353   : > { %v3762_v49 = vadd.f32 %v3708_v32, %v6711_v40 }
 0x354   : > { %v3945_v18 = vpop.f32.mrf.mxu1 }
 0x355   : > { %v3532_v20 = vpop.f32.mrf.mxu2  ;;  %v3995_v44 = vadd.f32 %v3940_v53, %v3762_v49 }
 0x356   : > { %v3621_v29 = vpop.f32.mrf.mxu3 }
 0x357   : > { %v4031_v14 = vadd.f32 %v6780_v30, %v3995_v44  ;;  %v3622_v15 = vadd.f32 %v3621_v29, %v3532_v20 }
 0x358   : > { %v3717_v62 = vpop.f32.mrf.mxu0 }
 0x359   : > { %4063 = vst [vmem:[%s6787_s18 + $0x88] sm:$0xff] %v4031_v14  ;;  %v3711_v2 = vadd.f32 %v3710_v21, %v3622_v15 }
 0x35b   : > { %v3763_v47 = vadd.f32 %v3711_v2, %v6718_v35 }
 0x35c   : > { %v3948_v1 = vpop.f32.mrf.mxu1 }
 0x35d   : > { %v3534_v43 = vpop.f32.mrf.mxu2  ;;  %v3996_v22 = vadd.f32 %v3943_v39, %v3763_v47 }
 0x35e   : > { %v3623_v8 = vpop.f32.mrf.mxu3 }
 0x35f   : > { %v4032_v40 = vadd.f32 %v6780_v30, %v3996_v22  ;;  %v3624_v16 = vadd.f32 %v3623_v8, %v3534_v43 }
 0x360   : > { %v3720_v48 = vpop.f32.mrf.mxu0 }
 0x361   : > { %4064 = vst [vmem:[%s6787_s18 + $0x90] sm:$0xff] %v4032_v40  ;;  %v3713_v55 = vadd.f32 %v3712_v59, %v3624_v16 }
 0x363   : > { %v3764_v57 = vadd.f32 %v3713_v55, %v6720_v33 }
 0x364   : > { %v3950_v4 = vpop.f32.mrf.mxu1 }
 0x365   : > { %v3537_v54 = vpop.f32.mrf.mxu2  ;;  %v3997_v45 = vadd.f32 %v3945_v18, %v3764_v57 }
 0x366   : > { %v3626_v41 = vpop.f32.mrf.mxu3 }
 0x367   : > { %v4033_v35 = vadd.f32 %v6780_v30, %v3997_v45  ;;  %v3627_v13 = vadd.f32 %v3626_v41, %v3537_v54 }
 0x368   : > { %v3722_v37 = vpop.f32.mrf.mxu0 }
 0x369   : > { %4065 = vst [vmem:[%s6787_s18 + $0x98] sm:$0xff] %v4033_v35  ;;  %v3716_v12 = vadd.f32 %v3715_v3, %v3627_v13 }
 0x36b   : > { %v3765_v0 = vadd.f32 %v3716_v12, %v6727_v23 }
 0x36c   : > { %v3953_v58 = vpop.f32.mrf.mxu1 }
 0x36d   : > { %v3539_v7 = vpop.f32.mrf.mxu2  ;;  %v3998_v5 = vadd.f32 %v3948_v1, %v3765_v0 }
 0x36e   : > { %v3628_v28 = vpop.f32.mrf.mxu3 }
 0x36f   : > { %v4034_v11 = vadd.f32 %v6780_v30, %v3998_v5  ;;  %v3629_v33 = vadd.f32 %v3628_v28, %v3539_v7 }
 0x370   : > { %v3725_v59 = vpop.f32.mrf.mxu0 }
 0x371   : > { %4066 = vst [vmem:[%s6787_s18 + $0xa0] sm:$0xff] %v4034_v11  ;;  %v3718_v21 = vadd.f32 %v3717_v62, %v3629_v33 }
 0x373   : > { %v3766_v19 = vadd.f32 %v3718_v21, %v6729_v36 }
 0x374   : > { %v3955_v27 = vpop.f32.mrf.mxu1 }
 0x375   : > { %v3542_v34 = vpop.f32.mrf.mxu2  ;;  %v3999_v53 = vadd.f32 %v3950_v4, %v3766_v19 }
 0x376   : > { %v3631_v46 = vpop.f32.mrf.mxu3 }
 0x377   : > { %v4035_v9 = vadd.f32 %v6780_v30, %v3999_v53  ;;  %v3632_v23 = vadd.f32 %v3631_v46, %v3542_v34 }
 0x378   : > { %v3727_v3 = vpop.f32.mrf.mxu0 }
 0x379   : > { %4067 = vst [vmem:[%s6787_s18 + $0xa8] sm:$0xff] %v4035_v9  ;;  %v3721_v24 = vadd.f32 %v3720_v48, %v3632_v23 }
 0x37b   : > { %v3767_v25 = vadd.f32 %v3721_v24, %v6736_v61 }
 0x37c   : > { %v3958_v50 = vpop.f32.mrf.mxu1 }
 0x37d   : > { %v3544_v10 = vpop.f32.mrf.mxu2  ;;  %v4000_v17 = vadd.f32 %v3953_v58, %v3767_v25 }
 0x37e   : > { %v3633_v39 = vpop.f32.mrf.mxu3 }
 0x37f   : > { %v4036_v60 = vadd.f32 %v6780_v30, %v4000_v17  ;;  %v3634_v36 = vadd.f32 %v3633_v39, %v3544_v10 }
 0x380   : > { %v3730_v22 = vpop.f32.mrf.mxu0 }
 0x381   : > { %4068 = vst [vmem:[%s6787_s18 + $0xb0] sm:$0xff] %v4036_v60  ;;  %v3723_v32 = vadd.f32 %v3722_v37, %v3634_v36 }
 0x383   : > { %v3768_v49 = vadd.f32 %v3723_v32, %v6738_v56 }
 0x384   : > { %v3960_v61 = vpop.f32.mrf.mxu1 }
 0x385   : > { %v3547_v20 = vpop.f32.mrf.mxu2  ;;  %v4001_v44 = vadd.f32 %v3955_v27, %v3768_v49 }
 0x386   : > { %v3636_v29 = vpop.f32.mrf.mxu3 }
 0x387   : > { %v4037_v18 = vadd.f32 %v6780_v30, %v4001_v44  ;;  %v3637_v14 = vadd.f32 %v3636_v29, %v3547_v20 }
 0x389   : > { %4069 = vst [vmem:[%s6787_s18 + $0xb8] sm:$0xff] %v4037_v18  ;;  %v3726_v15 = vadd.f32 %v3725_v59, %v3637_v14 }
 0x38b   : > { %v3769_v43 = vadd.f32 %v3726_v15, %v6745_v26  ;;  %v3732_v26 = vpop.f32.mrf.mxu0 }
 0x38c   : > { %v3963_v40 = vpop.f32.mrf.mxu1 }
 0x38d   : > { %v3549_v2 = vpop.f32.mrf.mxu2  ;;  %v4002_v47 = vadd.f32 %v3958_v50, %v3769_v43 }
 0x38e   : > { %v3638_v62 = vpop.f32.mrf.mxu3 }
 0x38f   : > { %v4038_v8 = vadd.f32 %v6780_v30, %v4002_v47  ;;  %v3639_v56 = vadd.f32 %v3638_v62, %v3549_v2 }
 0x391   : > { %4070 = vst [vmem:[%s6787_s18 + $0xc0] sm:$0xff] %v4038_v8  ;;  %v3728_v1 = vadd.f32 %v3727_v3, %v3639_v56 }
 0x393   : > { %v3770_v55 = vadd.f32 %v3728_v1, %v6747_v51  ;;  %v3735_v28 = vpop.f32.mrf.mxu0 }
 0x394   : > { %v3965_v13 = vpop.f32.mrf.mxu1 }
 0x395   : > { %v3552_v16 = vpop.f32.mrf.mxu2  ;;  %v4003_v54 = vadd.f32 %v3960_v61, %v3770_v55 }
 0x396   : > { %v3641_v57 = vpop.f32.mrf.mxu3 }
 0x397   : > { %v4039_v45 = vadd.f32 %v6780_v30, %v4003_v54  ;;  %v3642_v48 = vadd.f32 %v3641_v57, %v3552_v16 }
 0x399   : > { %4071 = vst [vmem:[%s6787_s18 + $0xc8] sm:$0xff] %v4039_v45  ;;  %v3731_v41 = vadd.f32 %v3730_v22, %v3642_v48 }
 0x39b   : > { %v3771_v35 = vadd.f32 %v3731_v41, %v6754_v63  ;;  %v3737_v27 = vpop.f32.mrf.mxu0 }
 0x39c   : > { %v3968_v37 = vpop.f32.mrf.mxu1 }
 0x39d   : > { %v3554_v4 = vpop.f32.mrf.mxu2  ;;  %v4004_v12 = vadd.f32 %v3963_v40, %v3771_v35 }
 0x39e   : > { %v3643_v7 = vpop.f32.mrf.mxu3 }
 0x39f   : > { %v4040_v0 = vadd.f32 %v6780_v30, %v4004_v12  ;;  %v3644_v5 = vadd.f32 %v3643_v7, %v3554_v4 }
 0x3a1   : > { %4072 = vst [vmem:[%s6787_s18 + $0xd0] sm:$0xff] %v4040_v0  ;;  %v3733_v51 = vadd.f32 %v3732_v26, %v3644_v5 }
 0x3a3   : > { %v3772_v11 = vadd.f32 %v3733_v51, %v6756_v52  ;;  %v3740_v50 = vpop.f32.mrf.mxu0 }
 0x3a4   : > { %v3970_v52 = vpop.f32.mrf.mxu1 }
 0x3a5   : > { %v3557_v58 = vpop.f32.mrf.mxu2  ;;  %v4005_v33 = vadd.f32 %v3965_v13, %v3772_v11 }
 0x3a6   : > { %v3646_v21 = vpop.f32.mrf.mxu3 }
 0x3a7   : > { %v4041_v34 = vadd.f32 %v6780_v30, %v4005_v33  ;;  %v3647_v63 = vadd.f32 %v3646_v21, %v3557_v58 }
 0x3a9   : > { %4073 = vst [vmem:[%s6787_s18 + $0xd8] sm:$0xff] %v4041_v34  ;;  %v3736_v19 = vadd.f32 %v3735_v28, %v3647_v63 }
 0x3ab   : > { %v3773_v46 = vadd.f32 %v3736_v19, %v6761_v31 }
 0x3ac   : > { %v3973_v20 = vpop.f32.mrf.mxu1 }
 0x3ad   : > { %v3559_v53 = vpop.f32.mrf.mxu2  ;;  %v4006_v9 = vadd.f32 %v3968_v37, %v3773_v46 }
 0x3ae   : > { %v3648_v23 = vpop.f32.mrf.mxu3 }
 0x3af   : > { %v4042_v24 = vadd.f32 %v6780_v30, %v4006_v9  ;;  %v3649_v10 = vadd.f32 %v3648_v23, %v3559_v53 }
 0x3b1   : > { %4074 = vst [vmem:[%s6787_s18 + $0xe0] sm:$0xff] %v4042_v24  ;;  %v3738_v59 = vadd.f32 %v3737_v27, %v3649_v10 }
 0x3b3   : > { %v3774_v17 = vadd.f32 %v3738_v59, %v6764_v6  ;;  %v3742_v6 = vpop.f32.mrf.mxu0 }
 0x3b4   : > { %v3975_v2 = vpop.f32.mrf.mxu1 }
 0x3b5   : > { %v3562_v25 = vpop.f32.mrf.mxu2  ;;  %v4007_v39 = vadd.f32 %v3970_v52, %v3774_v17 }
 0x3b6   : > { %v3651_v60 = vpop.f32.mrf.mxu3 }
 0x3b7   : > { %v4043_v36 = vadd.f32 %v6780_v30, %v4007_v39  ;;  %v3652_v31 = vadd.f32 %v3651_v60, %v3562_v25 }
 0x3b9   : > { %4075 = vst [vmem:[%s6787_s18 + $0xe8] sm:$0xff] %v4043_v36  ;;  %v3741_v32 = vadd.f32 %v3740_v50, %v3652_v31 }
 0x3bb   : > { %v3775_v49 = vadd.f32 %v3741_v32, %v6769_v42 }
 0x3bd   : > { %v3564_v3 = vpop.f32.mrf.mxu2  ;;  %v4008_v44 = vadd.f32 %v3973_v20, %v3775_v49 }
 0x3be   : > { %v3653_v29 = vpop.f32.mrf.mxu3 }
 0x3bf   : > { %v4044_v18 = vadd.f32 %v6780_v30, %v4008_v44  ;;  %v3654_v14 = vadd.f32 %v3653_v29, %v3564_v3 }
 0x3c1   : > { %4076 = vst [vmem:[%s6787_s18 + $0xf0] sm:$0xff] %v4044_v18  ;;  %v3743_v61 = vadd.f32 %v3742_v6, %v3654_v14 }
 0x3c3   : > { %v3776_v15 = vadd.f32 %v3743_v61, %v6772_v38 }
 0x3c5   : > { %v4009_v43 = vadd.f32 %v3975_v2, %v3776_v15 }
 0x3c7   : > { %v4045_v47 = vadd.f32 %v6780_v30, %v4009_v43 }
 0x3c9   : > { %4077 = vst [vmem:[%s6787_s18 + $0xf8] sm:$0xff] %v4045_v47 }
 0x3ca PF: > { %s17_s24 = sadd.s32 1, %s5397_s24  }
 0x3cb   : > { %p14_p4 = scmp.ge.s32.totalorder %s17_s24, 4  }
 0x3cd   :  { %16 = sbr.rel (!%p14_p4) target bundleno = 1 (0x1), region = 84 }

</bundles_post_ra>
